<compile_context>
chip_gen: v5e
topology: v5e:2x2
jax: 0.10.0
libtpu: 0.0.40
codegen_flags: <defaults>
</compile_context>

<pallas_src>
import jax
import jax.numpy as jnp
from jax import lax
from jax.experimental import pallas as pl
from jax.experimental.pallas import tpu as pltpu

# Static model geometry (fixed by the PyTorch module: 10x10 RGB input, fc1 in=256).
H_IN, W_IN, C_IN = 10, 10, 3
IN_FEATS = C_IN * H_IN * W_IN      # 300 (NCHW-flat order)
IN_PAD = 384                       # 300 padded up to a multiple of 128
OUT_WIDTH = 128                    # lane-dense output slab
BATCH_TILE = 256                   # rows per grid step (small batches use round_up(n, 8))


# ----------------------------------------------------------------------------
# The fused Pallas kernel (whole forward pass, both branches).
# ----------------------------------------------------------------------------
def _actor_critic_kernel(x_ref, w1_ref, b1_ref, w2a_ref, b2a_ref, w2v_ref, b2v_ref,
                         wf1_ref, bf1_ref, wf2_ref, bf2_ref, w3_ref, b3_ref, o_ref):
    # conv1 + vconv1 + bias + relu: one dense GEMM covering both branches.
    x = x_ref[...]                                                     # (TB, 384)
    a1 = jnp.dot(x, w1_ref[...], preferred_element_type=jnp.float32)
    a1 = jnp.maximum(a1 + b1_ref[...], 0.0)                            # (TB, 4096)

    # 2x2/stride-2 max-pool #1: columns ordered (ph, pw, branch, i, j, c) -> max of
    # four contiguous 1024-wide lane slabs.
    p1 = jnp.maximum(jnp.maximum(a1[:, 0:1024], a1[:, 1024:2048]),
                     jnp.maximum(a1[:, 2048:3072], a1[:, 3072:4096]))  # (TB, 1024)

    # conv2 / vconv2 + bias + relu (per-branch dense GEMMs on contiguous slabs).
    a2a = jnp.dot(p1[:, 0:512], w2a_ref[...], preferred_element_type=jnp.float32)
    a2a = jnp.maximum(a2a + b2a_ref[...], 0.0)                         # (TB, 1024)
    a2v = jnp.dot(p1[:, 512:1024], w2v_ref[...], preferred_element_type=jnp.float32)
    a2v = jnp.maximum(a2v + b2v_ref[...], 0.0)                         # (TB, 1024)

    # 2x2 max-pool #2.
    p2a = jnp.maximum(jnp.maximum(a2a[:, 0:256], a2a[:, 256:512]),
                      jnp.maximum(a2a[:, 512:768], a2a[:, 768:1024]))  # (TB, 256)
    p2v = jnp.maximum(jnp.maximum(a2v[:, 0:256], a2v[:, 256:512]),
                      jnp.maximum(a2v[:, 512:768], a2v[:, 768:1024]))  # (TB, 256)

    # fc1 / vfc1 fused into a single K=512, N=128 GEMM (128-aligned lane concat).
    p2 = jnp.concatenate([p2a, p2v], axis=-1)                          # (TB, 512)
    h1 = jnp.dot(p2, wf1_ref[...], preferred_element_type=jnp.float32)
    h1 = jnp.maximum(h1 + bf1_ref[...], 0.0)                           # (TB, 128)

    # fc2 / vfc2 fused into one 128x128 GEMM (relu after, matching PyTorch).
    z = jnp.dot(h1, wf2_ref[...], preferred_element_type=jnp.float32)
    z = jnp.maximum(z + bf2_ref[...], 0.0)                             # (TB, 128)

    # Action head: softmax over lanes 0:3 computed full-width with an iota mask
    # (no narrow lane slices, no partial stores later).
    lane = lax.broadcasted_iota(jnp.int32, z.shape, 1)                 # (TB, 128)
    za = jnp.where(lane < 3, z, -jnp.inf)
    m = jnp.max(za, axis=-1, keepdims=True)
    e = jnp.exp(za - m)                                                # lanes >= 3 -> 0
    probs = e / jnp.sum(e, axis=-1, keepdims=True)                     # probs in lanes 0:3

    # Value head: vfc3 (16 -> 1) as a full-width VPU multiply + lane reduce against a
    # zero-padded (1, 128) weight row (nonzero only at lanes 64:80).
    value = jnp.sum(z * w3_ref[...], axis=-1, keepdims=True) + b3_ref[...]
    value = jnp.maximum(value, 0.0)                                    # (TB, 1)

    # Single dense lane-wide store: [probs(0:3) | value@lane3 | zeros].
    o_ref[...] = jnp.where(lane == 3, value, probs)


# ----------------------------------------------------------------------------
# Parameters: raw PyTorch-layout init + one-time packing into kernel layout.
# ----------------------------------------------------------------------------
def init_params(key):
    """Raw parameters in PyTorch layouts (Conv2d: (Cout,Cin,K,K); Linear: (out,in))."""
    def normal(k, shape, scale=0.05):
        return scale * jax.random.normal(k, shape, dtype=jnp.float32)

    ks = jax.random.split(key, 18)
    return {
        "conv1_w": normal(ks[0], (32, 3, 5, 5)),    "conv1_b": normal(ks[1], (32,)),
        "conv2_w": normal(ks[2], (64, 32, 3, 3)),   "conv2_b": normal(ks[3], (64,)),
        "fc1_w": normal(ks[4], (64, 256)),          "fc1_b": normal(ks[5], (64,)),
        "fc2_w": normal(ks[6], (3, 64)),            "fc2_b": normal(ks[7], (3,)),
        "vconv1_w": normal(ks[8], (32, 3, 5, 5)),   "vconv1_b": normal(ks[9], (32,)),
        "vconv2_w": normal(ks[10], (64, 32, 3, 3)), "vconv2_b": normal(ks[11], (64,)),
        "vfc1_w": normal(ks[12], (64, 256)),        "vfc1_b": normal(ks[13], (64,)),
        "vfc2_w": normal(ks[14], (16, 64)),         "vfc2_b": normal(ks[15], (16,)),
        "vfc3_w": normal(ks[16], (1, 16)),          "vfc3_b": normal(ks[17], (1,)),
    }


def _conv_as_matrix(w_oihw, hin, win, pad, nchw_input):
    """Dense M so that flat(conv2d(x, w, padding=pad)) == flat_in(x) @ M.
    flat_in is NCHW-flat if nchw_input else (h, w, c)-flat; output columns are
    (oh, ow, c)-flat."""
    cout, cin, _, _ = w_oihw.shape
    fin = hin * win * cin
    eye = jnp.eye(fin, dtype=jnp.float32)
    if nchw_input:
        basis = eye.reshape(fin, cin, hin, win)                        # NCHW one-hot probes
    else:
        basis = jnp.transpose(eye.reshape(fin, hin, win, cin), (0, 3, 1, 2))
    y = lax.conv_general_dilated(basis, w_oihw, window_strides=(1, 1),
                                 padding=[(pad, pad), (pad, pad)],
                                 dimension_numbers=("NCHW", "OIHW", "NCHW"))
    hout, wout = y.shape[2], y.shape[3]
    m = jnp.transpose(y, (0, 2, 3, 1)).reshape(fin, hout * wout * cout)
    return m, hout, wout


def _pool_reorder(m, hout, wout, cout):
    """Reorder last-dim columns from (oh, ow, c) to (ph, pw, i, j, c) with oh=2i+ph,
    ow=2j+pw, so a 2x2/stride-2 max-pool is a max of 4 contiguous lane slabs."""
    lead = m.shape[:-1]
    m6 = m.reshape(*lead, hout // 2, 2, wout // 2, 2, cout)            # (..., i, ph, j, pw, c)
    nd = m6.ndim
    m6 = jnp.transpose(m6, tuple(range(nd - 5)) + (nd - 4, nd - 2, nd - 5, nd - 3, nd - 1))
    return m6.reshape(*lead, hout * wout * cout)


def _interleave_branches(ma, mv, n_slabs):
    """Per (ph, pw) slab, lay out [action_slab | value_slab]."""
    lead = ma.shape[:-1]
    a = ma.reshape(*lead, n_slabs, -1)
    v = mv.reshape(*lead, n_slabs, -1)
    return jnp.concatenate([a, v], axis=-1).reshape(*lead, -1)


def _fc1_rows_from_torch(w_torch):
    """PyTorch fc1 weight (64, 256) over NCHW-flattened input -> (256, 64) matrix
    consuming our pooled (h, w, c)-minor feature order."""
    w4 = w_torch.reshape(64, 64, 2, 2)                                 # (out, c, h, w)
    return jnp.transpose(w4, (2, 3, 1, 0)).reshape(256, 64)


def pack_params(raw):
    """Fold the convs into dense, pool-friendly GEMM matrices and fuse both branches'
    FC weights -- everything the Pallas kernel needs, computed once."""
    # conv1 / vconv1 -> one (384, 4096) matrix, columns (ph, pw, branch, i, j, c),
    # rows in NCHW-flat input order (so the wrapper only reshapes the input).
    m1a, h1, w1o = _conv_as_matrix(raw["conv1_w"], H_IN, W_IN, pad=1, nchw_input=True)
    m1v, _, _ = _conv_as_matrix(raw["vconv1_w"], H_IN, W_IN, pad=1, nchw_input=True)
    b1a = jnp.tile(raw["conv1_b"], h1 * w1o)[None, :]
    b1v = jnp.tile(raw["vconv1_b"], h1 * w1o)[None, :]
    m1a = _pool_reorder(m1a, h1, w1o, 32)
    m1v = _pool_reorder(m1v, h1, w1o, 32)
    b1a = _pool_reorder(b1a, h1, w1o, 32)
    b1v = _pool_reorder(b1v, h1, w1o, 32)
    w1 = jnp.pad(_interleave_branches(m1a, m1v, 4), ((0, IN_PAD - IN_FEATS), (0, 0)))
    b1 = _interleave_branches(b1a, b1v, 4)

    # conv2 / vconv2 -> per-branch (512, 1024) matrices, columns (ph, pw, i, j, c).
    m2a, h2, w2o = _conv_as_matrix(raw["conv2_w"], 4, 4, pad=1, nchw_input=False)
    m2v, _, _ = _conv_as_matrix(raw["vconv2_w"], 4, 4, pad=1, nchw_input=False)
    b2a = jnp.tile(raw["conv2_b"], h2 * w2o)[None, :]
    b2v = jnp.tile(raw["vconv2_b"], h2 * w2o)[None, :]
    w2a = _pool_reorder(m2a, h2, w2o, 64)
    w2v = _pool_reorder(m2v, h2, w2o, 64)
    b2a = _pool_reorder(b2a, h2, w2o, 64)
    b2v = _pool_reorder(b2v, h2, w2o, 64)

    # fc1 / vfc1 fused into ONE (512, 128) GEMM weight (block diagonal over branches).
    wf1 = jnp.zeros((512, 128), jnp.float32)
    wf1 = wf1.at[0:256, 0:64].set(_fc1_rows_from_torch(raw["fc1_w"]))
    wf1 = wf1.at[256:512, 64:128].set(_fc1_rows_from_torch(raw["vfc1_w"]))
    bf1 = jnp.concatenate([raw["fc1_b"], raw["vfc1_b"]])[None, :]      # (1, 128)

    # fc2 (64->3) and vfc2 (64->16) fused into one 128x128 GEMM.
    wf2 = jnp.zeros((128, 128), jnp.float32)
    wf2 = wf2.at[0:64, 0:3].set(raw["fc2_w"].T)
    wf2 = wf2.at[64:128, 64:80].set(raw["vfc2_w"].T)
    bf2 = jnp.zeros((1, 128), jnp.float32)
    bf2 = bf2.at[0, 0:3].set(raw["fc2_b"])
    bf2 = bf2.at[0, 64:80].set(raw["vfc2_b"])

    # vfc3 (16->1) as a full-lane-width weight row (nonzero at lanes 64:80).
    w3 = jnp.zeros((1, 128), jnp.float32).at[0, 64:80].set(raw["vfc3_w"].reshape(16))
    b3 = raw["vfc3_b"].reshape(1, 1)

    return {
        "w1": w1, "b1": b1,
        "w2a": w2a, "b2a": b2a, "w2v": w2v, "b2v": b2v,
        "wf1": wf1, "bf1": bf1,
        "wf2": wf2, "bf2": bf2,
        "w3": w3, "b3": b3,
    }


# ----------------------------------------------------------------------------
# Forward wrapper (single pallas_call).
# ----------------------------------------------------------------------------
def _round_up(x, m):
    return (x + m - 1) // m * m


def forward(packed, x_nchw):
    # TODO(synk): the original PyTorch forward() feeds the (N, 3) softmax output of
    # action_layer into value_layer (whose first op is a Conv2d expecting an image),
    # which is ill-typed and would raise in PyTorch.  As before, both heads are run
    # on the image input and we return (action_probs, state_value).
    n = x_nchw.shape[0]
    x_flat = x_nchw.reshape(n, IN_FEATS)                               # NCHW flat (no transpose)
    x_flat = jnp.pad(x_flat, ((0, 0), (0, IN_PAD - IN_FEATS)))

    tile = BATCH_TILE if n >= BATCH_TILE else _round_up(n, 8)
    n_pad = _round_up(n, tile)
    if n_pad != n:
        x_flat = jnp.pad(x_flat, ((0, n_pad - n), (0, 0)))
    grid = (n_pad // tile,)

    def _row_map(b):
        return (b, 0)

    def _const_map(b):
        return (0, 0)

    weight_keys = ("w1", "b1", "w2a", "b2a", "w2v", "b2v",
                   "wf1", "bf1", "wf2", "bf2", "w3", "b3")
    weight_specs = [pl.BlockSpec(packed[k].shape, _const_map) for k in weight_keys]

    out = pl.pallas_call(
        _actor_critic_kernel,
        out_shape=jax.ShapeDtypeStruct((n_pad, OUT_WIDTH), jnp.float32),
        grid_spec=pltpu.PrefetchScalarGridSpec(
            num_scalar_prefetch=0,
            grid=grid,
            in_specs=[pl.BlockSpec((tile, IN_PAD), _row_map)] + weight_specs,
            out_specs=pl.BlockSpec((tile, OUT_WIDTH), _row_map),
        ),
        compiler_params=pltpu.CompilerParams(
            dimension_semantics=("parallel",),
            vmem_limit_bytes=48 * 1024 * 1024,
        ),
    )(x_flat, *(packed[k] for k in weight_keys))

    return out[:n, 0:3], out[:n, 3:4]


def action_layer(packed, x_nchw):
    return forward(packed, x_nchw)[0]


def value_layer(packed, x_nchw):
    return forward(packed, x_nchw)[1]


# ----------------------------------------------------------------------------
# Pure-JAX reference (mirrors the PyTorch module op-for-op) for self-checking.
# ----------------------------------------------------------------------------
def reference_forward(raw, x_nchw):
    def conv(x, w, b):
        y = lax.conv_general_dilated(x, w, (1, 1), [(1, 1), (1, 1)],
                                     dimension_numbers=("NCHW", "OIHW", "NCHW"))
        return y + b.reshape(1, -1, 1, 1)

    def pool(x):
        return lax.reduce_window(x, -jnp.inf, lax.max, (1, 1, 2, 2), (1, 1, 2, 2), "VALID")

    def trunk(x, w1, b1, w2, b2):
        x = pool(jnp.maximum(conv(x, w1, b1), 0.0))
        x = pool(jnp.maximum(conv(x, w2, b2), 0.0))
        return x.reshape(-1, 256)                      # NCHW flatten == torch .view(-1, 256)

    fa = trunk(x_nchw, raw["conv1_w"], raw["conv1_b"], raw["conv2_w"], raw["conv2_b"])
    ha = jnp.maximum(fa @ raw["fc1_w"].T + raw["fc1_b"], 0.0)
    za = jnp.maximum(ha @ raw["fc2_w"].T + raw["fc2_b"], 0.0)
    probs = jax.nn.softmax(za, axis=-1)

    fv = trunk(x_nchw, raw["vconv1_w"], raw["vconv1_b"], raw["vconv2_w"], raw["vconv2_b"])
    hv = jnp.maximum(fv @ raw["vfc1_w"].T + raw["vfc1_b"], 0.0)
    hv = jnp.maximum(hv @ raw["vfc2_w"].T + raw["vfc2_b"], 0.0)
    value = jnp.maximum(hv @ raw["vfc3_w"].T + raw["vfc3_b"], 0.0)
    return probs, value


if __name__ == "__main__":
    x = jax.random.normal(jax.random.PRNGKey(0), (2, 3, 10, 10), dtype=jnp.float32)  # NCHW
    raw = init_params(jax.random.PRNGKey(1))
    packed = pack_params(raw)

    probs, value = jax.jit(forward)(packed, x)
    jax.block_until_ready((probs, value))

    assert probs.shape == (2, 3) and value.shape == (2, 1)
    assert bool(jnp.all(jnp.isfinite(probs))) and bool(jnp.all(jnp.isfinite(value)))
    assert bool(jnp.allclose(jnp.sum(probs, axis=-1), 1.0, atol=1e-5))

    probs_ref, value_ref = reference_forward(raw, x)
    assert bool(jnp.allclose(probs, probs_ref, atol=1e-4)), (probs, probs_ref)
    assert bool(jnp.allclose(value, value_ref, atol=1e-4)), (value, value_ref)
    print("KERNEL_OK")
</pallas_src>

<mosaic_0001>
module attributes {stable_mosaic.version = 11 : i64} {
  func.func @_actor_critic_kernel(%arg0: i32, %arg1: memref<8x384xf32, #tpu.memory_space<vmem>>, %arg2: memref<384x4096xf32, #tpu.memory_space<vmem>>, %arg3: memref<1x4096xf32, #tpu.memory_space<vmem>>, %arg4: memref<512x1024xf32, #tpu.memory_space<vmem>>, %arg5: memref<1x1024xf32, #tpu.memory_space<vmem>>, %arg6: memref<512x1024xf32, #tpu.memory_space<vmem>>, %arg7: memref<1x1024xf32, #tpu.memory_space<vmem>>, %arg8: memref<512x128xf32, #tpu.memory_space<vmem>>, %arg9: memref<1x128xf32, #tpu.memory_space<vmem>>, %arg10: memref<128x128xf32, #tpu.memory_space<vmem>>, %arg11: memref<1x128xf32, #tpu.memory_space<vmem>>, %arg12: memref<1x128xf32, #tpu.memory_space<vmem>>, %arg13: memref<1x1xf32, #tpu.memory_space<vmem>>, %arg14: memref<8x128xf32, #tpu.memory_space<vmem>>) attributes {dimension_semantics = [#tpu.dimension_semantics<parallel>], iteration_bounds = array<i64: 1>, scalar_prefetch = 0 : i64, scratch_operands = 0 : i64, tpu.core_type = #tpu.core_type<tc>, window_params = [{transform_indices = @transform_0, window_bounds = array<i64: 8, 384>}, {pipeline_mode = #tpu.pipeline_mode<synchronous>, transform_indices = @transform_1, window_bounds = array<i64: 384, 4096>}, {pipeline_mode = #tpu.pipeline_mode<synchronous>, transform_indices = @transform_2, window_bounds = array<i64: 1, 4096>}, {pipeline_mode = #tpu.pipeline_mode<synchronous>, transform_indices = @transform_3, window_bounds = array<i64: 512, 1024>}, {pipeline_mode = #tpu.pipeline_mode<synchronous>, transform_indices = @transform_4, window_bounds = array<i64: 1, 1024>}, {pipeline_mode = #tpu.pipeline_mode<synchronous>, transform_indices = @transform_5, window_bounds = array<i64: 512, 1024>}, {pipeline_mode = #tpu.pipeline_mode<synchronous>, transform_indices = @transform_6, window_bounds = array<i64: 1, 1024>}, {pipeline_mode = #tpu.pipeline_mode<synchronous>, transform_indices = @transform_7, window_bounds = array<i64: 512, 128>}, {pipeline_mode = #tpu.pipeline_mode<synchronous>, transform_indices = @transform_8, window_bounds = array<i64: 1, 128>}, {pipeline_mode = #tpu.pipeline_mode<synchronous>, transform_indices = @transform_9, window_bounds = array<i64: 128, 128>}, {pipeline_mode = #tpu.pipeline_mode<synchronous>, transform_indices = @transform_10, window_bounds = array<i64: 1, 128>}, {pipeline_mode = #tpu.pipeline_mode<synchronous>, transform_indices = @transform_11, window_bounds = array<i64: 1, 128>}, {pipeline_mode = #tpu.pipeline_mode<synchronous>, transform_indices = @transform_12, window_bounds = array<i64: 1, 1>}, {transform_indices = @transform_13, window_bounds = array<i64: 8, 128>}]} {
    %c0 = arith.constant 0 : index
    %c0_0 = arith.constant 0 : index
    %0 = vector.load %arg1[%c0, %c0_0] : memref<8x384xf32, #tpu.memory_space<vmem>>, vector<8x384xf32>
    %c0_1 = arith.constant 0 : index
    %c0_2 = arith.constant 0 : index
    %1 = vector.load %arg2[%c0_1, %c0_2] : memref<384x4096xf32, #tpu.memory_space<vmem>>, vector<384x4096xf32>
    %cst = arith.constant dense<0.000000e+00> : vector<8x4096xf32>
    %2 = tpu.matmul %0, %1, %cst {dimension_numbers = #tpu.dot_dimension_numbers<[1], [0], [0], [1], [0, 0, 1, 1], [], []>} : vector<8x384xf32>, vector<384x4096xf32>, vector<8x4096xf32> -> vector<8x4096xf32>
    %c0_3 = arith.constant 0 : index
    %c0_4 = arith.constant 0 : index
    %3 = vector.load %arg3[%c0_3, %c0_4] : memref<1x4096xf32, #tpu.memory_space<vmem>>, vector<1x4096xf32>
    %4 = vector.broadcast %3 : vector<1x4096xf32> to vector<8x4096xf32>
    %5 = arith.addf %2, %4 : vector<8x4096xf32>
    %cst_5 = arith.constant 0.000000e+00 : f32
    %6 = vector.broadcast %cst_5 : f32 to vector<8x4096xf32>
    %7 = arith.maximumf %5, %6 : vector<8x4096xf32>
    %8 = vector.extract_strided_slice %7 {offsets = [0, 0], sizes = [8, 1024], strides = [1, 1]} : vector<8x4096xf32> to vector<8x1024xf32>
    %9 = vector.extract_strided_slice %7 {offsets = [0, 1024], sizes = [8, 1024], strides = [1, 1]} : vector<8x4096xf32> to vector<8x1024xf32>
    %10 = arith.maximumf %8, %9 : vector<8x1024xf32>
    %11 = vector.extract_strided_slice %7 {offsets = [0, 2048], sizes = [8, 1024], strides = [1, 1]} : vector<8x4096xf32> to vector<8x1024xf32>
    %12 = vector.extract_strided_slice %7 {offsets = [0, 3072], sizes = [8, 1024], strides = [1, 1]} : vector<8x4096xf32> to vector<8x1024xf32>
    %13 = arith.maximumf %11, %12 : vector<8x1024xf32>
    %14 = arith.maximumf %10, %13 : vector<8x1024xf32>
    %15 = vector.extract_strided_slice %14 {offsets = [0, 0], sizes = [8, 512], strides = [1, 1]} : vector<8x1024xf32> to vector<8x512xf32>
    %c0_6 = arith.constant 0 : index
    %c0_7 = arith.constant 0 : index
    %16 = vector.load %arg4[%c0_6, %c0_7] : memref<512x1024xf32, #tpu.memory_space<vmem>>, vector<512x1024xf32>
    %cst_8 = arith.constant dense<0.000000e+00> : vector<8x1024xf32>
    %17 = tpu.matmul %15, %16, %cst_8 {dimension_numbers = #tpu.dot_dimension_numbers<[1], [0], [0], [1], [0, 0, 1, 1], [], []>} : vector<8x512xf32>, vector<512x1024xf32>, vector<8x1024xf32> -> vector<8x1024xf32>
    %c0_9 = arith.constant 0 : index
    %c0_10 = arith.constant 0 : index
    %18 = vector.load %arg5[%c0_9, %c0_10] : memref<1x1024xf32, #tpu.memory_space<vmem>>, vector<1x1024xf32>
    %19 = vector.broadcast %18 : vector<1x1024xf32> to vector<8x1024xf32>
    %20 = arith.addf %17, %19 : vector<8x1024xf32>
    %cst_11 = arith.constant 0.000000e+00 : f32
    %21 = vector.broadcast %cst_11 : f32 to vector<8x1024xf32>
    %22 = arith.maximumf %20, %21 : vector<8x1024xf32>
    %23 = vector.extract_strided_slice %14 {offsets = [0, 512], sizes = [8, 512], strides = [1, 1]} : vector<8x1024xf32> to vector<8x512xf32>
    %c0_12 = arith.constant 0 : index
    %c0_13 = arith.constant 0 : index
    %24 = vector.load %arg6[%c0_12, %c0_13] : memref<512x1024xf32, #tpu.memory_space<vmem>>, vector<512x1024xf32>
    %cst_14 = arith.constant dense<0.000000e+00> : vector<8x1024xf32>
    %25 = tpu.matmul %23, %24, %cst_14 {dimension_numbers = #tpu.dot_dimension_numbers<[1], [0], [0], [1], [0, 0, 1, 1], [], []>} : vector<8x512xf32>, vector<512x1024xf32>, vector<8x1024xf32> -> vector<8x1024xf32>
    %c0_15 = arith.constant 0 : index
    %c0_16 = arith.constant 0 : index
    %26 = vector.load %arg7[%c0_15, %c0_16] : memref<1x1024xf32, #tpu.memory_space<vmem>>, vector<1x1024xf32>
    %27 = vector.broadcast %26 : vector<1x1024xf32> to vector<8x1024xf32>
    %28 = arith.addf %25, %27 : vector<8x1024xf32>
    %cst_17 = arith.constant 0.000000e+00 : f32
    %29 = vector.broadcast %cst_17 : f32 to vector<8x1024xf32>
    %30 = arith.maximumf %28, %29 : vector<8x1024xf32>
    %31 = vector.extract_strided_slice %22 {offsets = [0, 0], sizes = [8, 256], strides = [1, 1]} : vector<8x1024xf32> to vector<8x256xf32>
    %32 = vector.extract_strided_slice %22 {offsets = [0, 256], sizes = [8, 256], strides = [1, 1]} : vector<8x1024xf32> to vector<8x256xf32>
    %33 = arith.maximumf %31, %32 : vector<8x256xf32>
    %34 = vector.extract_strided_slice %22 {offsets = [0, 512], sizes = [8, 256], strides = [1, 1]} : vector<8x1024xf32> to vector<8x256xf32>
    %35 = vector.extract_strided_slice %22 {offsets = [0, 768], sizes = [8, 256], strides = [1, 1]} : vector<8x1024xf32> to vector<8x256xf32>
    %36 = arith.maximumf %34, %35 : vector<8x256xf32>
    %37 = arith.maximumf %33, %36 : vector<8x256xf32>
    %38 = vector.extract_strided_slice %30 {offsets = [0, 0], sizes = [8, 256], strides = [1, 1]} : vector<8x1024xf32> to vector<8x256xf32>
    %39 = vector.extract_strided_slice %30 {offsets = [0, 256], sizes = [8, 256], strides = [1, 1]} : vector<8x1024xf32> to vector<8x256xf32>
    %40 = arith.maximumf %38, %39 : vector<8x256xf32>
    %41 = vector.extract_strided_slice %30 {offsets = [0, 512], sizes = [8, 256], strides = [1, 1]} : vector<8x1024xf32> to vector<8x256xf32>
    %42 = vector.extract_strided_slice %30 {offsets = [0, 768], sizes = [8, 256], strides = [1, 1]} : vector<8x1024xf32> to vector<8x256xf32>
    %43 = arith.maximumf %41, %42 : vector<8x256xf32>
    %44 = arith.maximumf %40, %43 : vector<8x256xf32>
    %45 = tpu.concatenate %37, %44 in 1 : vector<8x256xf32>, vector<8x256xf32> -> vector<8x512xf32>
    %c0_18 = arith.constant 0 : index
    %c0_19 = arith.constant 0 : index
    %46 = vector.load %arg8[%c0_18, %c0_19] : memref<512x128xf32, #tpu.memory_space<vmem>>, vector<512x128xf32>
    %cst_20 = arith.constant dense<0.000000e+00> : vector<8x128xf32>
    %47 = tpu.matmul %45, %46, %cst_20 {dimension_numbers = #tpu.dot_dimension_numbers<[1], [0], [0], [1], [0, 0, 1, 1], [], []>} : vector<8x512xf32>, vector<512x128xf32>, vector<8x128xf32> -> vector<8x128xf32>
    %c0_21 = arith.constant 0 : index
    %c0_22 = arith.constant 0 : index
    %48 = vector.load %arg9[%c0_21, %c0_22] : memref<1x128xf32, #tpu.memory_space<vmem>>, vector<1x128xf32>
    %49 = vector.broadcast %48 : vector<1x128xf32> to vector<8x128xf32>
    %50 = arith.addf %47, %49 : vector<8x128xf32>
    %cst_23 = arith.constant 0.000000e+00 : f32
    %51 = vector.broadcast %cst_23 : f32 to vector<8x128xf32>
    %52 = arith.maximumf %50, %51 : vector<8x128xf32>
    %c0_24 = arith.constant 0 : index
    %c0_25 = arith.constant 0 : index
    %53 = vector.load %arg10[%c0_24, %c0_25] : memref<128x128xf32, #tpu.memory_space<vmem>>, vector<128x128xf32>
    %cst_26 = arith.constant dense<0.000000e+00> : vector<8x128xf32>
    %54 = tpu.matmul %52, %53, %cst_26 {dimension_numbers = #tpu.dot_dimension_numbers<[1], [0], [0], [1], [0, 0, 1, 1], [], []>} : vector<8x128xf32>, vector<128x128xf32>, vector<8x128xf32> -> vector<8x128xf32>
    %c0_27 = arith.constant 0 : index
    %c0_28 = arith.constant 0 : index
    %55 = vector.load %arg11[%c0_27, %c0_28] : memref<1x128xf32, #tpu.memory_space<vmem>>, vector<1x128xf32>
    %56 = vector.broadcast %55 : vector<1x128xf32> to vector<8x128xf32>
    %57 = arith.addf %54, %56 : vector<8x128xf32>
    %cst_29 = arith.constant 0.000000e+00 : f32
    %58 = vector.broadcast %cst_29 : f32 to vector<8x128xf32>
    %59 = arith.maximumf %57, %58 : vector<8x128xf32>
    %60 = tpu.iota {dimensions = array<i32: 1>} : vector<8x128xi32>
    %c3_i32 = arith.constant 3 : i32
    %61 = vector.broadcast %c3_i32 : i32 to vector<8x128xi32>
    %62 = arith.cmpi slt, %60, %61 : vector<8x128xi32>
    %cst_30 = arith.constant 0xFF800000 : f32
    %63 = vector.broadcast %cst_30 : f32 to vector<8x128xf32>
    %64 = arith.select %62, %59, %63 : vector<8x128xi1>, vector<8x128xf32>
    %cst_31 = arith.constant dense<0xFF800000> : vector<8xf32>
    %65 = vector.multi_reduction <maximumf>, %64, %cst_31 [1] : vector<8x128xf32> to vector<8xf32>
    %66 = vector.shape_cast %65 : vector<8xf32> to vector<8x1xf32>
    %67 = vector.broadcast %66 : vector<8x1xf32> to vector<8x128xf32>
    %68 = arith.subf %64, %67 : vector<8x128xf32>
    %69 = math.exp %68 : vector<8x128xf32>
    %cst_32 = arith.constant dense<0.000000e+00> : vector<8xf32>
    %70 = vector.multi_reduction <add>, %69, %cst_32 [1] : vector<8x128xf32> to vector<8xf32>
    %71 = vector.shape_cast %70 : vector<8xf32> to vector<8x1xf32>
    %72 = vector.broadcast %71 : vector<8x1xf32> to vector<8x128xf32>
    %73 = arith.divf %69, %72 : vector<8x128xf32>
    %c0_33 = arith.constant 0 : index
    %c0_34 = arith.constant 0 : index
    %74 = vector.load %arg12[%c0_33, %c0_34] : memref<1x128xf32, #tpu.memory_space<vmem>>, vector<1x128xf32>
    %75 = vector.broadcast %74 : vector<1x128xf32> to vector<8x128xf32>
    %76 = arith.mulf %59, %75 : vector<8x128xf32>
    %cst_35 = arith.constant dense<0.000000e+00> : vector<8xf32>
    %77 = vector.multi_reduction <add>, %76, %cst_35 [1] : vector<8x128xf32> to vector<8xf32>
    %78 = vector.shape_cast %77 : vector<8xf32> to vector<8x1xf32>
    %c0_36 = arith.constant 0 : index
    %c0_37 = arith.constant 0 : index
    %79 = vector.load %arg13[%c0_36, %c0_37] : memref<1x1xf32, #tpu.memory_space<vmem>>, vector<1x1xf32>
    %80 = vector.broadcast %79 : vector<1x1xf32> to vector<8x1xf32>
    %81 = arith.addf %78, %80 : vector<8x1xf32>
    %cst_38 = arith.constant 0.000000e+00 : f32
    %82 = vector.broadcast %cst_38 : f32 to vector<8x1xf32>
    %83 = arith.maximumf %81, %82 : vector<8x1xf32>
    %c3_i32_39 = arith.constant 3 : i32
    %84 = vector.broadcast %c3_i32_39 : i32 to vector<8x128xi32>
    %85 = arith.cmpi eq, %60, %84 : vector<8x128xi32>
    %86 = vector.shape_cast %83 : vector<8x1xf32> to vector<8x1xf32>
    %87 = vector.broadcast %86 : vector<8x1xf32> to vector<8x128xf32>
    %88 = arith.select %85, %87, %73 : vector<8x128xi1>, vector<8x128xf32>
    %c0_40 = arith.constant 0 : index
    %c0_41 = arith.constant 0 : index
    %89 = vector.load %arg14[%c0_40, %c0_41] : memref<8x128xf32, #tpu.memory_space<vmem>>, vector<8x128xf32>
    tpu.vector_store %arg14[%c0_40, %c0_41], %88 {strides = array<i32>} : memref<8x128xf32, #tpu.memory_space<vmem>>, vector<8x128xf32>,
    return
  }
  func.func @transform_0(%arg0: i32) -> (i32, i32) {
    %c0_i32 = arith.constant 0 : i32
    %c0_i32_0 = arith.constant 0 : i32
    return %arg0, %c0_i32 : i32, i32
  }
  func.func @transform_1(%arg0: i32) -> (i32, i32) {
    %c0_i32 = arith.constant 0 : i32
    %c0_i32_0 = arith.constant 0 : i32
    %c0_i32_1 = arith.constant 0 : i32
    return %c0_i32, %c0_i32_0 : i32, i32
  }
  func.func @transform_2(%arg0: i32) -> (i32, i32) {
    %c0_i32 = arith.constant 0 : i32
    %c0_i32_0 = arith.constant 0 : i32
    %c0_i32_1 = arith.constant 0 : i32
    return %c0_i32, %c0_i32_0 : i32, i32
  }
  func.func @transform_3(%arg0: i32) -> (i32, i32) {
    %c0_i32 = arith.constant 0 : i32
    %c0_i32_0 = arith.constant 0 : i32
    %c0_i32_1 = arith.constant 0 : i32
    return %c0_i32, %c0_i32_0 : i32, i32
  }
  func.func @transform_4(%arg0: i32) -> (i32, i32) {
    %c0_i32 = arith.constant 0 : i32
    %c0_i32_0 = arith.constant 0 : i32
    %c0_i32_1 = arith.constant 0 : i32
    return %c0_i32, %c0_i32_0 : i32, i32
  }
  func.func @transform_5(%arg0: i32) -> (i32, i32) {
    %c0_i32 = arith.constant 0 : i32
    %c0_i32_0 = arith.constant 0 : i32
    %c0_i32_1 = arith.constant 0 : i32
    return %c0_i32, %c0_i32_0 : i32, i32
  }
  func.func @transform_6(%arg0: i32) -> (i32, i32) {
    %c0_i32 = arith.constant 0 : i32
    %c0_i32_0 = arith.constant 0 : i32
    %c0_i32_1 = arith.constant 0 : i32
    return %c0_i32, %c0_i32_0 : i32, i32
  }
  func.func @transform_7(%arg0: i32) -> (i32, i32) {
    %c0_i32 = arith.constant 0 : i32
    %c0_i32_0 = arith.constant 0 : i32
    %c0_i32_1 = arith.constant 0 : i32
    return %c0_i32, %c0_i32_0 : i32, i32
  }
  func.func @transform_8(%arg0: i32) -> (i32, i32) {
    %c0_i32 = arith.constant 0 : i32
    %c0_i32_0 = arith.constant 0 : i32
    %c0_i32_1 = arith.constant 0 : i32
    return %c0_i32, %c0_i32_0 : i32, i32
  }
  func.func @transform_9(%arg0: i32) -> (i32, i32) {
    %c0_i32 = arith.constant 0 : i32
    %c0_i32_0 = arith.constant 0 : i32
    %c0_i32_1 = arith.constant 0 : i32
    return %c0_i32, %c0_i32_0 : i32, i32
  }
  func.func @transform_10(%arg0: i32) -> (i32, i32) {
    %c0_i32 = arith.constant 0 : i32
    %c0_i32_0 = arith.constant 0 : i32
    %c0_i32_1 = arith.constant 0 : i32
    return %c0_i32, %c0_i32_0 : i32, i32
  }
  func.func @transform_11(%arg0: i32) -> (i32, i32) {
    %c0_i32 = arith.constant 0 : i32
    %c0_i32_0 = arith.constant 0 : i32
    %c0_i32_1 = arith.constant 0 : i32
    return %c0_i32, %c0_i32_0 : i32, i32
  }
  func.func @transform_12(%arg0: i32) -> (i32, i32) {
    %c0_i32 = arith.constant 0 : i32
    %c0_i32_0 = arith.constant 0 : i32
    %c0_i32_1 = arith.constant 0 : i32
    return %c0_i32, %c0_i32_0 : i32, i32
  }
  func.func @transform_13(%arg0: i32) -> (i32, i32) {
    %c0_i32 = arith.constant 0 : i32
    %c0_i32_0 = arith.constant 0 : i32
    return %arg0, %c0_i32 : i32, i32
  }
}

</mosaic_0001>

<bundles_post_ra>
// kernel: forward.1
= control target key start
LH: loop header
LB: loop body
LE: loop exit
PB: predicated region body
PF: predicated region fallthrough
CT: control target
= control target key end

     0   :  { %s7538_s0 = inlined_call_operand.vmem [shape: f32[8,384], index: 0, kind: input, shape index: {}]   ;;  %s7539_s1 = inlined_call_operand.hbm [shape: f32[384,4096], index: 1, kind: input, shape index: {}]   ;;  %s7540_s2 = inlined_call_operand.hbm [shape: f32[1,4096], index: 2, kind: input, shape index: {}]   ;;  %s7541_s3 = inlined_call_operand.hbm [shape: f32[512,1024], index: 3, kind: input, shape index: {}]   ;;  %s7542_s4 = inlined_call_operand.hbm [shape: f32[1,1024], index: 4, kind: input, shape index: {}]   ;;  %s7543_s5 = inlined_call_operand.hbm [shape: f32[512,1024], index: 5, kind: input, shape index: {}]   ;;  %s7544_s6 = inlined_call_operand.hbm [shape: f32[1,1024], index: 6, kind: input, shape index: {}]   ;;  %s7545_s7 = inlined_call_operand.hbm [shape: f32[512,128], index: 7, kind: input, shape index: {}]   ;;  %s7546_s8 = inlined_call_operand.hbm [shape: f32[1,128], index: 8, kind: input, shape index: {}]   ;;  %s7547_s9 = inlined_call_operand.hbm [shape: f32[128,128], index: 9, kind: input, shape index: {}]   ;;  %s7548_s10 = inlined_call_operand.hbm [shape: f32[1,128], index: 10, kind: input, shape index: {}]   ;;  %s7549_s11 = inlined_call_operand.hbm [shape: f32[1,128], index: 11, kind: input, shape index: {}]   ;;  %s7550_s12 = inlined_call_operand.<no memory space> [shape: f32[1,1], index: 12, kind: input, shape index: {}]   ;;  %s7551_s13 = inlined_call_operand.vmem [shape: f32[8,128], index: 13, kind: output, shape index: {}]  }
   0x1   :  { %v18_v0 = vstv %s7550_s12 }
   0x2   :  { %19 = vst [vmem:[#allocation2] sm:$0x1] %v18_v0 }
   0x3   :  { %20 = vsyncpa [#allocation4], 0 }
   0x4   :  { %21 = vsyncpa [#allocation6], 0 }
   0x5   :  { %22 = vsyncpa [#allocation9], 0 }
   0x6   :  { %23 = vsyncpa [#allocation12], 0 }
   0x7   :  { %24 = vsyncpa [#allocation15], 0  ;;  %s46_s29 = sshll.u32 %s7540_s2, 4  ;;  %s47_s29 = int_to_ptr.hbm [resolvable:$true] %s46_s29 }
   0x8   :  { %25 = vsyncpa [#allocation18], 0  ;;  %s6731_s30 = smov [#allocation5]   ;;  %s70_s17 = sshll.u32 %s7542_s4, 4  ;;  %s71_s17 = int_to_ptr.hbm [resolvable:$true] %s70_s17 }
   0x9   :  { %s48_s14 = sshll.u32 %s6731_s30, 4  ;;  %s6732_s12 = smov [#allocation8]   ;;  %s49_s14 = int_to_ptr.vmem [resolvable:$true] %s48_s14 }
   0xa   :  { %51 = dma.hbm_to_vmem [thread:$0]  %s47_s29, 512, %s49_s14, [#allocation6]  }
   0xb   :  { %s72_s18 = sshll.u32 %s6732_s12, 4  ;;  %s94_s21 = sshll.u32 %s7544_s6, 4  ;;  %s73_s18 = int_to_ptr.vmem [resolvable:$true] %s72_s18  ;;  %s95_s21 = int_to_ptr.hbm [resolvable:$true] %s94_s21 }
   0xc   :  { %75 = dma.hbm_to_vmem [thread:$0]  %s71_s17, 128, %s73_s18, [#allocation9]  }
   0xd   :  { %s118_s23 = sshll.u32 %s7546_s8, 4  ;;  %s6733_s24 = smov [#allocation11]   ;;  %s119_s23 = int_to_ptr.hbm [resolvable:$true] %s118_s23 }
   0xe   :  { %s96_s25 = sshll.u32 %s6733_s24, 4  ;;  %s6734_s4 = smov [#allocation14]   ;;  %s97_s25 = int_to_ptr.vmem [resolvable:$true] %s96_s25 }
   0xf   :  { %99 = dma.hbm_to_vmem [thread:$0]  %s95_s21, 128, %s97_s25, [#allocation12]  }
  0x10   :  { %s120_s26 = sshll.u32 %s6734_s4, 4  ;;  %s142_s29 = sshll.u32 %s7548_s10, 4  ;;  %s121_s26 = int_to_ptr.vmem [resolvable:$true] %s120_s26  ;;  %s143_s29 = int_to_ptr.hbm [resolvable:$true] %s142_s29 }
  0x11   :  { %123 = dma.hbm_to_vmem [thread:$0]  %s119_s23, 16, %s121_s26, [#allocation15]  }
  0x12   :  { %s32_s14 = sshll.u32 %s7539_s1, 4  ;;  %s6735_s15 = smov [#allocation17]   ;;  %s33_s14 = int_to_ptr.hbm [resolvable:$true] %s32_s14 }
  0x13   :  { %s144_s8 = sshll.u32 %s6735_s15, 4  ;;  %s6736_s16 = smov [#allocation3]   ;;  %s145_s8 = int_to_ptr.vmem [resolvable:$true] %s144_s8 }
  0x14   :  { %147 = dma.hbm_to_vmem [thread:$0]  %s143_s29, 16, %s145_s8, [#allocation18]  }
  0x15   :  { %s34_s17 = sshll.u32 %s6736_s16, 4  ;;  %s6737_s12 = smov 4096   ;;  %s35_s17 = int_to_ptr.vmem [resolvable:$true] %s34_s17 }
  0x16   :  { %s6738_s18 = smov 256   ;;  %s56_s20 = sshll.u32 %s7541_s3, 4  ;;  %s57_s20 = int_to_ptr.hbm [resolvable:$true] %s56_s20 }
  0x17   :  { %40 = dma.hbm_to_vmem [thread:$0]  %s33_s14, 196608, %s35_s17, [#allocation4], %s6737_s12, %s6737_s12, %s6738_s18  }
  0x18   :  { %s6739_s21 = smov [#allocation7]   ;;  %s80_s23 = sshll.u32 %s7543_s5, 4  ;;  %s81_s23 = int_to_ptr.hbm [resolvable:$true] %s80_s23 }
  0x19   :  { %s58_s2 = sshll.u32 %s6739_s21, 4  ;;  %s6740_s24 = smov 1024   ;;  %s59_s2 = int_to_ptr.vmem [resolvable:$true] %s58_s2 }
  0x1a   :  { %s6741_s25 = smov 64   ;;  %s6742_s4 = smov [#allocation10]  }
  0x1b   :  { %64 = dma.hbm_to_vmem [thread:$0]  %s57_s20, 65536, %s59_s2, [#allocation6], %s6740_s24, %s6740_s24, %s6741_s25  }
  0x1c   :  { %s82_s26 = sshll.u32 %s6742_s4, 4  ;;  %s104_s29 = sshll.u32 %s7545_s7, 4  ;;  %s83_s26 = int_to_ptr.vmem [resolvable:$true] %s82_s26  ;;  %s105_s29 = int_to_ptr.hbm [resolvable:$true] %s104_s29 }
  0x1d   :  { %88 = dma.hbm_to_vmem [thread:$0]  %s81_s23, 65536, %s83_s26, [#allocation9], %s6740_s24, %s6740_s24, %s6741_s25  }
  0x1e   :  { %s6743_s3 = smov [#allocation13]   ;;  %s128_s5 = sshll.u32 %s7547_s9, 4  ;;  %s129_s5 = int_to_ptr.hbm [resolvable:$true] %s128_s5 }
  0x1f   :  { %s106_s6 = sshll.u32 %s6743_s3, 4  ;;  %s6744_s15 = smov 128   ;;  %s107_s6 = int_to_ptr.vmem [resolvable:$true] %s106_s6 }
  0x20   :  { %s6745_s8 = smov 8   ;;  %s6746_s16 = smov [#allocation16]  }
  0x21   :  { %112 = dma.hbm_to_vmem [thread:$0]  %s105_s29, 8192, %s107_s6, [#allocation12], %s6744_s15, %s6744_s15, %s6745_s8  }
  0x22   :  { %s130_s17 = sshll.u32 %s6746_s16, 4  ;;  %s153_s7 = sshll.u32 %s7549_s11, 4  ;;  %s131_s17 = int_to_ptr.vmem [resolvable:$true] %s130_s17  ;;  %s154_s7 = int_to_ptr.hbm [resolvable:$true] %s153_s7 }
  0x23   :  { %136 = dma.hbm_to_vmem [thread:$0]  %s129_s5, 2048, %s131_s17, [#allocation15], %s6744_s15, %s6744_s15, %s6745_s8  }
  0x24   :  { %s6747_s19 = smov [#allocation19]  }
  0x25   :  { %s155_s10 = sshll.u32 %s6747_s19, 4  ;;  %s156_s10 = int_to_ptr.vmem [resolvable:$true] %s155_s10 }
  0x26   :  { %158 = dma.hbm_to_vmem [thread:$0]  %s154_s7, 16, %s156_s10, [#allocation18]  }
  0x27   :  { %6719 = dma.done.wait [#allocation4], 196608  }
  0x28   :  { %6720 = vsyncadd [#allocation4], 4294770688 }
  0x29   :  { %6721 = dma.done.wait [#allocation6], 66048  }
  0x2a   :  { %6722 = vsyncadd [#allocation6], 4294901248 }
  0x2b   :  { %6723 = dma.done.wait [#allocation9], 65664  }
  0x2c   :  { %6724 = vsyncadd [#allocation9], 4294901632 }
  0x2d   :  { %6725 = dma.done.wait [#allocation12], 8320  }
  0x2e   :  { %6726 = vsyncadd [#allocation12], 4294958976 }
  0x2f   :  { %6727 = dma.done.wait [#allocation15], 2064  }
  0x30   :  { %6728 = vsyncadd [#allocation15], 4294965232 }
  0x31   :  { %6729 = dma.done.wait [#allocation18], 32  }
  0x32   :  { %6730 = vsyncadd [#allocation18], 4294967264  ;;  %v688_v1 = vld [vmem:[#allocation3 + $0xf00] sm:$0xff]  ;;  %v689_v4 = vld [vmem:[#allocation3 + $0xf08] sm:$0xff] }
  0x33   :  { %v1200_v2 = vld [vmem:[#allocation3 + $0x1f00] sm:$0xff]  ;;  %1816 = vmatpush.msra.mxu0 %v688_v1  ;;  %1876 = vmatpush.msra.mxu3 %v689_v4  ;;  %v657_v8 = vld [vmem:[#allocation3 + $0xe08] sm:$0xff]  ;;  %v1202_v4 = vld [vmem:[#allocation3 + $0x1f10] sm:$0xff] }
  0x34   :  { %v1712_v3 = vld [vmem:[#allocation3 + $0x2f00] sm:$0xff]  ;;  %1836 = vmatpush.msra.mxu1 %v1200_v2  ;;  %v625_v12 = vld [vmem:[#allocation3 + $0xd08] sm:$0xff] }
  0x35   :  { %v656_v5 = vld [vmem:[#allocation3 + $0xe00] sm:$0xff]  ;;  %1856 = vmatpush.msra.mxu2 %v1712_v3  ;;  %1877 = vmatpush.msra.mxu3 %v657_v8  ;;  %v593_v16 = vld [vmem:[#allocation3 + $0xc08] sm:$0xff]  ;;  %v690_v3 = vld [vmem:[#allocation3 + $0xf10] sm:$0xff] }
  0x36   :  { %v1168_v6 = vld [vmem:[#allocation3 + $0x1e00] sm:$0xff]  ;;  %1817 = vmatpush.msra.mxu0 %v656_v5  ;;  %v561_v20 = vld [vmem:[#allocation3 + $0xb08] sm:$0xff]  ;;  %v1170_v8 = vld [vmem:[#allocation3 + $0x1e10] sm:$0xff] }
  0x37   :  { %v1680_v7 = vld [vmem:[#allocation3 + $0x2e00] sm:$0xff]  ;;  %1837 = vmatpush.msra.mxu1 %v1168_v6  ;;  %1878 = vmatpush.msra.mxu3 %v625_v12  ;;  %v529_v24 = vld [vmem:[#allocation3 + $0xa08] sm:$0xff]  ;;  %v1138_v12 = vld [vmem:[#allocation3 + $0x1d10] sm:$0xff] }
  0x38   :  { %v624_v9 = vld [vmem:[#allocation3 + $0xd00] sm:$0xff]  ;;  %1857 = vmatpush.msra.mxu2 %v1680_v7  ;;  %v497_v28 = vld [vmem:[#allocation3 + $0x908] sm:$0xff]  ;;  %v658_v7 = vld [vmem:[#allocation3 + $0xe10] sm:$0xff] }
  0x39   :  { %v1136_v10 = vld [vmem:[#allocation3 + $0x1d00] sm:$0xff]  ;;  %1818 = vmatpush.msra.mxu0 %v624_v9  ;;  %1879 = vmatpush.msra.mxu3 %v593_v16  ;;  %v465_v32 = vld [vmem:[#allocation3 + $0x808] sm:$0xff]  ;;  %v1106_v16 = vld [vmem:[#allocation3 + $0x1c10] sm:$0xff] }
  0x3a   :  { %v1648_v11 = vld [vmem:[#allocation3 + $0x2d00] sm:$0xff]  ;;  %1838 = vmatpush.msra.mxu1 %v1136_v10  ;;  %v433_v36 = vld [vmem:[#allocation3 + $0x708] sm:$0xff] }
  0x3b   :  { %v592_v13 = vld [vmem:[#allocation3 + $0xc00] sm:$0xff]  ;;  %1858 = vmatpush.msra.mxu2 %v1648_v11  ;;  %1880 = vmatpush.msra.mxu3 %v561_v20  ;;  %v401_v40 = vld [vmem:[#allocation3 + $0x608] sm:$0xff]  ;;  %v626_v11 = vld [vmem:[#allocation3 + $0xd10] sm:$0xff] }
  0x3c   :  { %v1104_v14 = vld [vmem:[#allocation3 + $0x1c00] sm:$0xff]  ;;  %1819 = vmatpush.msra.mxu0 %v592_v13  ;;  %v369_v44 = vld [vmem:[#allocation3 + $0x508] sm:$0xff]  ;;  %v1074_v20 = vld [vmem:[#allocation3 + $0x1b10] sm:$0xff] }
  0x3d   :  { %v1616_v15 = vld [vmem:[#allocation3 + $0x2c00] sm:$0xff]  ;;  %1839 = vmatpush.msra.mxu1 %v1104_v14  ;;  %1881 = vmatpush.msra.mxu3 %v529_v24  ;;  %v337_v48 = vld [vmem:[#allocation3 + $0x408] sm:$0xff]  ;;  %v1042_v24 = vld [vmem:[#allocation3 + $0x1a10] sm:$0xff] }
  0x3e   :  { %v560_v17 = vld [vmem:[#allocation3 + $0xb00] sm:$0xff]  ;;  %1859 = vmatpush.msra.mxu2 %v1616_v15  ;;  %v305_v52 = vld [vmem:[#allocation3 + $0x308] sm:$0xff]  ;;  %v594_v15 = vld [vmem:[#allocation3 + $0xc10] sm:$0xff] }
  0x3f   :  { %v1072_v18 = vld [vmem:[#allocation3 + $0x1b00] sm:$0xff]  ;;  %1820 = vmatpush.msra.mxu0 %v560_v17  ;;  %1882 = vmatpush.msra.mxu3 %v497_v28  ;;  %v273_v56 = vld [vmem:[#allocation3 + $0x208] sm:$0xff]  ;;  %v1010_v28 = vld [vmem:[#allocation3 + $0x1910] sm:$0xff] }
  0x40   :  { %v1584_v19 = vld [vmem:[#allocation3 + $0x2b00] sm:$0xff]  ;;  %1840 = vmatpush.msra.mxu1 %v1072_v18  ;;  %v241_v60 = vld [vmem:[#allocation3 + $0x108] sm:$0xff] }
  0x41   :  { %v528_v21 = vld [vmem:[#allocation3 + $0xa00] sm:$0xff]  ;;  %1860 = vmatpush.msra.mxu2 %v1584_v19  ;;  %1883 = vmatpush.msra.mxu3 %v465_v32  ;;  %v209_v0 = vld [vmem:[#allocation3 + $0x8] sm:$0xff]  ;;  %v562_v19 = vld [vmem:[#allocation3 + $0xb10] sm:$0xff] }
  0x42   :  { %v1040_v22 = vld [vmem:[#allocation3 + $0x1a00] sm:$0xff]  ;;  %1821 = vmatpush.msra.mxu0 %v528_v21  ;;  %v1201_v1 = vld [vmem:[#allocation3 + $0x1f08] sm:$0xff]  ;;  %v978_v32 = vld [vmem:[#allocation3 + $0x1810] sm:$0xff] }
  0x43   :  { %v1552_v23 = vld [vmem:[#allocation3 + $0x2a00] sm:$0xff]  ;;  %1841 = vmatpush.msra.mxu1 %v1040_v22  ;;  %1884 = vmatpush.msra.mxu3 %v433_v36  ;;  %v1713_v2 = vld [vmem:[#allocation3 + $0x2f08] sm:$0xff]  ;;  %v946_v36 = vld [vmem:[#allocation3 + $0x1710] sm:$0xff] }
  0x44   :  { %v496_v25 = vld [vmem:[#allocation3 + $0x900] sm:$0xff]  ;;  %1861 = vmatpush.msra.mxu2 %v1552_v23  ;;  %v1169_v5 = vld [vmem:[#allocation3 + $0x1e08] sm:$0xff]  ;;  %v530_v23 = vld [vmem:[#allocation3 + $0xa10] sm:$0xff] }
  0x45   :  { %v1008_v26 = vld [vmem:[#allocation3 + $0x1900] sm:$0xff]  ;;  %1822 = vmatpush.msra.mxu0 %v496_v25  ;;  %1885 = vmatpush.msra.mxu3 %v401_v40  ;;  %v1681_v6 = vld [vmem:[#allocation3 + $0x2e08] sm:$0xff]  ;;  %v914_v40 = vld [vmem:[#allocation3 + $0x1610] sm:$0xff] }
  0x46   :  { %v1520_v27 = vld [vmem:[#allocation3 + $0x2900] sm:$0xff]  ;;  %1842 = vmatpush.msra.mxu1 %v1008_v26  ;;  %v1137_v9 = vld [vmem:[#allocation3 + $0x1d08] sm:$0xff] }
  0x47   :  { %v464_v29 = vld [vmem:[#allocation3 + $0x800] sm:$0xff]  ;;  %1862 = vmatpush.msra.mxu2 %v1520_v27  ;;  %1886 = vmatpush.msra.mxu3 %v369_v44  ;;  %v1649_v10 = vld [vmem:[#allocation3 + $0x2d08] sm:$0xff]  ;;  %v498_v27 = vld [vmem:[#allocation3 + $0x910] sm:$0xff] }
  0x48   :  { %v976_v30 = vld [vmem:[#allocation3 + $0x1800] sm:$0xff]  ;;  %1823 = vmatpush.msra.mxu0 %v464_v29  ;;  %v1105_v13 = vld [vmem:[#allocation3 + $0x1c08] sm:$0xff]  ;;  %v882_v44 = vld [vmem:[#allocation3 + $0x1510] sm:$0xff] }
  0x49   :  { %v1488_v31 = vld [vmem:[#allocation3 + $0x2800] sm:$0xff]  ;;  %1843 = vmatpush.msra.mxu1 %v976_v30  ;;  %1887 = vmatpush.msra.mxu3 %v337_v48  ;;  %v1617_v14 = vld [vmem:[#allocation3 + $0x2c08] sm:$0xff]  ;;  %v850_v48 = vld [vmem:[#allocation3 + $0x1410] sm:$0xff] }
  0x4a   :  { %v432_v33 = vld [vmem:[#allocation3 + $0x700] sm:$0xff]  ;;  %1863 = vmatpush.msra.mxu2 %v1488_v31  ;;  %v1073_v17 = vld [vmem:[#allocation3 + $0x1b08] sm:$0xff]  ;;  %v466_v31 = vld [vmem:[#allocation3 + $0x810] sm:$0xff] }
  0x4b   :  { %v944_v34 = vld [vmem:[#allocation3 + $0x1700] sm:$0xff]  ;;  %1824 = vmatpush.msra.mxu0 %v432_v33  ;;  %1888 = vmatpush.msra.mxu3 %v305_v52  ;;  %v1585_v18 = vld [vmem:[#allocation3 + $0x2b08] sm:$0xff]  ;;  %v818_v52 = vld [vmem:[#allocation3 + $0x1310] sm:$0xff] }
  0x4c   :  { %v1456_v35 = vld [vmem:[#allocation3 + $0x2700] sm:$0xff]  ;;  %1844 = vmatpush.msra.mxu1 %v944_v34  ;;  %v1041_v21 = vld [vmem:[#allocation3 + $0x1a08] sm:$0xff] }
  0x4d   :  { %v400_v37 = vld [vmem:[#allocation3 + $0x600] sm:$0xff]  ;;  %1864 = vmatpush.msra.mxu2 %v1456_v35  ;;  %1889 = vmatpush.msra.mxu3 %v273_v56  ;;  %v1553_v22 = vld [vmem:[#allocation3 + $0x2a08] sm:$0xff]  ;;  %v434_v35 = vld [vmem:[#allocation3 + $0x710] sm:$0xff] }
  0x4e   :  { %v912_v38 = vld [vmem:[#allocation3 + $0x1600] sm:$0xff]  ;;  %1825 = vmatpush.msra.mxu0 %v400_v37  ;;  %v1009_v25 = vld [vmem:[#allocation3 + $0x1908] sm:$0xff]  ;;  %v786_v56 = vld [vmem:[#allocation3 + $0x1210] sm:$0xff] }
  0x4f   :  { %v1424_v39 = vld [vmem:[#allocation3 + $0x2600] sm:$0xff]  ;;  %1845 = vmatpush.msra.mxu1 %v912_v38  ;;  %1890 = vmatpush.msra.mxu3 %v241_v60  ;;  %v1521_v26 = vld [vmem:[#allocation3 + $0x2908] sm:$0xff]  ;;  %v754_v60 = vld [vmem:[#allocation3 + $0x1110] sm:$0xff] }
  0x50   :  { %v368_v41 = vld [vmem:[#allocation3 + $0x500] sm:$0xff]  ;;  %1865 = vmatpush.msra.mxu2 %v1424_v39  ;;  %v977_v29 = vld [vmem:[#allocation3 + $0x1808] sm:$0xff]  ;;  %v402_v39 = vld [vmem:[#allocation3 + $0x610] sm:$0xff] }
  0x51   :  { %v880_v42 = vld [vmem:[#allocation3 + $0x1500] sm:$0xff]  ;;  %1826 = vmatpush.msra.mxu0 %v368_v41  ;;  %1891 = vmatpush.msra.mxu3 %v209_v0  ;;  %v1489_v30 = vld [vmem:[#allocation3 + $0x2808] sm:$0xff]  ;;  %v722_v0 = vld [vmem:[#allocation3 + $0x1010] sm:$0xff] }
  0x52   :  { %v1392_v43 = vld [vmem:[#allocation3 + $0x2500] sm:$0xff]  ;;  %1846 = vmatpush.msra.mxu1 %v880_v42  ;;  %v945_v33 = vld [vmem:[#allocation3 + $0x1708] sm:$0xff] }
  0x53   :  { %v336_v45 = vld [vmem:[#allocation3 + $0x400] sm:$0xff]  ;;  %1866 = vmatpush.msra.mxu2 %v1392_v43  ;;  %1956 = vmatpush.msrb.mxu3 %v1202_v4  ;;  %v1457_v34 = vld [vmem:[#allocation3 + $0x2708] sm:$0xff]  ;;  %v370_v43 = vld [vmem:[#allocation3 + $0x510] sm:$0xff] }
  0x54   :  { %v848_v46 = vld [vmem:[#allocation3 + $0x1400] sm:$0xff]  ;;  %1827 = vmatpush.msra.mxu0 %v336_v45  ;;  %v913_v37 = vld [vmem:[#allocation3 + $0x1608] sm:$0xff]  ;;  %v1714_v4 = vld [vmem:[#allocation3 + $0x2f10] sm:$0xff] }
  0x55   :  { %v1360_v47 = vld [vmem:[#allocation3 + $0x2400] sm:$0xff]  ;;  %1847 = vmatpush.msra.mxu1 %v848_v46  ;;  %1957 = vmatpush.msrb.mxu3 %v1170_v8  ;;  %v1425_v38 = vld [vmem:[#allocation3 + $0x2608] sm:$0xff]  ;;  %v1682_v8 = vld [vmem:[#allocation3 + $0x2e10] sm:$0xff] }
  0x56   :  { %v304_v49 = vld [vmem:[#allocation3 + $0x300] sm:$0xff]  ;;  %1867 = vmatpush.msra.mxu2 %v1360_v47  ;;  %v881_v41 = vld [vmem:[#allocation3 + $0x1508] sm:$0xff]  ;;  %v338_v47 = vld [vmem:[#allocation3 + $0x410] sm:$0xff] }
  0x57   :  { %v816_v50 = vld [vmem:[#allocation3 + $0x1300] sm:$0xff]  ;;  %1828 = vmatpush.msra.mxu0 %v304_v49  ;;  %1958 = vmatpush.msrb.mxu3 %v1138_v12  ;;  %v1393_v42 = vld [vmem:[#allocation3 + $0x2508] sm:$0xff]  ;;  %v1650_v12 = vld [vmem:[#allocation3 + $0x2d10] sm:$0xff] }
  0x58   :  { %v1328_v51 = vld [vmem:[#allocation3 + $0x2300] sm:$0xff]  ;;  %1848 = vmatpush.msra.mxu1 %v816_v50  ;;  %v849_v45 = vld [vmem:[#allocation3 + $0x1408] sm:$0xff] }
  0x59   :  { %v272_v53 = vld [vmem:[#allocation3 + $0x200] sm:$0xff]  ;;  %1868 = vmatpush.msra.mxu2 %v1328_v51  ;;  %1959 = vmatpush.msrb.mxu3 %v1106_v16  ;;  %v1361_v46 = vld [vmem:[#allocation3 + $0x2408] sm:$0xff]  ;;  %v306_v51 = vld [vmem:[#allocation3 + $0x310] sm:$0xff] }
  0x5a   :  { %v784_v54 = vld [vmem:[#allocation3 + $0x1200] sm:$0xff]  ;;  %1829 = vmatpush.msra.mxu0 %v272_v53  ;;  %v817_v49 = vld [vmem:[#allocation3 + $0x1308] sm:$0xff]  ;;  %v1618_v16 = vld [vmem:[#allocation3 + $0x2c10] sm:$0xff] }
  0x5b   :  { %v1296_v55 = vld [vmem:[#allocation3 + $0x2200] sm:$0xff]  ;;  %1849 = vmatpush.msra.mxu1 %v784_v54  ;;  %1960 = vmatpush.msrb.mxu3 %v1074_v20  ;;  %v1329_v50 = vld [vmem:[#allocation3 + $0x2308] sm:$0xff]  ;;  %v1586_v20 = vld [vmem:[#allocation3 + $0x2b10] sm:$0xff] }
  0x5c   :  { %v240_v57 = vld [vmem:[#allocation3 + $0x100] sm:$0xff]  ;;  %1869 = vmatpush.msra.mxu2 %v1296_v55  ;;  %v785_v53 = vld [vmem:[#allocation3 + $0x1208] sm:$0xff]  ;;  %v274_v55 = vld [vmem:[#allocation3 + $0x210] sm:$0xff] }
  0x5d   :  { %v752_v58 = vld [vmem:[#allocation3 + $0x1100] sm:$0xff]  ;;  %1830 = vmatpush.msra.mxu0 %v240_v57  ;;  %1961 = vmatpush.msrb.mxu3 %v1042_v24  ;;  %v1297_v54 = vld [vmem:[#allocation3 + $0x2208] sm:$0xff]  ;;  %v531_v24 = vld [vmem:[#allocation3 + $0xa18] sm:$0xff] }
  0x5e   :  { %v1264_v59 = vld [vmem:[#allocation3 + $0x2100] sm:$0xff]  ;;  %1850 = vmatpush.msra.mxu1 %v752_v58  ;;  %v753_v57 = vld [vmem:[#allocation3 + $0x1108] sm:$0xff] }
  0x5f   :  { %v208_v61 = vld [vmem:[#allocation3] sm:$0xff]  ;;  %1870 = vmatpush.msra.mxu2 %v1264_v59  ;;  %1962 = vmatpush.msrb.mxu3 %v1010_v28  ;;  %v1265_v58 = vld [vmem:[#allocation3 + $0x2108] sm:$0xff]  ;;  %v242_v59 = vld [vmem:[#allocation3 + $0x110] sm:$0xff] }
  0x60   :  { %v720_v62 = vld [vmem:[#allocation3 + $0x1000] sm:$0xff]  ;;  %1831 = vmatpush.msra.mxu0 %v208_v61  ;;  %v721_v61 = vld [vmem:[#allocation3 + $0x1008] sm:$0xff]  ;;  %v1522_v28 = vld [vmem:[#allocation3 + $0x2910] sm:$0xff] }
  0x61   :  { %v1232_v63 = vld [vmem:[#allocation3 + $0x2000] sm:$0xff]  ;;  %1851 = vmatpush.msra.mxu1 %v720_v62  ;;  %1963 = vmatpush.msrb.mxu3 %v978_v32  ;;  %v1233_v62 = vld [vmem:[#allocation3 + $0x2008] sm:$0xff]  ;;  %v1490_v32 = vld [vmem:[#allocation3 + $0x2810] sm:$0xff] }
  0x62   :  { %1871 = vmatpush.msra.mxu2 %v1232_v63  ;;  %1896 = vmatpush.msrb.mxu0 %v1201_v1  ;;  %v210_v63 = vld [vmem:[#allocation3 + $0x10] sm:$0xff]  ;;  %v6858_v1 = vld [vmem:[%s7538_s0] sm:$0xff] }
  0x63   :  { %1916 = vmatpush.msrb.mxu1 %v1713_v2  ;;  %1964 = vmatpush.msrb.mxu3 %v946_v36  ;;  %v6863_v2 = vld [vmem:[%s7538_s0 + $0x8] sm:$0xff]  ;;  %v1458_v36 = vld [vmem:[#allocation3 + $0x2710] sm:$0xff] }
  0x64   :  { %1936 = vmatpush.msrb.mxu2 %v690_v3  ;;  %1897 = vmatpush.msrb.mxu0 %v1169_v5  ;;  %v6868_v3 = vld [vmem:[%s7538_s0 + $0x10] sm:$0xff]  ;;  %v691_v5 = vld [vmem:[#allocation3 + $0xf18] sm:$0xff] }
  0x65   :  { %1917 = vmatpush.msrb.mxu1 %v1681_v6  ;;  %1965 = vmatpush.msrb.mxu3 %v914_v40  ;;  %v1203_v6 = vld [vmem:[#allocation3 + $0x1f18] sm:$0xff]  ;;  %v1426_v40 = vld [vmem:[#allocation3 + $0x2610] sm:$0xff] }
  0x66   :  { %1937 = vmatpush.msrb.mxu2 %v658_v7  ;;  %1898 = vmatpush.msrb.mxu0 %v1137_v9  ;;  %v1715_v7 = vld [vmem:[#allocation3 + $0x2f18] sm:$0xff] }
  0x67   :  { %1918 = vmatpush.msrb.mxu1 %v1649_v10  ;;  %1966 = vmatpush.msrb.mxu3 %v882_v44  ;;  %v659_v9 = vld [vmem:[#allocation3 + $0xe18] sm:$0xff]  ;;  %v1394_v44 = vld [vmem:[#allocation3 + $0x2510] sm:$0xff] }
  0x68   :  { %1938 = vmatpush.msrb.mxu2 %v626_v11  ;;  %1899 = vmatpush.msrb.mxu0 %v1105_v13  ;;  %v1171_v10 = vld [vmem:[#allocation3 + $0x1e18] sm:$0xff] }
  0x69   :  { %1919 = vmatpush.msrb.mxu1 %v1617_v14  ;;  %1967 = vmatpush.msrb.mxu3 %v850_v48  ;;  %v1683_v11 = vld [vmem:[#allocation3 + $0x2e18] sm:$0xff]  ;;  %v1362_v48 = vld [vmem:[#allocation3 + $0x2410] sm:$0xff] }
  0x6a   :  { %1939 = vmatpush.msrb.mxu2 %v594_v15  ;;  %1900 = vmatpush.msrb.mxu0 %v1073_v17  ;;  %v627_v13 = vld [vmem:[#allocation3 + $0xd18] sm:$0xff] }
  0x6b   :  { %1920 = vmatpush.msrb.mxu1 %v1585_v18  ;;  %1968 = vmatpush.msrb.mxu3 %v818_v52  ;;  %v1139_v14 = vld [vmem:[#allocation3 + $0x1d18] sm:$0xff]  ;;  %v1330_v52 = vld [vmem:[#allocation3 + $0x2310] sm:$0xff] }
  0x6c   :  { %1940 = vmatpush.msrb.mxu2 %v562_v19  ;;  %1901 = vmatpush.msrb.mxu0 %v1041_v21  ;;  %v1651_v15 = vld [vmem:[#allocation3 + $0x2d18] sm:$0xff] }
  0x6d   :  { %1921 = vmatpush.msrb.mxu1 %v1553_v22  ;;  %1969 = vmatpush.msrb.mxu3 %v786_v56  ;;  %v595_v17 = vld [vmem:[#allocation3 + $0xc18] sm:$0xff]  ;;  %v1298_v56 = vld [vmem:[#allocation3 + $0x2210] sm:$0xff] }
  0x6e   :  { %1941 = vmatpush.msrb.mxu2 %v530_v23  ;;  %1902 = vmatpush.msrb.mxu0 %v1009_v25  ;;  %v1107_v18 = vld [vmem:[#allocation3 + $0x1c18] sm:$0xff]  ;;  %v1554_v25 = vld [vmem:[#allocation3 + $0x2a10] sm:$0xff] }
  0x6f   :  { %1922 = vmatpush.msrb.mxu1 %v1521_v26  ;;  %1970 = vmatpush.msrb.mxu3 %v754_v60  ;;  %v1619_v19 = vld [vmem:[#allocation3 + $0x2c18] sm:$0xff]  ;;  %v1266_v60 = vld [vmem:[#allocation3 + $0x2110] sm:$0xff] }
  0x70   :  { %1942 = vmatpush.msrb.mxu2 %v498_v27  ;;  %1903 = vmatpush.msrb.mxu0 %v977_v29  ;;  %v563_v21 = vld [vmem:[#allocation3 + $0xb18] sm:$0xff] }
  0x71   :  { %1923 = vmatpush.msrb.mxu1 %v1489_v30  ;;  %1971 = vmatpush.msrb.mxu3 %v722_v0  ;;  %v1075_v22 = vld [vmem:[#allocation3 + $0x1b18] sm:$0xff]  ;;  %v1234_v0 = vld [vmem:[#allocation3 + $0x2010] sm:$0xff] }
  0x72   :  { %1943 = vmatpush.msrb.mxu2 %v466_v31  ;;  %1904 = vmatpush.msrb.mxu0 %v945_v33  ;;  %v1587_v23 = vld [vmem:[#allocation3 + $0x2b18] sm:$0xff] }
  0x73   :  { %1924 = vmatpush.msrb.mxu1 %v1457_v34  ;;  %1832 = vmatmul.f32.vlgmr.msra.gmra.mxu0 %v6858_v1  ;;  %v1043_v26 = vld [vmem:[#allocation3 + $0x1a18] sm:$0xff] }
  0x74   :  { %1944 = vmatpush.msrb.mxu2 %v434_v35  ;;  %1905 = vmatpush.msrb.mxu0 %v913_v37  ;;  %v1555_v27 = vld [vmem:[#allocation3 + $0x2a18] sm:$0xff] }
  0x75   :  { %1925 = vmatpush.msrb.mxu1 %v1425_v38  ;;  %1872 = vmatmul.f32.vlgmr.msra.gmra.mxu2 %v6868_v3  ;;  %v499_v29 = vld [vmem:[#allocation3 + $0x918] sm:$0xff] }
  0x76   :  { %1945 = vmatpush.msrb.mxu2 %v402_v39  ;;  %1906 = vmatpush.msrb.mxu0 %v881_v41  ;;  %v1011_v30 = vld [vmem:[#allocation3 + $0x1918] sm:$0xff] }
  0x77   :  { %1926 = vmatpush.msrb.mxu1 %v1393_v42  ;;  %1892 = vmatmul.f32.vlgmr.msra.gmra.mxu3 %v6858_v1  ;;  %v1523_v31 = vld [vmem:[#allocation3 + $0x2918] sm:$0xff] }
  0x78   :  { %1946 = vmatpush.msrb.mxu2 %v370_v43  ;;  %1907 = vmatpush.msrb.mxu0 %v849_v45  ;;  %v467_v33 = vld [vmem:[#allocation3 + $0x818] sm:$0xff] }
  0x79   :  { %1927 = vmatpush.msrb.mxu1 %v1361_v46  ;;  %2036 = vmatpush.msra.mxu3 %v1715_v7  ;;  %v979_v34 = vld [vmem:[#allocation3 + $0x1818] sm:$0xff]  ;;  %v692_v7 = vld [vmem:[#allocation3 + $0xf20] sm:$0xff] }
  0x7a   :  { %1947 = vmatpush.msrb.mxu2 %v338_v47  ;;  %1908 = vmatpush.msrb.mxu0 %v817_v49  ;;  %v1491_v35 = vld [vmem:[#allocation3 + $0x2818] sm:$0xff] }
  0x7b   :  { %1928 = vmatpush.msrb.mxu1 %v1329_v50  ;;  %2037 = vmatpush.msra.mxu3 %v1683_v11  ;;  %v435_v37 = vld [vmem:[#allocation3 + $0x718] sm:$0xff]  ;;  %v660_v11 = vld [vmem:[#allocation3 + $0xe20] sm:$0xff] }
  0x7c   :  { %1948 = vmatpush.msrb.mxu2 %v306_v51  ;;  %1909 = vmatpush.msrb.mxu0 %v785_v53  ;;  %v947_v38 = vld [vmem:[#allocation3 + $0x1718] sm:$0xff] }
  0x7d   :  { %1929 = vmatpush.msrb.mxu1 %v1297_v54  ;;  %2038 = vmatpush.msra.mxu3 %v1651_v15  ;;  %v1459_v39 = vld [vmem:[#allocation3 + $0x2718] sm:$0xff]  ;;  %v628_v15 = vld [vmem:[#allocation3 + $0xd20] sm:$0xff] }
  0x7e   :  { %1949 = vmatpush.msrb.mxu2 %v274_v55  ;;  %1910 = vmatpush.msrb.mxu0 %v753_v57  ;;  %v403_v41 = vld [vmem:[#allocation3 + $0x618] sm:$0xff] }
  0x7f   :  { %1930 = vmatpush.msrb.mxu1 %v1265_v58  ;;  %2039 = vmatpush.msra.mxu3 %v1619_v19  ;;  %v915_v42 = vld [vmem:[#allocation3 + $0x1618] sm:$0xff]  ;;  %v596_v19 = vld [vmem:[#allocation3 + $0xc20] sm:$0xff] }
  0x80   :  { %1950 = vmatpush.msrb.mxu2 %v242_v59  ;;  %1911 = vmatpush.msrb.mxu0 %v721_v61  ;;  %v1427_v43 = vld [vmem:[#allocation3 + $0x2618] sm:$0xff] }
  0x81   :  { %1931 = vmatpush.msrb.mxu1 %v1233_v62  ;;  %2040 = vmatpush.msra.mxu3 %v1587_v23  ;;  %v371_v45 = vld [vmem:[#allocation3 + $0x518] sm:$0xff]  ;;  %v564_v23 = vld [vmem:[#allocation3 + $0xb20] sm:$0xff] }
  0x82   :  { %1951 = vmatpush.msrb.mxu2 %v210_v63  ;;  %1852 = vmatmul.f32.vlgmr.msra.gmra.mxu1 %v6863_v2  ;;  %v883_v46 = vld [vmem:[#allocation3 + $0x1518] sm:$0xff] }
  0x83   :  { %1976 = vmatpush.msra.mxu0 %v1714_v4  ;;  %1996 = vmatpush.msra.mxu1 %v691_v5  ;;  %v1395_v47 = vld [vmem:[#allocation3 + $0x2518] sm:$0xff] }
  0x84   :  { %2016 = vmatpush.msra.mxu2 %v1203_v6  ;;  %1912 = vmatmul.f32.vlgmr.msrb.gmra.mxu0 %v6863_v2  ;;  %v339_v49 = vld [vmem:[#allocation3 + $0x418] sm:$0xff] }
  0x85   :  { %1977 = vmatpush.msra.mxu0 %v1682_v8  ;;  %1997 = vmatpush.msra.mxu1 %v659_v9  ;;  %v851_v50 = vld [vmem:[#allocation3 + $0x1418] sm:$0xff]  ;;  %v1204_v8 = vld [vmem:[#allocation3 + $0x1f20] sm:$0xff] }
  0x86   :  { %2017 = vmatpush.msra.mxu2 %v1171_v10  ;;  %2041 = vmatpush.msra.mxu3 %v1555_v27  ;;  %v1363_v51 = vld [vmem:[#allocation3 + $0x2418] sm:$0xff]  ;;  %v1716_v9 = vld [vmem:[#allocation3 + $0x2f20] sm:$0xff]  ;;  %v693_v10 = vld [vmem:[#allocation3 + $0xf28] sm:$0xff] }
  0x87   :  { %1978 = vmatpush.msra.mxu0 %v1650_v12  ;;  %1998 = vmatpush.msra.mxu1 %v627_v13  ;;  %v307_v53 = vld [vmem:[#allocation3 + $0x318] sm:$0xff]  ;;  %v1172_v12 = vld [vmem:[#allocation3 + $0x1e20] sm:$0xff] }
  0x88   :  { %2018 = vmatpush.msra.mxu2 %v1139_v14  ;;  %2042 = vmatpush.msra.mxu3 %v1523_v31  ;;  %v819_v54 = vld [vmem:[#allocation3 + $0x1318] sm:$0xff]  ;;  %v1684_v13 = vld [vmem:[#allocation3 + $0x2e20] sm:$0xff]  ;;  %v661_v14 = vld [vmem:[#allocation3 + $0xe28] sm:$0xff] }
  0x89   :  { %1979 = vmatpush.msra.mxu0 %v1618_v16  ;;  %1999 = vmatpush.msra.mxu1 %v595_v17  ;;  %v1331_v55 = vld [vmem:[#allocation3 + $0x2318] sm:$0xff]  ;;  %v1140_v16 = vld [vmem:[#allocation3 + $0x1d20] sm:$0xff] }
  0x8a   :  { %2019 = vmatpush.msra.mxu2 %v1107_v18  ;;  %1932 = vmatmul.f32.vlgmr.msrb.gmra.mxu1 %v6868_v3  ;;  %v275_v57 = vld [vmem:[#allocation3 + $0x218] sm:$0xff]  ;;  %v1652_v17 = vld [vmem:[#allocation3 + $0x2d20] sm:$0xff]  ;;  %v629_v18 = vld [vmem:[#allocation3 + $0xd28] sm:$0xff] }
  0x8b   :  { %1980 = vmatpush.msra.mxu0 %v1586_v20  ;;  %2000 = vmatpush.msra.mxu1 %v563_v21  ;;  %v787_v58 = vld [vmem:[#allocation3 + $0x1218] sm:$0xff]  ;;  %v1108_v20 = vld [vmem:[#allocation3 + $0x1c20] sm:$0xff] }
  0x8c   :  { %2020 = vmatpush.msra.mxu2 %v1075_v22  ;;  %2043 = vmatpush.msra.mxu3 %v1491_v35  ;;  %v1299_v59 = vld [vmem:[#allocation3 + $0x2218] sm:$0xff]  ;;  %v1620_v21 = vld [vmem:[#allocation3 + $0x2c20] sm:$0xff]  ;;  %v597_v22 = vld [vmem:[#allocation3 + $0xc28] sm:$0xff] }
  0x8d   :  { %2001 = vmatpush.msra.mxu1 %v531_v24  ;;  %1981 = vmatpush.msra.mxu0 %v1554_v25  ;;  %v243_v61 = vld [vmem:[#allocation3 + $0x118] sm:$0xff]  ;;  %v1076_v24 = vld [vmem:[#allocation3 + $0x1b20] sm:$0xff] }
  0x8e   :  { %2021 = vmatpush.msra.mxu2 %v1043_v26  ;;  %2044 = vmatpush.msra.mxu3 %v1459_v39  ;;  %v755_v62 = vld [vmem:[#allocation3 + $0x1118] sm:$0xff]  ;;  %v1588_v25 = vld [vmem:[#allocation3 + $0x2b20] sm:$0xff]  ;;  %v565_v26 = vld [vmem:[#allocation3 + $0xb28] sm:$0xff] }
  0x8f   :  { %1982 = vmatpush.msra.mxu0 %v1522_v28  ;;  %2002 = vmatpush.msra.mxu1 %v499_v29  ;;  %v1267_v63 = vld [vmem:[#allocation3 + $0x2118] sm:$0xff]  ;;  %v1044_v27 = vld [vmem:[#allocation3 + $0x1a20] sm:$0xff] }
  0x90   :  { %2022 = vmatpush.msra.mxu2 %v1011_v30  ;;  %2045 = vmatpush.msra.mxu3 %v1427_v43  ;;  %v211_v4 = vld [vmem:[#allocation3 + $0x18] sm:$0xff]  ;;  %v532_v28 = vld [vmem:[#allocation3 + $0xa20] sm:$0xff]  ;;  %v533_v30 = vld [vmem:[#allocation3 + $0xa28] sm:$0xff] }
  0x91   :  { %1983 = vmatpush.msra.mxu0 %v1490_v32  ;;  %2003 = vmatpush.msra.mxu1 %v467_v33  ;;  %v723_v5 = vld [vmem:[#allocation3 + $0x1018] sm:$0xff]  ;;  %v1556_v29 = vld [vmem:[#allocation3 + $0x2a20] sm:$0xff] }
  0x92   :  { %2023 = vmatpush.msra.mxu2 %v979_v34  ;;  %2046 = vmatpush.msra.mxu3 %v1395_v47  ;;  %v1235_v6 = vld [vmem:[#allocation3 + $0x2018] sm:$0xff]  ;;  %v1012_v31 = vld [vmem:[#allocation3 + $0x1920] sm:$0xff]  ;;  %v501_v34 = vld [vmem:[#allocation3 + $0x928] sm:$0xff] }
  0x93   :  { %1984 = vmatpush.msra.mxu0 %v1458_v36  ;;  %2004 = vmatpush.msra.mxu1 %v435_v37  ;;  %v500_v32 = vld [vmem:[#allocation3 + $0x920] sm:$0xff] }
  0x94   :  { %2024 = vmatpush.msra.mxu2 %v947_v38  ;;  %2047 = vmatpush.msra.mxu3 %v1363_v51  ;;  %v1524_v33 = vld [vmem:[#allocation3 + $0x2920] sm:$0xff]  ;;  %v469_v38 = vld [vmem:[#allocation3 + $0x828] sm:$0xff] }
  0x95   :  { %1985 = vmatpush.msra.mxu0 %v1426_v40  ;;  %2005 = vmatpush.msra.mxu1 %v403_v41  ;;  %v980_v35 = vld [vmem:[#allocation3 + $0x1820] sm:$0xff] }
  0x96   :  { %2025 = vmatpush.msra.mxu2 %v915_v42  ;;  %2048 = vmatpush.msra.mxu3 %v1331_v55  ;;  %v468_v36 = vld [vmem:[#allocation3 + $0x820] sm:$0xff]  ;;  %v437_v42 = vld [vmem:[#allocation3 + $0x728] sm:$0xff] }
  0x97   :  { %1986 = vmatpush.msra.mxu0 %v1394_v44  ;;  %2006 = vmatpush.msra.mxu1 %v371_v45  ;;  %v1492_v37 = vld [vmem:[#allocation3 + $0x2820] sm:$0xff] }
  0x98   :  { %2026 = vmatpush.msra.mxu2 %v883_v46  ;;  %2049 = vmatpush.msra.mxu3 %v1299_v59  ;;  %v948_v39 = vld [vmem:[#allocation3 + $0x1720] sm:$0xff]  ;;  %v405_v46 = vld [vmem:[#allocation3 + $0x628] sm:$0xff] }
  0x99   :  { %1987 = vmatpush.msra.mxu0 %v1362_v48  ;;  %2007 = vmatpush.msra.mxu1 %v339_v49  ;;  %v436_v40 = vld [vmem:[#allocation3 + $0x720] sm:$0xff] }
  0x9a   :  { %2027 = vmatpush.msra.mxu2 %v851_v50  ;;  %2050 = vmatpush.msra.mxu3 %v1267_v63  ;;  %v1460_v41 = vld [vmem:[#allocation3 + $0x2720] sm:$0xff]  ;;  %v373_v50 = vld [vmem:[#allocation3 + $0x528] sm:$0xff] }
  0x9b   :  { %1988 = vmatpush.msra.mxu0 %v1330_v52  ;;  %2008 = vmatpush.msra.mxu1 %v307_v53  ;;  %v916_v43 = vld [vmem:[#allocation3 + $0x1620] sm:$0xff] }
  0x9c   :  { %2028 = vmatpush.msra.mxu2 %v819_v54  ;;  %2051 = vmatpush.msra.mxu3 %v1235_v6  ;;  %v404_v44 = vld [vmem:[#allocation3 + $0x620] sm:$0xff]  ;;  %v341_v54 = vld [vmem:[#allocation3 + $0x428] sm:$0xff] }
  0x9d   :  { %1989 = vmatpush.msra.mxu0 %v1298_v56  ;;  %2009 = vmatpush.msra.mxu1 %v275_v57  ;;  %v1428_v45 = vld [vmem:[#allocation3 + $0x2620] sm:$0xff] }
  0x9e   :  { %2029 = vmatpush.msra.mxu2 %v787_v58  ;;  %1972 = vmatmul.f32.vlgmr.msrb.gmra.mxu3 %v6863_v2  ;;  %v884_v47 = vld [vmem:[#allocation3 + $0x1520] sm:$0xff]  ;;  %v309_v58 = vld [vmem:[#allocation3 + $0x328] sm:$0xff] }
  0x9f   :  { %1990 = vmatpush.msra.mxu0 %v1266_v60  ;;  %2010 = vmatpush.msra.mxu1 %v243_v61  ;;  %v372_v48 = vld [vmem:[#allocation3 + $0x520] sm:$0xff] }
  0xa0   :  { %2030 = vmatpush.msra.mxu2 %v755_v62  ;;  %2116 = vmatpush.msrb.mxu3 %v693_v10  ;;  %v1396_v49 = vld [vmem:[#allocation3 + $0x2520] sm:$0xff]  ;;  %v277_v62 = vld [vmem:[#allocation3 + $0x228] sm:$0xff] }
  0xa1   :  { %1991 = vmatpush.msra.mxu0 %v1234_v0  ;;  %2011 = vmatpush.msra.mxu1 %v211_v4  ;;  %v852_v51 = vld [vmem:[#allocation3 + $0x1420] sm:$0xff]  ;;  %v1205_v10 = vld [vmem:[#allocation3 + $0x1f28] sm:$0xff] }
  0xa2   :  { %2031 = vmatpush.msra.mxu2 %v723_v5  ;;  %2117 = vmatpush.msrb.mxu3 %v661_v14  ;;  %v340_v52 = vld [vmem:[#allocation3 + $0x420] sm:$0xff]  ;;  %v245_v5 = vld [vmem:[#allocation3 + $0x128] sm:$0xff] }
  0xa3   :  { %1952 = vmatmul.f32.vlgmr.msrb.gmra.mxu2 %v6858_v1  ;;  %2056 = vmatpush.msrb.mxu0 %v692_v7  ;;  %v1364_v53 = vld [vmem:[#allocation3 + $0x2420] sm:$0xff]  ;;  %v1173_v14 = vld [vmem:[#allocation3 + $0x1e28] sm:$0xff] }
  0xa4   :  { %2076 = vmatpush.msrb.mxu1 %v1204_v8  ;;  %2096 = vmatpush.msrb.mxu2 %v1716_v9  ;;  %v820_v55 = vld [vmem:[#allocation3 + $0x1320] sm:$0xff]  ;;  %v213_v9 = vld [vmem:[#allocation3 + $0x28] sm:$0xff] }
  0xa5   :  { %2057 = vmatpush.msrb.mxu0 %v660_v11  ;;  %2118 = vmatpush.msrb.mxu3 %v629_v18  ;;  %v308_v56 = vld [vmem:[#allocation3 + $0x320] sm:$0xff]  ;;  %v1717_v11 = vld [vmem:[#allocation3 + $0x2f28] sm:$0xff] }
  0xa6   :  { %2077 = vmatpush.msrb.mxu1 %v1172_v12  ;;  %2097 = vmatpush.msrb.mxu2 %v1684_v13  ;;  %v1332_v57 = vld [vmem:[#allocation3 + $0x2320] sm:$0xff]  ;;  %v694_v12 = vld [vmem:[#allocation3 + $0xf30] sm:$0xff]  ;;  %v1141_v18 = vld [vmem:[#allocation3 + $0x1d28] sm:$0xff] }
  0xa7   :  { %2058 = vmatpush.msrb.mxu0 %v628_v15  ;;  %2119 = vmatpush.msrb.mxu3 %v597_v22  ;;  %v788_v59 = vld [vmem:[#allocation3 + $0x1220] sm:$0xff]  ;;  %v1206_v13 = vld [vmem:[#allocation3 + $0x1f30] sm:$0xff]  ;;  %v1685_v15 = vld [vmem:[#allocation3 + $0x2e28] sm:$0xff] }
  0xa8   :  { %2078 = vmatpush.msrb.mxu1 %v1140_v16  ;;  %2098 = vmatpush.msrb.mxu2 %v1652_v17  ;;  %v276_v60 = vld [vmem:[#allocation3 + $0x220] sm:$0xff]  ;;  %v662_v16 = vld [vmem:[#allocation3 + $0xe30] sm:$0xff]  ;;  %v1109_v22 = vld [vmem:[#allocation3 + $0x1c28] sm:$0xff] }
  0xa9   :  { %2059 = vmatpush.msrb.mxu0 %v596_v19  ;;  %2120 = vmatpush.msrb.mxu3 %v565_v26  ;;  %v1300_v61 = vld [vmem:[#allocation3 + $0x2220] sm:$0xff]  ;;  %v1174_v17 = vld [vmem:[#allocation3 + $0x1e30] sm:$0xff]  ;;  %v1653_v19 = vld [vmem:[#allocation3 + $0x2d28] sm:$0xff] }
  0xaa   :  { %2079 = vmatpush.msrb.mxu1 %v1108_v20  ;;  %2099 = vmatpush.msrb.mxu2 %v1620_v21  ;;  %v756_v63 = vld [vmem:[#allocation3 + $0x1120] sm:$0xff]  ;;  %v630_v20 = vld [vmem:[#allocation3 + $0xd30] sm:$0xff]  ;;  %v1077_v26 = vld [vmem:[#allocation3 + $0x1b28] sm:$0xff] }
  0xab   :  { %2060 = vmatpush.msrb.mxu0 %v564_v23  ;;  %2121 = vmatpush.msrb.mxu3 %v533_v30  ;;  %v244_v0 = vld [vmem:[#allocation3 + $0x120] sm:$0xff]  ;;  %v1142_v21 = vld [vmem:[#allocation3 + $0x1d30] sm:$0xff]  ;;  %v1621_v23 = vld [vmem:[#allocation3 + $0x2c28] sm:$0xff] }
  0xac   :  { %2080 = vmatpush.msrb.mxu1 %v1076_v24  ;;  %2100 = vmatpush.msrb.mxu2 %v1588_v25  ;;  %v1268_v4 = vld [vmem:[#allocation3 + $0x2120] sm:$0xff]  ;;  %v598_v24 = vld [vmem:[#allocation3 + $0xc30] sm:$0xff]  ;;  %v1045_v30 = vld [vmem:[#allocation3 + $0x1a28] sm:$0xff] }
  0xad   :  { %1992 = vmatmul.f32.vlgmr.msra.gmra.mxu0 %v6868_v3  ;;  %2122 = vmatpush.msrb.mxu3 %v501_v34  ;;  %v724_v6 = vld [vmem:[#allocation3 + $0x1020] sm:$0xff]  ;;  %v1110_v25 = vld [vmem:[#allocation3 + $0x1c30] sm:$0xff]  ;;  %v1013_v34 = vld [vmem:[#allocation3 + $0x1928] sm:$0xff] }
  0xae   :  { %2081 = vmatpush.msrb.mxu1 %v1044_v27  ;;  %2061 = vmatpush.msrb.mxu0 %v532_v28  ;;  %v212_v7 = vld [vmem:[#allocation3 + $0x20] sm:$0xff]  ;;  %v1589_v27 = vld [vmem:[#allocation3 + $0x2b28] sm:$0xff]  ;;  %v566_v28 = vld [vmem:[#allocation3 + $0xb30] sm:$0xff] }
  0xaf   :  { %2101 = vmatpush.msrb.mxu2 %v1556_v29  ;;  %2123 = vmatpush.msrb.mxu3 %v469_v38  ;;  %v1236_v8 = vld [vmem:[#allocation3 + $0x2020] sm:$0xff]  ;;  %v1078_v29 = vld [vmem:[#allocation3 + $0x1b30] sm:$0xff]  ;;  %v981_v38 = vld [vmem:[#allocation3 + $0x1828] sm:$0xff] }
  0xb0   :  { %2082 = vmatpush.msrb.mxu1 %v1012_v31  ;;  %2062 = vmatpush.msrb.mxu0 %v500_v32  ;;  %v1557_v31 = vld [vmem:[#allocation3 + $0x2a28] sm:$0xff]  ;;  %v534_v32 = vld [vmem:[#allocation3 + $0xa30] sm:$0xff] }
  0xb1   :  { %2102 = vmatpush.msrb.mxu2 %v1524_v33  ;;  %2124 = vmatpush.msrb.mxu3 %v437_v42  ;;  %v1046_v33 = vld [vmem:[#allocation3 + $0x1a30] sm:$0xff]  ;;  %v949_v42 = vld [vmem:[#allocation3 + $0x1728] sm:$0xff] }
  0xb2   :  { %2083 = vmatpush.msrb.mxu1 %v980_v35  ;;  %2063 = vmatpush.msrb.mxu0 %v468_v36  ;;  %v1525_v35 = vld [vmem:[#allocation3 + $0x2928] sm:$0xff]  ;;  %v502_v36 = vld [vmem:[#allocation3 + $0x930] sm:$0xff] }
  0xb3   :  { %2103 = vmatpush.msrb.mxu2 %v1492_v37  ;;  %2125 = vmatpush.msrb.mxu3 %v405_v46  ;;  %v1014_v37 = vld [vmem:[#allocation3 + $0x1930] sm:$0xff]  ;;  %v917_v46 = vld [vmem:[#allocation3 + $0x1628] sm:$0xff] }
  0xb4   :  { %2084 = vmatpush.msrb.mxu1 %v948_v39  ;;  %2064 = vmatpush.msrb.mxu0 %v436_v40  ;;  %v1493_v39 = vld [vmem:[#allocation3 + $0x2828] sm:$0xff]  ;;  %v470_v40 = vld [vmem:[#allocation3 + $0x830] sm:$0xff] }
  0xb5   :  { %2104 = vmatpush.msrb.mxu2 %v1460_v41  ;;  %2126 = vmatpush.msrb.mxu3 %v373_v50  ;;  %v982_v41 = vld [vmem:[#allocation3 + $0x1830] sm:$0xff]  ;;  %v885_v50 = vld [vmem:[#allocation3 + $0x1528] sm:$0xff] }
  0xb6   :  { %2085 = vmatpush.msrb.mxu1 %v916_v43  ;;  %2065 = vmatpush.msrb.mxu0 %v404_v44  ;;  %v1461_v43 = vld [vmem:[#allocation3 + $0x2728] sm:$0xff]  ;;  %v438_v44 = vld [vmem:[#allocation3 + $0x730] sm:$0xff] }
  0xb7   :  { %2105 = vmatpush.msrb.mxu2 %v1428_v45  ;;  %2127 = vmatpush.msrb.mxu3 %v341_v54  ;;  %v950_v45 = vld [vmem:[#allocation3 + $0x1730] sm:$0xff]  ;;  %v853_v54 = vld [vmem:[#allocation3 + $0x1428] sm:$0xff] }
  0xb8   :  { %2086 = vmatpush.msrb.mxu1 %v884_v47  ;;  %2066 = vmatpush.msrb.mxu0 %v372_v48  ;;  %v1429_v47 = vld [vmem:[#allocation3 + $0x2628] sm:$0xff]  ;;  %v406_v48 = vld [vmem:[#allocation3 + $0x630] sm:$0xff] }
  0xb9   :  { %2106 = vmatpush.msrb.mxu2 %v1396_v49  ;;  %2128 = vmatpush.msrb.mxu3 %v309_v58  ;;  %v918_v49 = vld [vmem:[#allocation3 + $0x1630] sm:$0xff]  ;;  %v821_v58 = vld [vmem:[#allocation3 + $0x1328] sm:$0xff] }
  0xba   :  { %2087 = vmatpush.msrb.mxu1 %v852_v51  ;;  %2067 = vmatpush.msrb.mxu0 %v340_v52  ;;  %v1397_v51 = vld [vmem:[#allocation3 + $0x2528] sm:$0xff]  ;;  %v374_v52 = vld [vmem:[#allocation3 + $0x530] sm:$0xff] }
  0xbb   :  { %2107 = vmatpush.msrb.mxu2 %v1364_v53  ;;  %2129 = vmatpush.msrb.mxu3 %v277_v62  ;;  %v886_v53 = vld [vmem:[#allocation3 + $0x1530] sm:$0xff]  ;;  %v789_v62 = vld [vmem:[#allocation3 + $0x1228] sm:$0xff] }
  0xbc   :  { %2088 = vmatpush.msrb.mxu1 %v820_v55  ;;  %2068 = vmatpush.msrb.mxu0 %v308_v56  ;;  %v1365_v55 = vld [vmem:[#allocation3 + $0x2428] sm:$0xff]  ;;  %v342_v56 = vld [vmem:[#allocation3 + $0x430] sm:$0xff] }
  0xbd   :  { %2108 = vmatpush.msrb.mxu2 %v1332_v57  ;;  %2130 = vmatpush.msrb.mxu3 %v245_v5  ;;  %v854_v57 = vld [vmem:[#allocation3 + $0x1430] sm:$0xff]  ;;  %v757_v5 = vld [vmem:[#allocation3 + $0x1128] sm:$0xff] }
  0xbe   :  { %2089 = vmatpush.msrb.mxu1 %v788_v59  ;;  %2069 = vmatpush.msrb.mxu0 %v276_v60  ;;  %v1333_v59 = vld [vmem:[#allocation3 + $0x2328] sm:$0xff]  ;;  %v310_v60 = vld [vmem:[#allocation3 + $0x330] sm:$0xff] }
  0xbf   :  { %2109 = vmatpush.msrb.mxu2 %v1300_v61  ;;  %2131 = vmatpush.msrb.mxu3 %v213_v9  ;;  %v822_v61 = vld [vmem:[#allocation3 + $0x1330] sm:$0xff]  ;;  %v725_v9 = vld [vmem:[#allocation3 + $0x1028] sm:$0xff] }
  0xc0   :  { %2090 = vmatpush.msrb.mxu1 %v756_v63  ;;  %2070 = vmatpush.msrb.mxu0 %v244_v0  ;;  %v1301_v63 = vld [vmem:[#allocation3 + $0x2228] sm:$0xff]  ;;  %v278_v0 = vld [vmem:[#allocation3 + $0x230] sm:$0xff] }
  0xc1   :  { %2110 = vmatpush.msrb.mxu2 %v1268_v4  ;;  %2012 = vmatmul.f32.vlgmr.msra.gmra.mxu1 %v6858_v1  ;;  %v790_v4 = vld [vmem:[#allocation3 + $0x1230] sm:$0xff] }
  0xc2   :  { %2091 = vmatpush.msrb.mxu1 %v724_v6  ;;  %2071 = vmatpush.msrb.mxu0 %v212_v7  ;;  %v1269_v6 = vld [vmem:[#allocation3 + $0x2128] sm:$0xff]  ;;  %v246_v7 = vld [vmem:[#allocation3 + $0x130] sm:$0xff] }
  0xc3   :  { %2111 = vmatpush.msrb.mxu2 %v1236_v8  ;;  %2052 = vmatmul.f32.vlgmr.msra.gmra.mxu3 %v6868_v3  ;;  %v758_v8 = vld [vmem:[#allocation3 + $0x1130] sm:$0xff] }
  0xc4   :  { %2032 = vmatmul.f32.vlgmr.msra.gmra.mxu2 %v6863_v2  ;;  %2136 = vmatpush.msra.mxu0 %v1205_v10  ;;  %v1237_v10 = vld [vmem:[#allocation3 + $0x2028] sm:$0xff] }
  0xc5   :  { %2156 = vmatpush.msra.mxu1 %v1717_v11  ;;  %2176 = vmatpush.msra.mxu2 %v694_v12  ;;  %v214_v11 = vld [vmem:[#allocation3 + $0x30] sm:$0xff] }
  0xc6   :  { %2196 = vmatpush.msra.mxu3 %v1206_v13  ;;  %2137 = vmatpush.msra.mxu0 %v1173_v14  ;;  %v726_v12 = vld [vmem:[#allocation3 + $0x1030] sm:$0xff]  ;;  %v695_v14 = vld [vmem:[#allocation3 + $0xf38] sm:$0xff] }
  0xc7   :  { %2157 = vmatpush.msra.mxu1 %v1685_v15  ;;  %2177 = vmatpush.msra.mxu2 %v662_v16  ;;  %v1718_v13 = vld [vmem:[#allocation3 + $0x2f30] sm:$0xff]  ;;  %v1207_v15 = vld [vmem:[#allocation3 + $0x1f38] sm:$0xff] }
  0xc8   :  { %2197 = vmatpush.msra.mxu3 %v1174_v17  ;;  %2138 = vmatpush.msra.mxu0 %v1141_v18  ;;  %v1719_v16 = vld [vmem:[#allocation3 + $0x2f38] sm:$0xff]  ;;  %v1686_v17 = vld [vmem:[#allocation3 + $0x2e30] sm:$0xff] }
  0xc9   :  { %2158 = vmatpush.msra.mxu1 %v1653_v19  ;;  %2178 = vmatpush.msra.mxu2 %v630_v20  ;;  %v663_v18 = vld [vmem:[#allocation3 + $0xe38] sm:$0xff] }
  0xca   :  { %2198 = vmatpush.msra.mxu3 %v1142_v21  ;;  %2139 = vmatpush.msra.mxu0 %v1109_v22  ;;  %v1175_v19 = vld [vmem:[#allocation3 + $0x1e38] sm:$0xff]  ;;  %v1654_v21 = vld [vmem:[#allocation3 + $0x2d30] sm:$0xff] }
  0xcb   :  { %2159 = vmatpush.msra.mxu1 %v1621_v23  ;;  %2179 = vmatpush.msra.mxu2 %v598_v24  ;;  %v1687_v20 = vld [vmem:[#allocation3 + $0x2e38] sm:$0xff] }
  0xcc   :  { %2199 = vmatpush.msra.mxu3 %v1110_v25  ;;  %2140 = vmatpush.msra.mxu0 %v1077_v26  ;;  %v631_v22 = vld [vmem:[#allocation3 + $0xd38] sm:$0xff]  ;;  %v1622_v25 = vld [vmem:[#allocation3 + $0x2c30] sm:$0xff] }
  0xcd   :  { %2160 = vmatpush.msra.mxu1 %v1589_v27  ;;  %2180 = vmatpush.msra.mxu2 %v566_v28  ;;  %v1143_v23 = vld [vmem:[#allocation3 + $0x1d38] sm:$0xff]  ;;  %v1590_v28 = vld [vmem:[#allocation3 + $0x2b30] sm:$0xff] }
  0xce   :  { %2200 = vmatpush.msra.mxu3 %v1078_v29  ;;  %2141 = vmatpush.msra.mxu0 %v1045_v30  ;;  %v1655_v24 = vld [vmem:[#allocation3 + $0x2d38] sm:$0xff] }
  0xcf   :  { %2161 = vmatpush.msra.mxu1 %v1557_v31  ;;  %2181 = vmatpush.msra.mxu2 %v534_v32  ;;  %v599_v26 = vld [vmem:[#allocation3 + $0xc38] sm:$0xff] }
  0xd0   :  { %2201 = vmatpush.msra.mxu3 %v1046_v33  ;;  %2142 = vmatpush.msra.mxu0 %v1013_v34  ;;  %v1623_v27 = vld [vmem:[#allocation3 + $0x2c38] sm:$0xff]  ;;  %v1558_v33 = vld [vmem:[#allocation3 + $0x2a30] sm:$0xff] }
  0xd1   :  { %2162 = vmatpush.msra.mxu1 %v1525_v35  ;;  %2182 = vmatpush.msra.mxu2 %v502_v36  ;;  %v567_v29 = vld [vmem:[#allocation3 + $0xb38] sm:$0xff]  ;;  %v1526_v36 = vld [vmem:[#allocation3 + $0x2930] sm:$0xff] }
  0xd2   :  { %2202 = vmatpush.msra.mxu3 %v1014_v37  ;;  %2143 = vmatpush.msra.mxu0 %v981_v38  ;;  %v1079_v30 = vld [vmem:[#allocation3 + $0x1b38] sm:$0xff] }
  0xd3   :  { %2163 = vmatpush.msra.mxu1 %v1493_v39  ;;  %2183 = vmatpush.msra.mxu2 %v470_v40  ;;  %v1591_v31 = vld [vmem:[#allocation3 + $0x2b38] sm:$0xff]  ;;  %v1494_v40 = vld [vmem:[#allocation3 + $0x2830] sm:$0xff] }
  0xd4   :  { %2203 = vmatpush.msra.mxu3 %v982_v41  ;;  %2144 = vmatpush.msra.mxu0 %v949_v42  ;;  %v535_v32 = vld [vmem:[#allocation3 + $0xa38] sm:$0xff] }
  0xd5   :  { %2164 = vmatpush.msra.mxu1 %v1461_v43  ;;  %2184 = vmatpush.msra.mxu2 %v438_v44  ;;  %v1047_v34 = vld [vmem:[#allocation3 + $0x1a38] sm:$0xff]  ;;  %v1462_v44 = vld [vmem:[#allocation3 + $0x2730] sm:$0xff] }
  0xd6   :  { %2204 = vmatpush.msra.mxu3 %v950_v45  ;;  %2145 = vmatpush.msra.mxu0 %v917_v46  ;;  %v1559_v35 = vld [vmem:[#allocation3 + $0x2a38] sm:$0xff] }
  0xd7   :  { %2165 = vmatpush.msra.mxu1 %v1429_v47  ;;  %2185 = vmatpush.msra.mxu2 %v406_v48  ;;  %v503_v37 = vld [vmem:[#allocation3 + $0x938] sm:$0xff]  ;;  %v1430_v47 = vld [vmem:[#allocation3 + $0x2630] sm:$0xff] }
  0xd8   :  { %2205 = vmatpush.msra.mxu3 %v918_v49  ;;  %2146 = vmatpush.msra.mxu0 %v885_v50  ;;  %v1015_v38 = vld [vmem:[#allocation3 + $0x1938] sm:$0xff]  ;;  %v1398_v50 = vld [vmem:[#allocation3 + $0x2530] sm:$0xff] }
  0xd9   :  { %2166 = vmatpush.msra.mxu1 %v1397_v51  ;;  %2186 = vmatpush.msra.mxu2 %v374_v52  ;;  %v1527_v39 = vld [vmem:[#allocation3 + $0x2938] sm:$0xff] }
  0xda   :  { %2206 = vmatpush.msra.mxu3 %v886_v53  ;;  %2147 = vmatpush.msra.mxu0 %v853_v54  ;;  %v471_v41 = vld [vmem:[#allocation3 + $0x838] sm:$0xff]  ;;  %v1366_v54 = vld [vmem:[#allocation3 + $0x2430] sm:$0xff] }
  0xdb   :  { %2167 = vmatpush.msra.mxu1 %v1365_v55  ;;  %2187 = vmatpush.msra.mxu2 %v342_v56  ;;  %v983_v42 = vld [vmem:[#allocation3 + $0x1838] sm:$0xff] }
  0xdc   :  { %2207 = vmatpush.msra.mxu3 %v854_v57  ;;  %2148 = vmatpush.msra.mxu0 %v821_v58  ;;  %v1495_v43 = vld [vmem:[#allocation3 + $0x2838] sm:$0xff]  ;;  %v1334_v58 = vld [vmem:[#allocation3 + $0x2330] sm:$0xff] }
  0xdd   :  { %2168 = vmatpush.msra.mxu1 %v1333_v59  ;;  %2188 = vmatpush.msra.mxu2 %v310_v60  ;;  %v951_v45 = vld [vmem:[#allocation3 + $0x1738] sm:$0xff] }
  0xde   :  { %2208 = vmatpush.msra.mxu3 %v822_v61  ;;  %2149 = vmatpush.msra.mxu0 %v789_v62  ;;  %v1463_v46 = vld [vmem:[#allocation3 + $0x2738] sm:$0xff]  ;;  %v1302_v62 = vld [vmem:[#allocation3 + $0x2230] sm:$0xff] }
  0xdf   :  { %2169 = vmatpush.msra.mxu1 %v1301_v63  ;;  %2189 = vmatpush.msra.mxu2 %v278_v0  ;;  %v407_v48 = vld [vmem:[#allocation3 + $0x638] sm:$0xff] }
  0xe0   :  { %2209 = vmatpush.msra.mxu3 %v790_v4  ;;  %2150 = vmatpush.msra.mxu0 %v757_v5  ;;  %v1431_v49 = vld [vmem:[#allocation3 + $0x2638] sm:$0xff]  ;;  %v1270_v5 = vld [vmem:[#allocation3 + $0x2130] sm:$0xff] }
  0xe1   :  { %2170 = vmatpush.msra.mxu1 %v1269_v6  ;;  %2190 = vmatpush.msra.mxu2 %v246_v7  ;;  %v375_v51 = vld [vmem:[#allocation3 + $0x538] sm:$0xff] }
  0xe2   :  { %2210 = vmatpush.msra.mxu3 %v758_v8  ;;  %2151 = vmatpush.msra.mxu0 %v725_v9  ;;  %v887_v52 = vld [vmem:[#allocation3 + $0x1538] sm:$0xff]  ;;  %v1238_v9 = vld [vmem:[#allocation3 + $0x2030] sm:$0xff] }
  0xe3   :  { %2171 = vmatpush.msra.mxu1 %v1237_v10  ;;  %2191 = vmatpush.msra.mxu2 %v214_v11  ;;  %v1399_v53 = vld [vmem:[#allocation3 + $0x2538] sm:$0xff] }
  0xe4   :  { %2211 = vmatpush.msra.mxu3 %v726_v12  ;;  %2072 = vmatmul.f32.vlgmr.msrb.gmra.mxu0 %v6858_v1  ;;  %v343_v55 = vld [vmem:[#allocation3 + $0x438] sm:$0xff] }
  0xe5   :  { %2092 = vmatmul.f32.vlgmr.msrb.gmra.mxu1 %v6863_v2  ;;  %2112 = vmatmul.f32.vlgmr.msrb.gmra.mxu2 %v6868_v3  ;;  %v855_v56 = vld [vmem:[#allocation3 + $0x1438] sm:$0xff] }
  0xe6   :  { %2132 = vmatmul.f32.vlgmr.msrb.gmra.mxu3 %v6858_v1  ;;  %2216 = vmatpush.msrb.mxu0 %v1718_v13  ;;  %v1111_v1 = vld [vmem:[#allocation3 + $0x1c38] sm:$0xff]  ;;  %v696_v13 = vld [vmem:[#allocation3 + $0xf40] sm:$0xff] }
  0xe7   :  { %2236 = vmatpush.msrb.mxu1 %v695_v14  ;;  %2256 = vmatpush.msrb.mxu2 %v1207_v15  ;;  %v1367_v57 = vld [vmem:[#allocation3 + $0x2438] sm:$0xff]  ;;  %v1208_v14 = vld [vmem:[#allocation3 + $0x1f40] sm:$0xff] }
  0xe8   :  { %2276 = vmatpush.msrb.mxu3 %v1719_v16  ;;  %2217 = vmatpush.msrb.mxu0 %v1686_v17  ;;  %v311_v59 = vld [vmem:[#allocation3 + $0x338] sm:$0xff]  ;;  %v1720_v15 = vld [vmem:[#allocation3 + $0x2f40] sm:$0xff]  ;;  %v697_v16 = vld [vmem:[#allocation3 + $0xf48] sm:$0xff] }
  0xe9   :  { %2237 = vmatpush.msrb.mxu1 %v663_v18  ;;  %2257 = vmatpush.msrb.mxu2 %v1175_v19  ;;  %v823_v60 = vld [vmem:[#allocation3 + $0x1338] sm:$0xff]  ;;  %v6897_v18 = vld [vmem:[%s7538_s0 + $0x8] sm:$0xff] }
  0xea   :  { %2277 = vmatpush.msrb.mxu3 %v1687_v20  ;;  %2218 = vmatpush.msrb.mxu0 %v1654_v21  ;;  %v1335_v61 = vld [vmem:[#allocation3 + $0x2338] sm:$0xff]  ;;  %v664_v19 = vld [vmem:[#allocation3 + $0xe40] sm:$0xff] }
  0xeb   :  { %2238 = vmatpush.msrb.mxu1 %v631_v22  ;;  %2258 = vmatpush.msrb.mxu2 %v1143_v23  ;;  %v279_v63 = vld [vmem:[#allocation3 + $0x238] sm:$0xff]  ;;  %v1176_v20 = vld [vmem:[#allocation3 + $0x1e40] sm:$0xff]  ;;  %v665_v22 = vld [vmem:[#allocation3 + $0xe48] sm:$0xff] }
  0xec   :  { %2278 = vmatpush.msrb.mxu3 %v1655_v24  ;;  %2219 = vmatpush.msrb.mxu0 %v1622_v25  ;;  %v791_v0 = vld [vmem:[#allocation3 + $0x1238] sm:$0xff]  ;;  %v1688_v21 = vld [vmem:[#allocation3 + $0x2e40] sm:$0xff] }
  0xed   :  { %2239 = vmatpush.msrb.mxu1 %v599_v26  ;;  %2259 = vmatpush.msrb.mxu2 %v1111_v1  ;;  %v1303_v4 = vld [vmem:[#allocation3 + $0x2238] sm:$0xff]  ;;  %v632_v23 = vld [vmem:[#allocation3 + $0xd40] sm:$0xff]  ;;  %v633_v26 = vld [vmem:[#allocation3 + $0xd48] sm:$0xff] }
  0xee   :  { %2279 = vmatpush.msrb.mxu3 %v1623_v27  ;;  %2220 = vmatpush.msrb.mxu0 %v1590_v28  ;;  %v247_v6 = vld [vmem:[#allocation3 + $0x138] sm:$0xff]  ;;  %v1144_v24 = vld [vmem:[#allocation3 + $0x1d40] sm:$0xff] }
  0xef   :  { %2240 = vmatpush.msrb.mxu1 %v567_v29  ;;  %2260 = vmatpush.msrb.mxu2 %v1079_v30  ;;  %v759_v7 = vld [vmem:[#allocation3 + $0x1138] sm:$0xff]  ;;  %v1656_v25 = vld [vmem:[#allocation3 + $0x2d40] sm:$0xff]  ;;  %v601_v29 = vld [vmem:[#allocation3 + $0xc48] sm:$0xff] }
  0xf0   :  { %2280 = vmatpush.msrb.mxu3 %v1591_v31  ;;  %2152 = vmatmul.f32.vlgmr.msra.gmra.mxu0 %v6863_v2  ;;  %v439_v2 = vld [vmem:[#allocation3 + $0x738] sm:$0xff]  ;;  %v600_v1 = vld [vmem:[#allocation3 + $0xc40] sm:$0xff] }
  0xf1   :  { %2241 = vmatpush.msrb.mxu1 %v535_v32  ;;  %2221 = vmatpush.msrb.mxu0 %v1558_v33  ;;  %v1271_v8 = vld [vmem:[#allocation3 + $0x2138] sm:$0xff]  ;;  %v1112_v27 = vld [vmem:[#allocation3 + $0x1c40] sm:$0xff]  ;;  %v569_v33 = vld [vmem:[#allocation3 + $0xb48] sm:$0xff] }
  0xf2   :  { %2261 = vmatpush.msrb.mxu2 %v1047_v34  ;;  %2281 = vmatpush.msrb.mxu3 %v1559_v35  ;;  %v215_v10 = vld [vmem:[#allocation3 + $0x38] sm:$0xff]  ;;  %v1624_v28 = vld [vmem:[#allocation3 + $0x2c40] sm:$0xff] }
  0xf3   :  { %2172 = vmatmul.f32.vlgmr.msra.gmra.mxu1 %v6868_v3  ;;  %2222 = vmatpush.msrb.mxu0 %v1526_v36  ;;  %v919_v3 = vld [vmem:[#allocation3 + $0x1638] sm:$0xff]  ;;  %v568_v30 = vld [vmem:[#allocation3 + $0xb40] sm:$0xff] }
  0xf4   :  { %2242 = vmatpush.msrb.mxu1 %v503_v37  ;;  %2262 = vmatpush.msrb.mxu2 %v1015_v38  ;;  %v727_v11 = vld [vmem:[#allocation3 + $0x1038] sm:$0xff]  ;;  %v1080_v31 = vld [vmem:[#allocation3 + $0x1b40] sm:$0xff]  ;;  %v537_v37 = vld [vmem:[#allocation3 + $0xa48] sm:$0xff] }
  0xf5   :  { %2282 = vmatpush.msrb.mxu3 %v1527_v39  ;;  %2223 = vmatpush.msrb.mxu0 %v1494_v40  ;;  %v1239_v12 = vld [vmem:[#allocation3 + $0x2038] sm:$0xff]  ;;  %v1592_v32 = vld [vmem:[#allocation3 + $0x2b40] sm:$0xff]  ;;  %v6903_v39 = vld [vmem:[%s7538_s0 + $0x10] sm:$0xff] }
  0xf6   :  { %2243 = vmatpush.msrb.mxu1 %v471_v41  ;;  %2263 = vmatpush.msrb.mxu2 %v983_v42  ;;  %v6891_v17 = vld [vmem:[%s7538_s0] sm:$0xff]  ;;  %v505_v42 = vld [vmem:[#allocation3 + $0x948] sm:$0xff] }
  0xf7   :  { %2283 = vmatpush.msrb.mxu3 %v1495_v43  ;;  %2224 = vmatpush.msrb.mxu0 %v1462_v44  ;;  %v1048_v34 = vld [vmem:[#allocation3 + $0x1a40] sm:$0xff] }
  0xf8   :  { %2244 = vmatpush.msrb.mxu1 %v439_v2  ;;  %2264 = vmatpush.msrb.mxu2 %v951_v45  ;;  %v536_v35 = vld [vmem:[#allocation3 + $0xa40] sm:$0xff]  ;;  %v473_v45 = vld [vmem:[#allocation3 + $0x848] sm:$0xff] }
  0xf9   :  { %2284 = vmatpush.msrb.mxu3 %v1463_v46  ;;  %2225 = vmatpush.msrb.mxu0 %v1430_v47  ;;  %v1560_v36 = vld [vmem:[#allocation3 + $0x2a40] sm:$0xff] }
  0xfa   :  { %2245 = vmatpush.msrb.mxu1 %v407_v48  ;;  %2265 = vmatpush.msrb.mxu2 %v919_v3  ;;  %v1016_v38 = vld [vmem:[#allocation3 + $0x1940] sm:$0xff]  ;;  %v441_v3 = vld [vmem:[#allocation3 + $0x748] sm:$0xff] }
  0xfb   :  { %2285 = vmatpush.msrb.mxu3 %v1431_v49  ;;  %2226 = vmatpush.msrb.mxu0 %v1398_v50  ;;  %v504_v40 = vld [vmem:[#allocation3 + $0x940] sm:$0xff] }
  0xfc   :  { %2246 = vmatpush.msrb.mxu1 %v375_v51  ;;  %2266 = vmatpush.msrb.mxu2 %v887_v52  ;;  %v1528_v41 = vld [vmem:[#allocation3 + $0x2940] sm:$0xff]  ;;  %v409_v52 = vld [vmem:[#allocation3 + $0x648] sm:$0xff] }
  0xfd   :  { %2286 = vmatpush.msrb.mxu3 %v1399_v53  ;;  %2227 = vmatpush.msrb.mxu0 %v1366_v54  ;;  %v984_v43 = vld [vmem:[#allocation3 + $0x1840] sm:$0xff] }
  0xfe   :  { %2247 = vmatpush.msrb.mxu1 %v343_v55  ;;  %2267 = vmatpush.msrb.mxu2 %v855_v56  ;;  %v472_v44 = vld [vmem:[#allocation3 + $0x840] sm:$0xff]  ;;  %v377_v56 = vld [vmem:[#allocation3 + $0x548] sm:$0xff] }
  0xff   :  { %2287 = vmatpush.msrb.mxu3 %v1367_v57  ;;  %2228 = vmatpush.msrb.mxu0 %v1334_v58  ;;  %v1496_v2 = vld [vmem:[#allocation3 + $0x2840] sm:$0xff] }
 0x100   :  { %2248 = vmatpush.msrb.mxu1 %v311_v59  ;;  %2268 = vmatpush.msrb.mxu2 %v823_v60  ;;  %v952_v46 = vld [vmem:[#allocation3 + $0x1740] sm:$0xff]  ;;  %v345_v60 = vld [vmem:[#allocation3 + $0x448] sm:$0xff] }
 0x101   :  { %2288 = vmatpush.msrb.mxu3 %v1335_v61  ;;  %2229 = vmatpush.msrb.mxu0 %v1302_v62  ;;  %v440_v47 = vld [vmem:[#allocation3 + $0x740] sm:$0xff] }
 0x102   :  { %2249 = vmatpush.msrb.mxu1 %v279_v63  ;;  %2269 = vmatpush.msrb.mxu2 %v791_v0  ;;  %v1464_v48 = vld [vmem:[#allocation3 + $0x2740] sm:$0xff]  ;;  %v313_v0 = vld [vmem:[#allocation3 + $0x348] sm:$0xff] }
 0x103   :  { %2289 = vmatpush.msrb.mxu3 %v1303_v4  ;;  %2230 = vmatpush.msrb.mxu0 %v1270_v5  ;;  %v920_v49 = vld [vmem:[#allocation3 + $0x1640] sm:$0xff] }
 0x104   :  { %2250 = vmatpush.msrb.mxu1 %v247_v6  ;;  %2270 = vmatpush.msrb.mxu2 %v759_v7  ;;  %v408_v50 = vld [vmem:[#allocation3 + $0x640] sm:$0xff]  ;;  %v281_v7 = vld [vmem:[#allocation3 + $0x248] sm:$0xff] }
 0x105   :  { %2290 = vmatpush.msrb.mxu3 %v1271_v8  ;;  %2231 = vmatpush.msrb.mxu0 %v1238_v9  ;;  %v1432_v51 = vld [vmem:[#allocation3 + $0x2640] sm:$0xff] }
 0x106   :  { %2251 = vmatpush.msrb.mxu1 %v215_v10  ;;  %2271 = vmatpush.msrb.mxu2 %v727_v11  ;;  %v888_v53 = vld [vmem:[#allocation3 + $0x1540] sm:$0xff]  ;;  %v249_v11 = vld [vmem:[#allocation3 + $0x148] sm:$0xff] }
 0x107   :  { %2291 = vmatpush.msrb.mxu3 %v1239_v12  ;;  %2192 = vmatmul.f32.vlgmr.msra.gmra.mxu2 %v6891_v17  ;;  %v376_v54 = vld [vmem:[#allocation3 + $0x540] sm:$0xff] }
 0x108   :  { %2212 = vmatmul.f32.vlgmr.msra.gmra.mxu3 %v6897_v18  ;;  %2296 = vmatpush.msra.mxu0 %v696_v13  ;;  %v1400_v55 = vld [vmem:[#allocation3 + $0x2540] sm:$0xff] }
 0x109   :  { %2316 = vmatpush.msra.mxu1 %v1208_v14  ;;  %2336 = vmatpush.msra.mxu2 %v1720_v15  ;;  %v856_v57 = vld [vmem:[#allocation3 + $0x1440] sm:$0xff]  ;;  %v217_v15 = vld [vmem:[#allocation3 + $0x48] sm:$0xff] }
 0x10a   :  { %2356 = vmatpush.msra.mxu3 %v697_v16  ;;  %2297 = vmatpush.msra.mxu0 %v664_v19  ;;  %v344_v58 = vld [vmem:[#allocation3 + $0x440] sm:$0xff]  ;;  %v1209_v16 = vld [vmem:[#allocation3 + $0x1f48] sm:$0xff] }
 0x10b   :  { %2317 = vmatpush.msra.mxu1 %v1176_v20  ;;  %2337 = vmatpush.msra.mxu2 %v1688_v21  ;;  %v1368_v59 = vld [vmem:[#allocation3 + $0x2440] sm:$0xff]  ;;  %v1721_v19 = vld [vmem:[#allocation3 + $0x2f48] sm:$0xff]  ;;  %v698_v20 = vld [vmem:[#allocation3 + $0xf50] sm:$0xff] }
 0x10c   :  { %2357 = vmatpush.msra.mxu3 %v665_v22  ;;  %2298 = vmatpush.msra.mxu0 %v632_v23  ;;  %v312_v61 = vld [vmem:[#allocation3 + $0x340] sm:$0xff]  ;;  %v1210_v21 = vld [vmem:[#allocation3 + $0x1f50] sm:$0xff]  ;;  %v1177_v22 = vld [vmem:[#allocation3 + $0x1e48] sm:$0xff] }
 0x10d   :  { %2318 = vmatpush.msra.mxu1 %v1144_v24  ;;  %2338 = vmatpush.msra.mxu2 %v1656_v25  ;;  %v824_v62 = vld [vmem:[#allocation3 + $0x1340] sm:$0xff]  ;;  %v1689_v23 = vld [vmem:[#allocation3 + $0x2e48] sm:$0xff]  ;;  %v666_v24 = vld [vmem:[#allocation3 + $0xe50] sm:$0xff] }
 0x10e   :  { %2358 = vmatpush.msra.mxu3 %v633_v26  ;;  %2299 = vmatpush.msra.mxu0 %v600_v1  ;;  %v1336_v63 = vld [vmem:[#allocation3 + $0x2340] sm:$0xff]  ;;  %v1178_v25 = vld [vmem:[#allocation3 + $0x1e50] sm:$0xff]  ;;  %v1145_v26 = vld [vmem:[#allocation3 + $0x1d48] sm:$0xff] }
 0x10f   :  { %2319 = vmatpush.msra.mxu1 %v1112_v27  ;;  %2339 = vmatpush.msra.mxu2 %v1624_v28  ;;  %v280_v4 = vld [vmem:[#allocation3 + $0x240] sm:$0xff]  ;;  %v1657_v1 = vld [vmem:[#allocation3 + $0x2d48] sm:$0xff]  ;;  %v634_v27 = vld [vmem:[#allocation3 + $0xd50] sm:$0xff] }
 0x110   :  { %2359 = vmatpush.msra.mxu3 %v601_v29  ;;  %2300 = vmatpush.msra.mxu0 %v568_v30  ;;  %v792_v5 = vld [vmem:[#allocation3 + $0x1240] sm:$0xff]  ;;  %v1146_v28 = vld [vmem:[#allocation3 + $0x1d50] sm:$0xff]  ;;  %v1113_v29 = vld [vmem:[#allocation3 + $0x1c48] sm:$0xff] }
 0x111   :  { %2320 = vmatpush.msra.mxu1 %v1080_v31  ;;  %2340 = vmatpush.msra.mxu2 %v1592_v32  ;;  %v1304_v6 = vld [vmem:[#allocation3 + $0x2240] sm:$0xff]  ;;  %v1625_v30 = vld [vmem:[#allocation3 + $0x2c48] sm:$0xff]  ;;  %v602_v31 = vld [vmem:[#allocation3 + $0xc50] sm:$0xff] }
 0x112   :  { %2360 = vmatpush.msra.mxu3 %v569_v33  ;;  %2232 = vmatmul.f32.vlgmr.msrb.gmra.mxu0 %v6903_v39  ;;  %v248_v8 = vld [vmem:[#allocation3 + $0x140] sm:$0xff]  ;;  %v1114_v32 = vld [vmem:[#allocation3 + $0x1c50] sm:$0xff]  ;;  %v1081_v33 = vld [vmem:[#allocation3 + $0x1b48] sm:$0xff] }
 0x113   :  { %2321 = vmatpush.msra.mxu1 %v1048_v34  ;;  %2301 = vmatpush.msra.mxu0 %v536_v35  ;;  %v760_v9 = vld [vmem:[#allocation3 + $0x1140] sm:$0xff]  ;;  %v1593_v34 = vld [vmem:[#allocation3 + $0x2b48] sm:$0xff]  ;;  %v570_v35 = vld [vmem:[#allocation3 + $0xb50] sm:$0xff] }
 0x114   :  { %2341 = vmatpush.msra.mxu2 %v1560_v36  ;;  %2361 = vmatpush.msra.mxu3 %v537_v37  ;;  %v1272_v10 = vld [vmem:[#allocation3 + $0x2140] sm:$0xff]  ;;  %v1082_v36 = vld [vmem:[#allocation3 + $0x1b50] sm:$0xff]  ;;  %v1049_v37 = vld [vmem:[#allocation3 + $0x1a48] sm:$0xff] }
 0x115   :  { %2322 = vmatpush.msra.mxu1 %v1016_v38  ;;  %2302 = vmatpush.msra.mxu0 %v504_v40  ;;  %v216_v12 = vld [vmem:[#allocation3 + $0x40] sm:$0xff]  ;;  %v1561_v38 = vld [vmem:[#allocation3 + $0x2a48] sm:$0xff]  ;;  %v538_v40 = vld [vmem:[#allocation3 + $0xa50] sm:$0xff] }
 0x116   :  { %2342 = vmatpush.msra.mxu2 %v1528_v41  ;;  %2362 = vmatpush.msra.mxu3 %v505_v42  ;;  %v728_v13 = vld [vmem:[#allocation3 + $0x1040] sm:$0xff]  ;;  %v1050_v41 = vld [vmem:[#allocation3 + $0x1a50] sm:$0xff]  ;;  %v1017_v42 = vld [vmem:[#allocation3 + $0x1948] sm:$0xff] }
 0x117   :  { %2323 = vmatpush.msra.mxu1 %v984_v43  ;;  %2303 = vmatpush.msra.mxu0 %v472_v44  ;;  %v1240_v14 = vld [vmem:[#allocation3 + $0x2040] sm:$0xff]  ;;  %v1529_v43 = vld [vmem:[#allocation3 + $0x2948] sm:$0xff]  ;;  %v506_v44 = vld [vmem:[#allocation3 + $0x950] sm:$0xff] }
 0x118   :  { %2343 = vmatpush.msra.mxu2 %v1496_v2  ;;  %2363 = vmatpush.msra.mxu3 %v473_v45  ;;  %v1018_v2 = vld [vmem:[#allocation3 + $0x1950] sm:$0xff]  ;;  %v985_v45 = vld [vmem:[#allocation3 + $0x1848] sm:$0xff] }
 0x119   :  { %2324 = vmatpush.msra.mxu1 %v952_v46  ;;  %2304 = vmatpush.msra.mxu0 %v440_v47  ;;  %v1497_v46 = vld [vmem:[#allocation3 + $0x2848] sm:$0xff]  ;;  %v474_v47 = vld [vmem:[#allocation3 + $0x850] sm:$0xff] }
 0x11a   :  { %2344 = vmatpush.msra.mxu2 %v1464_v48  ;;  %2364 = vmatpush.msra.mxu3 %v441_v3  ;;  %v986_v48 = vld [vmem:[#allocation3 + $0x1850] sm:$0xff]  ;;  %v953_v3 = vld [vmem:[#allocation3 + $0x1748] sm:$0xff] }
 0x11b   :  { %2325 = vmatpush.msra.mxu1 %v920_v49  ;;  %2305 = vmatpush.msra.mxu0 %v408_v50  ;;  %v1465_v49 = vld [vmem:[#allocation3 + $0x2748] sm:$0xff]  ;;  %v442_v50 = vld [vmem:[#allocation3 + $0x750] sm:$0xff] }
 0x11c   :  { %2345 = vmatpush.msra.mxu2 %v1432_v51  ;;  %2365 = vmatpush.msra.mxu3 %v409_v52  ;;  %v954_v51 = vld [vmem:[#allocation3 + $0x1750] sm:$0xff]  ;;  %v921_v52 = vld [vmem:[#allocation3 + $0x1648] sm:$0xff] }
 0x11d   :  { %2326 = vmatpush.msra.mxu1 %v888_v53  ;;  %2306 = vmatpush.msra.mxu0 %v376_v54  ;;  %v1433_v53 = vld [vmem:[#allocation3 + $0x2648] sm:$0xff]  ;;  %v410_v54 = vld [vmem:[#allocation3 + $0x650] sm:$0xff] }
 0x11e   :  { %2346 = vmatpush.msra.mxu2 %v1400_v55  ;;  %2366 = vmatpush.msra.mxu3 %v377_v56  ;;  %v922_v55 = vld [vmem:[#allocation3 + $0x1650] sm:$0xff]  ;;  %v889_v56 = vld [vmem:[#allocation3 + $0x1548] sm:$0xff] }
 0x11f   :  { %2327 = vmatpush.msra.mxu1 %v856_v57  ;;  %2307 = vmatpush.msra.mxu0 %v344_v58  ;;  %v1401_v57 = vld [vmem:[#allocation3 + $0x2548] sm:$0xff]  ;;  %v378_v58 = vld [vmem:[#allocation3 + $0x550] sm:$0xff] }
 0x120   :  { %2347 = vmatpush.msra.mxu2 %v1368_v59  ;;  %2367 = vmatpush.msra.mxu3 %v345_v60  ;;  %v890_v59 = vld [vmem:[#allocation3 + $0x1550] sm:$0xff]  ;;  %v857_v60 = vld [vmem:[#allocation3 + $0x1448] sm:$0xff] }
 0x121   :  { %2272 = vmatmul.f32.vlgmr.msrb.gmra.mxu2 %v6897_v18  ;;  %2308 = vmatpush.msra.mxu0 %v312_v61  ;;  %v1369_v61 = vld [vmem:[#allocation3 + $0x2448] sm:$0xff] }
 0x122   :  { %2328 = vmatpush.msra.mxu1 %v824_v62  ;;  %2348 = vmatpush.msra.mxu2 %v1336_v63  ;;  %v346_v62 = vld [vmem:[#allocation3 + $0x450] sm:$0xff] }
 0x123   :  { %2368 = vmatpush.msra.mxu3 %v313_v0  ;;  %2309 = vmatpush.msra.mxu0 %v280_v4  ;;  %v858_v63 = vld [vmem:[#allocation3 + $0x1450] sm:$0xff]  ;;  %v825_v0 = vld [vmem:[#allocation3 + $0x1348] sm:$0xff] }
 0x124   :  { %2329 = vmatpush.msra.mxu1 %v792_v5  ;;  %2349 = vmatpush.msra.mxu2 %v1304_v6  ;;  %v1337_v4 = vld [vmem:[#allocation3 + $0x2348] sm:$0xff]  ;;  %v314_v5 = vld [vmem:[#allocation3 + $0x350] sm:$0xff] }
 0x125   :  { %2369 = vmatpush.msra.mxu3 %v281_v7  ;;  %2252 = vmatmul.f32.vlgmr.msrb.gmra.mxu1 %v6891_v17  ;;  %v826_v6 = vld [vmem:[#allocation3 + $0x1350] sm:$0xff]  ;;  %v793_v7 = vld [vmem:[#allocation3 + $0x1248] sm:$0xff] }
 0x126   :  { %2310 = vmatpush.msra.mxu0 %v248_v8  ;;  %2330 = vmatpush.msra.mxu1 %v760_v9  ;;  %v1305_v8 = vld [vmem:[#allocation3 + $0x2248] sm:$0xff]  ;;  %v282_v9 = vld [vmem:[#allocation3 + $0x250] sm:$0xff] }
 0x127   :  { %2350 = vmatpush.msra.mxu2 %v1272_v10  ;;  %2370 = vmatpush.msra.mxu3 %v249_v11  ;;  %v794_v10 = vld [vmem:[#allocation3 + $0x1250] sm:$0xff]  ;;  %v761_v11 = vld [vmem:[#allocation3 + $0x1148] sm:$0xff] }
 0x128   :  { %2311 = vmatpush.msra.mxu0 %v216_v12  ;;  %2331 = vmatpush.msra.mxu1 %v728_v13  ;;  %v1273_v12 = vld [vmem:[#allocation3 + $0x2148] sm:$0xff]  ;;  %v250_v13 = vld [vmem:[#allocation3 + $0x150] sm:$0xff] }
 0x129   :  { %2351 = vmatpush.msra.mxu2 %v1240_v14  ;;  %2371 = vmatpush.msra.mxu3 %v217_v15  ;;  %v762_v14 = vld [vmem:[#allocation3 + $0x1150] sm:$0xff]  ;;  %v729_v15 = vld [vmem:[#allocation3 + $0x1048] sm:$0xff] }
 0x12a   :  { %2352 = vmatmul.f32.vlgmr.msra.gmra.mxu2 %v6903_v39  ;;  %2292 = vmatmul.f32.vlgmr.msrb.gmra.mxu3 %v6903_v39 }
 0x12b   :  { %2376 = vmatpush.msrb.mxu0 %v1209_v16  ;;  %2396 = vmatpush.msrb.mxu1 %v1721_v19  ;;  %v1241_v16 = vld [vmem:[#allocation3 + $0x2048] sm:$0xff]  ;;  %v218_v19 = vld [vmem:[#allocation3 + $0x50] sm:$0xff] }
 0x12c   :  { %2416 = vmatpush.msrb.mxu2 %v698_v20  ;;  %2436 = vmatpush.msrb.mxu3 %v1210_v21  ;;  %v730_v20 = vld [vmem:[#allocation3 + $0x1050] sm:$0xff]  ;;  %v699_v21 = vld [vmem:[#allocation3 + $0xf58] sm:$0xff] }
 0x12d   :  { %2312 = vmatmul.f32.vlgmr.msra.gmra.mxu0 %v6891_v17  ;;  %2397 = vmatpush.msrb.mxu1 %v1689_v23  ;;  %v1211_v23 = vld [vmem:[#allocation3 + $0x1f58] sm:$0xff] }
 0x12e   :  { %2377 = vmatpush.msrb.mxu0 %v1177_v22  ;;  %2417 = vmatpush.msrb.mxu2 %v666_v24  ;;  %v1722_v22 = vld [vmem:[#allocation3 + $0x2f50] sm:$0xff]  ;;  %v1723_v24 = vld [vmem:[#allocation3 + $0x2f58] sm:$0xff] }
 0x12f   :  { %2437 = vmatpush.msrb.mxu3 %v1178_v25  ;;  %2332 = vmatmul.f32.vlgmr.msra.gmra.mxu1 %v6897_v18  ;;  %v1690_v25 = vld [vmem:[#allocation3 + $0x2e50] sm:$0xff] }
 0x130   :  { %2378 = vmatpush.msrb.mxu0 %v1145_v26  ;;  %2398 = vmatpush.msrb.mxu1 %v1657_v1  ;;  %v667_v26 = vld [vmem:[#allocation3 + $0xe58] sm:$0xff] }
 0x131   :  { %2418 = vmatpush.msrb.mxu2 %v634_v27  ;;  %2438 = vmatpush.msrb.mxu3 %v1146_v28  ;;  %v1179_v1 = vld [vmem:[#allocation3 + $0x1e58] sm:$0xff]  ;;  %v1658_v28 = vld [vmem:[#allocation3 + $0x2d50] sm:$0xff] }
 0x132   :  { %2379 = vmatpush.msrb.mxu0 %v1113_v29  ;;  %2399 = vmatpush.msrb.mxu1 %v1625_v30  ;;  %v1691_v27 = vld [vmem:[#allocation3 + $0x2e58] sm:$0xff] }
 0x133   :  { %2419 = vmatpush.msrb.mxu2 %v602_v31  ;;  %2439 = vmatpush.msrb.mxu3 %v1114_v32  ;;  %v635_v29 = vld [vmem:[#allocation3 + $0xd58] sm:$0xff]  ;;  %v1626_v32 = vld [vmem:[#allocation3 + $0x2c50] sm:$0xff] }
 0x134   :  { %2380 = vmatpush.msrb.mxu0 %v1081_v33  ;;  %2400 = vmatpush.msrb.mxu1 %v1593_v34  ;;  %v1147_v30 = vld [vmem:[#allocation3 + $0x1d58] sm:$0xff] }
 0x135   :  { %2420 = vmatpush.msrb.mxu2 %v570_v35  ;;  %2440 = vmatpush.msrb.mxu3 %v1082_v36  ;;  %v1659_v31 = vld [vmem:[#allocation3 + $0x2d58] sm:$0xff]  ;;  %v1594_v36 = vld [vmem:[#allocation3 + $0x2b50] sm:$0xff] }
 0x136   :  { %2381 = vmatpush.msrb.mxu0 %v1049_v37  ;;  %2401 = vmatpush.msrb.mxu1 %v1561_v38  ;;  %v603_v33 = vld [vmem:[#allocation3 + $0xc58] sm:$0xff] }
 0x137   :  { %2421 = vmatpush.msrb.mxu2 %v538_v40  ;;  %2441 = vmatpush.msrb.mxu3 %v1050_v41  ;;  %v1115_v34 = vld [vmem:[#allocation3 + $0x1c58] sm:$0xff]  ;;  %v1562_v41 = vld [vmem:[#allocation3 + $0x2a50] sm:$0xff] }
 0x138   :  { %2382 = vmatpush.msrb.mxu0 %v1017_v42  ;;  %2402 = vmatpush.msrb.mxu1 %v1529_v43  ;;  %v1627_v35 = vld [vmem:[#allocation3 + $0x2c58] sm:$0xff] }
 0x139   :  { %2422 = vmatpush.msrb.mxu2 %v506_v44  ;;  %2442 = vmatpush.msrb.mxu3 %v1018_v2  ;;  %v571_v37 = vld [vmem:[#allocation3 + $0xb58] sm:$0xff]  ;;  %v1530_v2 = vld [vmem:[#allocation3 + $0x2950] sm:$0xff] }
 0x13a   :  { %2383 = vmatpush.msrb.mxu0 %v985_v45  ;;  %2403 = vmatpush.msrb.mxu1 %v1497_v46  ;;  %v1083_v38 = vld [vmem:[#allocation3 + $0x1b58] sm:$0xff] }
 0x13b   :  { %2423 = vmatpush.msrb.mxu2 %v474_v47  ;;  %2443 = vmatpush.msrb.mxu3 %v986_v48  ;;  %v1595_v40 = vld [vmem:[#allocation3 + $0x2b58] sm:$0xff]  ;;  %v1498_v48 = vld [vmem:[#allocation3 + $0x2850] sm:$0xff] }
 0x13c   :  { %2384 = vmatpush.msrb.mxu0 %v953_v3  ;;  %2404 = vmatpush.msrb.mxu1 %v1465_v49  ;;  %v539_v42 = vld [vmem:[#allocation3 + $0xa58] sm:$0xff] }
 0x13d   :  { %2424 = vmatpush.msrb.mxu2 %v442_v50  ;;  %2444 = vmatpush.msrb.mxu3 %v954_v51  ;;  %v1051_v43 = vld [vmem:[#allocation3 + $0x1a58] sm:$0xff]  ;;  %v1466_v51 = vld [vmem:[#allocation3 + $0x2750] sm:$0xff] }
 0x13e   :  { %2385 = vmatpush.msrb.mxu0 %v921_v52  ;;  %2405 = vmatpush.msrb.mxu1 %v1433_v53  ;;  %v1563_v44 = vld [vmem:[#allocation3 + $0x2a58] sm:$0xff] }
 0x13f   :  { %2425 = vmatpush.msrb.mxu2 %v410_v54  ;;  %2445 = vmatpush.msrb.mxu3 %v922_v55  ;;  %v507_v45 = vld [vmem:[#allocation3 + $0x958] sm:$0xff]  ;;  %v1434_v55 = vld [vmem:[#allocation3 + $0x2650] sm:$0xff] }
 0x140   :  { %2386 = vmatpush.msrb.mxu0 %v889_v56  ;;  %2406 = vmatpush.msrb.mxu1 %v1401_v57  ;;  %v1019_v46 = vld [vmem:[#allocation3 + $0x1958] sm:$0xff] }
 0x141   :  { %2426 = vmatpush.msrb.mxu2 %v378_v58  ;;  %2446 = vmatpush.msrb.mxu3 %v890_v59  ;;  %v1531_v47 = vld [vmem:[#allocation3 + $0x2958] sm:$0xff]  ;;  %v1402_v59 = vld [vmem:[#allocation3 + $0x2550] sm:$0xff] }
 0x142   :  { %2387 = vmatpush.msrb.mxu0 %v857_v60  ;;  %2407 = vmatpush.msrb.mxu1 %v1369_v61  ;;  %v475_v3 = vld [vmem:[#allocation3 + $0x858] sm:$0xff] }
 0x143   :  { %2427 = vmatpush.msrb.mxu2 %v346_v62  ;;  %2447 = vmatpush.msrb.mxu3 %v858_v63  ;;  %v987_v49 = vld [vmem:[#allocation3 + $0x1858] sm:$0xff]  ;;  %v1370_v63 = vld [vmem:[#allocation3 + $0x2450] sm:$0xff] }
 0x144   :  { %2388 = vmatpush.msrb.mxu0 %v825_v0  ;;  %2372 = vmatmul.f32.vlgmr.msra.gmra.mxu3 %v6891_v17  ;;  %v1499_v50 = vld [vmem:[#allocation3 + $0x2858] sm:$0xff] }
 0x145   :  { %2408 = vmatpush.msrb.mxu1 %v1337_v4  ;;  %2428 = vmatpush.msrb.mxu2 %v314_v5  ;;  %v443_v52 = vld [vmem:[#allocation3 + $0x758] sm:$0xff] }
 0x146   :  { %2448 = vmatpush.msrb.mxu3 %v826_v6  ;;  %2389 = vmatpush.msrb.mxu0 %v793_v7  ;;  %v955_v53 = vld [vmem:[#allocation3 + $0x1758] sm:$0xff]  ;;  %v1338_v6 = vld [vmem:[#allocation3 + $0x2350] sm:$0xff] }
 0x147   :  { %2409 = vmatpush.msrb.mxu1 %v1305_v8  ;;  %2429 = vmatpush.msrb.mxu2 %v282_v9  ;;  %v1467_v54 = vld [vmem:[#allocation3 + $0x2758] sm:$0xff] }
 0x148   :  { %2449 = vmatpush.msrb.mxu3 %v794_v10  ;;  %2390 = vmatpush.msrb.mxu0 %v761_v11  ;;  %v411_v56 = vld [vmem:[#allocation3 + $0x658] sm:$0xff]  ;;  %v1306_v10 = vld [vmem:[#allocation3 + $0x2250] sm:$0xff] }
 0x149   :  { %2410 = vmatpush.msrb.mxu1 %v1273_v12  ;;  %2430 = vmatpush.msrb.mxu2 %v250_v13  ;;  %v923_v57 = vld [vmem:[#allocation3 + $0x1658] sm:$0xff] }
 0x14a   :  { %2450 = vmatpush.msrb.mxu3 %v762_v14  ;;  %2391 = vmatpush.msrb.mxu0 %v729_v15  ;;  %v1435_v58 = vld [vmem:[#allocation3 + $0x2658] sm:$0xff]  ;;  %v1274_v14 = vld [vmem:[#allocation3 + $0x2150] sm:$0xff] }
 0x14b   :  { %2411 = vmatpush.msrb.mxu1 %v1241_v16  ;;  %2431 = vmatpush.msrb.mxu2 %v218_v19  ;;  %v379_v60 = vld [vmem:[#allocation3 + $0x558] sm:$0xff] }
 0x14c   :  { %2451 = vmatpush.msrb.mxu3 %v730_v20  ;;  %2392 = vmatmul.f32.vlgmr.msrb.gmra.mxu0 %v6897_v18  ;;  %v891_v61 = vld [vmem:[#allocation3 + $0x1558] sm:$0xff]  ;;  %v1242_v20 = vld [vmem:[#allocation3 + $0x2050] sm:$0xff] }
 0x14d   :  { %2476 = vmatpush.msra.mxu1 %v699_v21  ;;  %2456 = vmatpush.msra.mxu0 %v1722_v22  ;;  %v1403_v62 = vld [vmem:[#allocation3 + $0x2558] sm:$0xff] }
 0x14e   :  { %2496 = vmatpush.msra.mxu2 %v1211_v23  ;;  %2516 = vmatpush.msra.mxu3 %v1723_v24  ;;  %v347_v0 = vld [vmem:[#allocation3 + $0x458] sm:$0xff]  ;;  %v700_v24 = vld [vmem:[#allocation3 + $0xf60] sm:$0xff] }
 0x14f   :  { %2412 = vmatmul.f32.vlgmr.msrb.gmra.mxu1 %v6903_v39  ;;  %2457 = vmatpush.msra.mxu0 %v1690_v25  ;;  %v859_v4 = vld [vmem:[#allocation3 + $0x1458] sm:$0xff]  ;;  %v1212_v25 = vld [vmem:[#allocation3 + $0x1f60] sm:$0xff] }
 0x150   :  { %2477 = vmatpush.msra.mxu1 %v667_v26  ;;  %2497 = vmatpush.msra.mxu2 %v1179_v1  ;;  %v1371_v5 = vld [vmem:[#allocation3 + $0x2458] sm:$0xff]  ;;  %v1724_v26 = vld [vmem:[#allocation3 + $0x2f60] sm:$0xff]  ;;  %v701_v1 = vld [vmem:[#allocation3 + $0xf68] sm:$0xff] }
 0x151   :  { %2517 = vmatpush.msra.mxu3 %v1691_v27  ;;  %2458 = vmatpush.msra.mxu0 %v1658_v28  ;;  %v315_v7 = vld [vmem:[#allocation3 + $0x358] sm:$0xff]  ;;  %v668_v27 = vld [vmem:[#allocation3 + $0xe60] sm:$0xff] }
 0x152   :  { %2478 = vmatpush.msra.mxu1 %v635_v29  ;;  %2498 = vmatpush.msra.mxu2 %v1147_v30  ;;  %v827_v8 = vld [vmem:[#allocation3 + $0x1358] sm:$0xff]  ;;  %v1180_v28 = vld [vmem:[#allocation3 + $0x1e60] sm:$0xff]  ;;  %v669_v30 = vld [vmem:[#allocation3 + $0xe68] sm:$0xff] }
 0x153   :  { %2518 = vmatpush.msra.mxu3 %v1659_v31  ;;  %2459 = vmatpush.msra.mxu0 %v1626_v32  ;;  %v1339_v9 = vld [vmem:[#allocation3 + $0x2358] sm:$0xff]  ;;  %v1692_v29 = vld [vmem:[#allocation3 + $0x2e60] sm:$0xff] }
 0x154   :  { %2479 = vmatpush.msra.mxu1 %v603_v33  ;;  %2499 = vmatpush.msra.mxu2 %v1115_v34  ;;  %v283_v11 = vld [vmem:[#allocation3 + $0x258] sm:$0xff]  ;;  %v636_v31 = vld [vmem:[#allocation3 + $0xd60] sm:$0xff]  ;;  %v637_v34 = vld [vmem:[#allocation3 + $0xd68] sm:$0xff] }
 0x155   :  { %2519 = vmatpush.msra.mxu3 %v1627_v35  ;;  %2460 = vmatpush.msra.mxu0 %v1594_v36  ;;  %v795_v12 = vld [vmem:[#allocation3 + $0x1258] sm:$0xff]  ;;  %v1148_v32 = vld [vmem:[#allocation3 + $0x1d60] sm:$0xff] }
 0x156   :  { %2480 = vmatpush.msra.mxu1 %v571_v37  ;;  %2500 = vmatpush.msra.mxu2 %v1083_v38  ;;  %v1307_v13 = vld [vmem:[#allocation3 + $0x2258] sm:$0xff]  ;;  %v1660_v33 = vld [vmem:[#allocation3 + $0x2d60] sm:$0xff]  ;;  %v605_v37 = vld [vmem:[#allocation3 + $0xc68] sm:$0xff] }
 0x157   :  { %2520 = vmatpush.msra.mxu3 %v1595_v40  ;;  %2461 = vmatpush.msra.mxu0 %v1562_v41  ;;  %v251_v15 = vld [vmem:[#allocation3 + $0x158] sm:$0xff]  ;;  %v1116_v35 = vld [vmem:[#allocation3 + $0x1c60] sm:$0xff] }
 0x158   :  { %2481 = vmatpush.msra.mxu1 %v539_v42  ;;  %2501 = vmatpush.msra.mxu2 %v1051_v43  ;;  %v763_v16 = vld [vmem:[#allocation3 + $0x1158] sm:$0xff]  ;;  %v1628_v36 = vld [vmem:[#allocation3 + $0x2c60] sm:$0xff]  ;;  %v573_v42 = vld [vmem:[#allocation3 + $0xb68] sm:$0xff] }
 0x159   :  { %2521 = vmatpush.msra.mxu3 %v1563_v44  ;;  %2462 = vmatpush.msra.mxu0 %v1530_v2  ;;  %v1275_v19 = vld [vmem:[#allocation3 + $0x2158] sm:$0xff]  ;;  %v572_v38 = vld [vmem:[#allocation3 + $0xb60] sm:$0xff]  ;;  %v541_v2 = vld [vmem:[#allocation3 + $0xa68] sm:$0xff] }
 0x15a   :  { %2482 = vmatpush.msra.mxu1 %v507_v45  ;;  %2502 = vmatpush.msra.mxu2 %v1019_v46  ;;  %v219_v21 = vld [vmem:[#allocation3 + $0x58] sm:$0xff]  ;;  %v1084_v40 = vld [vmem:[#allocation3 + $0x1b60] sm:$0xff] }
 0x15b   :  { %2522 = vmatpush.msra.mxu3 %v1531_v47  ;;  %2463 = vmatpush.msra.mxu0 %v1498_v48  ;;  %v731_v22 = vld [vmem:[#allocation3 + $0x1058] sm:$0xff]  ;;  %v1596_v41 = vld [vmem:[#allocation3 + $0x2b60] sm:$0xff]  ;;  %v509_v48 = vld [vmem:[#allocation3 + $0x968] sm:$0xff] }
 0x15c   :  { %2483 = vmatpush.msra.mxu1 %v475_v3  ;;  %2503 = vmatpush.msra.mxu2 %v987_v49  ;;  %v1243_v23 = vld [vmem:[#allocation3 + $0x2058] sm:$0xff]  ;;  %v540_v43 = vld [vmem:[#allocation3 + $0xa60] sm:$0xff] }
 0x15d   :  { %2523 = vmatpush.msra.mxu3 %v1499_v50  ;;  %2464 = vmatpush.msra.mxu0 %v1466_v51  ;;  %v1052_v44 = vld [vmem:[#allocation3 + $0x1a60] sm:$0xff]  ;;  %v477_v51 = vld [vmem:[#allocation3 + $0x868] sm:$0xff] }
 0x15e   :  { %2484 = vmatpush.msra.mxu1 %v443_v52  ;;  %2504 = vmatpush.msra.mxu2 %v955_v53  ;;  %v508_v45 = vld [vmem:[#allocation3 + $0x960] sm:$0xff] }
 0x15f   :  { %2524 = vmatpush.msra.mxu3 %v1467_v54  ;;  %2465 = vmatpush.msra.mxu0 %v1434_v55  ;;  %v1020_v46 = vld [vmem:[#allocation3 + $0x1960] sm:$0xff]  ;;  %v445_v55 = vld [vmem:[#allocation3 + $0x768] sm:$0xff] }
 0x160   :  { %2485 = vmatpush.msra.mxu1 %v411_v56  ;;  %2505 = vmatpush.msra.mxu2 %v923_v57  ;;  %v1532_v47 = vld [vmem:[#allocation3 + $0x2960] sm:$0xff] }
 0x161   :  { %2525 = vmatpush.msra.mxu3 %v1435_v58  ;;  %2466 = vmatpush.msra.mxu0 %v1402_v59  ;;  %v476_v3 = vld [vmem:[#allocation3 + $0x860] sm:$0xff]  ;;  %v413_v59 = vld [vmem:[#allocation3 + $0x668] sm:$0xff] }
 0x162   :  { %2486 = vmatpush.msra.mxu1 %v379_v60  ;;  %2506 = vmatpush.msra.mxu2 %v891_v61  ;;  %v988_v49 = vld [vmem:[#allocation3 + $0x1860] sm:$0xff] }
 0x163   :  { %2526 = vmatpush.msra.mxu3 %v1403_v62  ;;  %2432 = vmatmul.f32.vlgmr.msrb.gmra.mxu2 %v6891_v17  ;;  %v1500_v50 = vld [vmem:[#allocation3 + $0x2860] sm:$0xff] }
 0x164   :  { %2467 = vmatpush.msra.mxu0 %v1370_v63  ;;  %2487 = vmatpush.msra.mxu1 %v347_v0  ;;  %v444_v52 = vld [vmem:[#allocation3 + $0x760] sm:$0xff]  ;;  %v381_v63 = vld [vmem:[#allocation3 + $0x568] sm:$0xff] }
 0x165   :  { %2507 = vmatpush.msra.mxu2 %v859_v4  ;;  %2527 = vmatpush.msra.mxu3 %v1371_v5  ;;  %v956_v53 = vld [vmem:[#allocation3 + $0x1760] sm:$0xff] }
 0x166   :  { %2468 = vmatpush.msra.mxu0 %v1338_v6  ;;  %2452 = vmatmul.f32.vlgmr.msrb.gmra.mxu3 %v6897_v18  ;;  %v1468_v54 = vld [vmem:[#allocation3 + $0x2760] sm:$0xff]  ;;  %v349_v6 = vld [vmem:[#allocation3 + $0x468] sm:$0xff] }
 0x167   :  { %2488 = vmatpush.msra.mxu1 %v315_v7  ;;  %2508 = vmatpush.msra.mxu2 %v827_v8  ;;  %v412_v56 = vld [vmem:[#allocation3 + $0x660] sm:$0xff] }
 0x168   :  { %2528 = vmatpush.msra.mxu3 %v1339_v9  ;;  %2469 = vmatpush.msra.mxu0 %v1306_v10  ;;  %v924_v57 = vld [vmem:[#allocation3 + $0x1660] sm:$0xff]  ;;  %v317_v10 = vld [vmem:[#allocation3 + $0x368] sm:$0xff] }
 0x169   :  { %2489 = vmatpush.msra.mxu1 %v283_v11  ;;  %2509 = vmatpush.msra.mxu2 %v795_v12  ;;  %v1436_v58 = vld [vmem:[#allocation3 + $0x2660] sm:$0xff] }
 0x16a   :  { %2529 = vmatpush.msra.mxu3 %v1307_v13  ;;  %2470 = vmatpush.msra.mxu0 %v1274_v14  ;;  %v380_v60 = vld [vmem:[#allocation3 + $0x560] sm:$0xff]  ;;  %v285_v14 = vld [vmem:[#allocation3 + $0x268] sm:$0xff] }
 0x16b   :  { %2490 = vmatpush.msra.mxu1 %v251_v15  ;;  %2510 = vmatpush.msra.mxu2 %v763_v16  ;;  %v892_v61 = vld [vmem:[#allocation3 + $0x1560] sm:$0xff] }
 0x16c   :  { %2530 = vmatpush.msra.mxu3 %v1275_v19  ;;  %2471 = vmatpush.msra.mxu0 %v1242_v20  ;;  %v1404_v62 = vld [vmem:[#allocation3 + $0x2560] sm:$0xff]  ;;  %v253_v20 = vld [vmem:[#allocation3 + $0x168] sm:$0xff] }
 0x16d   :  { %2491 = vmatpush.msra.mxu1 %v219_v21  ;;  %2511 = vmatpush.msra.mxu2 %v731_v22  ;;  %v348_v0 = vld [vmem:[#allocation3 + $0x460] sm:$0xff] }
 0x16e   :  { %2531 = vmatpush.msra.mxu3 %v1243_v23  ;;  %2472 = vmatmul.f32.vlgmr.msra.gmra.mxu0 %v6903_v39  ;;  %v860_v4 = vld [vmem:[#allocation3 + $0x1460] sm:$0xff] }
 0x16f   :  { %2512 = vmatmul.f32.vlgmr.msra.gmra.mxu2 %v6897_v18  ;;  %2536 = vmatpush.msrb.mxu0 %v700_v24  ;;  %v604_v18 = vld [vmem:[#allocation3 + $0xc60] sm:$0xff]  ;;  %v221_v24 = vld [vmem:[#allocation3 + $0x68] sm:$0xff] }
 0x170   :  { %2556 = vmatpush.msrb.mxu1 %v1212_v25  ;;  %2576 = vmatpush.msrb.mxu2 %v1724_v26  ;;  %v1372_v5 = vld [vmem:[#allocation3 + $0x2460] sm:$0xff]  ;;  %v1213_v25 = vld [vmem:[#allocation3 + $0x1f68] sm:$0xff] }
 0x171   :  { %2596 = vmatpush.msrb.mxu3 %v701_v1  ;;  %2537 = vmatpush.msrb.mxu0 %v668_v27  ;;  %v316_v7 = vld [vmem:[#allocation3 + $0x360] sm:$0xff]  ;;  %v1725_v26 = vld [vmem:[#allocation3 + $0x2f68] sm:$0xff]  ;;  %v702_v1 = vld [vmem:[#allocation3 + $0xf70] sm:$0xff] }
 0x172   :  { %2532 = vmatmul.f32.vlgmr.msra.gmra.mxu3 %v6903_v39  ;;  %2557 = vmatpush.msrb.mxu1 %v1180_v28  ;;  %v828_v8 = vld [vmem:[#allocation3 + $0x1360] sm:$0xff]  ;;  %v1214_v27 = vld [vmem:[#allocation3 + $0x1f70] sm:$0xff]  ;;  %v1181_v28 = vld [vmem:[#allocation3 + $0x1e68] sm:$0xff] }
 0x173   :  { %2577 = vmatpush.msrb.mxu2 %v1692_v29  ;;  %2597 = vmatpush.msrb.mxu3 %v669_v30  ;;  %v1340_v9 = vld [vmem:[#allocation3 + $0x2360] sm:$0xff]  ;;  %v1693_v29 = vld [vmem:[#allocation3 + $0x2e68] sm:$0xff]  ;;  %v670_v30 = vld [vmem:[#allocation3 + $0xe70] sm:$0xff] }
 0x174   :  { %2492 = vmatmul.f32.vlgmr.msra.gmra.mxu1 %v6891_v17  ;;  %2538 = vmatpush.msrb.mxu0 %v636_v31  ;;  %v1564_v17 = vld [vmem:[#allocation3 + $0x2a60] sm:$0xff]  ;;  %v1182_v31 = vld [vmem:[#allocation3 + $0x1e70] sm:$0xff] }
 0x175   :  { %2558 = vmatpush.msrb.mxu1 %v1148_v32  ;;  %2578 = vmatpush.msrb.mxu2 %v1660_v33  ;;  %v284_v11 = vld [vmem:[#allocation3 + $0x260] sm:$0xff]  ;;  %v1149_v33 = vld [vmem:[#allocation3 + $0x1d68] sm:$0xff] }
 0x176   :  { %2598 = vmatpush.msrb.mxu3 %v637_v34  ;;  %2539 = vmatpush.msrb.mxu0 %v604_v18  ;;  %v796_v12 = vld [vmem:[#allocation3 + $0x1260] sm:$0xff]  ;;  %v1661_v34 = vld [vmem:[#allocation3 + $0x2d68] sm:$0xff]  ;;  %v1150_v18 = vld [vmem:[#allocation3 + $0x1d70] sm:$0xff] }
 0x177   :  { %2559 = vmatpush.msrb.mxu1 %v1116_v35  ;;  %2579 = vmatpush.msrb.mxu2 %v1628_v36  ;;  %v1308_v13 = vld [vmem:[#allocation3 + $0x2260] sm:$0xff]  ;;  %v1117_v35 = vld [vmem:[#allocation3 + $0x1c68] sm:$0xff] }
 0x178   :  { %2599 = vmatpush.msrb.mxu3 %v605_v37  ;;  %2540 = vmatpush.msrb.mxu0 %v572_v38  ;;  %v252_v15 = vld [vmem:[#allocation3 + $0x160] sm:$0xff]  ;;  %v1629_v37 = vld [vmem:[#allocation3 + $0x2c68] sm:$0xff]  ;;  %v606_v38 = vld [vmem:[#allocation3 + $0xc70] sm:$0xff] }
 0x179   :  { %2560 = vmatpush.msrb.mxu1 %v1084_v40  ;;  %2580 = vmatpush.msrb.mxu2 %v1596_v41  ;;  %v764_v16 = vld [vmem:[#allocation3 + $0x1160] sm:$0xff]  ;;  %v1118_v40 = vld [vmem:[#allocation3 + $0x1c70] sm:$0xff]  ;;  %v1085_v41 = vld [vmem:[#allocation3 + $0x1b68] sm:$0xff] }
 0x17a   :  { %2600 = vmatpush.msrb.mxu3 %v573_v42  ;;  %2541 = vmatpush.msrb.mxu0 %v540_v43  ;;  %v1276_v19 = vld [vmem:[#allocation3 + $0x2160] sm:$0xff]  ;;  %v1597_v42 = vld [vmem:[#allocation3 + $0x2b68] sm:$0xff]  ;;  %v574_v43 = vld [vmem:[#allocation3 + $0xb70] sm:$0xff] }
 0x17b   :  { %2561 = vmatpush.msrb.mxu1 %v1052_v44  ;;  %2581 = vmatpush.msrb.mxu2 %v1564_v17  ;;  %v220_v21 = vld [vmem:[#allocation3 + $0x60] sm:$0xff]  ;;  %v1086_v44 = vld [vmem:[#allocation3 + $0x1b70] sm:$0xff]  ;;  %v1053_v17 = vld [vmem:[#allocation3 + $0x1a68] sm:$0xff] }
 0x17c   :  { %2601 = vmatpush.msrb.mxu3 %v541_v2  ;;  %2542 = vmatpush.msrb.mxu0 %v508_v45  ;;  %v732_v22 = vld [vmem:[#allocation3 + $0x1060] sm:$0xff]  ;;  %v1565_v2 = vld [vmem:[#allocation3 + $0x2a68] sm:$0xff]  ;;  %v542_v45 = vld [vmem:[#allocation3 + $0xa70] sm:$0xff] }
 0x17d   :  { %2562 = vmatpush.msrb.mxu1 %v1020_v46  ;;  %2582 = vmatpush.msrb.mxu2 %v1532_v47  ;;  %v1244_v23 = vld [vmem:[#allocation3 + $0x2060] sm:$0xff]  ;;  %v1054_v46 = vld [vmem:[#allocation3 + $0x1a70] sm:$0xff]  ;;  %v1021_v47 = vld [vmem:[#allocation3 + $0x1968] sm:$0xff] }
 0x17e   :  { %2602 = vmatpush.msrb.mxu3 %v509_v48  ;;  %2543 = vmatpush.msrb.mxu0 %v476_v3  ;;  %v6925_v32 = vld [vmem:[%s7538_s0] sm:$0xff]  ;;  %v6931_v36 = vld [vmem:[%s7538_s0 + $0x8] sm:$0xff]  ;;  %v510_v3 = vld [vmem:[#allocation3 + $0x970] sm:$0xff] }
 0x17f   :  { %2563 = vmatpush.msrb.mxu1 %v988_v49  ;;  %2583 = vmatpush.msrb.mxu2 %v1500_v50  ;;  %v1533_v48 = vld [vmem:[#allocation3 + $0x2968] sm:$0xff]  ;;  %v1022_v49 = vld [vmem:[#allocation3 + $0x1970] sm:$0xff] }
 0x180   :  { %2603 = vmatpush.msrb.mxu3 %v477_v51  ;;  %2544 = vmatpush.msrb.mxu0 %v444_v52  ;;  %v989_v50 = vld [vmem:[#allocation3 + $0x1868] sm:$0xff]  ;;  %v478_v52 = vld [vmem:[#allocation3 + $0x870] sm:$0xff] }
 0x181   :  { %2564 = vmatpush.msrb.mxu1 %v956_v53  ;;  %2584 = vmatpush.msrb.mxu2 %v1468_v54  ;;  %v1501_v51 = vld [vmem:[#allocation3 + $0x2868] sm:$0xff]  ;;  %v990_v53 = vld [vmem:[#allocation3 + $0x1870] sm:$0xff] }
 0x182   :  { %2604 = vmatpush.msrb.mxu3 %v445_v55  ;;  %2545 = vmatpush.msrb.mxu0 %v412_v56  ;;  %v957_v54 = vld [vmem:[#allocation3 + $0x1768] sm:$0xff]  ;;  %v446_v56 = vld [vmem:[#allocation3 + $0x770] sm:$0xff] }
 0x183   :  { %2565 = vmatpush.msrb.mxu1 %v924_v57  ;;  %2585 = vmatpush.msrb.mxu2 %v1436_v58  ;;  %v1469_v55 = vld [vmem:[#allocation3 + $0x2768] sm:$0xff]  ;;  %v958_v57 = vld [vmem:[#allocation3 + $0x1770] sm:$0xff] }
 0x184   :  { %2605 = vmatpush.msrb.mxu3 %v413_v59  ;;  %2546 = vmatpush.msrb.mxu0 %v380_v60  ;;  %v925_v58 = vld [vmem:[#allocation3 + $0x1668] sm:$0xff]  ;;  %v414_v60 = vld [vmem:[#allocation3 + $0x670] sm:$0xff] }
 0x185   :  { %2566 = vmatpush.msrb.mxu1 %v892_v61  ;;  %2586 = vmatpush.msrb.mxu2 %v1404_v62  ;;  %v1437_v59 = vld [vmem:[#allocation3 + $0x2668] sm:$0xff]  ;;  %v926_v61 = vld [vmem:[#allocation3 + $0x1670] sm:$0xff] }
 0x186   :  { %2606 = vmatpush.msrb.mxu3 %v381_v63  ;;  %2547 = vmatpush.msrb.mxu0 %v348_v0  ;;  %v893_v62 = vld [vmem:[#allocation3 + $0x1568] sm:$0xff]  ;;  %v382_v0 = vld [vmem:[#allocation3 + $0x570] sm:$0xff] }
 0x187   :  { %2567 = vmatpush.msrb.mxu1 %v860_v4  ;;  %2587 = vmatpush.msrb.mxu2 %v1372_v5  ;;  %v1405_v63 = vld [vmem:[#allocation3 + $0x2568] sm:$0xff]  ;;  %v894_v4 = vld [vmem:[#allocation3 + $0x1570] sm:$0xff] }
 0x188   :  { %2607 = vmatpush.msrb.mxu3 %v349_v6  ;;  %2548 = vmatpush.msrb.mxu0 %v316_v7  ;;  %v861_v5 = vld [vmem:[#allocation3 + $0x1468] sm:$0xff]  ;;  %v350_v7 = vld [vmem:[#allocation3 + $0x470] sm:$0xff] }
 0x189   :  { %2568 = vmatpush.msrb.mxu1 %v828_v8  ;;  %2588 = vmatpush.msrb.mxu2 %v1340_v9  ;;  %v1373_v6 = vld [vmem:[#allocation3 + $0x2468] sm:$0xff]  ;;  %v862_v8 = vld [vmem:[#allocation3 + $0x1470] sm:$0xff] }
 0x18a   :  { %2608 = vmatpush.msrb.mxu3 %v317_v10  ;;  %2549 = vmatpush.msrb.mxu0 %v284_v11  ;;  %v829_v9 = vld [vmem:[#allocation3 + $0x1368] sm:$0xff]  ;;  %v318_v11 = vld [vmem:[#allocation3 + $0x370] sm:$0xff] }
 0x18b   :  { %2569 = vmatpush.msrb.mxu1 %v796_v12  ;;  %2589 = vmatpush.msrb.mxu2 %v1308_v13  ;;  %v1341_v10 = vld [vmem:[#allocation3 + $0x2368] sm:$0xff]  ;;  %v830_v12 = vld [vmem:[#allocation3 + $0x1370] sm:$0xff] }
 0x18c   :  { %2609 = vmatpush.msrb.mxu3 %v285_v14  ;;  %2550 = vmatpush.msrb.mxu0 %v252_v15  ;;  %v797_v13 = vld [vmem:[#allocation3 + $0x1268] sm:$0xff]  ;;  %v286_v15 = vld [vmem:[#allocation3 + $0x270] sm:$0xff] }
 0x18d   :  { %2570 = vmatpush.msrb.mxu1 %v764_v16  ;;  %2590 = vmatpush.msrb.mxu2 %v1276_v19  ;;  %v1309_v14 = vld [vmem:[#allocation3 + $0x2268] sm:$0xff]  ;;  %v798_v16 = vld [vmem:[#allocation3 + $0x1270] sm:$0xff] }
 0x18e   :  { %2610 = vmatpush.msrb.mxu3 %v253_v20  ;;  %2551 = vmatpush.msrb.mxu0 %v220_v21  ;;  %v765_v19 = vld [vmem:[#allocation3 + $0x1168] sm:$0xff]  ;;  %v254_v21 = vld [vmem:[#allocation3 + $0x170] sm:$0xff] }
 0x18f   :  { %2571 = vmatpush.msrb.mxu1 %v732_v22  ;;  %2591 = vmatpush.msrb.mxu2 %v1244_v23  ;;  %v1277_v20 = vld [vmem:[#allocation3 + $0x2168] sm:$0xff]  ;;  %v766_v22 = vld [vmem:[#allocation3 + $0x1170] sm:$0xff] }
 0x190   :  { %2611 = vmatpush.msrb.mxu3 %v221_v24  ;;  %2592 = vmatmul.f32.vlgmr.msrb.gmra.mxu2 %v6903_v39  ;;  %v638_v39 = vld [vmem:[#allocation3 + $0xd70] sm:$0xff]  ;;  %v733_v23 = vld [vmem:[#allocation3 + $0x1068] sm:$0xff] }
 0x191   :  { %2616 = vmatpush.msra.mxu0 %v1213_v25  ;;  %2636 = vmatpush.msra.mxu1 %v1725_v26  ;;  %v1245_v24 = vld [vmem:[#allocation3 + $0x2068] sm:$0xff]  ;;  %v222_v25 = vld [vmem:[#allocation3 + $0x70] sm:$0xff] }
 0x192   :  { %2656 = vmatpush.msra.mxu2 %v702_v1  ;;  %2676 = vmatpush.msra.mxu3 %v1214_v27  ;;  %v734_v26 = vld [vmem:[#allocation3 + $0x1070] sm:$0xff]  ;;  %v703_v1 = vld [vmem:[#allocation3 + $0xf78] sm:$0xff] }
 0x193   :  { %2552 = vmatmul.f32.vlgmr.msrb.gmra.mxu0 %v6925_v32  ;;  %2637 = vmatpush.msra.mxu1 %v1693_v29  ;;  %v1726_v27 = vld [vmem:[#allocation3 + $0x2f70] sm:$0xff]  ;;  %v1727_v29 = vld [vmem:[#allocation3 + $0x2f78] sm:$0xff] }
 0x194   :  { %2617 = vmatpush.msra.mxu0 %v1181_v28  ;;  %2657 = vmatpush.msra.mxu2 %v670_v30  ;;  %v1215_v28 = vld [vmem:[#allocation3 + $0x1f78] sm:$0xff]  ;;  %v1694_v30 = vld [vmem:[#allocation3 + $0x2e70] sm:$0xff] }
 0x195   :  { %2677 = vmatpush.msra.mxu3 %v1182_v31  ;;  %2572 = vmatmul.f32.vlgmr.msrb.gmra.mxu1 %v6931_v36  ;;  %v671_v31 = vld [vmem:[#allocation3 + $0xe78] sm:$0xff] }
 0x196   :  { %2618 = vmatpush.msra.mxu0 %v1149_v33  ;;  %2638 = vmatpush.msra.mxu1 %v1661_v34  ;;  %v1183_v33 = vld [vmem:[#allocation3 + $0x1e78] sm:$0xff] }
 0x197   :  { %2658 = vmatpush.msra.mxu2 %v638_v39  ;;  %2678 = vmatpush.msra.mxu3 %v1150_v18  ;;  %v1695_v34 = vld [vmem:[#allocation3 + $0x2e78] sm:$0xff]  ;;  %v6939_v39 = vld [vmem:[%s7538_s0 + $0x10] sm:$0xff] }
 0x198   :  { %2619 = vmatpush.msra.mxu0 %v1117_v35  ;;  %2639 = vmatpush.msra.mxu1 %v1629_v37  ;;  %v1662_v18 = vld [vmem:[#allocation3 + $0x2d70] sm:$0xff]  ;;  %v639_v35 = vld [vmem:[#allocation3 + $0xd78] sm:$0xff] }
 0x199   :  { %2659 = vmatpush.msra.mxu2 %v606_v38  ;;  %2679 = vmatpush.msra.mxu3 %v1118_v40  ;;  %v1151_v37 = vld [vmem:[#allocation3 + $0x1d78] sm:$0xff]  ;;  %v1630_v40 = vld [vmem:[#allocation3 + $0x2c70] sm:$0xff] }
 0x19a   :  { %2620 = vmatpush.msra.mxu0 %v1085_v41  ;;  %2640 = vmatpush.msra.mxu1 %v1597_v42  ;;  %v1663_v38 = vld [vmem:[#allocation3 + $0x2d78] sm:$0xff] }
 0x19b   :  { %2660 = vmatpush.msra.mxu2 %v574_v43  ;;  %2680 = vmatpush.msra.mxu3 %v1086_v44  ;;  %v607_v41 = vld [vmem:[#allocation3 + $0xc78] sm:$0xff]  ;;  %v1598_v44 = vld [vmem:[#allocation3 + $0x2b70] sm:$0xff] }
 0x19c   :  { %2621 = vmatpush.msra.mxu0 %v1053_v17  ;;  %2641 = vmatpush.msra.mxu1 %v1565_v2  ;;  %v1119_v42 = vld [vmem:[#allocation3 + $0x1c78] sm:$0xff] }
 0x19d   :  { %2661 = vmatpush.msra.mxu2 %v542_v45  ;;  %2681 = vmatpush.msra.mxu3 %v1054_v46  ;;  %v1631_v43 = vld [vmem:[#allocation3 + $0x2c78] sm:$0xff]  ;;  %v1566_v46 = vld [vmem:[#allocation3 + $0x2a70] sm:$0xff] }
 0x19e   :  { %2622 = vmatpush.msra.mxu0 %v1021_v47  ;;  %2642 = vmatpush.msra.mxu1 %v1533_v48  ;;  %v575_v17 = vld [vmem:[#allocation3 + $0xb78] sm:$0xff] }
 0x19f   :  { %2662 = vmatpush.msra.mxu2 %v510_v3  ;;  %2682 = vmatpush.msra.mxu3 %v1022_v49  ;;  %v1087_v2 = vld [vmem:[#allocation3 + $0x1b78] sm:$0xff]  ;;  %v1534_v49 = vld [vmem:[#allocation3 + $0x2970] sm:$0xff] }
 0x1a0   :  { %2623 = vmatpush.msra.mxu0 %v989_v50  ;;  %2643 = vmatpush.msra.mxu1 %v1501_v51  ;;  %v1599_v45 = vld [vmem:[#allocation3 + $0x2b78] sm:$0xff] }
 0x1a1   :  { %2663 = vmatpush.msra.mxu2 %v478_v52  ;;  %2683 = vmatpush.msra.mxu3 %v990_v53  ;;  %v543_v47 = vld [vmem:[#allocation3 + $0xa78] sm:$0xff]  ;;  %v1502_v53 = vld [vmem:[#allocation3 + $0x2870] sm:$0xff] }
 0x1a2   :  { %2624 = vmatpush.msra.mxu0 %v957_v54  ;;  %2644 = vmatpush.msra.mxu1 %v1469_v55  ;;  %v1055_v48 = vld [vmem:[#allocation3 + $0x1a78] sm:$0xff] }
 0x1a3   :  { %2664 = vmatpush.msra.mxu2 %v446_v56  ;;  %2684 = vmatpush.msra.mxu3 %v958_v57  ;;  %v1567_v3 = vld [vmem:[#allocation3 + $0x2a78] sm:$0xff]  ;;  %v1470_v57 = vld [vmem:[#allocation3 + $0x2770] sm:$0xff] }
 0x1a4   :  { %2625 = vmatpush.msra.mxu0 %v925_v58  ;;  %2645 = vmatpush.msra.mxu1 %v1437_v59  ;;  %v511_v50 = vld [vmem:[#allocation3 + $0x978] sm:$0xff] }
 0x1a5   :  { %2665 = vmatpush.msra.mxu2 %v414_v60  ;;  %2685 = vmatpush.msra.mxu3 %v926_v61  ;;  %v1023_v51 = vld [vmem:[#allocation3 + $0x1978] sm:$0xff]  ;;  %v1438_v61 = vld [vmem:[#allocation3 + $0x2670] sm:$0xff] }
 0x1a6   :  { %2626 = vmatpush.msra.mxu0 %v893_v62  ;;  %2646 = vmatpush.msra.mxu1 %v1405_v63  ;;  %v1535_v52 = vld [vmem:[#allocation3 + $0x2978] sm:$0xff] }
 0x1a7   :  { %2666 = vmatpush.msra.mxu2 %v382_v0  ;;  %2686 = vmatpush.msra.mxu3 %v894_v4  ;;  %v479_v54 = vld [vmem:[#allocation3 + $0x878] sm:$0xff]  ;;  %v1406_v4 = vld [vmem:[#allocation3 + $0x2570] sm:$0xff] }
 0x1a8   :  { %2627 = vmatpush.msra.mxu0 %v861_v5  ;;  %2647 = vmatpush.msra.mxu1 %v1373_v6  ;;  %v991_v55 = vld [vmem:[#allocation3 + $0x1878] sm:$0xff] }
 0x1a9   :  { %2667 = vmatpush.msra.mxu2 %v350_v7  ;;  %2687 = vmatpush.msra.mxu3 %v862_v8  ;;  %v1503_v56 = vld [vmem:[#allocation3 + $0x2878] sm:$0xff]  ;;  %v1374_v8 = vld [vmem:[#allocation3 + $0x2470] sm:$0xff] }
 0x1aa   :  { %2628 = vmatpush.msra.mxu0 %v829_v9  ;;  %2612 = vmatmul.f32.vlgmr.msrb.gmra.mxu3 %v6925_v32  ;;  %v447_v58 = vld [vmem:[#allocation3 + $0x778] sm:$0xff] }
 0x1ab   :  { %2648 = vmatpush.msra.mxu1 %v1341_v10  ;;  %2668 = vmatpush.msra.mxu2 %v318_v11  ;;  %v959_v59 = vld [vmem:[#allocation3 + $0x1778] sm:$0xff] }
 0x1ac   :  { %2688 = vmatpush.msra.mxu3 %v830_v12  ;;  %2629 = vmatpush.msra.mxu0 %v797_v13  ;;  %v1471_v60 = vld [vmem:[#allocation3 + $0x2778] sm:$0xff]  ;;  %v1342_v12 = vld [vmem:[#allocation3 + $0x2370] sm:$0xff] }
 0x1ad   :  { %2649 = vmatpush.msra.mxu1 %v1309_v14  ;;  %2669 = vmatpush.msra.mxu2 %v286_v15  ;;  %v415_v62 = vld [vmem:[#allocation3 + $0x678] sm:$0xff] }
 0x1ae   :  { %2689 = vmatpush.msra.mxu3 %v798_v16  ;;  %2630 = vmatpush.msra.mxu0 %v765_v19  ;;  %v927_v63 = vld [vmem:[#allocation3 + $0x1678] sm:$0xff]  ;;  %v1310_v16 = vld [vmem:[#allocation3 + $0x2270] sm:$0xff] }
 0x1af   :  { %2650 = vmatpush.msra.mxu1 %v1277_v20  ;;  %2670 = vmatpush.msra.mxu2 %v254_v21  ;;  %v1439_v0 = vld [vmem:[#allocation3 + $0x2678] sm:$0xff] }
 0x1b0   :  { %2690 = vmatpush.msra.mxu3 %v766_v22  ;;  %2631 = vmatpush.msra.mxu0 %v733_v23  ;;  %v383_v5 = vld [vmem:[#allocation3 + $0x578] sm:$0xff]  ;;  %v1278_v22 = vld [vmem:[#allocation3 + $0x2170] sm:$0xff] }
 0x1b1   :  { %2651 = vmatpush.msra.mxu1 %v1245_v24  ;;  %2671 = vmatpush.msra.mxu2 %v222_v25  ;;  %v895_v6 = vld [vmem:[#allocation3 + $0x1578] sm:$0xff] }
 0x1b2   :  { %2691 = vmatpush.msra.mxu3 %v734_v26  ;;  %2632 = vmatmul.f32.vlgmr.msra.gmra.mxu0 %v6931_v36  ;;  %v1407_v7 = vld [vmem:[#allocation3 + $0x2578] sm:$0xff]  ;;  %v1246_v26 = vld [vmem:[#allocation3 + $0x2070] sm:$0xff] }
 0x1b3   :  { %2716 = vmatpush.msrb.mxu1 %v703_v1  ;;  %2696 = vmatpush.msrb.mxu0 %v1726_v27  ;;  %v351_v9 = vld [vmem:[#allocation3 + $0x478] sm:$0xff] }
 0x1b4   :  { %2736 = vmatpush.msrb.mxu2 %v1215_v28  ;;  %2756 = vmatpush.msrb.mxu3 %v1727_v29  ;;  %v863_v10 = vld [vmem:[#allocation3 + $0x1478] sm:$0xff]  ;;  %v704_v29 = vld [vmem:[#allocation3 + $0xf80] sm:$0xff] }
 0x1b5   :  { %2652 = vmatmul.f32.vlgmr.msra.gmra.mxu1 %v6939_v39  ;;  %2697 = vmatpush.msrb.mxu0 %v1694_v30  ;;  %v1375_v11 = vld [vmem:[#allocation3 + $0x2478] sm:$0xff]  ;;  %v1216_v30 = vld [vmem:[#allocation3 + $0x1f80] sm:$0xff] }
 0x1b6   :  { %2717 = vmatpush.msrb.mxu1 %v671_v31  ;;  %2737 = vmatpush.msrb.mxu2 %v1183_v33  ;;  %v319_v13 = vld [vmem:[#allocation3 + $0x378] sm:$0xff]  ;;  %v1728_v31 = vld [vmem:[#allocation3 + $0x2f80] sm:$0xff]  ;;  %v705_v33 = vld [vmem:[#allocation3 + $0xf88] sm:$0xff] }
 0x1b7   :  { %2757 = vmatpush.msrb.mxu3 %v1695_v34  ;;  %2698 = vmatpush.msrb.mxu0 %v1662_v18  ;;  %v831_v14 = vld [vmem:[#allocation3 + $0x1378] sm:$0xff]  ;;  %v672_v34 = vld [vmem:[#allocation3 + $0xe80] sm:$0xff] }
 0x1b8   :  { %2718 = vmatpush.msrb.mxu1 %v639_v35  ;;  %2738 = vmatpush.msrb.mxu2 %v1151_v37  ;;  %v1343_v15 = vld [vmem:[#allocation3 + $0x2378] sm:$0xff]  ;;  %v1184_v18 = vld [vmem:[#allocation3 + $0x1e80] sm:$0xff]  ;;  %v673_v37 = vld [vmem:[#allocation3 + $0xe88] sm:$0xff] }
 0x1b9   :  { %2758 = vmatpush.msrb.mxu3 %v1663_v38  ;;  %2699 = vmatpush.msrb.mxu0 %v1630_v40  ;;  %v287_v19 = vld [vmem:[#allocation3 + $0x278] sm:$0xff]  ;;  %v1696_v35 = vld [vmem:[#allocation3 + $0x2e80] sm:$0xff] }
 0x1ba   :  { %2719 = vmatpush.msrb.mxu1 %v607_v41  ;;  %2739 = vmatpush.msrb.mxu2 %v1119_v42  ;;  %v799_v20 = vld [vmem:[#allocation3 + $0x1278] sm:$0xff]  ;;  %v640_v38 = vld [vmem:[#allocation3 + $0xd80] sm:$0xff]  ;;  %v641_v42 = vld [vmem:[#allocation3 + $0xd88] sm:$0xff] }
 0x1bb   :  { %2759 = vmatpush.msrb.mxu3 %v1631_v43  ;;  %2700 = vmatpush.msrb.mxu0 %v1598_v44  ;;  %v1311_v21 = vld [vmem:[#allocation3 + $0x2278] sm:$0xff]  ;;  %v1152_v40 = vld [vmem:[#allocation3 + $0x1d80] sm:$0xff] }
 0x1bc   :  { %2720 = vmatpush.msrb.mxu1 %v575_v17  ;;  %2740 = vmatpush.msrb.mxu2 %v1087_v2  ;;  %v255_v23 = vld [vmem:[#allocation3 + $0x178] sm:$0xff]  ;;  %v1664_v41 = vld [vmem:[#allocation3 + $0x2d80] sm:$0xff]  ;;  %v609_v2 = vld [vmem:[#allocation3 + $0xc88] sm:$0xff] }
 0x1bd   :  { %2760 = vmatpush.msrb.mxu3 %v1599_v45  ;;  %2701 = vmatpush.msrb.mxu0 %v1566_v46  ;;  %v767_v24 = vld [vmem:[#allocation3 + $0x1178] sm:$0xff]  ;;  %v608_v43 = vld [vmem:[#allocation3 + $0xc80] sm:$0xff] }
 0x1be   :  { %2721 = vmatpush.msrb.mxu1 %v543_v47  ;;  %2741 = vmatpush.msrb.mxu2 %v1055_v48  ;;  %v1279_v25 = vld [vmem:[#allocation3 + $0x2178] sm:$0xff]  ;;  %v1120_v44 = vld [vmem:[#allocation3 + $0x1c80] sm:$0xff]  ;;  %v577_v48 = vld [vmem:[#allocation3 + $0xb88] sm:$0xff] }
 0x1bf   :  { %2761 = vmatpush.msrb.mxu3 %v1567_v3  ;;  %2702 = vmatpush.msrb.mxu0 %v1534_v49  ;;  %v223_v1 = vld [vmem:[#allocation3 + $0x78] sm:$0xff]  ;;  %v1632_v17 = vld [vmem:[#allocation3 + $0x2c80] sm:$0xff] }
 0x1c0   :  { %2722 = vmatpush.msrb.mxu1 %v511_v50  ;;  %2742 = vmatpush.msrb.mxu2 %v1023_v51  ;;  %v735_v27 = vld [vmem:[#allocation3 + $0x1078] sm:$0xff]  ;;  %v576_v45 = vld [vmem:[#allocation3 + $0xb80] sm:$0xff]  ;;  %v545_v50 = vld [vmem:[#allocation3 + $0xa88] sm:$0xff] }
 0x1c1   :  { %2762 = vmatpush.msrb.mxu3 %v1535_v52  ;;  %2703 = vmatpush.msrb.mxu0 %v1502_v53  ;;  %v1247_v28 = vld [vmem:[#allocation3 + $0x2078] sm:$0xff]  ;;  %v1088_v46 = vld [vmem:[#allocation3 + $0x1b80] sm:$0xff] }
 0x1c2   :  { %2723 = vmatpush.msrb.mxu1 %v479_v54  ;;  %2743 = vmatpush.msrb.mxu2 %v991_v55  ;;  %v1600_v47 = vld [vmem:[#allocation3 + $0x2b80] sm:$0xff]  ;;  %v513_v54 = vld [vmem:[#allocation3 + $0x988] sm:$0xff] }
 0x1c3   :  { %2763 = vmatpush.msrb.mxu3 %v1503_v56  ;;  %2704 = vmatpush.msrb.mxu0 %v1470_v57  ;;  %v544_v3 = vld [vmem:[#allocation3 + $0xa80] sm:$0xff] }
 0x1c4   :  { %2724 = vmatpush.msrb.mxu1 %v447_v58  ;;  %2744 = vmatpush.msrb.mxu2 %v959_v59  ;;  %v1056_v49 = vld [vmem:[#allocation3 + $0x1a80] sm:$0xff]  ;;  %v481_v58 = vld [vmem:[#allocation3 + $0x888] sm:$0xff] }
 0x1c5   :  { %2764 = vmatpush.msrb.mxu3 %v1471_v60  ;;  %2705 = vmatpush.msrb.mxu0 %v1438_v61  ;;  %v512_v51 = vld [vmem:[#allocation3 + $0x980] sm:$0xff] }
 0x1c6   :  { %2725 = vmatpush.msrb.mxu1 %v415_v62  ;;  %2745 = vmatpush.msrb.mxu2 %v927_v63  ;;  %v1024_v52 = vld [vmem:[#allocation3 + $0x1980] sm:$0xff]  ;;  %v449_v62 = vld [vmem:[#allocation3 + $0x788] sm:$0xff] }
 0x1c7   :  { %2765 = vmatpush.msrb.mxu3 %v1439_v0  ;;  %2706 = vmatpush.msrb.mxu0 %v1406_v4  ;;  %v1536_v53 = vld [vmem:[#allocation3 + $0x2980] sm:$0xff] }
 0x1c8   :  { %2726 = vmatpush.msrb.mxu1 %v383_v5  ;;  %2746 = vmatpush.msrb.mxu2 %v895_v6  ;;  %v480_v55 = vld [vmem:[#allocation3 + $0x880] sm:$0xff]  ;;  %v417_v5 = vld [vmem:[#allocation3 + $0x688] sm:$0xff] }
 0x1c9   :  { %2766 = vmatpush.msrb.mxu3 %v1407_v7  ;;  %2672 = vmatmul.f32.vlgmr.msra.gmra.mxu2 %v6925_v32  ;;  %v992_v56 = vld [vmem:[#allocation3 + $0x1880] sm:$0xff] }
 0x1ca   :  { %2707 = vmatpush.msrb.mxu0 %v1374_v8  ;;  %2727 = vmatpush.msrb.mxu1 %v351_v9  ;;  %v1504_v57 = vld [vmem:[#allocation3 + $0x2880] sm:$0xff]  ;;  %v385_v9 = vld [vmem:[#allocation3 + $0x588] sm:$0xff] }
 0x1cb   :  { %2747 = vmatpush.msrb.mxu2 %v863_v10  ;;  %2767 = vmatpush.msrb.mxu3 %v1375_v11  ;;  %v448_v59 = vld [vmem:[#allocation3 + $0x780] sm:$0xff] }
 0x1cc   :  { %2708 = vmatpush.msrb.mxu0 %v1342_v12  ;;  %2692 = vmatmul.f32.vlgmr.msra.gmra.mxu3 %v6931_v36  ;;  %v960_v60 = vld [vmem:[#allocation3 + $0x1780] sm:$0xff] }
 0x1cd   :  { %2728 = vmatpush.msrb.mxu1 %v319_v13  ;;  %2748 = vmatpush.msrb.mxu2 %v831_v14  ;;  %v1472_v61 = vld [vmem:[#allocation3 + $0x2780] sm:$0xff]  ;;  %v353_v13 = vld [vmem:[#allocation3 + $0x488] sm:$0xff] }
 0x1ce   :  { %2768 = vmatpush.msrb.mxu3 %v1343_v15  ;;  %2709 = vmatpush.msrb.mxu0 %v1310_v16  ;;  %v416_v63 = vld [vmem:[#allocation3 + $0x680] sm:$0xff] }
 0x1cf   :  { %2729 = vmatpush.msrb.mxu1 %v287_v19  ;;  %2749 = vmatpush.msrb.mxu2 %v799_v20  ;;  %v928_v0 = vld [vmem:[#allocation3 + $0x1680] sm:$0xff]  ;;  %v321_v19 = vld [vmem:[#allocation3 + $0x388] sm:$0xff] }
 0x1d0   :  { %2769 = vmatpush.msrb.mxu3 %v1311_v21  ;;  %2710 = vmatpush.msrb.mxu0 %v1278_v22  ;;  %v1440_v4 = vld [vmem:[#allocation3 + $0x2680] sm:$0xff] }
 0x1d1   :  { %2730 = vmatpush.msrb.mxu1 %v255_v23  ;;  %2750 = vmatpush.msrb.mxu2 %v767_v24  ;;  %v384_v6 = vld [vmem:[#allocation3 + $0x580] sm:$0xff]  ;;  %v289_v23 = vld [vmem:[#allocation3 + $0x288] sm:$0xff] }
 0x1d2   :  { %2770 = vmatpush.msrb.mxu3 %v1279_v25  ;;  %2711 = vmatpush.msrb.mxu0 %v1246_v26  ;;  %v896_v7 = vld [vmem:[#allocation3 + $0x1580] sm:$0xff] }
 0x1d3   :  { %2731 = vmatpush.msrb.mxu1 %v223_v1  ;;  %2751 = vmatpush.msrb.mxu2 %v735_v27  ;;  %v1408_v8 = vld [vmem:[#allocation3 + $0x2580] sm:$0xff]  ;;  %v257_v1 = vld [vmem:[#allocation3 + $0x188] sm:$0xff] }
 0x1d4   :  { %2771 = vmatpush.msrb.mxu3 %v1247_v28  ;;  %2712 = vmatmul.f32.vlgmr.msrb.gmra.mxu0 %v6939_v39  ;;  %v352_v10 = vld [vmem:[#allocation3 + $0x480] sm:$0xff] }
 0x1d5   :  { %2752 = vmatmul.f32.vlgmr.msrb.gmra.mxu2 %v6931_v36  ;;  %2776 = vmatpush.msra.mxu0 %v704_v29  ;;  %v864_v11 = vld [vmem:[#allocation3 + $0x1480] sm:$0xff] }
 0x1d6   :  { %2796 = vmatpush.msra.mxu1 %v1216_v30  ;;  %2816 = vmatpush.msra.mxu2 %v1728_v31  ;;  %v1376_v12 = vld [vmem:[#allocation3 + $0x2480] sm:$0xff]  ;;  %v225_v30 = vld [vmem:[#allocation3 + $0x88] sm:$0xff] }
 0x1d7   :  { %2836 = vmatpush.msra.mxu3 %v705_v33  ;;  %2777 = vmatpush.msra.mxu0 %v672_v34  ;;  %v320_v14 = vld [vmem:[#allocation3 + $0x380] sm:$0xff]  ;;  %v1217_v31 = vld [vmem:[#allocation3 + $0x1f88] sm:$0xff]  ;;  %v706_v34 = vld [vmem:[#allocation3 + $0xf90] sm:$0xff] }
 0x1d8   :  { %2772 = vmatmul.f32.vlgmr.msrb.gmra.mxu3 %v6939_v39  ;;  %2797 = vmatpush.msra.mxu1 %v1184_v18  ;;  %v832_v15 = vld [vmem:[#allocation3 + $0x1380] sm:$0xff]  ;;  %v1729_v33 = vld [vmem:[#allocation3 + $0x2f88] sm:$0xff]  ;;  %v1218_v18 = vld [vmem:[#allocation3 + $0x1f90] sm:$0xff] }
 0x1d9   :  { %2817 = vmatpush.msra.mxu2 %v1696_v35  ;;  %2837 = vmatpush.msra.mxu3 %v673_v37  ;;  %v1344_v16 = vld [vmem:[#allocation3 + $0x2380] sm:$0xff]  ;;  %v1185_v35 = vld [vmem:[#allocation3 + $0x1e88] sm:$0xff] }
 0x1da   :  { %2732 = vmatmul.f32.vlgmr.msrb.gmra.mxu1 %v6925_v32  ;;  %2778 = vmatpush.msra.mxu0 %v640_v38  ;;  %v1568_v32 = vld [vmem:[#allocation3 + $0x2a80] sm:$0xff]  ;;  %v1697_v37 = vld [vmem:[#allocation3 + $0x2e88] sm:$0xff]  ;;  %v674_v38 = vld [vmem:[#allocation3 + $0xe90] sm:$0xff] }
 0x1db   :  { %2798 = vmatpush.msra.mxu1 %v1152_v40  ;;  %2818 = vmatpush.msra.mxu2 %v1664_v41  ;;  %v288_v20 = vld [vmem:[#allocation3 + $0x280] sm:$0xff]  ;;  %v1186_v40 = vld [vmem:[#allocation3 + $0x1e90] sm:$0xff]  ;;  %v1153_v41 = vld [vmem:[#allocation3 + $0x1d88] sm:$0xff] }
 0x1dc   :  { %2838 = vmatpush.msra.mxu3 %v641_v42  ;;  %2779 = vmatpush.msra.mxu0 %v608_v43  ;;  %v800_v21 = vld [vmem:[#allocation3 + $0x1280] sm:$0xff]  ;;  %v1665_v42 = vld [vmem:[#allocation3 + $0x2d88] sm:$0xff]  ;;  %v642_v43 = vld [vmem:[#allocation3 + $0xd90] sm:$0xff] }
 0x1dd   :  { %2799 = vmatpush.msra.mxu1 %v1120_v44  ;;  %2819 = vmatpush.msra.mxu2 %v1632_v17  ;;  %v1312_v22 = vld [vmem:[#allocation3 + $0x2280] sm:$0xff]  ;;  %v1154_v44 = vld [vmem:[#allocation3 + $0x1d90] sm:$0xff]  ;;  %v1121_v17 = vld [vmem:[#allocation3 + $0x1c88] sm:$0xff] }
 0x1de   :  { %2839 = vmatpush.msra.mxu3 %v609_v2  ;;  %2780 = vmatpush.msra.mxu0 %v576_v45  ;;  %v256_v24 = vld [vmem:[#allocation3 + $0x180] sm:$0xff]  ;;  %v1633_v2 = vld [vmem:[#allocation3 + $0x2c88] sm:$0xff]  ;;  %v610_v45 = vld [vmem:[#allocation3 + $0xc90] sm:$0xff] }
 0x1df   :  { %2800 = vmatpush.msra.mxu1 %v1088_v46  ;;  %2820 = vmatpush.msra.mxu2 %v1600_v47  ;;  %v768_v25 = vld [vmem:[#allocation3 + $0x1180] sm:$0xff]  ;;  %v1122_v46 = vld [vmem:[#allocation3 + $0x1c90] sm:$0xff]  ;;  %v1089_v47 = vld [vmem:[#allocation3 + $0x1b88] sm:$0xff] }
 0x1e0   :  { %2840 = vmatpush.msra.mxu3 %v577_v48  ;;  %2781 = vmatpush.msra.mxu0 %v544_v3  ;;  %v1280_v26 = vld [vmem:[#allocation3 + $0x2180] sm:$0xff]  ;;  %v1601_v48 = vld [vmem:[#allocation3 + $0x2b88] sm:$0xff]  ;;  %v578_v3 = vld [vmem:[#allocation3 + $0xb90] sm:$0xff] }
 0x1e1   :  { %2801 = vmatpush.msra.mxu1 %v1056_v49  ;;  %2821 = vmatpush.msra.mxu2 %v1568_v32  ;;  %v224_v27 = vld [vmem:[#allocation3 + $0x80] sm:$0xff]  ;;  %v1090_v49 = vld [vmem:[#allocation3 + $0x1b90] sm:$0xff]  ;;  %v1057_v32 = vld [vmem:[#allocation3 + $0x1a88] sm:$0xff] }
 0x1e2   :  { %2841 = vmatpush.msra.mxu3 %v545_v50  ;;  %2782 = vmatpush.msra.mxu0 %v512_v51  ;;  %v736_v28 = vld [vmem:[#allocation3 + $0x1080] sm:$0xff]  ;;  %v1569_v50 = vld [vmem:[#allocation3 + $0x2a88] sm:$0xff]  ;;  %v546_v51 = vld [vmem:[#allocation3 + $0xa90] sm:$0xff] }
 0x1e3   :  { %2802 = vmatpush.msra.mxu1 %v1024_v52  ;;  %2822 = vmatpush.msra.mxu2 %v1536_v53  ;;  %v1248_v29 = vld [vmem:[#allocation3 + $0x2080] sm:$0xff]  ;;  %v1058_v52 = vld [vmem:[#allocation3 + $0x1a90] sm:$0xff]  ;;  %v1025_v53 = vld [vmem:[#allocation3 + $0x1988] sm:$0xff] }
 0x1e4   :  { %2842 = vmatpush.msra.mxu3 %v513_v54  ;;  %2783 = vmatpush.msra.mxu0 %v480_v55  ;;  %v1537_v54 = vld [vmem:[#allocation3 + $0x2988] sm:$0xff]  ;;  %v514_v55 = vld [vmem:[#allocation3 + $0x990] sm:$0xff] }
 0x1e5   :  { %2803 = vmatpush.msra.mxu1 %v992_v56  ;;  %2823 = vmatpush.msra.mxu2 %v1504_v57  ;;  %v1026_v56 = vld [vmem:[#allocation3 + $0x1990] sm:$0xff]  ;;  %v993_v57 = vld [vmem:[#allocation3 + $0x1888] sm:$0xff] }
 0x1e6   :  { %2843 = vmatpush.msra.mxu3 %v481_v58  ;;  %2784 = vmatpush.msra.mxu0 %v448_v59  ;;  %v1505_v58 = vld [vmem:[#allocation3 + $0x2888] sm:$0xff]  ;;  %v482_v59 = vld [vmem:[#allocation3 + $0x890] sm:$0xff] }
 0x1e7   :  { %2804 = vmatpush.msra.mxu1 %v960_v60  ;;  %2824 = vmatpush.msra.mxu2 %v1472_v61  ;;  %v994_v60 = vld [vmem:[#allocation3 + $0x1890] sm:$0xff]  ;;  %v961_v61 = vld [vmem:[#allocation3 + $0x1788] sm:$0xff] }
 0x1e8   :  { %2844 = vmatpush.msra.mxu3 %v449_v62  ;;  %2785 = vmatpush.msra.mxu0 %v416_v63  ;;  %v1473_v62 = vld [vmem:[#allocation3 + $0x2788] sm:$0xff]  ;;  %v450_v63 = vld [vmem:[#allocation3 + $0x790] sm:$0xff] }
 0x1e9   :  { %2805 = vmatpush.msra.mxu1 %v928_v0  ;;  %2825 = vmatpush.msra.mxu2 %v1440_v4  ;;  %v962_v0 = vld [vmem:[#allocation3 + $0x1790] sm:$0xff]  ;;  %v929_v4 = vld [vmem:[#allocation3 + $0x1688] sm:$0xff] }
 0x1ea   :  { %2845 = vmatpush.msra.mxu3 %v417_v5  ;;  %2786 = vmatpush.msra.mxu0 %v384_v6  ;;  %v1441_v5 = vld [vmem:[#allocation3 + $0x2688] sm:$0xff]  ;;  %v418_v6 = vld [vmem:[#allocation3 + $0x690] sm:$0xff] }
 0x1eb   :  { %2806 = vmatpush.msra.mxu1 %v896_v7  ;;  %2826 = vmatpush.msra.mxu2 %v1408_v8  ;;  %v930_v7 = vld [vmem:[#allocation3 + $0x1690] sm:$0xff]  ;;  %v897_v8 = vld [vmem:[#allocation3 + $0x1588] sm:$0xff] }
 0x1ec   :  { %2846 = vmatpush.msra.mxu3 %v385_v9  ;;  %2787 = vmatpush.msra.mxu0 %v352_v10  ;;  %v1409_v9 = vld [vmem:[#allocation3 + $0x2588] sm:$0xff]  ;;  %v386_v10 = vld [vmem:[#allocation3 + $0x590] sm:$0xff] }
 0x1ed   :  { %2807 = vmatpush.msra.mxu1 %v864_v11  ;;  %2827 = vmatpush.msra.mxu2 %v1376_v12  ;;  %v898_v11 = vld [vmem:[#allocation3 + $0x1590] sm:$0xff]  ;;  %v865_v12 = vld [vmem:[#allocation3 + $0x1488] sm:$0xff] }
 0x1ee   :  { %2847 = vmatpush.msra.mxu3 %v353_v13  ;;  %2788 = vmatpush.msra.mxu0 %v320_v14  ;;  %v1377_v13 = vld [vmem:[#allocation3 + $0x2488] sm:$0xff]  ;;  %v354_v14 = vld [vmem:[#allocation3 + $0x490] sm:$0xff] }
 0x1ef   :  { %2808 = vmatpush.msra.mxu1 %v832_v15  ;;  %2828 = vmatpush.msra.mxu2 %v1344_v16  ;;  %v866_v15 = vld [vmem:[#allocation3 + $0x1490] sm:$0xff]  ;;  %v833_v16 = vld [vmem:[#allocation3 + $0x1388] sm:$0xff] }
 0x1f0   :  { %2848 = vmatpush.msra.mxu3 %v321_v19  ;;  %2789 = vmatpush.msra.mxu0 %v288_v20  ;;  %v1345_v19 = vld [vmem:[#allocation3 + $0x2388] sm:$0xff]  ;;  %v322_v20 = vld [vmem:[#allocation3 + $0x390] sm:$0xff] }
 0x1f1   :  { %2809 = vmatpush.msra.mxu1 %v800_v21  ;;  %2829 = vmatpush.msra.mxu2 %v1312_v22  ;;  %v834_v21 = vld [vmem:[#allocation3 + $0x1390] sm:$0xff]  ;;  %v801_v22 = vld [vmem:[#allocation3 + $0x1288] sm:$0xff] }
 0x1f2   :  { %2849 = vmatpush.msra.mxu3 %v289_v23  ;;  %2790 = vmatpush.msra.mxu0 %v256_v24  ;;  %v1313_v23 = vld [vmem:[#allocation3 + $0x2288] sm:$0xff]  ;;  %v290_v24 = vld [vmem:[#allocation3 + $0x290] sm:$0xff] }
 0x1f3   :  { %2810 = vmatpush.msra.mxu1 %v768_v25  ;;  %2830 = vmatpush.msra.mxu2 %v1280_v26  ;;  %v802_v25 = vld [vmem:[#allocation3 + $0x1290] sm:$0xff]  ;;  %v769_v26 = vld [vmem:[#allocation3 + $0x1188] sm:$0xff] }
 0x1f4   :  { %2850 = vmatpush.msra.mxu3 %v257_v1  ;;  %2791 = vmatpush.msra.mxu0 %v224_v27  ;;  %v1281_v1 = vld [vmem:[#allocation3 + $0x2188] sm:$0xff]  ;;  %v258_v27 = vld [vmem:[#allocation3 + $0x190] sm:$0xff] }
 0x1f5   :  { %2811 = vmatpush.msra.mxu1 %v736_v28  ;;  %2831 = vmatpush.msra.mxu2 %v1248_v29  ;;  %v770_v28 = vld [vmem:[#allocation3 + $0x1190] sm:$0xff]  ;;  %v737_v29 = vld [vmem:[#allocation3 + $0x1088] sm:$0xff] }
 0x1f6   :  { %2851 = vmatpush.msra.mxu3 %v225_v30  ;;  %2856 = vmatpush.msrb.mxu0 %v1217_v31  ;;  %v1249_v30 = vld [vmem:[#allocation3 + $0x2088] sm:$0xff]  ;;  %v226_v31 = vld [vmem:[#allocation3 + $0x90] sm:$0xff] }
 0x1f7   :  { %2876 = vmatpush.msrb.mxu1 %v1729_v33  ;;  %2896 = vmatpush.msrb.mxu2 %v706_v34  ;;  %v738_v33 = vld [vmem:[#allocation3 + $0x1090] sm:$0xff] }
 0x1f8   :  { %2916 = vmatpush.msrb.mxu3 %v1218_v18  ;;  %2857 = vmatpush.msrb.mxu0 %v1185_v35  ;;  %v1730_v34 = vld [vmem:[#allocation3 + $0x2f90] sm:$0xff]  ;;  %v707_v18 = vld [vmem:[#allocation3 + $0xf98] sm:$0xff] }
 0x1f9   :  { %2877 = vmatpush.msrb.mxu1 %v1697_v37  ;;  %2897 = vmatpush.msrb.mxu2 %v674_v38  ;;  %v6951_v35 = vld [vmem:[%s7538_s0] sm:$0xff] }
 0x1fa   :  { %2917 = vmatpush.msrb.mxu3 %v1186_v40  ;;  %2858 = vmatpush.msrb.mxu0 %v1153_v41  ;;  %v1219_v37 = vld [vmem:[#allocation3 + $0x1f98] sm:$0xff]  ;;  %v1698_v40 = vld [vmem:[#allocation3 + $0x2e90] sm:$0xff] }
 0x1fb   :  { %2878 = vmatpush.msrb.mxu1 %v1665_v42  ;;  %2898 = vmatpush.msrb.mxu2 %v642_v43  ;;  %v1731_v38 = vld [vmem:[#allocation3 + $0x2f98] sm:$0xff] }
 0x1fc   :  { %2918 = vmatpush.msrb.mxu3 %v1154_v44  ;;  %2859 = vmatpush.msrb.mxu0 %v1121_v17  ;;  %v675_v41 = vld [vmem:[#allocation3 + $0xe98] sm:$0xff]  ;;  %v1666_v44 = vld [vmem:[#allocation3 + $0x2d90] sm:$0xff] }
 0x1fd   :  { %2879 = vmatpush.msrb.mxu1 %v1633_v2  ;;  %2899 = vmatpush.msrb.mxu2 %v610_v45  ;;  %v1187_v42 = vld [vmem:[#allocation3 + $0x1e98] sm:$0xff]  ;;  %v1634_v45 = vld [vmem:[#allocation3 + $0x2c90] sm:$0xff] }
 0x1fe   :  { %2919 = vmatpush.msrb.mxu3 %v1122_v46  ;;  %2860 = vmatpush.msrb.mxu0 %v1089_v47  ;;  %v1699_v43 = vld [vmem:[#allocation3 + $0x2e98] sm:$0xff] }
 0x1ff   :  { %2880 = vmatpush.msrb.mxu1 %v1601_v48  ;;  %2900 = vmatpush.msrb.mxu2 %v578_v3  ;;  %v643_v17 = vld [vmem:[#allocation3 + $0xd98] sm:$0xff]  ;;  %v1602_v3 = vld [vmem:[#allocation3 + $0x2b90] sm:$0xff] }
 0x200   :  { %2920 = vmatpush.msrb.mxu3 %v1090_v49  ;;  %2861 = vmatpush.msrb.mxu0 %v1057_v32  ;;  %v1155_v2 = vld [vmem:[#allocation3 + $0x1d98] sm:$0xff] }
 0x201   :  { %2881 = vmatpush.msrb.mxu1 %v1569_v50  ;;  %2901 = vmatpush.msrb.mxu2 %v546_v51  ;;  %v611_v46 = vld [vmem:[#allocation3 + $0xc98] sm:$0xff] }
 0x202   :  { %2921 = vmatpush.msrb.mxu3 %v1058_v52  ;;  %2862 = vmatpush.msrb.mxu0 %v1025_v53  ;;  %v1123_v47 = vld [vmem:[#allocation3 + $0x1c98] sm:$0xff]  ;;  %v1570_v52 = vld [vmem:[#allocation3 + $0x2a90] sm:$0xff] }
 0x203   :  { %2882 = vmatpush.msrb.mxu1 %v1537_v54  ;;  %2902 = vmatpush.msrb.mxu2 %v514_v55  ;;  %v1635_v48 = vld [vmem:[#allocation3 + $0x2c98] sm:$0xff]  ;;  %v6960_v55 = vld [vmem:[%s7538_s0 + $0x8] sm:$0xff] }
 0x204   :  { %2922 = vmatpush.msrb.mxu3 %v1026_v56  ;;  %2863 = vmatpush.msrb.mxu0 %v993_v57  ;;  %v579_v49 = vld [vmem:[#allocation3 + $0xb98] sm:$0xff]  ;;  %v1538_v56 = vld [vmem:[#allocation3 + $0x2990] sm:$0xff] }
 0x205   :  { %2883 = vmatpush.msrb.mxu1 %v1505_v58  ;;  %2903 = vmatpush.msrb.mxu2 %v482_v59  ;;  %v1091_v32 = vld [vmem:[#allocation3 + $0x1b98] sm:$0xff] }
 0x206   :  { %2923 = vmatpush.msrb.mxu3 %v994_v60  ;;  %2864 = vmatpush.msrb.mxu0 %v961_v61  ;;  %v1603_v50 = vld [vmem:[#allocation3 + $0x2b98] sm:$0xff]  ;;  %v1506_v60 = vld [vmem:[#allocation3 + $0x2890] sm:$0xff] }
 0x207   :  { %2884 = vmatpush.msrb.mxu1 %v1473_v62  ;;  %2904 = vmatpush.msrb.mxu2 %v450_v63  ;;  %v547_v51 = vld [vmem:[#allocation3 + $0xa98] sm:$0xff] }
 0x208   :  { %2924 = vmatpush.msrb.mxu3 %v962_v0  ;;  %2865 = vmatpush.msrb.mxu0 %v929_v4  ;;  %v1059_v53 = vld [vmem:[#allocation3 + $0x1a98] sm:$0xff]  ;;  %v1474_v0 = vld [vmem:[#allocation3 + $0x2790] sm:$0xff] }
 0x209   :  { %2885 = vmatpush.msrb.mxu1 %v1441_v5  ;;  %2905 = vmatpush.msrb.mxu2 %v418_v6  ;;  %v1571_v54 = vld [vmem:[#allocation3 + $0x2a98] sm:$0xff] }
 0x20a   :  { %2925 = vmatpush.msrb.mxu3 %v930_v7  ;;  %2866 = vmatpush.msrb.mxu0 %v897_v8  ;;  %v515_v57 = vld [vmem:[#allocation3 + $0x998] sm:$0xff]  ;;  %v1442_v7 = vld [vmem:[#allocation3 + $0x2690] sm:$0xff] }
 0x20b   :  { %2886 = vmatpush.msrb.mxu1 %v1409_v9  ;;  %2906 = vmatpush.msrb.mxu2 %v386_v10  ;;  %v1027_v58 = vld [vmem:[#allocation3 + $0x1998] sm:$0xff]  ;;  %v1410_v10 = vld [vmem:[#allocation3 + $0x2590] sm:$0xff] }
 0x20c   :  { %2926 = vmatpush.msrb.mxu3 %v898_v11  ;;  %2867 = vmatpush.msrb.mxu0 %v865_v12  ;;  %v1539_v59 = vld [vmem:[#allocation3 + $0x2998] sm:$0xff] }
 0x20d   :  { %2887 = vmatpush.msrb.mxu1 %v1377_v13  ;;  %2907 = vmatpush.msrb.mxu2 %v354_v14  ;;  %v483_v61 = vld [vmem:[#allocation3 + $0x898] sm:$0xff]  ;;  %v1378_v14 = vld [vmem:[#allocation3 + $0x2490] sm:$0xff] }
 0x20e   :  { %2927 = vmatpush.msrb.mxu3 %v866_v15  ;;  %2868 = vmatpush.msrb.mxu0 %v833_v16  ;;  %v995_v62 = vld [vmem:[#allocation3 + $0x1898] sm:$0xff] }
 0x20f   :  { %2888 = vmatpush.msrb.mxu1 %v1345_v19  ;;  %2908 = vmatpush.msrb.mxu2 %v322_v20  ;;  %v1507_v63 = vld [vmem:[#allocation3 + $0x2898] sm:$0xff]  ;;  %v1346_v20 = vld [vmem:[#allocation3 + $0x2390] sm:$0xff] }
 0x210   :  { %2928 = vmatpush.msrb.mxu3 %v834_v21  ;;  %2869 = vmatpush.msrb.mxu0 %v801_v22  ;;  %v451_v4 = vld [vmem:[#allocation3 + $0x798] sm:$0xff] }
 0x211   :  { %2889 = vmatpush.msrb.mxu1 %v1313_v23  ;;  %2909 = vmatpush.msrb.mxu2 %v290_v24  ;;  %v963_v5 = vld [vmem:[#allocation3 + $0x1798] sm:$0xff]  ;;  %v1314_v24 = vld [vmem:[#allocation3 + $0x2290] sm:$0xff] }
 0x212   :  { %2929 = vmatpush.msrb.mxu3 %v802_v25  ;;  %2870 = vmatpush.msrb.mxu0 %v769_v26  ;;  %v1475_v6 = vld [vmem:[#allocation3 + $0x2798] sm:$0xff] }
 0x213   :  { %2890 = vmatpush.msrb.mxu1 %v1281_v1  ;;  %2910 = vmatpush.msrb.mxu2 %v258_v27  ;;  %v419_v8 = vld [vmem:[#allocation3 + $0x698] sm:$0xff]  ;;  %v1282_v27 = vld [vmem:[#allocation3 + $0x2190] sm:$0xff] }
 0x214   :  { %2930 = vmatpush.msrb.mxu3 %v770_v28  ;;  %2871 = vmatpush.msrb.mxu0 %v737_v29  ;;  %v1443_v9 = vld [vmem:[#allocation3 + $0x2698] sm:$0xff] }
 0x215   :  { %2891 = vmatpush.msrb.mxu1 %v1249_v30  ;;  %2911 = vmatpush.msrb.mxu2 %v226_v31  ;;  %v387_v11 = vld [vmem:[#allocation3 + $0x598] sm:$0xff]  ;;  %v1250_v31 = vld [vmem:[#allocation3 + $0x2090] sm:$0xff] }
 0x216   :  { %2931 = vmatpush.msrb.mxu3 %v738_v33  ;;  %2792 = vmatmul.f32.vlgmr.msra.gmra.mxu0 %v6951_v35  ;;  %v899_v12 = vld [vmem:[#allocation3 + $0x1598] sm:$0xff] }
 0x217   :  { %2812 = vmatmul.f32.vlgmr.msra.gmra.mxu1 %v6931_v36  ;;  %2832 = vmatmul.f32.vlgmr.msra.gmra.mxu2 %v6939_v39  ;;  %v1667_v36 = vld [vmem:[#allocation3 + $0x2d98] sm:$0xff] }
 0x218   :  { %2852 = vmatmul.f32.vlgmr.msra.gmra.mxu3 %v6951_v35  ;;  %2936 = vmatpush.msra.mxu0 %v1730_v34  ;;  %v1411_v13 = vld [vmem:[#allocation3 + $0x2598] sm:$0xff] }
 0x219   :  { %2956 = vmatpush.msra.mxu1 %v707_v18  ;;  %2976 = vmatpush.msra.mxu2 %v1219_v37  ;;  %v355_v15 = vld [vmem:[#allocation3 + $0x498] sm:$0xff]  ;;  %v708_v37 = vld [vmem:[#allocation3 + $0xfa0] sm:$0xff] }
 0x21a   :  { %2996 = vmatpush.msra.mxu3 %v1731_v38  ;;  %2937 = vmatpush.msra.mxu0 %v1698_v40  ;;  %v867_v16 = vld [vmem:[#allocation3 + $0x1498] sm:$0xff]  ;;  %v1220_v38 = vld [vmem:[#allocation3 + $0x1fa0] sm:$0xff] }
 0x21b   :  { %2957 = vmatpush.msra.mxu1 %v675_v41  ;;  %2977 = vmatpush.msra.mxu2 %v1187_v42  ;;  %v1379_v19 = vld [vmem:[#allocation3 + $0x2498] sm:$0xff]  ;;  %v1732_v40 = vld [vmem:[#allocation3 + $0x2fa0] sm:$0xff]  ;;  %v709_v41 = vld [vmem:[#allocation3 + $0xfa8] sm:$0xff] }
 0x21c   :  { %2997 = vmatpush.msra.mxu3 %v1699_v43  ;;  %2938 = vmatpush.msra.mxu0 %v1666_v44  ;;  %v323_v21 = vld [vmem:[#allocation3 + $0x398] sm:$0xff]  ;;  %v676_v42 = vld [vmem:[#allocation3 + $0xea0] sm:$0xff] }
 0x21d   :  { %2958 = vmatpush.msra.mxu1 %v643_v17  ;;  %2978 = vmatpush.msra.mxu2 %v1155_v2  ;;  %v835_v22 = vld [vmem:[#allocation3 + $0x1398] sm:$0xff]  ;;  %v1188_v43 = vld [vmem:[#allocation3 + $0x1ea0] sm:$0xff]  ;;  %v677_v17 = vld [vmem:[#allocation3 + $0xea8] sm:$0xff] }
 0x21e   :  { %2998 = vmatpush.msra.mxu3 %v1667_v36  ;;  %2939 = vmatpush.msra.mxu0 %v1634_v45  ;;  %v1347_v23 = vld [vmem:[#allocation3 + $0x2398] sm:$0xff]  ;;  %v1700_v44 = vld [vmem:[#allocation3 + $0x2ea0] sm:$0xff] }
 0x21f   :  { %2959 = vmatpush.msra.mxu1 %v611_v46  ;;  %2979 = vmatpush.msra.mxu2 %v1123_v47  ;;  %v291_v25 = vld [vmem:[#allocation3 + $0x298] sm:$0xff]  ;;  %v644_v2 = vld [vmem:[#allocation3 + $0xda0] sm:$0xff]  ;;  %v645_v46 = vld [vmem:[#allocation3 + $0xda8] sm:$0xff] }
 0x220   :  { %2999 = vmatpush.msra.mxu3 %v1635_v48  ;;  %2940 = vmatpush.msra.mxu0 %v1602_v3  ;;  %v803_v26 = vld [vmem:[#allocation3 + $0x1298] sm:$0xff]  ;;  %v1156_v36 = vld [vmem:[#allocation3 + $0x1da0] sm:$0xff] }
 0x221   :  { %2960 = vmatpush.msra.mxu1 %v579_v49  ;;  %2980 = vmatpush.msra.mxu2 %v1091_v32  ;;  %v1315_v1 = vld [vmem:[#allocation3 + $0x2298] sm:$0xff]  ;;  %v1668_v45 = vld [vmem:[#allocation3 + $0x2da0] sm:$0xff]  ;;  %v613_v49 = vld [vmem:[#allocation3 + $0xca8] sm:$0xff] }
 0x222   :  { %3000 = vmatpush.msra.mxu3 %v1603_v50  ;;  %2872 = vmatmul.f32.vlgmr.msrb.gmra.mxu0 %v6960_v55  ;;  %v259_v28 = vld [vmem:[#allocation3 + $0x198] sm:$0xff]  ;;  %v612_v47 = vld [vmem:[#allocation3 + $0xca0] sm:$0xff] }
 0x223   :  { %2961 = vmatpush.msra.mxu1 %v547_v51  ;;  %2941 = vmatpush.msra.mxu0 %v1570_v52  ;;  %v771_v29 = vld [vmem:[#allocation3 + $0x1198] sm:$0xff]  ;;  %v1124_v48 = vld [vmem:[#allocation3 + $0x1ca0] sm:$0xff]  ;;  %v581_v52 = vld [vmem:[#allocation3 + $0xba8] sm:$0xff] }
 0x224   :  { %2981 = vmatpush.msra.mxu2 %v1059_v53  ;;  %3001 = vmatpush.msra.mxu3 %v1571_v54  ;;  %v1283_v30 = vld [vmem:[#allocation3 + $0x2198] sm:$0xff]  ;;  %v1636_v3 = vld [vmem:[#allocation3 + $0x2ca0] sm:$0xff] }
 0x225   :  { %2892 = vmatmul.f32.vlgmr.msrb.gmra.mxu1 %v6939_v39  ;;  %2942 = vmatpush.msra.mxu0 %v1538_v56  ;;  %v931_v39 = vld [vmem:[#allocation3 + $0x1698] sm:$0xff]  ;;  %v580_v32 = vld [vmem:[#allocation3 + $0xba0] sm:$0xff] }
 0x226   :  { %2962 = vmatpush.msra.mxu1 %v515_v57  ;;  %2982 = vmatpush.msra.mxu2 %v1027_v58  ;;  %v227_v33 = vld [vmem:[#allocation3 + $0x98] sm:$0xff]  ;;  %v1092_v50 = vld [vmem:[#allocation3 + $0x1ba0] sm:$0xff]  ;;  %v549_v57 = vld [vmem:[#allocation3 + $0xaa8] sm:$0xff] }
 0x227   :  { %3002 = vmatpush.msra.mxu3 %v1539_v59  ;;  %2943 = vmatpush.msra.mxu0 %v1506_v60  ;;  %v739_v34 = vld [vmem:[#allocation3 + $0x1098] sm:$0xff]  ;;  %v1604_v51 = vld [vmem:[#allocation3 + $0x2ba0] sm:$0xff]  ;;  %v6969_v59 = vld [vmem:[%s7538_s0 + $0x10] sm:$0xff] }
 0x228   :  { %2963 = vmatpush.msra.mxu1 %v483_v61  ;;  %2983 = vmatpush.msra.mxu2 %v995_v62  ;;  %v1251_v18 = vld [vmem:[#allocation3 + $0x2098] sm:$0xff]  ;;  %v1060_v53 = vld [vmem:[#allocation3 + $0x1aa0] sm:$0xff]  ;;  %v517_v62 = vld [vmem:[#allocation3 + $0x9a8] sm:$0xff] }
 0x229   :  { %3003 = vmatpush.msra.mxu3 %v1507_v63  ;;  %2944 = vmatpush.msra.mxu0 %v1474_v0  ;;  %v548_v54 = vld [vmem:[#allocation3 + $0xaa0] sm:$0xff] }
 0x22a   :  { %2964 = vmatpush.msra.mxu1 %v451_v4  ;;  %2984 = vmatpush.msra.mxu2 %v963_v5  ;;  %v1572_v56 = vld [vmem:[#allocation3 + $0x2aa0] sm:$0xff]  ;;  %v485_v5 = vld [vmem:[#allocation3 + $0x8a8] sm:$0xff] }
 0x22b   :  { %3004 = vmatpush.msra.mxu3 %v1475_v6  ;;  %2945 = vmatpush.msra.mxu0 %v1442_v7  ;;  %v1028_v58 = vld [vmem:[#allocation3 + $0x19a0] sm:$0xff] }
 0x22c   :  { %2965 = vmatpush.msra.mxu1 %v419_v8  ;;  %2985 = vmatpush.msra.mxu2 %v931_v39  ;;  %v516_v60 = vld [vmem:[#allocation3 + $0x9a0] sm:$0xff]  ;;  %v453_v39 = vld [vmem:[#allocation3 + $0x7a8] sm:$0xff] }
 0x22d   :  { %3005 = vmatpush.msra.mxu3 %v1443_v9  ;;  %2946 = vmatpush.msra.mxu0 %v1410_v10  ;;  %v1540_v61 = vld [vmem:[#allocation3 + $0x29a0] sm:$0xff] }
 0x22e   :  { %2966 = vmatpush.msra.mxu1 %v387_v11  ;;  %2986 = vmatpush.msra.mxu2 %v899_v12  ;;  %v996_v63 = vld [vmem:[#allocation3 + $0x18a0] sm:$0xff]  ;;  %v421_v12 = vld [vmem:[#allocation3 + $0x6a8] sm:$0xff] }
 0x22f   :  { %3006 = vmatpush.msra.mxu3 %v1411_v13  ;;  %2947 = vmatpush.msra.mxu0 %v1378_v14  ;;  %v484_v0 = vld [vmem:[#allocation3 + $0x8a0] sm:$0xff] }
 0x230   :  { %2967 = vmatpush.msra.mxu1 %v355_v15  ;;  %2987 = vmatpush.msra.mxu2 %v867_v16  ;;  %v1508_v4 = vld [vmem:[#allocation3 + $0x28a0] sm:$0xff]  ;;  %v389_v16 = vld [vmem:[#allocation3 + $0x5a8] sm:$0xff] }
 0x231   :  { %3007 = vmatpush.msra.mxu3 %v1379_v19  ;;  %2948 = vmatpush.msra.mxu0 %v1346_v20  ;;  %v964_v6 = vld [vmem:[#allocation3 + $0x17a0] sm:$0xff] }
 0x232   :  { %2968 = vmatpush.msra.mxu1 %v323_v21  ;;  %2988 = vmatpush.msra.mxu2 %v835_v22  ;;  %v452_v7 = vld [vmem:[#allocation3 + $0x7a0] sm:$0xff]  ;;  %v357_v22 = vld [vmem:[#allocation3 + $0x4a8] sm:$0xff] }
 0x233   :  { %3008 = vmatpush.msra.mxu3 %v1347_v23  ;;  %2949 = vmatpush.msra.mxu0 %v1314_v24  ;;  %v1476_v8 = vld [vmem:[#allocation3 + $0x27a0] sm:$0xff] }
 0x234   :  { %2969 = vmatpush.msra.mxu1 %v291_v25  ;;  %2989 = vmatpush.msra.mxu2 %v803_v26  ;;  %v932_v9 = vld [vmem:[#allocation3 + $0x16a0] sm:$0xff]  ;;  %v325_v26 = vld [vmem:[#allocation3 + $0x3a8] sm:$0xff] }
 0x235   :  { %3009 = vmatpush.msra.mxu3 %v1315_v1  ;;  %2950 = vmatpush.msra.mxu0 %v1282_v27  ;;  %v420_v10 = vld [vmem:[#allocation3 + $0x6a0] sm:$0xff] }
 0x236   :  { %2970 = vmatpush.msra.mxu1 %v259_v28  ;;  %2990 = vmatpush.msra.mxu2 %v771_v29  ;;  %v1444_v11 = vld [vmem:[#allocation3 + $0x26a0] sm:$0xff]  ;;  %v293_v29 = vld [vmem:[#allocation3 + $0x2a8] sm:$0xff] }
 0x237   :  { %3010 = vmatpush.msra.mxu3 %v1283_v30  ;;  %2951 = vmatpush.msra.mxu0 %v1250_v31  ;;  %v900_v13 = vld [vmem:[#allocation3 + $0x15a0] sm:$0xff] }
 0x238   :  { %2971 = vmatpush.msra.mxu1 %v227_v33  ;;  %2991 = vmatpush.msra.mxu2 %v739_v34  ;;  %v388_v14 = vld [vmem:[#allocation3 + $0x5a0] sm:$0xff]  ;;  %v261_v34 = vld [vmem:[#allocation3 + $0x1a8] sm:$0xff] }
 0x239   :  { %3011 = vmatpush.msra.mxu3 %v1251_v18  ;;  %2912 = vmatmul.f32.vlgmr.msrb.gmra.mxu2 %v6951_v35  ;;  %v1412_v15 = vld [vmem:[#allocation3 + $0x25a0] sm:$0xff] }
 0x23a   :  { %2932 = vmatmul.f32.vlgmr.msrb.gmra.mxu3 %v6960_v55  ;;  %3016 = vmatpush.msrb.mxu0 %v708_v37  ;;  %v868_v19 = vld [vmem:[#allocation3 + $0x14a0] sm:$0xff] }
 0x23b   :  { %3036 = vmatpush.msrb.mxu1 %v1220_v38  ;;  %3056 = vmatpush.msrb.mxu2 %v1732_v40  ;;  %v356_v20 = vld [vmem:[#allocation3 + $0x4a0] sm:$0xff]  ;;  %v229_v40 = vld [vmem:[#allocation3 + $0xa8] sm:$0xff] }
 0x23c   :  { %3076 = vmatpush.msrb.mxu3 %v709_v41  ;;  %3017 = vmatpush.msrb.mxu0 %v676_v42  ;;  %v1380_v21 = vld [vmem:[#allocation3 + $0x24a0] sm:$0xff]  ;;  %v1221_v41 = vld [vmem:[#allocation3 + $0x1fa8] sm:$0xff] }
 0x23d   :  { %3037 = vmatpush.msrb.mxu1 %v1188_v43  ;;  %3057 = vmatpush.msrb.mxu2 %v1700_v44  ;;  %v836_v23 = vld [vmem:[#allocation3 + $0x13a0] sm:$0xff]  ;;  %v1733_v42 = vld [vmem:[#allocation3 + $0x2fa8] sm:$0xff]  ;;  %v710_v43 = vld [vmem:[#allocation3 + $0xfb0] sm:$0xff] }
 0x23e   :  { %3077 = vmatpush.msrb.mxu3 %v677_v17  ;;  %3018 = vmatpush.msrb.mxu0 %v644_v2  ;;  %v324_v24 = vld [vmem:[#allocation3 + $0x3a0] sm:$0xff]  ;;  %v1222_v44 = vld [vmem:[#allocation3 + $0x1fb0] sm:$0xff]  ;;  %v1189_v17 = vld [vmem:[#allocation3 + $0x1ea8] sm:$0xff] }
 0x23f   :  { %3038 = vmatpush.msrb.mxu1 %v1156_v36  ;;  %3058 = vmatpush.msrb.mxu2 %v1668_v45  ;;  %v1348_v25 = vld [vmem:[#allocation3 + $0x23a0] sm:$0xff]  ;;  %v1701_v2 = vld [vmem:[#allocation3 + $0x2ea8] sm:$0xff]  ;;  %v678_v36 = vld [vmem:[#allocation3 + $0xeb0] sm:$0xff] }
 0x240   :  { %3078 = vmatpush.msrb.mxu3 %v645_v46  ;;  %3019 = vmatpush.msrb.mxu0 %v612_v47  ;;  %v804_v1 = vld [vmem:[#allocation3 + $0x12a0] sm:$0xff]  ;;  %v1190_v45 = vld [vmem:[#allocation3 + $0x1eb0] sm:$0xff]  ;;  %v1157_v46 = vld [vmem:[#allocation3 + $0x1da8] sm:$0xff] }
 0x241   :  { %3039 = vmatpush.msrb.mxu1 %v1124_v48  ;;  %3059 = vmatpush.msrb.mxu2 %v1636_v3  ;;  %v292_v27 = vld [vmem:[#allocation3 + $0x2a0] sm:$0xff]  ;;  %v1669_v47 = vld [vmem:[#allocation3 + $0x2da8] sm:$0xff]  ;;  %v646_v48 = vld [vmem:[#allocation3 + $0xdb0] sm:$0xff] }
 0x242   :  { %3079 = vmatpush.msrb.mxu3 %v613_v49  ;;  %3020 = vmatpush.msrb.mxu0 %v580_v32  ;;  %v1316_v28 = vld [vmem:[#allocation3 + $0x22a0] sm:$0xff]  ;;  %v1158_v3 = vld [vmem:[#allocation3 + $0x1db0] sm:$0xff]  ;;  %v1125_v49 = vld [vmem:[#allocation3 + $0x1ca8] sm:$0xff] }
 0x243   :  { %3040 = vmatpush.msrb.mxu1 %v1092_v50  ;;  %3060 = vmatpush.msrb.mxu2 %v1604_v51  ;;  %v772_v30 = vld [vmem:[#allocation3 + $0x11a0] sm:$0xff]  ;;  %v1637_v32 = vld [vmem:[#allocation3 + $0x2ca8] sm:$0xff]  ;;  %v614_v50 = vld [vmem:[#allocation3 + $0xcb0] sm:$0xff] }
 0x244   :  { %3080 = vmatpush.msrb.mxu3 %v581_v52  ;;  %2952 = vmatmul.f32.vlgmr.msra.gmra.mxu0 %v6969_v59  ;;  %v260_v31 = vld [vmem:[#allocation3 + $0x1a0] sm:$0xff]  ;;  %v1126_v51 = vld [vmem:[#allocation3 + $0x1cb0] sm:$0xff]  ;;  %v1093_v52 = vld [vmem:[#allocation3 + $0x1ba8] sm:$0xff] }
 0x245   :  { %3041 = vmatpush.msrb.mxu1 %v1060_v53  ;;  %3021 = vmatpush.msrb.mxu0 %v548_v54  ;;  %v1284_v33 = vld [vmem:[#allocation3 + $0x21a0] sm:$0xff]  ;;  %v1605_v53 = vld [vmem:[#allocation3 + $0x2ba8] sm:$0xff]  ;;  %v582_v54 = vld [vmem:[#allocation3 + $0xbb0] sm:$0xff] }
 0x246   :  { %3061 = vmatpush.msrb.mxu2 %v1572_v56  ;;  %3081 = vmatpush.msrb.mxu3 %v549_v57  ;;  %v740_v18 = vld [vmem:[#allocation3 + $0x10a0] sm:$0xff]  ;;  %v1094_v56 = vld [vmem:[#allocation3 + $0x1bb0] sm:$0xff]  ;;  %v1061_v57 = vld [vmem:[#allocation3 + $0x1aa8] sm:$0xff] }
 0x247   :  { %3042 = vmatpush.msrb.mxu1 %v1028_v58  ;;  %3022 = vmatpush.msrb.mxu0 %v516_v60  ;;  %v228_v37 = vld [vmem:[#allocation3 + $0xa0] sm:$0xff]  ;;  %v1573_v58 = vld [vmem:[#allocation3 + $0x2aa8] sm:$0xff]  ;;  %v550_v60 = vld [vmem:[#allocation3 + $0xab0] sm:$0xff] }
 0x248   :  { %3062 = vmatpush.msrb.mxu2 %v1540_v61  ;;  %3082 = vmatpush.msrb.mxu3 %v517_v62  ;;  %v1252_v38 = vld [vmem:[#allocation3 + $0x20a0] sm:$0xff]  ;;  %v1062_v61 = vld [vmem:[#allocation3 + $0x1ab0] sm:$0xff]  ;;  %v1029_v62 = vld [vmem:[#allocation3 + $0x19a8] sm:$0xff] }
 0x249   :  { %3043 = vmatpush.msrb.mxu1 %v996_v63  ;;  %3023 = vmatpush.msrb.mxu0 %v484_v0  ;;  %v1541_v63 = vld [vmem:[#allocation3 + $0x29a8] sm:$0xff]  ;;  %v518_v0 = vld [vmem:[#allocation3 + $0x9b0] sm:$0xff] }
 0x24a   :  { %3063 = vmatpush.msrb.mxu2 %v1508_v4  ;;  %3083 = vmatpush.msrb.mxu3 %v485_v5  ;;  %v1030_v4 = vld [vmem:[#allocation3 + $0x19b0] sm:$0xff]  ;;  %v997_v5 = vld [vmem:[#allocation3 + $0x18a8] sm:$0xff] }
 0x24b   :  { %3044 = vmatpush.msrb.mxu1 %v964_v6  ;;  %3024 = vmatpush.msrb.mxu0 %v452_v7  ;;  %v1509_v6 = vld [vmem:[#allocation3 + $0x28a8] sm:$0xff]  ;;  %v486_v7 = vld [vmem:[#allocation3 + $0x8b0] sm:$0xff] }
 0x24c   :  { %3064 = vmatpush.msrb.mxu2 %v1476_v8  ;;  %3084 = vmatpush.msrb.mxu3 %v453_v39  ;;  %v998_v8 = vld [vmem:[#allocation3 + $0x18b0] sm:$0xff]  ;;  %v965_v39 = vld [vmem:[#allocation3 + $0x17a8] sm:$0xff] }
 0x24d   :  { %3045 = vmatpush.msrb.mxu1 %v932_v9  ;;  %3025 = vmatpush.msrb.mxu0 %v420_v10  ;;  %v1477_v9 = vld [vmem:[#allocation3 + $0x27a8] sm:$0xff]  ;;  %v454_v10 = vld [vmem:[#allocation3 + $0x7b0] sm:$0xff] }
 0x24e   :  { %3065 = vmatpush.msrb.mxu2 %v1444_v11  ;;  %3085 = vmatpush.msrb.mxu3 %v421_v12  ;;  %v966_v11 = vld [vmem:[#allocation3 + $0x17b0] sm:$0xff]  ;;  %v933_v12 = vld [vmem:[#allocation3 + $0x16a8] sm:$0xff] }
 0x24f   :  { %3046 = vmatpush.msrb.mxu1 %v900_v13  ;;  %3026 = vmatpush.msrb.mxu0 %v388_v14  ;;  %v1445_v13 = vld [vmem:[#allocation3 + $0x26a8] sm:$0xff]  ;;  %v422_v14 = vld [vmem:[#allocation3 + $0x6b0] sm:$0xff] }
 0x250   :  { %3066 = vmatpush.msrb.mxu2 %v1412_v15  ;;  %3086 = vmatpush.msrb.mxu3 %v389_v16  ;;  %v934_v15 = vld [vmem:[#allocation3 + $0x16b0] sm:$0xff]  ;;  %v901_v16 = vld [vmem:[#allocation3 + $0x15a8] sm:$0xff] }
 0x251   :  { %3047 = vmatpush.msrb.mxu1 %v868_v19  ;;  %3027 = vmatpush.msrb.mxu0 %v356_v20  ;;  %v1413_v19 = vld [vmem:[#allocation3 + $0x25a8] sm:$0xff]  ;;  %v390_v20 = vld [vmem:[#allocation3 + $0x5b0] sm:$0xff] }
 0x252   :  { %3067 = vmatpush.msrb.mxu2 %v1380_v21  ;;  %3087 = vmatpush.msrb.mxu3 %v357_v22  ;;  %v902_v21 = vld [vmem:[#allocation3 + $0x15b0] sm:$0xff]  ;;  %v869_v22 = vld [vmem:[#allocation3 + $0x14a8] sm:$0xff] }
 0x253   :  { %3048 = vmatpush.msrb.mxu1 %v836_v23  ;;  %3028 = vmatpush.msrb.mxu0 %v324_v24  ;;  %v1381_v23 = vld [vmem:[#allocation3 + $0x24a8] sm:$0xff]  ;;  %v358_v24 = vld [vmem:[#allocation3 + $0x4b0] sm:$0xff] }
 0x254   :  { %3068 = vmatpush.msrb.mxu2 %v1348_v25  ;;  %3088 = vmatpush.msrb.mxu3 %v325_v26  ;;  %v870_v25 = vld [vmem:[#allocation3 + $0x14b0] sm:$0xff]  ;;  %v837_v26 = vld [vmem:[#allocation3 + $0x13a8] sm:$0xff] }
 0x255   :  { %3049 = vmatpush.msrb.mxu1 %v804_v1  ;;  %3029 = vmatpush.msrb.mxu0 %v292_v27  ;;  %v1349_v1 = vld [vmem:[#allocation3 + $0x23a8] sm:$0xff]  ;;  %v326_v27 = vld [vmem:[#allocation3 + $0x3b0] sm:$0xff] }
 0x256   :  { %3069 = vmatpush.msrb.mxu2 %v1316_v28  ;;  %3089 = vmatpush.msrb.mxu3 %v293_v29  ;;  %v838_v28 = vld [vmem:[#allocation3 + $0x13b0] sm:$0xff]  ;;  %v805_v29 = vld [vmem:[#allocation3 + $0x12a8] sm:$0xff] }
 0x257   :  { %3050 = vmatpush.msrb.mxu1 %v772_v30  ;;  %3030 = vmatpush.msrb.mxu0 %v260_v31  ;;  %v1317_v30 = vld [vmem:[#allocation3 + $0x22a8] sm:$0xff]  ;;  %v294_v31 = vld [vmem:[#allocation3 + $0x2b0] sm:$0xff] }
 0x258   :  { %3070 = vmatpush.msrb.mxu2 %v1284_v33  ;;  %3090 = vmatpush.msrb.mxu3 %v261_v34  ;;  %v806_v33 = vld [vmem:[#allocation3 + $0x12b0] sm:$0xff]  ;;  %v773_v34 = vld [vmem:[#allocation3 + $0x11a8] sm:$0xff] }
 0x259   :  { %3051 = vmatpush.msrb.mxu1 %v740_v18  ;;  %3031 = vmatpush.msrb.mxu0 %v228_v37  ;;  %v1285_v18 = vld [vmem:[#allocation3 + $0x21a8] sm:$0xff]  ;;  %v262_v37 = vld [vmem:[#allocation3 + $0x1b0] sm:$0xff] }
 0x25a   :  { %3071 = vmatpush.msrb.mxu2 %v1252_v38  ;;  %3091 = vmatpush.msrb.mxu3 %v229_v40  ;;  %v774_v38 = vld [vmem:[#allocation3 + $0x11b0] sm:$0xff]  ;;  %v741_v40 = vld [vmem:[#allocation3 + $0x10a8] sm:$0xff] }
 0x25b   :  { %2972 = vmatmul.f32.vlgmr.msra.gmra.mxu1 %v6951_v35  ;;  %2992 = vmatmul.f32.vlgmr.msra.gmra.mxu2 %v6960_v55 }
 0x25c   :  { %3012 = vmatmul.f32.vlgmr.msra.gmra.mxu3 %v6969_v59  ;;  %3096 = vmatpush.msra.mxu0 %v1221_v41  ;;  %v1253_v41 = vld [vmem:[#allocation3 + $0x20a8] sm:$0xff] }
 0x25d   :  { %3116 = vmatpush.msra.mxu1 %v1733_v42  ;;  %3136 = vmatpush.msra.mxu2 %v710_v43  ;;  %v230_v42 = vld [vmem:[#allocation3 + $0xb0] sm:$0xff] }
 0x25e   :  { %3156 = vmatpush.msra.mxu3 %v1222_v44  ;;  %3097 = vmatpush.msra.mxu0 %v1189_v17  ;;  %v742_v43 = vld [vmem:[#allocation3 + $0x10b0] sm:$0xff]  ;;  %v711_v17 = vld [vmem:[#allocation3 + $0xfb8] sm:$0xff] }
 0x25f   :  { %3117 = vmatpush.msra.mxu1 %v1701_v2  ;;  %3137 = vmatpush.msra.mxu2 %v678_v36  ;;  %v1734_v44 = vld [vmem:[#allocation3 + $0x2fb0] sm:$0xff]  ;;  %v1223_v2 = vld [vmem:[#allocation3 + $0x1fb8] sm:$0xff] }
 0x260   :  { %3157 = vmatpush.msra.mxu3 %v1190_v45  ;;  %3098 = vmatpush.msra.mxu0 %v1157_v46  ;;  %v1735_v36 = vld [vmem:[#allocation3 + $0x2fb8] sm:$0xff]  ;;  %v1702_v45 = vld [vmem:[#allocation3 + $0x2eb0] sm:$0xff] }
 0x261   :  { %3118 = vmatpush.msra.mxu1 %v1669_v47  ;;  %3138 = vmatpush.msra.mxu2 %v646_v48  ;;  %v679_v46 = vld [vmem:[#allocation3 + $0xeb8] sm:$0xff] }
 0x262   :  { %3158 = vmatpush.msra.mxu3 %v1158_v3  ;;  %3099 = vmatpush.msra.mxu0 %v1125_v49  ;;  %v1191_v47 = vld [vmem:[#allocation3 + $0x1eb8] sm:$0xff]  ;;  %v1670_v3 = vld [vmem:[#allocation3 + $0x2db0] sm:$0xff] }
 0x263   :  { %3119 = vmatpush.msra.mxu1 %v1637_v32  ;;  %3139 = vmatpush.msra.mxu2 %v614_v50  ;;  %v1703_v48 = vld [vmem:[#allocation3 + $0x2eb8] sm:$0xff] }
 0x264   :  { %3159 = vmatpush.msra.mxu3 %v1126_v51  ;;  %3100 = vmatpush.msra.mxu0 %v1093_v52  ;;  %v647_v49 = vld [vmem:[#allocation3 + $0xdb8] sm:$0xff]  ;;  %v1638_v51 = vld [vmem:[#allocation3 + $0x2cb0] sm:$0xff] }
 0x265   :  { %3120 = vmatpush.msra.mxu1 %v1605_v53  ;;  %3140 = vmatpush.msra.mxu2 %v582_v54  ;;  %v1159_v32 = vld [vmem:[#allocation3 + $0x1db8] sm:$0xff]  ;;  %v1606_v54 = vld [vmem:[#allocation3 + $0x2bb0] sm:$0xff] }
 0x266   :  { %3160 = vmatpush.msra.mxu3 %v1094_v56  ;;  %3101 = vmatpush.msra.mxu0 %v1061_v57  ;;  %v1671_v50 = vld [vmem:[#allocation3 + $0x2db8] sm:$0xff] }
 0x267   :  { %3121 = vmatpush.msra.mxu1 %v1573_v58  ;;  %3141 = vmatpush.msra.mxu2 %v550_v60  ;;  %v615_v52 = vld [vmem:[#allocation3 + $0xcb8] sm:$0xff] }
 0x268   :  { %3161 = vmatpush.msra.mxu3 %v1062_v61  ;;  %3102 = vmatpush.msra.mxu0 %v1029_v62  ;;  %v1639_v53 = vld [vmem:[#allocation3 + $0x2cb8] sm:$0xff]  ;;  %v1574_v61 = vld [vmem:[#allocation3 + $0x2ab0] sm:$0xff] }
 0x269   :  { %3122 = vmatpush.msra.mxu1 %v1541_v63  ;;  %3142 = vmatpush.msra.mxu2 %v518_v0  ;;  %v583_v56 = vld [vmem:[#allocation3 + $0xbb8] sm:$0xff]  ;;  %v1542_v0 = vld [vmem:[#allocation3 + $0x29b0] sm:$0xff] }
 0x26a   :  { %3162 = vmatpush.msra.mxu3 %v1030_v4  ;;  %3103 = vmatpush.msra.mxu0 %v997_v5  ;;  %v1095_v57 = vld [vmem:[#allocation3 + $0x1bb8] sm:$0xff] }
 0x26b   :  { %3123 = vmatpush.msra.mxu1 %v1509_v6  ;;  %3143 = vmatpush.msra.mxu2 %v486_v7  ;;  %v1607_v58 = vld [vmem:[#allocation3 + $0x2bb8] sm:$0xff]  ;;  %v1510_v7 = vld [vmem:[#allocation3 + $0x28b0] sm:$0xff] }
 0x26c   :  { %3163 = vmatpush.msra.mxu3 %v998_v8  ;;  %3104 = vmatpush.msra.mxu0 %v965_v39  ;;  %v551_v60 = vld [vmem:[#allocation3 + $0xab8] sm:$0xff] }
 0x26d   :  { %3124 = vmatpush.msra.mxu1 %v1477_v9  ;;  %3144 = vmatpush.msra.mxu2 %v454_v10  ;;  %v1063_v62 = vld [vmem:[#allocation3 + $0x1ab8] sm:$0xff]  ;;  %v1478_v10 = vld [vmem:[#allocation3 + $0x27b0] sm:$0xff] }
 0x26e   :  { %3164 = vmatpush.msra.mxu3 %v966_v11  ;;  %3105 = vmatpush.msra.mxu0 %v933_v12  ;;  %v1575_v63 = vld [vmem:[#allocation3 + $0x2ab8] sm:$0xff] }
 0x26f   :  { %3125 = vmatpush.msra.mxu1 %v1445_v13  ;;  %3145 = vmatpush.msra.mxu2 %v422_v14  ;;  %v519_v4 = vld [vmem:[#allocation3 + $0x9b8] sm:$0xff]  ;;  %v1446_v14 = vld [vmem:[#allocation3 + $0x26b0] sm:$0xff] }
 0x270   :  { %3165 = vmatpush.msra.mxu3 %v934_v15  ;;  %3106 = vmatpush.msra.mxu0 %v901_v16  ;;  %v1031_v5 = vld [vmem:[#allocation3 + $0x19b8] sm:$0xff] }
 0x271   :  { %3126 = vmatpush.msra.mxu1 %v1413_v19  ;;  %3146 = vmatpush.msra.mxu2 %v390_v20  ;;  %v1543_v6 = vld [vmem:[#allocation3 + $0x29b8] sm:$0xff]  ;;  %v1414_v20 = vld [vmem:[#allocation3 + $0x25b0] sm:$0xff] }
 0x272   :  { %3166 = vmatpush.msra.mxu3 %v902_v21  ;;  %3107 = vmatpush.msra.mxu0 %v869_v22  ;;  %v487_v8 = vld [vmem:[#allocation3 + $0x8b8] sm:$0xff] }
 0x273   :  { %3127 = vmatpush.msra.mxu1 %v1381_v23  ;;  %3147 = vmatpush.msra.mxu2 %v358_v24  ;;  %v999_v39 = vld [vmem:[#allocation3 + $0x18b8] sm:$0xff]  ;;  %v1382_v24 = vld [vmem:[#allocation3 + $0x24b0] sm:$0xff] }
 0x274   :  { %3167 = vmatpush.msra.mxu3 %v870_v25  ;;  %3108 = vmatpush.msra.mxu0 %v837_v26  ;;  %v1511_v9 = vld [vmem:[#allocation3 + $0x28b8] sm:$0xff] }
 0x275   :  { %3128 = vmatpush.msra.mxu1 %v1349_v1  ;;  %3148 = vmatpush.msra.mxu2 %v326_v27  ;;  %v455_v11 = vld [vmem:[#allocation3 + $0x7b8] sm:$0xff]  ;;  %v1350_v27 = vld [vmem:[#allocation3 + $0x23b0] sm:$0xff] }
 0x276   :  { %3168 = vmatpush.msra.mxu3 %v838_v28  ;;  %3109 = vmatpush.msra.mxu0 %v805_v29  ;;  %v967_v12 = vld [vmem:[#allocation3 + $0x17b8] sm:$0xff] }
 0x277   :  { %3129 = vmatpush.msra.mxu1 %v1317_v30  ;;  %3149 = vmatpush.msra.mxu2 %v294_v31  ;;  %v1479_v13 = vld [vmem:[#allocation3 + $0x27b8] sm:$0xff]  ;;  %v1318_v31 = vld [vmem:[#allocation3 + $0x22b0] sm:$0xff] }
 0x278   :  { %3169 = vmatpush.msra.mxu3 %v806_v33  ;;  %3110 = vmatpush.msra.mxu0 %v773_v34  ;;  %v423_v15 = vld [vmem:[#allocation3 + $0x6b8] sm:$0xff] }
 0x279   :  { %3130 = vmatpush.msra.mxu1 %v1285_v18  ;;  %3150 = vmatpush.msra.mxu2 %v262_v37  ;;  %v935_v16 = vld [vmem:[#allocation3 + $0x16b8] sm:$0xff]  ;;  %v1286_v37 = vld [vmem:[#allocation3 + $0x21b0] sm:$0xff] }
 0x27a   :  { %3170 = vmatpush.msra.mxu3 %v774_v38  ;;  %3111 = vmatpush.msra.mxu0 %v741_v40  ;;  %v1447_v19 = vld [vmem:[#allocation3 + $0x26b8] sm:$0xff] }
 0x27b   :  { %3131 = vmatpush.msra.mxu1 %v1253_v41  ;;  %3151 = vmatpush.msra.mxu2 %v230_v42  ;;  %v391_v21 = vld [vmem:[#allocation3 + $0x5b8] sm:$0xff]  ;;  %v1254_v42 = vld [vmem:[#allocation3 + $0x20b0] sm:$0xff] }
 0x27c   :  { %3171 = vmatpush.msra.mxu3 %v742_v43  ;;  %3032 = vmatmul.f32.vlgmr.msrb.gmra.mxu0 %v6951_v35  ;;  %v903_v22 = vld [vmem:[#allocation3 + $0x15b8] sm:$0xff] }
 0x27d   :  { %3052 = vmatmul.f32.vlgmr.msrb.gmra.mxu1 %v6960_v55  ;;  %3072 = vmatmul.f32.vlgmr.msrb.gmra.mxu2 %v6969_v59  ;;  %v1415_v23 = vld [vmem:[#allocation3 + $0x25b8] sm:$0xff] }
 0x27e   :  { %3092 = vmatmul.f32.vlgmr.msrb.gmra.mxu3 %v6951_v35  ;;  %3176 = vmatpush.msrb.mxu0 %v1734_v44  ;;  %v1127_v35 = vld [vmem:[#allocation3 + $0x1cb8] sm:$0xff] }
 0x27f   :  { %3196 = vmatpush.msrb.mxu1 %v711_v17  ;;  %3216 = vmatpush.msrb.mxu2 %v1223_v2  ;;  %v359_v25 = vld [vmem:[#allocation3 + $0x4b8] sm:$0xff]  ;;  %v712_v2 = vld [vmem:[#allocation3 + $0xfc0] sm:$0xff] }
 0x280   :  { %3236 = vmatpush.msrb.mxu3 %v1735_v36  ;;  %3177 = vmatpush.msrb.mxu0 %v1702_v45  ;;  %v871_v26 = vld [vmem:[#allocation3 + $0x14b8] sm:$0xff]  ;;  %v1224_v36 = vld [vmem:[#allocation3 + $0x1fc0] sm:$0xff] }
 0x281   :  { %3197 = vmatpush.msrb.mxu1 %v679_v46  ;;  %3217 = vmatpush.msrb.mxu2 %v1191_v47  ;;  %v1383_v1 = vld [vmem:[#allocation3 + $0x24b8] sm:$0xff]  ;;  %v1736_v45 = vld [vmem:[#allocation3 + $0x2fc0] sm:$0xff]  ;;  %v713_v46 = vld [vmem:[#allocation3 + $0xfc8] sm:$0xff] }
 0x282   :  { %3237 = vmatpush.msrb.mxu3 %v1703_v48  ;;  %3178 = vmatpush.msrb.mxu0 %v1670_v3  ;;  %v327_v28 = vld [vmem:[#allocation3 + $0x3b8] sm:$0xff]  ;;  %v680_v48 = vld [vmem:[#allocation3 + $0xec0] sm:$0xff] }
 0x283   :  { %3198 = vmatpush.msrb.mxu1 %v647_v49  ;;  %3218 = vmatpush.msrb.mxu2 %v1159_v32  ;;  %v839_v29 = vld [vmem:[#allocation3 + $0x13b8] sm:$0xff]  ;;  %v1192_v3 = vld [vmem:[#allocation3 + $0x1ec0] sm:$0xff]  ;;  %v681_v32 = vld [vmem:[#allocation3 + $0xec8] sm:$0xff] }
 0x284   :  { %3238 = vmatpush.msrb.mxu3 %v1671_v50  ;;  %3179 = vmatpush.msrb.mxu0 %v1638_v51  ;;  %v1351_v30 = vld [vmem:[#allocation3 + $0x23b8] sm:$0xff]  ;;  %v1704_v49 = vld [vmem:[#allocation3 + $0x2ec0] sm:$0xff] }
 0x285   :  { %3199 = vmatpush.msrb.mxu1 %v615_v52  ;;  %3219 = vmatpush.msrb.mxu2 %v1127_v35  ;;  %v295_v33 = vld [vmem:[#allocation3 + $0x2b8] sm:$0xff]  ;;  %v648_v50 = vld [vmem:[#allocation3 + $0xdc0] sm:$0xff]  ;;  %v649_v35 = vld [vmem:[#allocation3 + $0xdc8] sm:$0xff] }
 0x286   :  { %3239 = vmatpush.msrb.mxu3 %v1639_v53  ;;  %3180 = vmatpush.msrb.mxu0 %v1606_v54  ;;  %v807_v34 = vld [vmem:[#allocation3 + $0x12b8] sm:$0xff]  ;;  %v1160_v51 = vld [vmem:[#allocation3 + $0x1dc0] sm:$0xff] }
 0x287   :  { %3200 = vmatpush.msrb.mxu1 %v583_v56  ;;  %3220 = vmatpush.msrb.mxu2 %v1095_v57  ;;  %v1319_v18 = vld [vmem:[#allocation3 + $0x22b8] sm:$0xff]  ;;  %v1672_v52 = vld [vmem:[#allocation3 + $0x2dc0] sm:$0xff]  ;;  %v617_v56 = vld [vmem:[#allocation3 + $0xcc8] sm:$0xff] }
 0x288   :  { %3240 = vmatpush.msrb.mxu3 %v1607_v58  ;;  %3112 = vmatmul.f32.vlgmr.msra.gmra.mxu0 %v6960_v55  ;;  %v263_v38 = vld [vmem:[#allocation3 + $0x1b8] sm:$0xff]  ;;  %v616_v53 = vld [vmem:[#allocation3 + $0xcc0] sm:$0xff] }
 0x289   :  { %3201 = vmatpush.msrb.mxu1 %v551_v60  ;;  %3181 = vmatpush.msrb.mxu0 %v1574_v61  ;;  %v775_v40 = vld [vmem:[#allocation3 + $0x11b8] sm:$0xff]  ;;  %v1128_v54 = vld [vmem:[#allocation3 + $0x1cc0] sm:$0xff]  ;;  %v585_v61 = vld [vmem:[#allocation3 + $0xbc8] sm:$0xff] }
 0x28a   :  { %3221 = vmatpush.msrb.mxu2 %v1063_v62  ;;  %3241 = vmatpush.msrb.mxu3 %v1575_v63  ;;  %v1287_v41 = vld [vmem:[#allocation3 + $0x21b8] sm:$0xff]  ;;  %v584_v57 = vld [vmem:[#allocation3 + $0xbc0] sm:$0xff]  ;;  %v6988_v63 = vpop.f32.mrf.mxu1 }
 0x28b   :  { %3132 = vmatmul.f32.vlgmr.msra.gmra.mxu1 %v6969_v59  ;;  %3182 = vmatpush.msrb.mxu0 %v1542_v0  ;;  %v231_v43 = vld [vmem:[#allocation3 + $0xb8] sm:$0xff]  ;;  %v1096_v58 = vld [vmem:[#allocation3 + $0x1bc0] sm:$0xff] }
 0x28c   :  { %3202 = vmatpush.msrb.mxu1 %v519_v4  ;;  %3222 = vmatpush.msrb.mxu2 %v1031_v5  ;;  %v743_v44 = vld [vmem:[#allocation3 + $0x10b8] sm:$0xff]  ;;  %v1608_v60 = vld [vmem:[#allocation3 + $0x2bc0] sm:$0xff]  ;;  %v553_v5 = vld [vmem:[#allocation3 + $0xac8] sm:$0xff] }
 0x28d   :  { %3242 = vmatpush.msrb.mxu3 %v1543_v6  ;;  %3183 = vmatpush.msrb.mxu0 %v1510_v7  ;;  %v1255_v17 = vld [vmem:[#allocation3 + $0x20b8] sm:$0xff]  ;;  %v1064_v62 = vld [vmem:[#allocation3 + $0x1ac0] sm:$0xff] }
 0x28e   :  { %3203 = vmatpush.msrb.mxu1 %v487_v8  ;;  %3223 = vmatpush.msrb.mxu2 %v999_v39  ;;  %v6984_v47 = vld [vmem:[%s7538_s0] sm:$0xff]  ;;  %v521_v39 = vld [vmem:[#allocation3 + $0x9c8] sm:$0xff] }
 0x28f   :  { %3243 = vmatpush.msrb.mxu3 %v1511_v9  ;;  %3184 = vmatpush.msrb.mxu0 %v1478_v10  ;;  %v552_v0 = vld [vmem:[#allocation3 + $0xac0] sm:$0xff] }
 0x290   :  { %3204 = vmatpush.msrb.mxu1 %v455_v11  ;;  %3224 = vmatpush.msrb.mxu2 %v967_v12  ;;  %v1576_v4 = vld [vmem:[#allocation3 + $0x2ac0] sm:$0xff]  ;;  %v489_v12 = vld [vmem:[#allocation3 + $0x8c8] sm:$0xff] }
 0x291   :  { %3244 = vmatpush.msrb.mxu3 %v1479_v13  ;;  %3185 = vmatpush.msrb.mxu0 %v1446_v14  ;;  %v1032_v6 = vld [vmem:[#allocation3 + $0x19c0] sm:$0xff] }
 0x292   :  { %3205 = vmatpush.msrb.mxu1 %v423_v15  ;;  %3225 = vmatpush.msrb.mxu2 %v935_v16  ;;  %v520_v7 = vld [vmem:[#allocation3 + $0x9c0] sm:$0xff]  ;;  %v457_v16 = vld [vmem:[#allocation3 + $0x7c8] sm:$0xff] }
 0x293   :  { %3245 = vmatpush.msrb.mxu3 %v1447_v19  ;;  %3186 = vmatpush.msrb.mxu0 %v1414_v20  ;;  %v1544_v8 = vld [vmem:[#allocation3 + $0x29c0] sm:$0xff] }
 0x294   :  { %3206 = vmatpush.msrb.mxu1 %v391_v21  ;;  %3226 = vmatpush.msrb.mxu2 %v903_v22  ;;  %v1000_v9 = vld [vmem:[#allocation3 + $0x18c0] sm:$0xff]  ;;  %v425_v22 = vld [vmem:[#allocation3 + $0x6c8] sm:$0xff] }
 0x295   :  { %3246 = vmatpush.msrb.mxu3 %v1415_v23  ;;  %3187 = vmatpush.msrb.mxu0 %v1382_v24  ;;  %v488_v10 = vld [vmem:[#allocation3 + $0x8c0] sm:$0xff]  ;;  %v6991_v24 = vpop.f32.mrf.mxu2 }
 0x296   :  { %3207 = vmatpush.msrb.mxu1 %v359_v25  ;;  %3227 = vmatpush.msrb.mxu2 %v871_v26  ;;  %v1512_v11 = vld [vmem:[#allocation3 + $0x28c0] sm:$0xff]  ;;  %v6993_v25 = vpop.f32.mrf.mxu1 }
 0x297   :  { %3247 = vmatpush.msrb.mxu3 %v1383_v1  ;;  %3188 = vmatpush.msrb.mxu0 %v1350_v27  ;;  %v968_v13 = vld [vmem:[#allocation3 + $0x17c0] sm:$0xff]  ;;  %v393_v27 = vld [vmem:[#allocation3 + $0x5c8] sm:$0xff] }
 0x298   :  { %3208 = vmatpush.msrb.mxu1 %v327_v28  ;;  %3228 = vmatpush.msrb.mxu2 %v839_v29  ;;  %v456_v14 = vld [vmem:[#allocation3 + $0x7c0] sm:$0xff] }
 0x299   :  { %3248 = vmatpush.msrb.mxu3 %v1351_v30  ;;  %3189 = vmatpush.msrb.mxu0 %v1318_v31  ;;  %v1480_v15 = vld [vmem:[#allocation3 + $0x27c0] sm:$0xff]  ;;  %v361_v31 = vld [vmem:[#allocation3 + $0x4c8] sm:$0xff] }
 0x29a   :  { %3209 = vmatpush.msrb.mxu1 %v295_v33  ;;  %3229 = vmatpush.msrb.mxu2 %v807_v34  ;;  %v936_v19 = vld [vmem:[#allocation3 + $0x16c0] sm:$0xff] }
 0x29b   :  { %3249 = vmatpush.msrb.mxu3 %v1319_v18  ;;  %3190 = vmatpush.msrb.mxu0 %v1286_v37  ;;  %v424_v20 = vld [vmem:[#allocation3 + $0x6c0] sm:$0xff]  ;;  %v329_v37 = vld [vmem:[#allocation3 + $0x3c8] sm:$0xff] }
 0x29c   :  { %3210 = vmatpush.msrb.mxu1 %v263_v38  ;;  %3230 = vmatpush.msrb.mxu2 %v775_v40  ;;  %v1448_v21 = vld [vmem:[#allocation3 + $0x26c0] sm:$0xff] }
 0x29d   :  { %3250 = vmatpush.msrb.mxu3 %v1287_v41  ;;  %3191 = vmatpush.msrb.mxu0 %v1254_v42  ;;  %v904_v23 = vld [vmem:[#allocation3 + $0x15c0] sm:$0xff] }
 0x29e   :  { %3211 = vmatpush.msrb.mxu1 %v231_v43  ;;  %3231 = vmatpush.msrb.mxu2 %v743_v44  ;;  %v392_v26 = vld [vmem:[#allocation3 + $0x5c0] sm:$0xff]  ;;  %v297_v43 = vld [vmem:[#allocation3 + $0x2c8] sm:$0xff]  ;;  %v7001_v44 = vpop.f32.mrf.mxu2 }
 0x29f   :  { %3251 = vmatpush.msrb.mxu3 %v1255_v17  ;;  %3152 = vmatmul.f32.vlgmr.msra.gmra.mxu2 %v6984_v47  ;;  %v1416_v1 = vld [vmem:[#allocation3 + $0x25c0] sm:$0xff]  ;;  %v7003_v17 = vpop.f32.mrf.mxu1 }
 0x2a0   :  { %3172 = vmatmul.f32.vlgmr.msra.gmra.mxu3 %v6960_v55  ;;  %3256 = vmatpush.msra.mxu0 %v712_v2  ;;  %v1640_v55 = vld [vmem:[#allocation3 + $0x2cc0] sm:$0xff] }
 0x2a1   :  { %3276 = vmatpush.msra.mxu1 %v1224_v36  ;;  %3296 = vmatpush.msra.mxu2 %v1736_v45  ;;  %v872_v28 = vld [vmem:[#allocation3 + $0x14c0] sm:$0xff] }
 0x2a2   :  { %3316 = vmatpush.msra.mxu3 %v713_v46  ;;  %3257 = vmatpush.msra.mxu0 %v680_v48  ;;  %v360_v29 = vld [vmem:[#allocation3 + $0x4c0] sm:$0xff]  ;;  %v265_v46 = vld [vmem:[#allocation3 + $0x1c8] sm:$0xff] }
 0x2a3   :  { %3277 = vmatpush.msra.mxu1 %v1192_v3  ;;  %3297 = vmatpush.msra.mxu2 %v1704_v49  ;;  %v1384_v30 = vld [vmem:[#allocation3 + $0x24c0] sm:$0xff]  ;;  %v7005_v3 = vpop.f32.mrf.mxu3 }
 0x2a4   :  { %3317 = vmatpush.msra.mxu3 %v681_v32  ;;  %3258 = vmatpush.msra.mxu0 %v648_v50  ;;  %v328_v33 = vld [vmem:[#allocation3 + $0x3c0] sm:$0xff]  ;;  %v233_v50 = vld [vmem:[#allocation3 + $0xc8] sm:$0xff] }
 0x2a5   :  { %3278 = vmatpush.msra.mxu1 %v1160_v51  ;;  %3298 = vmatpush.msra.mxu2 %v1672_v52  ;;  %v840_v34 = vld [vmem:[#allocation3 + $0x13c0] sm:$0xff]  ;;  %v1225_v51 = vld [vmem:[#allocation3 + $0x1fc8] sm:$0xff] }
 0x2a6   :  { %3318 = vmatpush.msra.mxu3 %v649_v35  ;;  %3259 = vmatpush.msra.mxu0 %v616_v53  ;;  %v1352_v18 = vld [vmem:[#allocation3 + $0x23c0] sm:$0xff]  ;;  %v1737_v52 = vld [vmem:[#allocation3 + $0x2fc8] sm:$0xff]  ;;  %v714_v35 = vld [vmem:[#allocation3 + $0xfd0] sm:$0xff] }
 0x2a7   :  { %3279 = vmatpush.msra.mxu1 %v1128_v54  ;;  %3299 = vmatpush.msra.mxu2 %v1640_v55  ;;  %v6998_v38 = vld [vmem:[%s7538_s0 + $0x8] sm:$0xff]  ;;  %v1226_v53 = vld [vmem:[#allocation3 + $0x1fd0] sm:$0xff]  ;;  %v7009_v54 = vpop.f32.mrf.mxu2  ;;  %v7011_v55 = vpop.f32.mrf.mxu1 }
 0x2a8   :  { %3319 = vmatpush.msra.mxu3 %v617_v56  ;;  %3260 = vmatpush.msra.mxu0 %v584_v57  ;;  %v296_v40 = vld [vmem:[#allocation3 + $0x2c0] sm:$0xff]  ;;  %7552 = vst [vmem:[#allocation26_spill] sm:$0xff] %v7009_v54  ;;  %v1193_v56 = vld [vmem:[#allocation3 + $0x1ec8] sm:$0xff] }
 0x2a9   :  { %3280 = vmatpush.msra.mxu1 %v1096_v58  ;;  %3300 = vmatpush.msra.mxu2 %v1608_v60  ;;  %v808_v41 = vld [vmem:[#allocation3 + $0x12c0] sm:$0xff]  ;;  %7553 = vst [vmem:[#allocation27_spill] sm:$0xff] %v7011_v55  ;;  %v1705_v57 = vld [vmem:[#allocation3 + $0x2ec8] sm:$0xff]  ;;  %v682_v58 = vld [vmem:[#allocation3 + $0xed0] sm:$0xff] }
 0x2aa   :  { %3320 = vmatpush.msra.mxu3 %v585_v61  ;;  %3192 = vmatmul.f32.vlgmr.msrb.gmra.mxu0 %v6969_v59  ;;  %v1320_v42 = vld [vmem:[#allocation3 + $0x22c0] sm:$0xff]  ;;  %v1194_v60 = vld [vmem:[#allocation3 + $0x1ed0] sm:$0xff]  ;;  %v1161_v61 = vld [vmem:[#allocation3 + $0x1dc8] sm:$0xff] }
 0x2ab   :  { %3281 = vmatpush.msra.mxu1 %v1064_v62  ;;  %3261 = vmatpush.msra.mxu0 %v552_v0  ;;  %v264_v2 = vld [vmem:[#allocation3 + $0x1c0] sm:$0xff]  ;;  %v7015_v62 = vpop.f32.mrf.mxu3  ;;  %v1673_v0 = vld [vmem:[#allocation3 + $0x2dc8] sm:$0xff] }
 0x2ac   :  { %3301 = vmatpush.msra.mxu2 %v1576_v4  ;;  %3321 = vmatpush.msra.mxu3 %v553_v5  ;;  %v776_v36 = vld [vmem:[#allocation3 + $0x11c0] sm:$0xff]  ;;  %v650_v4 = vld [vmem:[#allocation3 + $0xdd0] sm:$0xff]  ;;  %v1129_v5 = vld [vmem:[#allocation3 + $0x1cc8] sm:$0xff] }
 0x2ad   :  { %3282 = vmatpush.msra.mxu1 %v1032_v6  ;;  %3262 = vmatpush.msra.mxu0 %v520_v7  ;;  %v1288_v45 = vld [vmem:[#allocation3 + $0x21c0] sm:$0xff]  ;;  %v1641_v6 = vld [vmem:[#allocation3 + $0x2cc8] sm:$0xff]  ;;  %v618_v7 = vld [vmem:[#allocation3 + $0xcd0] sm:$0xff] }
 0x2ae   :  { %3302 = vmatpush.msra.mxu2 %v1544_v8  ;;  %3322 = vmatpush.msra.mxu3 %v521_v39  ;;  %v232_v48 = vld [vmem:[#allocation3 + $0xc0] sm:$0xff]  ;;  %v1130_v8 = vld [vmem:[#allocation3 + $0x1cd0] sm:$0xff]  ;;  %v1097_v39 = vld [vmem:[#allocation3 + $0x1bc8] sm:$0xff] }
 0x2af   :  { %3283 = vmatpush.msra.mxu1 %v1000_v9  ;;  %3263 = vmatpush.msra.mxu0 %v488_v10  ;;  %v744_v49 = vld [vmem:[#allocation3 + $0x10c0] sm:$0xff]  ;;  %v1609_v9 = vld [vmem:[#allocation3 + $0x2bc8] sm:$0xff]  ;;  %v586_v10 = vld [vmem:[#allocation3 + $0xbd0] sm:$0xff] }
 0x2b0   :  { %3303 = vmatpush.msra.mxu2 %v1512_v11  ;;  %3323 = vmatpush.msra.mxu3 %v489_v12  ;;  %v1256_v32 = vld [vmem:[#allocation3 + $0x20c0] sm:$0xff]  ;;  %v7018_v11 = vpop.f32.mrf.mxu2  ;;  %v1098_v12 = vld [vmem:[#allocation3 + $0x1bd0] sm:$0xff] }
 0x2b1   :  { %3284 = vmatpush.msra.mxu1 %v968_v13  ;;  %3264 = vmatpush.msra.mxu0 %v456_v14  ;;  %7554 = vst [vmem:[#allocation28_spill] sm:$0xff] %v7018_v11  ;;  %v1065_v13 = vld [vmem:[#allocation3 + $0x1ac8] sm:$0xff]  ;;  %v3984_v54 = vld [vmem:[#allocation7 + $0x600] sm:$0xff] }
 0x2b2   :  { %3304 = vmatpush.msra.mxu2 %v1480_v15  ;;  %3324 = vmatpush.msra.mxu3 %v457_v16  ;;  %v1577_v14 = vld [vmem:[#allocation3 + $0x2ac8] sm:$0xff]  ;;  %v554_v15 = vld [vmem:[#allocation3 + $0xad0] sm:$0xff]  ;;  %v7020_v16 = vpop.f32.mrf.mxu1 }
 0x2b3   :  { %3285 = vmatpush.msra.mxu1 %v936_v19  ;;  %3265 = vmatpush.msra.mxu0 %v424_v20  ;;  %7555 = vst [vmem:[#allocation29_spill] sm:$0xff] %v7020_v16  ;;  %v1066_v19 = vld [vmem:[#allocation3 + $0x1ad0] sm:$0xff]  ;;  %v1033_v20 = vld [vmem:[#allocation3 + $0x19c8] sm:$0xff] }
 0x2b4   :  { %3305 = vmatpush.msra.mxu2 %v1448_v21  ;;  %3325 = vmatpush.msra.mxu3 %v425_v22  ;;  %v7022_v21 = vpop.f32.mrf.mxu3  ;;  %v1545_v22 = vld [vmem:[#allocation3 + $0x29c8] sm:$0xff] }
 0x2b5   :  { %3286 = vmatpush.msra.mxu1 %v904_v23  ;;  %3266 = vmatpush.msra.mxu0 %v392_v26  ;;  %7556 = vst [vmem:[#allocation30_spill] sm:$0xff] %v7022_v21  ;;  %v522_v23 = vld [vmem:[#allocation3 + $0x9d0] sm:$0xff]  ;;  %v301_v16 = vld [vmem:[#allocation3 + $0x2e8] sm:$0xff]  ;;  %v4120_v21 = vld [vmem:[#allocation7 + $0xa40] sm:$0xff] }
 0x2b6   :  { %3306 = vmatpush.msra.mxu2 %v1416_v1  ;;  %3326 = vmatpush.msra.mxu3 %v393_v27  ;;  %v1034_v26 = vld [vmem:[#allocation3 + $0x19d0] sm:$0xff]  ;;  %v1001_v1 = vld [vmem:[#allocation3 + $0x18c8] sm:$0xff] }
 0x2b7   :  { %3287 = vmatpush.msra.mxu1 %v872_v28  ;;  %3267 = vmatpush.msra.mxu0 %v360_v29  ;;  %v1513_v27 = vld [vmem:[#allocation3 + $0x28c8] sm:$0xff]  ;;  %v490_v28 = vld [vmem:[#allocation3 + $0x8d0] sm:$0xff] }
 0x2b8   :  { %3307 = vmatpush.msra.mxu2 %v1384_v30  ;;  %3327 = vmatpush.msra.mxu3 %v361_v31  ;;  %v1002_v29 = vld [vmem:[#allocation3 + $0x18d0] sm:$0xff]  ;;  %v969_v30 = vld [vmem:[#allocation3 + $0x17c8] sm:$0xff] }
 0x2b9   :  { %3232 = vmatmul.f32.vlgmr.msrb.gmra.mxu2 %v6998_v38  ;;  %3268 = vmatpush.msra.mxu0 %v328_v33  ;;  %v1481_v31 = vld [vmem:[#allocation3 + $0x27c8] sm:$0xff]  ;;  %v458_v33 = vld [vmem:[#allocation3 + $0x7d0] sm:$0xff] }
 0x2ba   :  { %3288 = vmatpush.msra.mxu1 %v840_v34  ;;  %3308 = vmatpush.msra.mxu2 %v1352_v18  ;;  %v7024_v34 = vpop.f32.mrf.mxu2  ;;  %v970_v18 = vld [vmem:[#allocation3 + $0x17d0] sm:$0xff] }
 0x2bb   :  { %3328 = vmatpush.msra.mxu3 %v329_v37  ;;  %3269 = vmatpush.msra.mxu0 %v296_v40  ;;  %7557 = vst [vmem:[#allocation31_spill] sm:$0xff] %v7024_v34  ;;  %v937_v37 = vld [vmem:[#allocation3 + $0x16c8] sm:$0xff] }
 0x2bc   :  { %3289 = vmatpush.msra.mxu1 %v808_v41  ;;  %3309 = vmatpush.msra.mxu2 %v1320_v42  ;;  %v1449_v40 = vld [vmem:[#allocation3 + $0x26c8] sm:$0xff]  ;;  %v426_v41 = vld [vmem:[#allocation3 + $0x6d0] sm:$0xff]  ;;  %v7026_v42 = vpop.f32.mrf.mxu1 }
 0x2bd   :  { %3329 = vmatpush.msra.mxu3 %v297_v43  ;;  %3212 = vmatmul.f32.vlgmr.msrb.gmra.mxu1 %v6984_v47  ;;  %7558 = vst [vmem:[#allocation32_spill] sm:$0xff] %v7026_v42  ;;  %v938_v43 = vld [vmem:[#allocation3 + $0x16d0] sm:$0xff] }
 0x2be   :  { %3270 = vmatpush.msra.mxu0 %v264_v2  ;;  %3290 = vmatpush.msra.mxu1 %v776_v36  ;;  %v905_v2 = vld [vmem:[#allocation3 + $0x15c8] sm:$0xff]  ;;  %v7028_v36 = vpop.f32.mrf.mxu3 }
 0x2bf   :  { %3310 = vmatpush.msra.mxu2 %v1288_v45  ;;  %3330 = vmatpush.msra.mxu3 %v265_v46  ;;  %7559 = vst [vmem:[#allocation33_spill] sm:$0xff] %v7028_v36  ;;  %v1417_v45 = vld [vmem:[#allocation3 + $0x25c8] sm:$0xff]  ;;  %v394_v46 = vld [vmem:[#allocation3 + $0x5d0] sm:$0xff] }
 0x2c0   :  { %3271 = vmatpush.msra.mxu0 %v232_v48  ;;  %3291 = vmatpush.msra.mxu1 %v744_v49  ;;  %v906_v48 = vld [vmem:[#allocation3 + $0x15d0] sm:$0xff]  ;;  %v873_v49 = vld [vmem:[#allocation3 + $0x14c8] sm:$0xff] }
 0x2c1   :  { %3311 = vmatpush.msra.mxu2 %v1256_v32  ;;  %3331 = vmatpush.msra.mxu3 %v233_v50  ;;  %v1385_v32 = vld [vmem:[#allocation3 + $0x24c8] sm:$0xff]  ;;  %v362_v50 = vld [vmem:[#allocation3 + $0x4d0] sm:$0xff] }
 0x2c2   :  { %3312 = vmatmul.f32.vlgmr.msra.gmra.mxu2 %v6969_v59  ;;  %3252 = vmatmul.f32.vlgmr.msrb.gmra.mxu3 %v6969_v59  ;;  %v1162_v59 = vld [vmem:[#allocation3 + $0x1dd0] sm:$0xff] }
 0x2c3   :  { %3336 = vmatpush.msrb.mxu0 %v1225_v51  ;;  %3356 = vmatpush.msrb.mxu1 %v1737_v52  ;;  %v874_v51 = vld [vmem:[#allocation3 + $0x14d0] sm:$0xff]  ;;  %v841_v52 = vld [vmem:[#allocation3 + $0x13c8] sm:$0xff] }
 0x2c4   :  { %3376 = vmatpush.msrb.mxu2 %v714_v35  ;;  %3396 = vmatpush.msrb.mxu3 %v1226_v53  ;;  %v7030_v35 = vpop.f32.mrf.mxu0  ;;  %v1353_v53 = vld [vmem:[#allocation3 + $0x23c8] sm:$0xff] }
 0x2c5   :  { %3272 = vmatmul.f32.vlgmr.msra.gmra.mxu0 %v6984_v47  ;;  %3357 = vmatpush.msrb.mxu1 %v1705_v57  ;;  %v330_v57 = vld [vmem:[#allocation3 + $0x3d0] sm:$0xff] }
 0x2c6   :  { %3337 = vmatpush.msrb.mxu0 %v1193_v56  ;;  %3377 = vmatpush.msrb.mxu2 %v682_v58  ;;  %v7032_v56 = vpop.f32.mrf.mxu2  ;;  %v842_v58 = vld [vmem:[#allocation3 + $0x13d0] sm:$0xff] }
 0x2c7   :  { %3397 = vmatpush.msrb.mxu3 %v1194_v60  ;;  %3292 = vmatmul.f32.vlgmr.msra.gmra.mxu1 %v6998_v38  ;;  %7560 = vst [vmem:[#allocation34_spill] sm:$0xff] %v7032_v56  ;;  %v809_v60 = vld [vmem:[#allocation3 + $0x12c8] sm:$0xff]  ;;  %v622_v56 = vld [vmem:[#allocation3 + $0xcf0] sm:$0xff] }
 0x2c8   :  { %3338 = vmatpush.msrb.mxu0 %v1161_v61  ;;  %3358 = vmatpush.msrb.mxu1 %v1673_v0  ;;  %v1321_v61 = vld [vmem:[#allocation3 + $0x22c8] sm:$0xff]  ;;  %v298_v0 = vld [vmem:[#allocation3 + $0x2d0] sm:$0xff] }
 0x2c9   :  { %3378 = vmatpush.msrb.mxu2 %v650_v4  ;;  %3398 = vmatpush.msrb.mxu3 %v1162_v59  ;;  %v810_v4 = vld [vmem:[#allocation3 + $0x12d0] sm:$0xff]  ;;  %v7035_v59 = vpop.f32.mrf.mxu3 }
 0x2ca   :  { %3339 = vmatpush.msrb.mxu0 %v1129_v5  ;;  %3359 = vmatpush.msrb.mxu1 %v1641_v6  ;;  %7561 = vst [vmem:[#allocation35_spill] sm:$0xff] %v7035_v59  ;;  %v777_v5 = vld [vmem:[#allocation3 + $0x11c8] sm:$0xff] }
 0x2cb   :  { %3379 = vmatpush.msrb.mxu2 %v618_v7  ;;  %3399 = vmatpush.msrb.mxu3 %v1130_v8  ;;  %v1289_v6 = vld [vmem:[#allocation3 + $0x21c8] sm:$0xff]  ;;  %v7037_v7 = vpop.f32.mrf.mxu1  ;;  %v266_v8 = vld [vmem:[#allocation3 + $0x1d0] sm:$0xff] }
 0x2cc   :  { %3340 = vmatpush.msrb.mxu0 %v1097_v39  ;;  %3360 = vmatpush.msrb.mxu1 %v1609_v9  ;;  %v778_v39 = vld [vmem:[#allocation3 + $0x11d0] sm:$0xff]  ;;  %v745_v9 = vld [vmem:[#allocation3 + $0x10c8] sm:$0xff] }
 0x2cd   :  { %3380 = vmatpush.msrb.mxu2 %v586_v10  ;;  %3400 = vmatpush.msrb.mxu3 %v1098_v12  ;;  %v1257_v10 = vld [vmem:[#allocation3 + $0x20c8] sm:$0xff]  ;;  %v234_v12 = vld [vmem:[#allocation3 + $0xd0] sm:$0xff] }
 0x2ce   :  { %3341 = vmatpush.msrb.mxu0 %v1065_v13  ;;  %3361 = vmatpush.msrb.mxu1 %v1577_v14  ;;  %v746_v13 = vld [vmem:[#allocation3 + $0x10d0] sm:$0xff]  ;;  %v715_v14 = vld [vmem:[#allocation3 + $0xfd8] sm:$0xff] }
 0x2cf   :  { %3381 = vmatpush.msrb.mxu2 %v554_v15  ;;  %3401 = vmatpush.msrb.mxu3 %v1066_v19  ;;  %v1738_v15 = vld [vmem:[#allocation3 + $0x2fd0] sm:$0xff]  ;;  %v1227_v19 = vld [vmem:[#allocation3 + $0x1fd8] sm:$0xff] }
 0x2d0   :  { %3342 = vmatpush.msrb.mxu0 %v1033_v20  ;;  %3362 = vmatpush.msrb.mxu1 %v1545_v22  ;;  %v7039_v20 = vpop.f32.mrf.mxu0  ;;  %v1739_v22 = vld [vmem:[#allocation3 + $0x2fd8] sm:$0xff] }
 0x2d1   :  { %3382 = vmatpush.msrb.mxu2 %v522_v23  ;;  %3402 = vmatpush.msrb.mxu3 %v1034_v26  ;;  %v7041_v23 = vpop.f32.mrf.mxu2  ;;  %v1706_v26 = vld [vmem:[#allocation3 + $0x2ed0] sm:$0xff] }
 0x2d2   :  { %3343 = vmatpush.msrb.mxu0 %v1001_v1  ;;  %3363 = vmatpush.msrb.mxu1 %v1513_v27  ;;  %v683_v1 = vld [vmem:[#allocation3 + $0xed8] sm:$0xff]  ;;  %v7044_v27 = vpop.f32.mrf.mxu3 }
 0x2d3   :  { %3383 = vmatpush.msrb.mxu2 %v490_v28  ;;  %3403 = vmatpush.msrb.mxu3 %v1002_v29  ;;  %7562 = vst [vmem:[#allocation36_spill] sm:$0xff] %v7044_v27  ;;  %v1195_v28 = vld [vmem:[#allocation3 + $0x1ed8] sm:$0xff] }
 0x2d4   :  { %3344 = vmatpush.msrb.mxu0 %v969_v30  ;;  %3364 = vmatpush.msrb.mxu1 %v1481_v31  ;;  %v1707_v29 = vld [vmem:[#allocation3 + $0x2ed8] sm:$0xff]  ;;  %v7046_v30 = vpop.f32.mrf.mxu1  ;;  %v7051_v31 = vld [vmem:[%s7538_s0 + $0x10] sm:$0xff] }
 0x2d5   :  { %3384 = vmatpush.msrb.mxu2 %v458_v33  ;;  %3404 = vmatpush.msrb.mxu3 %v970_v18  ;;  %v1674_v33 = vld [vmem:[#allocation3 + $0x2dd0] sm:$0xff]  ;;  %v651_v18 = vld [vmem:[#allocation3 + $0xdd8] sm:$0xff] }
 0x2d6   :  { %3345 = vmatpush.msrb.mxu0 %v937_v37  ;;  %3365 = vmatpush.msrb.mxu1 %v1449_v40  ;;  %v1163_v37 = vld [vmem:[#allocation3 + $0x1dd8] sm:$0xff] }
 0x2d7   :  { %3385 = vmatpush.msrb.mxu2 %v426_v41  ;;  %3405 = vmatpush.msrb.mxu3 %v938_v43  ;;  %v1675_v40 = vld [vmem:[#allocation3 + $0x2dd8] sm:$0xff]  ;;  %v1642_v41 = vld [vmem:[#allocation3 + $0x2cd0] sm:$0xff] }
 0x2d8   :  { %3346 = vmatpush.msrb.mxu0 %v905_v2  ;;  %3366 = vmatpush.msrb.mxu1 %v1417_v45  ;;  %v619_v43 = vld [vmem:[#allocation3 + $0xcd8] sm:$0xff] }
 0x2d9   :  { %3386 = vmatpush.msrb.mxu2 %v394_v46  ;;  %3406 = vmatpush.msrb.mxu3 %v906_v48  ;;  %v1131_v2 = vld [vmem:[#allocation3 + $0x1cd8] sm:$0xff]  ;;  %v1610_v46 = vld [vmem:[#allocation3 + $0x2bd0] sm:$0xff] }
 0x2da   :  { %3347 = vmatpush.msrb.mxu0 %v873_v49  ;;  %3367 = vmatpush.msrb.mxu1 %v1385_v32  ;;  %v1643_v45 = vld [vmem:[#allocation3 + $0x2cd8] sm:$0xff]  ;;  %v7054_v49 = vpop.f32.mrf.mxu0 }
 0x2db   :  { %3387 = vmatpush.msrb.mxu2 %v362_v50  ;;  %3407 = vmatpush.msrb.mxu3 %v874_v51  ;;  %v587_v48 = vld [vmem:[#allocation3 + $0xbd8] sm:$0xff]  ;;  %v7056_v51 = vpop.f32.mrf.mxu2 }
 0x2dc   :  { %3348 = vmatpush.msrb.mxu0 %v841_v52  ;;  %3332 = vmatmul.f32.vlgmr.msra.gmra.mxu3 %v6984_v47  ;;  %v1099_v32 = vld [vmem:[#allocation3 + $0x1bd8] sm:$0xff]  ;;  %v1578_v52 = vld [vmem:[#allocation3 + $0x2ad0] sm:$0xff] }
 0x2dd   :  { %3368 = vmatpush.msrb.mxu1 %v1353_v53  ;;  %3388 = vmatpush.msrb.mxu2 %v330_v57  ;;  %v1611_v50 = vld [vmem:[#allocation3 + $0x2bd8] sm:$0xff]  ;;  %v7058_v57 = vpop.f32.mrf.mxu3 }
 0x2de   :  { %3408 = vmatpush.msrb.mxu3 %v842_v58  ;;  %3349 = vmatpush.msrb.mxu0 %v809_v60  ;;  %v555_v53 = vld [vmem:[#allocation3 + $0xad8] sm:$0xff] }
 0x2df   :  { %3369 = vmatpush.msrb.mxu1 %v1321_v61  ;;  %3389 = vmatpush.msrb.mxu2 %v298_v0  ;;  %v1067_v58 = vld [vmem:[#allocation3 + $0x1ad8] sm:$0xff]  ;;  %v7060_v61 = vpop.f32.mrf.mxu1  ;;  %v1546_v0 = vld [vmem:[#allocation3 + $0x29d0] sm:$0xff] }
 0x2e0   :  { %3409 = vmatpush.msrb.mxu3 %v810_v4  ;;  %3350 = vmatpush.msrb.mxu0 %v777_v5  ;;  %v1579_v60 = vld [vmem:[#allocation3 + $0x2ad8] sm:$0xff] }
 0x2e1   :  { %3370 = vmatpush.msrb.mxu1 %v1289_v6  ;;  %3390 = vmatpush.msrb.mxu2 %v266_v8  ;;  %v523_v4 = vld [vmem:[#allocation3 + $0x9d8] sm:$0xff]  ;;  %v1514_v8 = vld [vmem:[#allocation3 + $0x28d0] sm:$0xff] }
 0x2e2   :  { %3410 = vmatpush.msrb.mxu3 %v778_v39  ;;  %3351 = vmatpush.msrb.mxu0 %v745_v9  ;;  %v1035_v5 = vld [vmem:[#allocation3 + $0x19d8] sm:$0xff] }
 0x2e3   :  { %3371 = vmatpush.msrb.mxu1 %v1257_v10  ;;  %3391 = vmatpush.msrb.mxu2 %v234_v12  ;;  %v1547_v6 = vld [vmem:[#allocation3 + $0x29d8] sm:$0xff]  ;;  %v1482_v12 = vld [vmem:[#allocation3 + $0x27d0] sm:$0xff] }
 0x2e4   :  { %3411 = vmatpush.msrb.mxu3 %v746_v13  ;;  %3352 = vmatmul.f32.vlgmr.msrb.gmra.mxu0 %v6998_v38  ;;  %v491_v39 = vld [vmem:[#allocation3 + $0x8d8] sm:$0xff] }
 0x2e5   :  { %3436 = vmatpush.msra.mxu1 %v715_v14  ;;  %3416 = vmatpush.msra.mxu0 %v1738_v15  ;;  %v1003_v9 = vld [vmem:[#allocation3 + $0x18d8] sm:$0xff]  ;;  %v7062_v14 = vpop.f32.mrf.mxu0 }
 0x2e6   :  { %3456 = vmatpush.msra.mxu2 %v1227_v19  ;;  %3476 = vmatpush.msra.mxu3 %v1739_v22  ;;  %v1515_v10 = vld [vmem:[#allocation3 + $0x28d8] sm:$0xff]  ;;  %7563 = vst [vmem:[#allocation37_spill] sm:$0xff] %v7062_v14  ;;  %v7064_v22 = vpop.f32.mrf.mxu2 }
 0x2e7   :  { %3372 = vmatmul.f32.vlgmr.msrb.gmra.mxu1 %v7051_v31  ;;  %3417 = vmatpush.msra.mxu0 %v1706_v26  ;;  %v459_v13 = vld [vmem:[#allocation3 + $0x7d8] sm:$0xff]  ;;  %v1450_v26 = vld [vmem:[#allocation3 + $0x26d0] sm:$0xff] }
 0x2e8   :  { %3437 = vmatpush.msra.mxu1 %v683_v1  ;;  %3457 = vmatpush.msra.mxu2 %v1195_v28  ;;  %v971_v15 = vld [vmem:[#allocation3 + $0x17d8] sm:$0xff]  ;;  %v7066_v28 = vpop.f32.mrf.mxu3 }
 0x2e9   :  { %3477 = vmatpush.msra.mxu3 %v1707_v29  ;;  %3418 = vmatpush.msra.mxu0 %v1674_v33  ;;  %v1483_v19 = vld [vmem:[#allocation3 + $0x27d8] sm:$0xff] }
 0x2ea   :  { %3438 = vmatpush.msra.mxu1 %v651_v18  ;;  %3458 = vmatpush.msra.mxu2 %v1163_v37  ;;  %v427_v1 = vld [vmem:[#allocation3 + $0x6d8] sm:$0xff]  ;;  %v7068_v18 = vpop.f32.mrf.mxu1  ;;  %v1418_v37 = vld [vmem:[#allocation3 + $0x25d0] sm:$0xff] }
 0x2eb   :  { %3478 = vmatpush.msra.mxu3 %v1675_v40  ;;  %3419 = vmatpush.msra.mxu0 %v1642_v41  ;;  %v939_v29 = vld [vmem:[#allocation3 + $0x16d8] sm:$0xff]  ;;  %7564 = vst [vmem:[#allocation38_spill] sm:$0xff] %v7068_v18  ;;  %v941_v18 = vld [vmem:[#allocation3 + $0x16e8] sm:$0xff] }
 0x2ec   :  { %3439 = vmatpush.msra.mxu1 %v619_v43  ;;  %3459 = vmatpush.msra.mxu2 %v1131_v2  ;;  %v1451_v33 = vld [vmem:[#allocation3 + $0x26d8] sm:$0xff]  ;;  %v1386_v2 = vld [vmem:[#allocation3 + $0x24d0] sm:$0xff] }
 0x2ed   :  { %3479 = vmatpush.msra.mxu3 %v1643_v45  ;;  %3420 = vmatpush.msra.mxu0 %v1610_v46  ;;  %v395_v40 = vld [vmem:[#allocation3 + $0x5d8] sm:$0xff] }
 0x2ee   :  { %3440 = vmatpush.msra.mxu1 %v587_v48  ;;  %3460 = vmatpush.msra.mxu2 %v1099_v32  ;;  %v907_v41 = vld [vmem:[#allocation3 + $0x15d8] sm:$0xff]  ;;  %v1354_v32 = vld [vmem:[#allocation3 + $0x23d0] sm:$0xff] }
 0x2ef   :  { %3480 = vmatpush.msra.mxu3 %v1611_v50  ;;  %3421 = vmatpush.msra.mxu0 %v1578_v52  ;;  %v1419_v43 = vld [vmem:[#allocation3 + $0x25d8] sm:$0xff]  ;;  %v7071_v52 = vpop.f32.mrf.mxu2 }
 0x2f0   :  { %3441 = vmatpush.msra.mxu1 %v555_v53  ;;  %3461 = vmatpush.msra.mxu2 %v1067_v58  ;;  %v363_v45 = vld [vmem:[#allocation3 + $0x4d8] sm:$0xff]  ;;  %7565 = vst [vmem:[#allocation39_spill] sm:$0xff] %v7071_v52  ;;  %v1645_v52 = vld [vmem:[#allocation3 + $0x2ce8] sm:$0xff] }
 0x2f1   :  { %3481 = vmatpush.msra.mxu3 %v1579_v60  ;;  %3422 = vmatpush.msra.mxu0 %v1546_v0  ;;  %v875_v46 = vld [vmem:[#allocation3 + $0x14d8] sm:$0xff]  ;;  %v7073_v60 = vpop.f32.mrf.mxu0  ;;  %v7075_v0 = vpop.f32.mrf.mxu3 }
 0x2f2   :  { %3442 = vmatpush.msra.mxu1 %v523_v4  ;;  %3462 = vmatpush.msra.mxu2 %v1035_v5  ;;  %v1387_v48 = vld [vmem:[#allocation3 + $0x24d8] sm:$0xff]  ;;  %7566 = vst [vmem:[#allocation40_spill] sm:$0xff] %v7073_v60  ;;  %v1322_v4 = vld [vmem:[#allocation3 + $0x22d0] sm:$0xff] }
 0x2f3   :  { %3482 = vmatpush.msra.mxu3 %v1547_v6  ;;  %3423 = vmatpush.msra.mxu0 %v1514_v8  ;;  %v331_v50 = vld [vmem:[#allocation3 + $0x3d8] sm:$0xff]  ;;  %7567 = vst [vmem:[#allocation41_spill] sm:$0xff] %v7075_v0  ;;  %v7077_v6 = vpop.f32.mrf.mxu1 }
 0x2f4   :  { %3443 = vmatpush.msra.mxu1 %v491_v39  ;;  %3463 = vmatpush.msra.mxu2 %v1003_v9  ;;  %v843_v53 = vld [vmem:[#allocation3 + $0x13d8] sm:$0xff]  ;;  %7568 = vst [vmem:[#allocation42_spill] sm:$0xff] %v7077_v6  ;;  %v1290_v9 = vld [vmem:[#allocation3 + $0x21d0] sm:$0xff] }
 0x2f5   :  { %3483 = vmatpush.msra.mxu3 %v1515_v10  ;;  %3424 = vmatpush.msra.mxu0 %v1482_v12  ;;  %v1355_v58 = vld [vmem:[#allocation3 + $0x23d8] sm:$0xff]  ;;  %v686_v6 = vld [vmem:[#allocation3 + $0xef0] sm:$0xff] }
 0x2f6   :  { %3444 = vmatpush.msra.mxu1 %v459_v13  ;;  %3464 = vmatpush.msra.mxu2 %v971_v15  ;;  %v299_v5 = vld [vmem:[#allocation3 + $0x2d8] sm:$0xff]  ;;  %v1258_v15 = vld [vmem:[#allocation3 + $0x20d0] sm:$0xff] }
 0x2f7   :  { %3484 = vmatpush.msra.mxu3 %v1483_v19  ;;  %3425 = vmatpush.msra.mxu0 %v1450_v26  ;;  %v811_v8 = vld [vmem:[#allocation3 + $0x12d8] sm:$0xff] }
 0x2f8   :  { %3445 = vmatpush.msra.mxu1 %v427_v1  ;;  %3465 = vmatpush.msra.mxu2 %v939_v29  ;;  %v1323_v39 = vld [vmem:[#allocation3 + $0x22d8] sm:$0xff]  ;;  %v7080_v29 = vpop.f32.mrf.mxu2 }
 0x2f9   :  { %3485 = vmatpush.msra.mxu3 %v1451_v33  ;;  %3426 = vmatpush.msra.mxu0 %v1418_v37  ;;  %v267_v10 = vld [vmem:[#allocation3 + $0x1d8] sm:$0xff]  ;;  %7569 = vst [vmem:[#allocation43_spill] sm:$0xff] %v7080_v29  ;;  %v716_v33 = vld [vmem:[#allocation3 + $0xfe0] sm:$0xff] }
 0x2fa   :  { %3446 = vmatpush.msra.mxu1 %v395_v40  ;;  %3466 = vmatpush.msra.mxu2 %v907_v41  ;;  %v779_v12 = vld [vmem:[#allocation3 + $0x11d8] sm:$0xff]  ;;  %v1228_v37 = vld [vmem:[#allocation3 + $0x1fe0] sm:$0xff]  ;;  %v7082_v40 = vpop.f32.mrf.mxu0  ;;  %v7084_v41 = vpop.f32.mrf.mxu3 }
 0x2fb   :  { %3486 = vmatpush.msra.mxu3 %v1419_v43  ;;  %3392 = vmatmul.f32.vlgmr.msrb.gmra.mxu2 %v6984_v47  ;;  %v1291_v13 = vld [vmem:[#allocation3 + $0x21d8] sm:$0xff]  ;;  %7570 = vst [vmem:[#allocation44_spill] sm:$0xff] %v7082_v40  ;;  %v1740_v43 = vld [vmem:[#allocation3 + $0x2fe0] sm:$0xff] }
 0x2fc   :  { %3427 = vmatpush.msra.mxu0 %v1386_v2  ;;  %3447 = vmatpush.msra.mxu1 %v363_v45  ;;  %v235_v19 = vld [vmem:[#allocation3 + $0xd8] sm:$0xff]  ;;  %7571 = vst [vmem:[#allocation45_spill] sm:$0xff] %v7084_v41  ;;  %v717_v2 = vld [vmem:[#allocation3 + $0xfe8] sm:$0xff]  ;;  %v7086_v45 = vpop.f32.mrf.mxu1  ;;  %v812_v40 = vld [vmem:[#allocation3 + $0x12e0] sm:$0xff] }
 0x2fd   :  { %3467 = vmatpush.msra.mxu2 %v875_v46  ;;  %3487 = vmatpush.msra.mxu3 %v1387_v48  ;;  %v747_v26 = vld [vmem:[#allocation3 + $0x10d8] sm:$0xff]  ;;  %7572 = vst [vmem:[#allocation46_spill] sm:$0xff] %v7086_v45  ;;  %v684_v46 = vld [vmem:[#allocation3 + $0xee0] sm:$0xff] }
 0x2fe   :  { %3428 = vmatpush.msra.mxu0 %v1354_v32  ;;  %3412 = vmatmul.f32.vlgmr.msrb.gmra.mxu3 %v6998_v38  ;;  %v1259_v1 = vld [vmem:[#allocation3 + $0x20d8] sm:$0xff]  ;;  %v1196_v48 = vld [vmem:[#allocation3 + $0x1ee0] sm:$0xff] }
 0x2ff   :  { %3448 = vmatpush.msra.mxu1 %v331_v50  ;;  %3468 = vmatpush.msra.mxu2 %v843_v53  ;;  %v1708_v32 = vld [vmem:[#allocation3 + $0x2ee0] sm:$0xff]  ;;  %v685_v50 = vld [vmem:[#allocation3 + $0xee8] sm:$0xff] }
 0x300   :  { %3488 = vmatpush.msra.mxu3 %v1355_v58  ;;  %3429 = vmatpush.msra.mxu0 %v1322_v4  ;;  %v652_v53 = vld [vmem:[#allocation3 + $0xde0] sm:$0xff] }
 0x301   :  { %3449 = vmatpush.msra.mxu1 %v299_v5  ;;  %3469 = vmatpush.msra.mxu2 %v811_v8  ;;  %v1164_v58 = vld [vmem:[#allocation3 + $0x1de0] sm:$0xff]  ;;  %v653_v5 = vld [vmem:[#allocation3 + $0xde8] sm:$0xff] }
 0x302   :  { %3489 = vmatpush.msra.mxu3 %v1323_v39  ;;  %3430 = vmatpush.msra.mxu0 %v1290_v9  ;;  %v1676_v4 = vld [vmem:[#allocation3 + $0x2de0] sm:$0xff]  ;;  %v7092_v9 = vpop.f32.mrf.mxu2 }
 0x303   :  { %3450 = vmatpush.msra.mxu1 %v267_v10  ;;  %3470 = vmatpush.msra.mxu2 %v779_v12  ;;  %v620_v8 = vld [vmem:[#allocation3 + $0xce0] sm:$0xff]  ;;  %7573 = vst [vmem:[#allocation47_spill] sm:$0xff] %v7092_v9  ;;  %v621_v12 = vld [vmem:[#allocation3 + $0xce8] sm:$0xff] }
 0x304   :  { %3490 = vmatpush.msra.mxu3 %v1291_v13  ;;  %3431 = vmatpush.msra.mxu0 %v1258_v15  ;;  %v1132_v39 = vld [vmem:[#allocation3 + $0x1ce0] sm:$0xff]  ;;  %v7094_v13 = vpop.f32.mrf.mxu0  ;;  %v7096_v15 = vpop.f32.mrf.mxu3  ;;  %v1069_v9 = vld [vmem:[#allocation3 + $0x1ae8] sm:$0xff] }
 0x305   :  { %3451 = vmatpush.msra.mxu1 %v235_v19  ;;  %3471 = vmatpush.msra.mxu2 %v747_v26  ;;  %v1644_v10 = vld [vmem:[#allocation3 + $0x2ce0] sm:$0xff]  ;;  %7574 = vst [vmem:[#allocation48_spill] sm:$0xff] %v7096_v15  ;;  %v1581_v15 = vld [vmem:[#allocation3 + $0x2ae8] sm:$0xff] }
 0x306   :  { %3491 = vmatpush.msra.mxu3 %v1259_v1  ;;  %3432 = vmatmul.f32.vlgmr.msra.gmra.mxu0 %v7051_v31  ;;  %v588_v19 = vld [vmem:[#allocation3 + $0xbe0] sm:$0xff]  ;;  %v7098_v1 = vpop.f32.mrf.mxu1 }
 0x307   :  { %3472 = vmatmul.f32.vlgmr.msra.gmra.mxu2 %v6998_v38  ;;  %3496 = vmatpush.msrb.mxu0 %v716_v33  ;;  %v1100_v26 = vld [vmem:[#allocation3 + $0x1be0] sm:$0xff]  ;;  %v589_v33 = vld [vmem:[#allocation3 + $0xbe8] sm:$0xff] }
 0x308   :  { %3516 = vmatpush.msrb.mxu1 %v1228_v37  ;;  %3536 = vmatpush.msrb.mxu2 %v1740_v43  ;;  %v556_v37 = vld [vmem:[#allocation3 + $0xae0] sm:$0xff] }
 0x309   :  { %3556 = vmatpush.msrb.mxu3 %v717_v2  ;;  %3497 = vmatpush.msrb.mxu0 %v684_v46  ;;  %v1068_v43 = vld [vmem:[#allocation3 + $0x1ae0] sm:$0xff]  ;;  %v557_v46 = vld [vmem:[#allocation3 + $0xae8] sm:$0xff] }
 0x30a   :  { %3492 = vmatmul.f32.vlgmr.msra.gmra.mxu3 %v7051_v31  ;;  %3517 = vmatpush.msrb.mxu1 %v1196_v48  ;;  %v1580_v2 = vld [vmem:[#allocation3 + $0x2ae0] sm:$0xff] }
 0x30b   :  { %3537 = vmatpush.msrb.mxu2 %v1708_v32  ;;  %3557 = vmatpush.msrb.mxu3 %v685_v50  ;;  %v524_v48 = vld [vmem:[#allocation3 + $0x9e0] sm:$0xff] }
 0x30c   :  { %3452 = vmatmul.f32.vlgmr.msra.gmra.mxu1 %v6984_v47  ;;  %3498 = vmatpush.msrb.mxu0 %v652_v53  ;;  %v1612_v47 = vld [vmem:[#allocation3 + $0x2be0] sm:$0xff]  ;;  %v525_v53 = vld [vmem:[#allocation3 + $0x9e8] sm:$0xff] }
 0x30d   :  { %3518 = vmatpush.msrb.mxu1 %v1164_v58  ;;  %3538 = vmatpush.msrb.mxu2 %v1676_v4  ;;  %v1036_v32 = vld [vmem:[#allocation3 + $0x19e0] sm:$0xff] }
 0x30e   :  { %3558 = vmatpush.msrb.mxu3 %v653_v5  ;;  %3499 = vmatpush.msrb.mxu0 %v620_v8  ;;  %v1548_v50 = vld [vmem:[#allocation3 + $0x29e0] sm:$0xff]  ;;  %v7100_v5 = vpop.f32.mrf.mxu2 }
 0x30f   :  { %3519 = vmatpush.msrb.mxu1 %v1132_v39  ;;  %3539 = vmatpush.msrb.mxu2 %v1644_v10  ;;  %v492_v58 = vld [vmem:[#allocation3 + $0x8e0] sm:$0xff]  ;;  %v493_v39 = vld [vmem:[#allocation3 + $0x8e8] sm:$0xff]  ;;  %v7102_v10 = vpop.f32.mrf.mxu0 }
 0x310   :  { %3559 = vmatpush.msrb.mxu3 %v621_v12  ;;  %3500 = vmatpush.msrb.mxu0 %v588_v19  ;;  %v1004_v4 = vld [vmem:[#allocation3 + $0x18e0] sm:$0xff]  ;;  %v7104_v12 = vpop.f32.mrf.mxu3 }
 0x311   :  { %3520 = vmatpush.msrb.mxu1 %v1100_v26  ;;  %3540 = vmatpush.msrb.mxu2 %v1612_v47  ;;  %v1516_v8 = vld [vmem:[#allocation3 + $0x28e0] sm:$0xff]  ;;  %7575 = vst [vmem:[#allocation49_spill] sm:$0xff] %v7104_v12 }
 0x312   :  { %3560 = vmatpush.msrb.mxu3 %v589_v33  ;;  %3501 = vmatpush.msrb.mxu0 %v556_v37  ;;  %v460_v19 = vld [vmem:[#allocation3 + $0x7e0] sm:$0xff]  ;;  %v461_v33 = vld [vmem:[#allocation3 + $0x7e8] sm:$0xff] }
 0x313   :  { %3521 = vmatpush.msrb.mxu1 %v1068_v43  ;;  %3541 = vmatpush.msrb.mxu2 %v1580_v2  ;;  %v972_v26 = vld [vmem:[#allocation3 + $0x17e0] sm:$0xff]  ;;  %v7106_v2 = vpop.f32.mrf.mxu1 }
 0x314   :  { %3561 = vmatpush.msrb.mxu3 %v557_v46  ;;  %3502 = vmatpush.msrb.mxu0 %v524_v48  ;;  %v1484_v47 = vld [vmem:[#allocation3 + $0x27e0] sm:$0xff]  ;;  %v429_v48 = vld [vmem:[#allocation3 + $0x6e8] sm:$0xff] }
 0x315   :  { %3522 = vmatpush.msrb.mxu1 %v1036_v32  ;;  %3542 = vmatpush.msrb.mxu2 %v1548_v50  ;;  %v428_v37 = vld [vmem:[#allocation3 + $0x6e0] sm:$0xff] }
 0x316   :  { %3562 = vmatpush.msrb.mxu3 %v525_v53  ;;  %3503 = vmatpush.msrb.mxu0 %v492_v58  ;;  %v940_v43 = vld [vmem:[#allocation3 + $0x16e0] sm:$0xff]  ;;  %v397_v58 = vld [vmem:[#allocation3 + $0x5e8] sm:$0xff] }
 0x317   :  { %3523 = vmatpush.msrb.mxu1 %v1004_v4  ;;  %3543 = vmatpush.msrb.mxu2 %v1516_v8  ;;  %v1452_v46 = vld [vmem:[#allocation3 + $0x26e0] sm:$0xff]  ;;  %v7110_v27 = vpop.f32.mrf.mxu0 }
 0x318   :  { %3563 = vmatpush.msrb.mxu3 %v493_v39  ;;  %3504 = vmatpush.msrb.mxu0 %v460_v19  ;;  %v396_v32 = vld [vmem:[#allocation3 + $0x5e0] sm:$0xff]  ;;  %v7108_v39 = vpop.f32.mrf.mxu2 }
 0x319   :  { %3524 = vmatpush.msrb.mxu1 %v972_v26  ;;  %3544 = vmatpush.msrb.mxu2 %v1484_v47  ;;  %v908_v50 = vld [vmem:[#allocation3 + $0x15e0] sm:$0xff]  ;;  %v365_v26 = vld [vmem:[#allocation3 + $0x4e8] sm:$0xff]  ;;  %v7112_v47 = vpop.f32.mrf.mxu3 }
 0x31a   :  { %3564 = vmatpush.msrb.mxu3 %v461_v33  ;;  %3505 = vmatpush.msrb.mxu0 %v428_v37  ;;  %v1420_v53 = vld [vmem:[#allocation3 + $0x25e0] sm:$0xff] }
 0x31b   :  { %3525 = vmatpush.msrb.mxu1 %v940_v43  ;;  %3545 = vmatpush.msrb.mxu2 %v1452_v46  ;;  %v364_v4 = vld [vmem:[#allocation3 + $0x4e0] sm:$0xff]  ;;  %v333_v46 = vld [vmem:[#allocation3 + $0x3e8] sm:$0xff] }
 0x31c   :  { %3565 = vmatpush.msrb.mxu3 %v429_v48  ;;  %v876_v8 = vld [vmem:[#allocation3 + $0x14e0] sm:$0xff]  ;;  %3506 = vmatpush.msrb.mxu0 %v396_v32  ;;  %v7114_v32 = vpop.f32.mrf.mxu1 }
 0x31d   :  { %3526 = vmatpush.msrb.mxu1 %v908_v50  ;;  %v1388_v19 = vld [vmem:[#allocation3 + $0x24e0] sm:$0xff]  ;;  %3546 = vmatpush.msrb.mxu2 %v1420_v53 }
 0x31e   :  { %3566 = vmatpush.msrb.mxu3 %v397_v58  ;;  %v332_v33 = vld [vmem:[#allocation3 + $0x3e0] sm:$0xff]  ;;  %3507 = vmatpush.msrb.mxu0 %v364_v4 }
 0x31f   :  { %v844_v37 = vld [vmem:[#allocation3 + $0x13e0] sm:$0xff]  ;;  %3527 = vmatpush.msrb.mxu1 %v876_v8  ;;  %3547 = vmatpush.msrb.mxu2 %v1388_v19  ;;  %v269_v8 = vld [vmem:[#allocation3 + $0x1e8] sm:$0xff]  ;;  %v7118_v12 = vpop.f32.mrf.mxu0 }
 0x320   :  { %v1356_v43 = vld [vmem:[#allocation3 + $0x23e0] sm:$0xff]  ;;  %3567 = vmatpush.msrb.mxu3 %v365_v26  ;;  %3508 = vmatpush.msrb.mxu0 %v332_v33  ;;  %v7116_v11 = vpop.f32.mrf.mxu2  ;;  %7577 = vst [vmem:[#allocation51_spill] sm:$0xff] %v7118_v12 }
 0x321   :  { %v300_v48 = vld [vmem:[#allocation3 + $0x2e0] sm:$0xff]  ;;  %3528 = vmatpush.msrb.mxu1 %v844_v37  ;;  %3548 = vmatpush.msrb.mxu2 %v1356_v43  ;;  %7576 = vst [vmem:[#allocation50_spill] sm:$0xff] %v7116_v11  ;;  %v237_v37 = vld [vmem:[#allocation3 + $0xe8] sm:$0xff]  ;;  %v7120_v43 = vpop.f32.mrf.mxu3 }
 0x322   :  { %v1324_v50 = vld [vmem:[#allocation3 + $0x22e0] sm:$0xff]  ;;  %3568 = vmatpush.msrb.mxu3 %v333_v46  ;;  %3509 = vmatpush.msrb.mxu0 %v300_v48  ;;  %v1229_v46 = vld [vmem:[#allocation3 + $0x1fe8] sm:$0xff]  ;;  %v718_v48 = vld [vmem:[#allocation3 + $0xff0] sm:$0xff] }
 0x323   :  { %v268_v53 = vld [vmem:[#allocation3 + $0x1e0] sm:$0xff]  ;;  %3529 = vmatpush.msrb.mxu1 %v812_v40  ;;  %3549 = vmatpush.msrb.mxu2 %v1324_v50  ;;  %v1741_v40 = vld [vmem:[#allocation3 + $0x2fe8] sm:$0xff] }
 0x324   :  { %v780_v58 = vld [vmem:[#allocation3 + $0x11e0] sm:$0xff]  ;;  %3569 = vmatpush.msrb.mxu3 %v301_v16  ;;  %3510 = vmatpush.msrb.mxu0 %v268_v53  ;;  %v1230_v16 = vld [vmem:[#allocation3 + $0x1ff0] sm:$0xff]  ;;  %v7122_v50 = vpop.f32.mrf.mxu1  ;;  %v1197_v53 = vld [vmem:[#allocation3 + $0x1ee8] sm:$0xff] }
 0x325   :  { %v1292_v4 = vld [vmem:[#allocation3 + $0x21e0] sm:$0xff]  ;;  %3530 = vmatpush.msrb.mxu1 %v780_v58  ;;  %7578 = vst [vmem:[#allocation52_spill] sm:$0xff] %v7122_v50  ;;  %v1709_v58 = vld [vmem:[#allocation3 + $0x2ee8] sm:$0xff]  ;;  %v558_v50 = vld [vmem:[#allocation3 + $0xaf0] sm:$0xff] }
 0x326   :  { %v236_v19 = vld [vmem:[#allocation3 + $0xe0] sm:$0xff]  ;;  %3550 = vmatpush.msrb.mxu2 %v1292_v4  ;;  %3570 = vmatpush.msrb.mxu3 %v269_v8  ;;  %v1198_v4 = vld [vmem:[#allocation3 + $0x1ef0] sm:$0xff] }
 0x327   :  { %v748_v26 = vld [vmem:[#allocation3 + $0x10e0] sm:$0xff]  ;;  %3511 = vmatpush.msrb.mxu0 %v236_v19  ;;  %v1165_v19 = vld [vmem:[#allocation3 + $0x1de8] sm:$0xff] }
 0x328   :  { %v1260_v33 = vld [vmem:[#allocation3 + $0x20e0] sm:$0xff]  ;;  %3531 = vmatpush.msrb.mxu1 %v748_v26  ;;  %3571 = vmatpush.msrb.mxu3 %v237_v37  ;;  %v1677_v26 = vld [vmem:[#allocation3 + $0x2de8] sm:$0xff]  ;;  %v7131_v37 = vpop.f32.mrf.mxu2 }
 0x329   :  { %3551 = vmatpush.msrb.mxu2 %v1260_v33  ;;  %3576 = vmatpush.msra.mxu0 %v1229_v46  ;;  %v7128_v8 = vld [vmem:[%s7538_s0] sm:$0xff]  ;;  %v654_v33 = vld [vmem:[#allocation3 + $0xdf0] sm:$0xff]  ;;  %7579 = vst [vmem:[#allocation53_spill] sm:$0xff] %v7131_v37  ;;  %v1613_v37 = vld [vmem:[#allocation3 + $0x2be8] sm:$0xff] }
 0x32a   :  { %3552 = vmatmul.f32.vlgmr.msrb.gmra.mxu2 %v7051_v31  ;;  %3596 = vmatpush.msra.mxu1 %v1741_v40  ;;  %v1166_v46 = vld [vmem:[#allocation3 + $0x1df0] sm:$0xff]  ;;  %v1133_v40 = vld [vmem:[#allocation3 + $0x1ce8] sm:$0xff] }
 0x32b   :  { %3616 = vmatpush.msra.mxu2 %v718_v48  ;;  %3636 = vmatpush.msra.mxu3 %v1230_v16  ;;  %v7133_v48 = vpop.f32.mrf.mxu0  ;;  %v7135_v16 = vpop.f32.mrf.mxu3 }
 0x32c   :  { %3512 = vmatmul.f32.vlgmr.msrb.gmra.mxu0 %v7128_v8  ;;  %3597 = vmatpush.msra.mxu1 %v1709_v58  ;;  %7580 = vst [vmem:[#allocation54_spill] sm:$0xff] %v7133_v48  ;;  %v1101_v58 = vld [vmem:[#allocation3 + $0x1be8] sm:$0xff] }
 0x32d   :  { %3577 = vmatpush.msra.mxu0 %v1197_v53  ;;  %3617 = vmatpush.msra.mxu2 %v686_v6  ;;  %7581 = vst [vmem:[#allocation55_spill] sm:$0xff] %v7135_v16  ;;  %v1134_v53 = vld [vmem:[#allocation3 + $0x1cf0] sm:$0xff]  ;;  %v4248_v16 = vld [vmem:[#allocation7 + $0xe40] sm:$0xff] }
 0x32e   :  { %3637 = vmatpush.msra.mxu3 %v1198_v4  ;;  %3532 = vmatmul.f32.vlgmr.msrb.gmra.mxu1 %v6998_v38  ;;  %v590_v6 = vld [vmem:[#allocation3 + $0xbf0] sm:$0xff]  ;;  %v7138_v38 = vpop.f32.mrf.mxu1 }
 0x32f   :  { %3578 = vmatpush.msra.mxu0 %v1165_v19  ;;  %3598 = vmatpush.msra.mxu1 %v1677_v26  ;;  %v1102_v4 = vld [vmem:[#allocation3 + $0x1bf0] sm:$0xff]  ;;  %7582 = vst [vmem:[#allocation56_spill] sm:$0xff] %v7138_v38  ;;  %v1037_v26 = vld [vmem:[#allocation3 + $0x19e8] sm:$0xff] }
 0x330   :  { %3618 = vmatpush.msra.mxu2 %v654_v33  ;;  %3638 = vmatpush.msra.mxu3 %v1166_v46  ;;  %v1070_v19 = vld [vmem:[#allocation3 + $0x1af0] sm:$0xff]  ;;  %v1549_v33 = vld [vmem:[#allocation3 + $0x29e8] sm:$0xff] }
 0x331   :  { %3579 = vmatpush.msra.mxu0 %v1133_v40  ;;  %3599 = vmatpush.msra.mxu1 %v1645_v52  ;;  %v526_v46 = vld [vmem:[#allocation3 + $0x9f0] sm:$0xff]  ;;  %v7140_v40 = vpop.f32.mrf.mxu2  ;;  %v1005_v52 = vld [vmem:[#allocation3 + $0x18e8] sm:$0xff] }
 0x332   :  { %3619 = vmatpush.msra.mxu2 %v622_v56  ;;  %3639 = vmatpush.msra.mxu3 %v1134_v53  ;;  %7583 = vst [vmem:[#allocation57_spill] sm:$0xff] %v7140_v40  ;;  %v1038_v56 = vld [vmem:[#allocation3 + $0x19f0] sm:$0xff] }
 0x333   :  { %3580 = vmatpush.msra.mxu0 %v1101_v58  ;;  %3600 = vmatpush.msra.mxu1 %v1613_v37  ;;  %v7142_v53 = vpop.f32.mrf.mxu0  ;;  %v7144_v58 = vpop.f32.mrf.mxu3  ;;  %v1517_v37 = vld [vmem:[#allocation3 + $0x28e8] sm:$0xff]  ;;  %v7146_v38 = vld [vmem:[#allocation5 + $0x10] sm:$0xff] }
 0x334   :  { %3620 = vmatpush.msra.mxu2 %v590_v6  ;;  %3640 = vmatpush.msra.mxu3 %v1102_v4  ;;  %7584 = vst [vmem:[#allocation58_spill] sm:$0xff] %v7142_v53  ;;  %v494_v6 = vld [vmem:[#allocation3 + $0x8f0] sm:$0xff]  ;;  %v973_v4 = vld [vmem:[#allocation3 + $0x17e8] sm:$0xff]  ;;  %v1775_v48 = vperm.slane %v7146_v38, 7  ;;  %v1768_v12 = vperm.slane %v7146_v38, 0  ;;  %v1769_v59 = vperm.slane %v7146_v38, 1 }
 0x335   :  { %3581 = vmatpush.msra.mxu0 %v1069_v9  ;;  %3601 = vmatpush.msra.mxu1 %v1581_v15  ;;  %7585 = vst [vmem:[#allocation59_spill] sm:$0xff] %v7144_v58  ;;  %v1006_v9 = vld [vmem:[#allocation3 + $0x18f0] sm:$0xff]  ;;  %v1485_v15 = vld [vmem:[#allocation3 + $0x27e8] sm:$0xff]  ;;  %v1455_v58 = vld [vmem:[#allocation3 + $0x26f8] sm:$0xff] }
 0x336   :  { %3621 = vmatpush.msra.mxu2 %v558_v50  ;;  %3641 = vmatpush.msra.mxu3 %v1070_v19  ;;  %v462_v50 = vld [vmem:[#allocation3 + $0x7f0] sm:$0xff]  ;;  %v1453_v19 = vld [vmem:[#allocation3 + $0x26e8] sm:$0xff]  ;;  %v2854_v11 = vadd.f32 %v7112_v47, %v1769_v59  ;;  %v3968_v47 = vld [vmem:[#allocation7 + $0x580] sm:$0xff] }
 0x337   :  { %3582 = vmatpush.msra.mxu0 %v1037_v26  ;;  %3602 = vmatpush.msra.mxu1 %v1549_v33  ;;  %v974_v53 = vld [vmem:[#allocation3 + $0x17f0] sm:$0xff] }
 0x338   :  { %3622 = vmatpush.msra.mxu2 %v526_v46  ;;  %3642 = vmatpush.msra.mxu3 %v1038_v56  ;;  %v430_v26 = vld [vmem:[#allocation3 + $0x6f0] sm:$0xff]  ;;  %v909_v46 = vld [vmem:[#allocation3 + $0x15e8] sm:$0xff] }
 0x339   :  { %3583 = vmatpush.msra.mxu0 %v1005_v52  ;;  %3603 = vmatpush.msra.mxu1 %v1517_v37  ;;  %v942_v33 = vld [vmem:[#allocation3 + $0x16f0] sm:$0xff]  ;;  %v1421_v56 = vld [vmem:[#allocation3 + $0x25e8] sm:$0xff] }
 0x33a   :  { %3623 = vmatpush.msra.mxu2 %v494_v6  ;;  %3643 = vmatpush.msra.mxu3 %v1006_v9  ;;  %v3213_v42 = vpop.f32.mrf.mxu1  ;;  %v398_v52 = vld [vmem:[#allocation3 + $0x5f0] sm:$0xff]  ;;  %v877_v6 = vld [vmem:[#allocation3 + $0x14e8] sm:$0xff] }
 0x33b   :  { %3584 = vmatpush.msra.mxu0 %v973_v4  ;;  %3604 = vmatpush.msra.mxu1 %v1485_v15  ;;  %v3214_v40 = vadd.f32 %v3213_v42, %v1775_v48  ;;  %v910_v37 = vld [vmem:[#allocation3 + $0x15f0] sm:$0xff]  ;;  %v7149_v29 = vpop.f32.mrf.mxu0  ;;  %v7151_v9 = vpop.f32.mrf.mxu3  ;;  %v1389_v4 = vld [vmem:[#allocation3 + $0x24e8] sm:$0xff] }
 0x33c   :  { %3624 = vmatpush.msra.mxu2 %v462_v50  ;;  %3644 = vmatpush.msra.mxu3 %v974_v53  ;;  %v3233_v45 = vpop.f32.mrf.mxu2  ;;  %7586 = vst [vmem:[#allocation60_spill] sm:$0xff] %v7151_v9  ;;  %v366_v15 = vld [vmem:[#allocation3 + $0x4f0] sm:$0xff]  ;;  %v845_v53 = vld [vmem:[#allocation3 + $0x13e8] sm:$0xff] }
 0x33d   :  { %3585 = vmatpush.msra.mxu0 %v941_v18  ;;  %3605 = vmatpush.msra.mxu1 %v1453_v19  ;;  %v3234_v50 = vadd.f32 %v3233_v45, %v3214_v40  ;;  %v878_v18 = vld [vmem:[#allocation3 + $0x14f0] sm:$0xff]  ;;  %v1357_v42 = vld [vmem:[#allocation3 + $0x23e8] sm:$0xff] }
 0x33e   :  { %3625 = vmatpush.msra.mxu2 %v430_v26  ;;  %3645 = vmatpush.msra.mxu3 %v942_v33  ;;  %v334_v48 = vld [vmem:[#allocation3 + $0x3f0] sm:$0xff]  ;;  %v813_v26 = vld [vmem:[#allocation3 + $0x12e8] sm:$0xff] }
 0x33f   :  { %3586 = vmatpush.msra.mxu0 %v909_v46  ;;  %3606 = vmatpush.msra.mxu1 %v1421_v56  ;;  %v846_v19 = vld [vmem:[#allocation3 + $0x13f0] sm:$0xff]  ;;  %v1325_v9 = vld [vmem:[#allocation3 + $0x22e8] sm:$0xff] }
 0x340   :  { %3626 = vmatpush.msra.mxu2 %v398_v52  ;;  %3646 = vmatpush.msra.mxu3 %v910_v37  ;;  %v302_v33 = vld [vmem:[#allocation3 + $0x2f0] sm:$0xff]  ;;  %v781_v40 = vld [vmem:[#allocation3 + $0x11e8] sm:$0xff] }
 0x341   :  { %3587 = vmatpush.msra.mxu0 %v877_v6  ;;  %3607 = vmatpush.msra.mxu1 %v1389_v4  ;;  %v814_v45 = vld [vmem:[#allocation3 + $0x12f0] sm:$0xff]  ;;  %v1293_v46 = vld [vmem:[#allocation3 + $0x21e8] sm:$0xff] }
 0x342   :  { %3627 = vmatpush.msra.mxu2 %v366_v15  ;;  %3647 = vmatpush.msra.mxu3 %v878_v18  ;;  %v270_v56 = vld [vmem:[#allocation3 + $0x1f0] sm:$0xff]  ;;  %v749_v37 = vld [vmem:[#allocation3 + $0x10e8] sm:$0xff] }
 0x343   :  { %3588 = vmatpush.msra.mxu0 %v845_v53  ;;  %3572 = vmatmul.f32.vlgmr.msrb.gmra.mxu3 %v7128_v8  ;;  %v782_v52 = vld [vmem:[#allocation3 + $0x11f0] sm:$0xff]  ;;  %v1261_v6 = vld [vmem:[#allocation3 + $0x20e8] sm:$0xff] }
 0x344   :  { %3608 = vmatpush.msra.mxu1 %v1357_v42  ;;  %3628 = vmatpush.msra.mxu2 %v334_v48  ;;  %v238_v15 = vld [vmem:[#allocation3 + $0xf0] sm:$0xff]  ;;  %v7156_v42 = vpop.f32.mrf.mxu0  ;;  %v719_v48 = vld [vmem:[#allocation3 + $0xff8] sm:$0xff] }
 0x345   :  { %3648 = vmatpush.msra.mxu3 %v846_v19  ;;  %3589 = vmatpush.msra.mxu0 %v813_v26  ;;  %v3253_v4 = vpop.f32.mrf.mxu3  ;;  %v750_v18 = vld [vmem:[#allocation3 + $0x10f0] sm:$0xff]  ;;  %v1231_v19 = vld [vmem:[#allocation3 + $0x1ff8] sm:$0xff]  ;;  %v7192_v60 = vpop.f32.mrf.mxu2 }
 0x346   :  { %3609 = vmatpush.msra.mxu1 %v1325_v9  ;;  %3629 = vmatpush.msra.mxu2 %v302_v33  ;;  %v7154_v53 = vadd.f32 %v3253_v4, %v3234_v50  ;;  %v1742_v9 = vld [vmem:[#allocation3 + $0x2ff0] sm:$0xff]  ;;  %v1743_v26 = vld [vmem:[#allocation3 + $0x2ff8] sm:$0xff]  ;;  %v7161_v33 = vld [vmem:[%s7538_s0 + $0x8] sm:$0xff] }
 0x347   :  { %3649 = vmatpush.msra.mxu3 %v814_v45  ;;  %3590 = vmatpush.msra.mxu0 %v781_v40  ;;  %v1710_v50 = vld [vmem:[#allocation3 + $0x2ef0] sm:$0xff]  ;;  %v687_v45 = vld [vmem:[#allocation3 + $0xef8] sm:$0xff] }
 0x348   :  { %3610 = vmatpush.msra.mxu1 %v1293_v46  ;;  %7587 = vst [vmem:[#allocation61_spill] sm:$0xff] %v7154_v53  ;;  %3630 = vmatpush.msra.mxu2 %v270_v56  ;;  %v1199_v40 = vld [vmem:[#allocation3 + $0x1ef8] sm:$0xff]  ;;  %v1678_v56 = vld [vmem:[#allocation3 + $0x2df0] sm:$0xff] }
 0x349   :  { %3650 = vmatpush.msra.mxu3 %v782_v52  ;;  %3591 = vmatpush.msra.mxu0 %v749_v37  ;;  %v1711_v46 = vld [vmem:[#allocation3 + $0x2ef8] sm:$0xff]  ;;  %v1646_v4 = vld [vmem:[#allocation3 + $0x2cf0] sm:$0xff] }
 0x34a   :  { %3611 = vmatpush.msra.mxu1 %v1261_v6  ;;  %3631 = vmatpush.msra.mxu2 %v238_v15  ;;  %v655_v52 = vld [vmem:[#allocation3 + $0xdf8] sm:$0xff] }
 0x34b   :  { %3651 = vmatpush.msra.mxu3 %v750_v18  ;;  %3592 = vmatmul.f32.vlgmr.msra.gmra.mxu0 %v7161_v33  ;;  %v1167_v37 = vld [vmem:[#allocation3 + $0x1df8] sm:$0xff] }
 0x34c   :  { %3676 = vmatpush.msrb.mxu1 %v719_v48  ;;  %3656 = vmatpush.msrb.mxu0 %v1742_v9  ;;  %v1679_v6 = vld [vmem:[#allocation3 + $0x2df8] sm:$0xff]  ;;  %v7165_v18 = vpop.f32.mrf.mxu0 }
 0x34d   :  { %3696 = vmatpush.msrb.mxu2 %v1231_v19  ;;  %3716 = vmatpush.msrb.mxu3 %v1743_v26  ;;  %v623_v15 = vld [vmem:[#allocation3 + $0xcf8] sm:$0xff]  ;;  %v1614_v19 = vld [vmem:[#allocation3 + $0x2bf0] sm:$0xff] }
 0x34e   :  { %3612 = vmatmul.f32.vlgmr.msra.gmra.mxu1 %v7051_v31  ;;  %3657 = vmatpush.msrb.mxu0 %v1710_v50  ;;  %v1135_v48 = vld [vmem:[#allocation3 + $0x1cf8] sm:$0xff] }
 0x34f   :  { %3677 = vmatpush.msrb.mxu1 %v687_v45  ;;  %3697 = vmatpush.msrb.mxu2 %v1199_v40  ;;  %v1647_v9 = vld [vmem:[#allocation3 + $0x2cf8] sm:$0xff]  ;;  %v1582_v45 = vld [vmem:[#allocation3 + $0x2af0] sm:$0xff] }
 0x350   :  { %3717 = vmatpush.msrb.mxu3 %v1711_v46  ;;  %3658 = vmatpush.msrb.mxu0 %v1678_v56  ;;  %v591_v31 = vld [vmem:[#allocation3 + $0xbf8] sm:$0xff]  ;;  %v1550_v56 = vld [vmem:[#allocation3 + $0x29f0] sm:$0xff] }
 0x351   :  { %3678 = vmatpush.msrb.mxu1 %v655_v52  ;;  %3698 = vmatpush.msrb.mxu2 %v1167_v37  ;;  %v1103_v26 = vld [vmem:[#allocation3 + $0x1bf8] sm:$0xff] }
 0x352   :  { %3718 = vmatpush.msrb.mxu3 %v1679_v6  ;;  %3659 = vmatpush.msrb.mxu0 %v1646_v4  ;;  %v1615_v50 = vld [vmem:[#allocation3 + $0x2bf8] sm:$0xff]  ;;  %v1518_v4 = vld [vmem:[#allocation3 + $0x28f0] sm:$0xff] }
 0x353   :  { %3679 = vmatpush.msrb.mxu1 %v623_v15  ;;  %3699 = vmatpush.msrb.mxu2 %v1135_v48  ;;  %v559_v40 = vld [vmem:[#allocation3 + $0xaf8] sm:$0xff] }
 0x354   :  { %3719 = vmatpush.msrb.mxu3 %v1647_v9  ;;  %3660 = vmatpush.msrb.mxu0 %v1614_v19  ;;  %v1071_v46 = vld [vmem:[#allocation3 + $0x1af8] sm:$0xff]  ;;  %v7167_v48 = vpop.f32.mrf.mxu0 }
 0x355   :  { %3680 = vmatpush.msrb.mxu1 %v591_v31  ;;  %v1583_v53 = vld [vmem:[#allocation3 + $0x2af8] sm:$0xff]  ;;  %3700 = vmatpush.msrb.mxu2 %v1103_v26  ;;  %7588 = vst [vmem:[#allocation62_spill] sm:$0xff] %v7167_v48  ;;  %v1486_v31 = vld [vmem:[#allocation3 + $0x27f0] sm:$0xff] }
 0x356   :  { %3720 = vmatpush.msrb.mxu3 %v1615_v50  ;;  %v527_v52 = vld [vmem:[#allocation3 + $0x9f8] sm:$0xff]  ;;  %3661 = vmatpush.msrb.mxu0 %v1582_v45 }
 0x357   :  { %3681 = vmatpush.msrb.mxu1 %v559_v40  ;;  %v1039_v37 = vld [vmem:[#allocation3 + $0x19f8] sm:$0xff]  ;;  %3701 = vmatpush.msrb.mxu2 %v1071_v46  ;;  %v1454_v40 = vld [vmem:[#allocation3 + $0x26f0] sm:$0xff] }
 0x358   :  { %v1551_v6 = vld [vmem:[#allocation3 + $0x29f8] sm:$0xff]  ;;  %3721 = vmatpush.msrb.mxu3 %v1583_v53  ;;  %3662 = vmatpush.msrb.mxu0 %v1550_v56  ;;  %v1422_v56 = vld [vmem:[#allocation3 + $0x25f0] sm:$0xff] }
 0x359   :  { %v495_v15 = vld [vmem:[#allocation3 + $0x8f8] sm:$0xff]  ;;  %3682 = vmatpush.msrb.mxu1 %v527_v52  ;;  %3702 = vmatpush.msrb.mxu2 %v1039_v37 }
 0x35a   :  { %v1007_v9 = vld [vmem:[#allocation3 + $0x18f8] sm:$0xff]  ;;  %3722 = vmatpush.msrb.mxu3 %v1551_v6  ;;  %3663 = vmatpush.msrb.mxu0 %v1518_v4  ;;  %v1390_v4 = vld [vmem:[#allocation3 + $0x24f0] sm:$0xff] }
 0x35b   :  { %v1519_v19 = vld [vmem:[#allocation3 + $0x28f8] sm:$0xff]  ;;  %3683 = vmatpush.msrb.mxu1 %v495_v15  ;;  %3703 = vmatpush.msrb.mxu2 %v1007_v9 }
 0x35c   :  { %v463_v26 = vld [vmem:[#allocation3 + $0x7f8] sm:$0xff]  ;;  %3723 = vmatpush.msrb.mxu3 %v1519_v19  ;;  %3664 = vmatpush.msrb.mxu0 %v1486_v31  ;;  %v1358_v31 = vld [vmem:[#allocation3 + $0x23f0] sm:$0xff] }
 0x35d   :  { %v975_v50 = vld [vmem:[#allocation3 + $0x17f8] sm:$0xff]  ;;  %3684 = vmatpush.msrb.mxu1 %v463_v26  ;;  %v7169_v26 = vpop.f32.mrf.mxu0  ;;  %3632 = vmatmul.f32.vlgmr.msra.gmra.mxu2 %v7128_v8 }
 0x35e   :  { %v1487_v45 = vld [vmem:[#allocation3 + $0x27f8] sm:$0xff]  ;;  %3704 = vmatpush.msrb.mxu2 %v975_v50  ;;  %3665 = vmatpush.msrb.mxu0 %v1454_v40  ;;  %7589 = vst [vmem:[#allocation63_spill] sm:$0xff] %v7169_v26 }
 0x35f   :  { %v431_v53 = vld [vmem:[#allocation3 + $0x6f8] sm:$0xff]  ;;  %3724 = vmatpush.msrb.mxu3 %v1487_v45 }
 0x360   :  { %v943_v46 = vld [vmem:[#allocation3 + $0x16f8] sm:$0xff]  ;;  %3685 = vmatpush.msrb.mxu1 %v431_v53  ;;  %3666 = vmatpush.msrb.mxu0 %v1422_v56 }
 0x361   :  { %v399_v52 = vld [vmem:[#allocation3 + $0x5f8] sm:$0xff]  ;;  %3705 = vmatpush.msrb.mxu2 %v943_v46  ;;  %3725 = vmatpush.msrb.mxu3 %v1455_v58  ;;  %v1326_v58 = vld [vmem:[#allocation3 + $0x22f0] sm:$0xff] }
 0x362   :  { %v911_v37 = vld [vmem:[#allocation3 + $0x15f8] sm:$0xff]  ;;  %3686 = vmatpush.msrb.mxu1 %v399_v52  ;;  %3667 = vmatpush.msrb.mxu0 %v1390_v4  ;;  %v1294_v52 = vld [vmem:[#allocation3 + $0x21f0] sm:$0xff] }
 0x363   :  { %v1423_v6 = vld [vmem:[#allocation3 + $0x25f8] sm:$0xff]  ;;  %3706 = vmatpush.msrb.mxu2 %v911_v37  ;;  %3652 = vmatmul.f32.vlgmr.msra.gmra.mxu3 %v7161_v33 }
 0x364   :  { %v367_v15 = vld [vmem:[#allocation3 + $0x4f8] sm:$0xff]  ;;  %3726 = vmatpush.msrb.mxu3 %v1423_v6  ;;  %3668 = vmatpush.msrb.mxu0 %v1358_v31 }
 0x365   :  { %v879_v9 = vld [vmem:[#allocation3 + $0x14f8] sm:$0xff]  ;;  %3687 = vmatpush.msrb.mxu1 %v367_v15  ;;  %v1262_v15 = vld [vmem:[#allocation3 + $0x20f0] sm:$0xff]  ;;  %v7173_v26 = vpop.f32.mrf.mxu0 }
 0x366   :  { %v1391_v19 = vld [vmem:[#allocation3 + $0x24f8] sm:$0xff]  ;;  %3707 = vmatpush.msrb.mxu2 %v879_v9  ;;  %3669 = vmatpush.msrb.mxu0 %v1326_v58  ;;  %7590 = vst [vmem:[#allocation64_spill] sm:$0xff] %v7173_v26  ;;  %v4296_v58 = vld [vmem:[#allocation7 + $0xfc0] sm:$0xff] }
 0x367   :  { %v335_v50 = vld [vmem:[#allocation3 + $0x3f8] sm:$0xff]  ;;  %3727 = vmatpush.msrb.mxu3 %v1391_v19  ;;  %v4264_v26 = vld [vmem:[#allocation7 + $0xec0] sm:$0xff] }
 0x368   :  { %v847_v45 = vld [vmem:[#allocation3 + $0x13f8] sm:$0xff]  ;;  %3688 = vmatpush.msrb.mxu1 %v335_v50  ;;  %3670 = vmatpush.msrb.mxu0 %v1294_v52  ;;  %v3912_v50 = vld [vmem:[#allocation7 + $0x3c0] sm:$0xff] }
 0x369   :  { %v1359_v40 = vld [vmem:[#allocation3 + $0x23f8] sm:$0xff]  ;;  %3708 = vmatpush.msrb.mxu2 %v847_v45  ;;  %v4040_v45 = vld [vmem:[#allocation7 + $0x7c0] sm:$0xff] }
 0x36a   :  { %v303_v53 = vld [vmem:[#allocation3 + $0x2f8] sm:$0xff]  ;;  %3728 = vmatpush.msrb.mxu3 %v1359_v40  ;;  %3671 = vmatpush.msrb.mxu0 %v1262_v15  ;;  %v4168_v40 = vld [vmem:[#allocation7 + $0xbc0] sm:$0xff] }
 0x36b   :  { %v815_v46 = vld [vmem:[#allocation3 + $0x12f8] sm:$0xff]  ;;  %3689 = vmatpush.msrb.mxu1 %v303_v53  ;;  %v6449_v53 = vld [vmem:[%s7538_s0 + $0x10] sm:$0xff]  ;;  %v4160_v52 = vld [vmem:[#allocation7 + $0xb80] sm:$0xff] }
 0x36c   :  { %v1327_v56 = vld [vmem:[#allocation3 + $0x22f8] sm:$0xff]  ;;  %3709 = vmatpush.msrb.mxu2 %v815_v46  ;;  %3672 = vmatmul.f32.vlgmr.msrb.gmra.mxu0 %v6449_v53  ;;  %v3904_v46 = vld [vmem:[#allocation7 + $0x380] sm:$0xff] }
 0x36d   :  { %v271_v37 = vld [vmem:[#allocation3 + $0x1f8] sm:$0xff]  ;;  %3729 = vmatpush.msrb.mxu3 %v1327_v56  ;;  %4322 = vmatpush.msra.mxu0 %v3912_v50  ;;  %v4032_v56 = vld [vmem:[#allocation7 + $0x780] sm:$0xff] }
 0x36e   :  { %v783_v6 = vld [vmem:[#allocation3 + $0x11f8] sm:$0xff]  ;;  %3690 = vmatpush.msrb.mxu1 %v271_v37  ;;  %v4288_v37 = vld [vmem:[#allocation7 + $0xf80] sm:$0xff] }
 0x36f   :  { %v1295_v4 = vld [vmem:[#allocation3 + $0x21f8] sm:$0xff]  ;;  %3710 = vmatpush.msrb.mxu2 %v783_v6  ;;  %4323 = vmatpush.msra.mxu0 %v3904_v46  ;;  %v3896_v6 = vld [vmem:[#allocation7 + $0x340] sm:$0xff] }
 0x370   :  { %v239_v9 = vld [vmem:[#allocation3 + $0xf8] sm:$0xff]  ;;  %3730 = vmatpush.msrb.mxu3 %v1295_v4  ;;  %v4024_v4 = vld [vmem:[#allocation7 + $0x740] sm:$0xff] }
 0x371   :  { %v751_v19 = vld [vmem:[#allocation3 + $0x10f8] sm:$0xff]  ;;  %3691 = vmatpush.msrb.mxu1 %v239_v9  ;;  %v4152_v15 = vld [vmem:[#allocation7 + $0xb40] sm:$0xff]  ;;  %4324 = vmatpush.msra.mxu0 %v3896_v6  ;;  %v3293_v6 = vpop.f32.mrf.mxu1 }
 0x372   :  { %v1263_v31 = vld [vmem:[#allocation3 + $0x20f8] sm:$0xff]  ;;  %3711 = vmatpush.msrb.mxu2 %v751_v19  ;;  %v4280_v9 = vld [vmem:[#allocation7 + $0xf40] sm:$0xff]  ;;  %3692 = vmatmul.f32.vlgmr.msrb.gmra.mxu1 %v7128_v8 }
 0x373   :  { %3731 = vmatpush.msrb.mxu3 %v1263_v31  ;;  %3712 = vmatmul.f32.vlgmr.msrb.gmra.mxu2 %v7161_v33  ;;  %v7179_v19 = vld [vmem:[#allocation5 + $0x18] sm:$0xff]  ;;  %v3273_v31 = vpop.f32.mrf.mxu0  ;;  %v3888_v33 = vld [vmem:[#allocation7 + $0x300] sm:$0xff] }
 0x374   :  { %4342 = vmatpush.msra.mxu1 %v4040_v45  ;;  %4362 = vmatpush.msra.mxu2 %v4168_v40  ;;  %v4016_v50 = vld [vmem:[#allocation7 + $0x700] sm:$0xff]  ;;  %v7182_v45 = vld [vmem:[#allocation5 + $0x8] sm:$0xff] }
 0x375   :  { %4382 = vmatpush.msra.mxu3 %v4296_v58  ;;  %v4144_v40 = vld [vmem:[#allocation7 + $0xb00] sm:$0xff]  ;;  %4325 = vmatpush.msra.mxu0 %v3888_v33  ;;  %v1760_v48 = vperm.slane %v7182_v45, 0  ;;  %v1761_v41 = vperm.slane %v7182_v45, 1 }
 0x376   :  { %3732 = vmatmul.f32.vlgmr.msrb.gmra.mxu3 %v6449_v53  ;;  %4343 = vmatpush.msra.mxu1 %v4032_v56  ;;  %v4272_v58 = vld [vmem:[#allocation7 + $0xf00] sm:$0xff] }
 0x377   :  { %4363 = vmatpush.msra.mxu2 %v4160_v52  ;;  %4383 = vmatpush.msra.mxu3 %v4288_v37  ;;  %v3880_v53 = vld [vmem:[#allocation7 + $0x2c0] sm:$0xff]  ;;  %v1776_v52 = vperm.slane %v7179_v19, 0  ;;  %v1777_v37 = vperm.slane %v7179_v19, 1  ;;  %v2314_v0 = vadd.f32 %v7094_v13, %v1760_v48 }
 0x378   :  { %4344 = vmatpush.msra.mxu1 %v4024_v4  ;;  %v4008_v46 = vld [vmem:[#allocation7 + $0x6c0] sm:$0xff]  ;;  %v3333_v4 = vpop.f32.mrf.mxu3  ;;  %4326 = vmatpush.msra.mxu0 %v3880_v53 }
 0x379   :  { %4364 = vmatpush.msra.mxu2 %v4152_v15  ;;  %4384 = vmatpush.msra.mxu3 %v4280_v9  ;;  %v7184_v56 = vld [vmem:[#allocation5] sm:$0xff]  ;;  %v3274_v36 = vadd.f32 %v3273_v31, %v1776_v52  ;;  %v3334_v14 = vadd.f32 %v3333_v4, %v1777_v37  ;;  %v2334_v59 = vadd.f32 %v7037_v7, %v2314_v0  ;;  %v1770_v0 = vperm.slane %v7146_v38, 2 }
 0x37a   :  { %4345 = vmatpush.msra.mxu1 %v4016_v50  ;;  %v4136_v8 = vld [vmem:[#allocation7 + $0xac0] sm:$0xff]  ;;  %v1752_v55 = vperm.slane %v7184_v56, 0  ;;  %v1753_v34 = vperm.slane %v7184_v56, 1 }
 0x37b   :  { %4365 = vmatpush.msra.mxu2 %v4144_v40  ;;  %4385 = vmatpush.msra.mxu3 %v4272_v58  ;;  %v3872_v15 = vld [vmem:[#allocation7 + $0x280] sm:$0xff]  ;;  %v3353_v53 = vpop.f32.mrf.mxu0 }
 0x37c   :  { %v4000_v9 = vld [vmem:[#allocation7 + $0x680] sm:$0xff]  ;;  %4346 = vmatpush.msra.mxu1 %v4008_v46  ;;  %4327 = vmatpush.msra.mxu0 %v3872_v15  ;;  %v1834_v37 = vadd.f32 %v7030_v35, %v1752_v55  ;;  %v1894_v4 = vadd.f32 %v7005_v3, %v1753_v34  ;;  %v3294_v15 = vadd.f32 %v3293_v6, %v3274_v36  ;;  %v1778_v55 = vperm.slane %v7179_v19, 2 }
 0x37d   :  { %v4128_v33 = vld [vmem:[#allocation7 + $0xa80] sm:$0xff]  ;;  %4366 = vmatpush.msra.mxu2 %v4136_v8  ;;  %4386 = vmatpush.msra.mxu3 %v4264_v26  ;;  %v2374_v8 = vadd.f32 %v7058_v57, %v1761_v41  ;;  %v2794_v26 = vadd.f32 %v7149_v29, %v1768_v12  ;;  %v3373_v41 = vpop.f32.mrf.mxu1  ;;  %v2874_v3 = vadd.f32 %v7156_v42, %v2854_v11 }
 0x37e   :  { %v4256_v50 = vld [vmem:[#allocation7 + $0xe80] sm:$0xff]  ;;  %4347 = vmatpush.msra.mxu1 %v4000_v9  ;;  %v3354_v9 = vadd.f32 %v3353_v53, %v3334_v14  ;;  %v3393_v36 = vpop.f32.mrf.mxu2  ;;  %v1854_v7 = vadd.f32 %v6988_v63, %v1834_v37  ;;  %v1762_v14 = vperm.slane %v7182_v45, 2  ;;  %v7214_v63 = vadd.f32 %v7041_v23, %v2334_v59 }
 0x37f   :  { %v3864_v40 = vld [vmem:[#allocation7 + $0x240] sm:$0xff]  ;;  %4367 = vmatpush.msra.mxu2 %v4128_v33  ;;  %4387 = vmatpush.msra.mxu3 %v4256_v50  ;;  %v2814_v35 = vadd.f32 %v7098_v1, %v2794_v26  ;;  %v3314_v1 = vadd.f32 %v7192_v60, %v3294_v15  ;;  %v1754_v50 = vperm.slane %v7184_v56, 2  ;;  %v3394_v53 = vadd.f32 %v3393_v36, %v1778_v55 }
 0x380   :  { %v3992_v58 = vld [vmem:[#allocation7 + $0x640] sm:$0xff]  ;;  %4328 = vmatpush.msra.mxu0 %v3864_v40  ;;  %v3374_v11 = vadd.f32 %v3373_v41, %v3354_v9  ;;  %v2894_v60 = vadd.f32 %v7106_v2, %v2874_v3  ;;  %v1874_v23 = vadd.f32 %v6991_v24, %v1854_v7  ;;  %v2914_v37 = vadd.f32 %v7108_v39, %v1770_v0 }
 0x381   :  { %v3856_v46 = vld [vmem:[#allocation7 + $0x200] sm:$0xff]  ;;  %4348 = vmatpush.msra.mxu1 %v3992_v58  ;;  %4368 = vmatpush.msra.mxu2 %v4120_v21  ;;  %v2394_v21 = vadd.f32 %v7102_v10, %v2374_v8  ;;  %v1914_v10 = vadd.f32 %v7039_v20, %v1894_v4  ;;  %v2834_v20 = vadd.f32 %v7100_v5, %v2814_v35  ;;  %v3760_v5 = vmax.f32 %v3314_v1, 0.0 }
 0x382   :  { %v4112_v31 = vld [vmem:[#allocation7 + $0xa00] sm:$0xff]  ;;  %4388 = vmatpush.msra.mxu3 %v4248_v16  ;;  %4329 = vmatpush.msra.mxu0 %v3856_v46  ;;  %v3761_v4 = vmax.f32 %v3374_v11, 0.0  ;;  %v1954_v9 = vadd.f32 %v7001_v44, %v1754_v50  ;;  %v3744_v24 = vmax.f32 %v7214_v63, 0.0  ;;  %v3753_v41 = vmax.f32 %v2894_v60, 0.0  ;;  %v4041_v60 = vld [vmem:[#allocation7 + $0x7c8] sm:$0xff] }
 0x383   :  { %v4240_v52 = vld [vmem:[#allocation7 + $0xe00] sm:$0xff]  ;;  %4349 = vmatpush.msra.mxu1 %v3984_v54  ;;  %4369 = vmatpush.msra.mxu2 %v4112_v31  ;;  %v7217_v46 = vadd.f32 %v7046_v30, %v2394_v21  ;;  %v3413_v31 = vpop.f32.mrf.mxu3  ;;  %v3752_v59 = vmax.f32 %v2834_v20, 0.0  ;;  %v1779_v55 = vperm.slane %v7179_v19, 3  ;;  %v3736_v21 = vmax.f32 %v1874_v23, 0.0  ;;  %v3913_v20 = vld [vmem:[#allocation7 + $0x3c8] sm:$0xff] }
 0x384   :  { %v3848_v13 = vld [vmem:[#allocation7 + $0x1c0] sm:$0xff]  ;;  %4389 = vmatpush.msra.mxu3 %v4240_v52  ;;  %v2434_v52 = vadd.f32 %v7056_v51, %v1762_v14  ;;  %v1763_v35 = vperm.slane %v7182_v45, 3  ;;  %v2934_v3 = vadd.f32 %v7120_v43, %v2914_v37  ;;  %v1771_v7 = vperm.slane %v7146_v38, 3 }
 0x385   :  { %v3976_v48 = vld [vmem:[#allocation7 + $0x5c0] sm:$0xff]  ;;  %4330 = vmatpush.msra.mxu0 %v3848_v13  ;;  %v3776_v14 = vmax.f32 %v3752_v59, %v3760_v5  ;;  %v3777_v0 = vmax.f32 %v3753_v41, %v3761_v4  ;;  %v1755_v1 = vperm.slane %v7184_v56, 3  ;;  %v3768_v11 = vmax.f32 %v3736_v21, %v3744_v24  ;;  %v7591_v5 = vld [vmem:[#allocation50_spill] sm:$0xff]  ;;  %v4153_v24 = vld [vmem:[#allocation7 + $0xb48] sm:$0xff] }
 0x386   :  { %v4104_v57 = vld [vmem:[#allocation7 + $0x9c0] sm:$0xff]  ;;  %4350 = vmatpush.msra.mxu1 %v3976_v48  ;;  %v1934_v48 = vadd.f32 %v6993_v25, %v1914_v10  ;;  %v2454_v44 = vadd.f32 %v7066_v28, %v2434_v52  ;;  %v1974_v28 = vadd.f32 %v7015_v62, %v1954_v9  ;;  %v2954_v62 = vadd.f32 %v7165_v18, %v2934_v3  ;;  %v4017_v59 = vld [vmem:[#allocation7 + $0x708] sm:$0xff] }
 0x387   :  { %v4232_v29 = vld [vmem:[#allocation7 + $0xdc0] sm:$0xff]  ;;  %4370 = vmatpush.msra.mxu2 %v4104_v57  ;;  %v3414_v57 = vadd.f32 %v3413_v31, %v3394_v53  ;;  %v2974_v53 = vadd.f32 %v7114_v32, %v1771_v7  ;;  %v3905_v32 = vld [vmem:[#allocation7 + $0x388] sm:$0xff]  ;;  %v7595_v7 = vld [vmem:[#allocation30_spill] sm:$0xff] }
 0x388   :  { %v3840_v12 = vld [vmem:[#allocation7 + $0x180] sm:$0xff]  ;;  %4390 = vmatpush.msra.mxu3 %v4232_v29  ;;  %4351 = vmatpush.msra.mxu1 %v3968_v47  ;;  %v3745_v29 = vmax.f32 %v7217_v46, 0.0  ;;  %v3433_v47 = vpop.f32.mrf.mxu0  ;;  %v3737_v36 = vmax.f32 %v1934_v48, 0.0  ;;  %v2474_v63 = vadd.f32 %v7110_v27, %v2454_v44  ;;  %v7239_v46 = vmax.f32 %v3768_v11, %v3776_v14  ;;  %v4169_v27 = vld [vmem:[#allocation7 + $0xbc8] sm:$0xff] }
 0x389   :  { %v4096_v54 = vld [vmem:[#allocation7 + $0x980] sm:$0xff]  ;;  %4331 = vmatpush.msra.mxu0 %v3840_v12  ;;  %v3434_v10 = vadd.f32 %v3433_v47, %v3414_v57  ;;  %v4033_v31 = vld [vmem:[#allocation7 + $0x788] sm:$0xff]  ;;  %v3754_v37 = vmax.f32 %v2954_v62, 0.0  ;;  %v2994_v4 = vadd.f32 %v7591_v5, %v2974_v53 }
 0x38a   :  { %v4224_v34 = vld [vmem:[#allocation7 + $0xd80] sm:$0xff]  ;;  %4371 = vmatpush.msra.mxu2 %v4096_v54  ;;  %v3746_v52 = vmax.f32 %v2474_v63, 0.0  ;;  %v7593_v47 = vld [vmem:[#allocation41_spill] sm:$0xff] }
 0x38b   :  { %v3832_v16 = vld [vmem:[#allocation7 + $0x140] sm:$0xff]  ;;  %4391 = vmatpush.msra.mxu3 %v4224_v34  ;;  %v3762_v18 = vmax.f32 %v3434_v10, 0.0  ;;  %v4009_v3 = vld [vmem:[#allocation7 + $0x6c8] sm:$0xff] }
 0x38c   :  { %v3960_v6 = vld [vmem:[#allocation7 + $0x540] sm:$0xff]  ;;  %4332 = vmatpush.msra.mxu0 %v3832_v16  ;;  %v3865_v10 = vld [vmem:[#allocation7 + $0x248] sm:$0xff] }
 0x38d   :  { %v4088_v42 = vld [vmem:[#allocation7 + $0x940] sm:$0xff]  ;;  %4352 = vmatpush.msra.mxu1 %v3960_v6  ;;  %v3453_v6 = vpop.f32.mrf.mxu1  ;;  %v3778_v9 = vmax.f32 %v3754_v37, %v3762_v18  ;;  %v4121_v11 = vld [vmem:[#allocation7 + $0xa48] sm:$0xff] }
 0x38e   :  { %v4216_v33 = vld [vmem:[#allocation7 + $0xd40] sm:$0xff]  ;;  %4372 = vmatpush.msra.mxu2 %v4088_v42  ;;  %v3769_v42 = vmax.f32 %v3737_v36, %v3745_v29  ;;  %v3454_v50 = vadd.f32 %v3453_v6, %v1779_v55  ;;  %v3889_v29 = vld [vmem:[#allocation7 + $0x308] sm:$0xff] }
 0x38f   :  { %v3824_v40 = vld [vmem:[#allocation7 + $0x100] sm:$0xff]  ;;  %4392 = vmatpush.msra.mxu3 %v4216_v33  ;;  %v4265_v36 = vld [vmem:[#allocation7 + $0xec8] sm:$0xff] }
 0x390   :  { %v3952_v58 = vld [vmem:[#allocation7 + $0x500] sm:$0xff]  ;;  %4333 = vmatpush.msra.mxu0 %v3824_v40  ;;  %v2494_v40 = vadd.f32 %v7060_v61, %v1763_v35  ;;  %v7241_v56 = vmax.f32 %v3769_v42, %v3777_v0  ;;  %v4297_v61 = vld [vmem:[#allocation7 + $0xfc8] sm:$0xff] }
 0x391   :  { %v4080_v8 = vld [vmem:[#allocation7 + $0x900] sm:$0xff]  ;;  %4353 = vmatpush.msra.mxu1 %v3952_v58  ;;  %v3473_v58 = vpop.f32.mrf.mxu2  ;;  %v3881_v35 = vld [vmem:[#allocation7 + $0x2c8] sm:$0xff] }
 0x392   :  { %v4208_v26 = vld [vmem:[#allocation7 + $0xd00] sm:$0xff]  ;;  %4373 = vmatpush.msra.mxu2 %v4080_v8  ;;  %v1994_v8 = vadd.f32 %v7054_v49, %v1974_v28  ;;  %v3474_v23 = vadd.f32 %v3473_v58, %v3454_v50  ;;  %v4289_v49 = vld [vmem:[#allocation7 + $0xf88] sm:$0xff]  ;;  %v2514_v48 = vadd.f32 %v7064_v22, %v2494_v40 }
 0x393   :  { %v3816_v13 = vld [vmem:[#allocation7 + $0xc0] sm:$0xff]  ;;  %4393 = vmatpush.msra.mxu3 %v4208_v26  ;;  %v2014_v26 = vadd.f32 %v7003_v17, %v1755_v1  ;;  %v3897_v17 = vld [vmem:[#allocation7 + $0x348] sm:$0xff] }
 0x394   :  { %v3944_v30 = vld [vmem:[#allocation7 + $0x4c0] sm:$0xff]  ;;  %4334 = vmatpush.msra.mxu0 %v3816_v13  ;;  %v4161_v13 = vld [vmem:[#allocation7 + $0xb88] sm:$0xff]  ;;  %v2534_v55 = vadd.f32 %v7593_v47, %v2514_v48  ;;  %v3914_v47 = vld [vmem:[#allocation7 + $0x3d0] sm:$0xff] }
 0x395   :  { %v4072_v2 = vld [vmem:[#allocation7 + $0x8c0] sm:$0xff]  ;;  %4354 = vmatpush.msra.mxu1 %v3944_v30  ;;  %v3493_v30 = vpop.f32.mrf.mxu3  ;;  %v4129_v6 = vld [vmem:[#allocation7 + $0xa88] sm:$0xff] }
 0x396   :  { %v4200_v15 = vld [vmem:[#allocation7 + $0xcc0] sm:$0xff]  ;;  %4374 = vmatpush.msra.mxu2 %v4072_v2  ;;  %v4025_v2 = vld [vmem:[#allocation7 + $0x748] sm:$0xff]  ;;  %v3494_v41 = vadd.f32 %v3493_v30, %v3474_v23  ;;  %v3747_v28 = vmax.f32 %v2534_v55, 0.0  ;;  %v4042_v55 = vld [vmem:[#allocation7 + $0x7d0] sm:$0xff] }
 0x397   :  { %v3808_v51 = vld [vmem:[#allocation7 + $0x80] sm:$0xff]  ;;  %4394 = vmatpush.msra.mxu3 %v4200_v15  ;;  %v3738_v15 = vmax.f32 %v1994_v8, 0.0  ;;  %v3993_v1 = vld [vmem:[#allocation7 + $0x648] sm:$0xff] }
 0x398   :  { %v3936_v39 = vld [vmem:[#allocation7 + $0x480] sm:$0xff]  ;;  %4335 = vmatpush.msra.mxu0 %v3808_v51  ;;  %v4281_v51 = vld [vmem:[#allocation7 + $0xf48] sm:$0xff]  ;;  %v3763_v0 = vmax.f32 %v3494_v41, 0.0 }
 0x399   :  { %v4064_v25 = vld [vmem:[#allocation7 + $0x880] sm:$0xff]  ;;  %4355 = vmatpush.msra.mxu1 %v3936_v39  ;;  %v7592_v39 = vld [vmem:[#allocation26_spill] sm:$0xff]  ;;  %v3770_v22 = vmax.f32 %v3738_v15, %v3746_v52  ;;  %v3857_v50 = vld [vmem:[#allocation7 + $0x208] sm:$0xff] }
 0x39a   :  { %v4192_v12 = vld [vmem:[#allocation7 + $0xc80] sm:$0xff]  ;;  %4375 = vmatpush.msra.mxu2 %v4064_v25  ;;  %v2034_v57 = vadd.f32 %v7592_v39, %v2014_v26  ;;  %v4145_v25 = vld [vmem:[#allocation7 + $0xb08] sm:$0xff] }
 0x39b   :  { %v3800_v54 = vld [vmem:[#allocation7 + $0x40] sm:$0xff]  ;;  %4395 = vmatpush.msra.mxu3 %v4192_v12  ;;  %v4273_v12 = vld [vmem:[#allocation7 + $0xf08] sm:$0xff] }
 0x39c   :  { %v3928_v34 = vld [vmem:[#allocation7 + $0x440] sm:$0xff]  ;;  %4336 = vmatpush.msra.mxu0 %v3800_v54  ;;  %v7252_v54 = vmax.f32 %v3770_v22, %v3778_v9  ;;  %v2054_v14 = vadd.f32 %v7595_v7, %v2034_v57  ;;  %v3985_v63 = vld [vmem:[#allocation7 + $0x608] sm:$0xff]  ;;  %v3898_v7 = vld [vmem:[#allocation7 + $0x350] sm:$0xff] }
 0x39d   :  { %v4056_v16 = vld [vmem:[#allocation7 + $0x840] sm:$0xff]  ;;  %4356 = vmatpush.msra.mxu1 %v3928_v34  ;;  %v4137_v34 = vld [vmem:[#allocation7 + $0xac8] sm:$0xff] }
 0x39e   :  { %v4184_v19 = vld [vmem:[#allocation7 + $0xc40] sm:$0xff]  ;;  %4376 = vmatpush.msra.mxu2 %v4056_v16  ;;  %v3873_v16 = vld [vmem:[#allocation7 + $0x288] sm:$0xff]  ;;  %v3739_v42 = vmax.f32 %v2054_v14, 0.0  ;;  %v4026_v14 = vld [vmem:[#allocation7 + $0x750] sm:$0xff] }
 0x39f   :  { %v3792_v45 = vld [vmem:[#allocation7] sm:$0xff]  ;;  %4396 = vmatpush.msra.mxu3 %v4184_v19  ;;  %v4001_v19 = vld [vmem:[#allocation7 + $0x688] sm:$0xff] }
 0x3a0   :  { %v3920_v43 = vld [vmem:[#allocation7 + $0x400] sm:$0xff]  ;;  %4337 = vmatpush.msra.mxu0 %v3792_v45  ;;  %v4113_v40 = vld [vmem:[#allocation7 + $0xa08] sm:$0xff]  ;;  %v3771_v62 = vmax.f32 %v3739_v42, %v3747_v28  ;;  %v4146_v28 = vld [vmem:[#allocation7 + $0xb10] sm:$0xff] }
 0x3a1   :  { %v4048_v38 = vld [vmem:[#allocation7 + $0x800] sm:$0xff]  ;;  %4357 = vmatpush.msra.mxu1 %v3920_v43  ;;  %4338 = vmatmul.f32.vlgmr.msra.gmra.mxu0 %v7239_v46  ;;  %v4257_v43 = vld [vmem:[#allocation7 + $0xe88] sm:$0xff]  ;;  %v3874_v42 = vld [vmem:[#allocation7 + $0x290] sm:$0xff] }
 0x3a2   :  { %v4176_v33 = vld [vmem:[#allocation7 + $0xc00] sm:$0xff]  ;;  %4377 = vmatpush.msra.mxu2 %v4048_v38  ;;  %4358 = vmatmul.f32.vlgmr.msra.gmra.mxu1 %v7241_v56  ;;  %v4241_v58 = vld [vmem:[#allocation7 + $0xe08] sm:$0xff] }
 0x3a3   :  { %4397 = vmatpush.msra.mxu3 %v4176_v33  ;;  %4402 = vmatpush.msrb.mxu0 %v3913_v20  ;;  %v7594_v21 = vld [vmem:[#allocation55_spill] sm:$0xff]  ;;  %v4249_v33 = vld [vmem:[#allocation7 + $0xe48] sm:$0xff] }
 0x3a4   :  { %4422 = vmatpush.msrb.mxu1 %v4041_v60  ;;  %4442 = vmatpush.msrb.mxu2 %v4169_v27  ;;  %v3014_v44 = vadd.f32 %v7594_v21, %v2994_v4  ;;  %v3849_v53 = vld [vmem:[#allocation7 + $0x1c8] sm:$0xff]  ;;  %v4170_v21 = vld [vmem:[#allocation7 + $0xbd0] sm:$0xff] }
 0x3a5   :  { %4462 = vmatpush.msrb.mxu3 %v4297_v61  ;;  %4403 = vmatpush.msrb.mxu0 %v3905_v32  ;;  %v3977_v20 = vld [vmem:[#allocation7 + $0x5c8] sm:$0xff] }
 0x3a6   :  { %4423 = vmatpush.msrb.mxu1 %v4033_v31  ;;  %4443 = vmatpush.msrb.mxu2 %v4161_v13  ;;  %v3755_v45 = vmax.f32 %v3014_v44, 0.0  ;;  %v4105_v60 = vld [vmem:[#allocation7 + $0x9c8] sm:$0xff]  ;;  %v4298_v44 = vld [vmem:[#allocation7 + $0xfd0] sm:$0xff] }
 0x3a7   :  { %4463 = vmatpush.msrb.mxu3 %v4289_v49  ;;  %4404 = vmatpush.msrb.mxu0 %v3897_v17  ;;  %v4233_v27 = vld [vmem:[#allocation7 + $0xdc8] sm:$0xff] }
 0x3a8   :  { %4424 = vmatpush.msrb.mxu1 %v4025_v2  ;;  %4444 = vmatpush.msrb.mxu2 %v4153_v24  ;;  %v3779_v38 = vmax.f32 %v3755_v45, %v3763_v0  ;;  %v3841_v61 = vld [vmem:[#allocation7 + $0x188] sm:$0xff]  ;;  %v4154_v0 = vld [vmem:[#allocation7 + $0xb50] sm:$0xff] }
 0x3a9   :  { %4464 = vmatpush.msrb.mxu3 %v4281_v51  ;;  %4405 = vmatpush.msrb.mxu0 %v3889_v29  ;;  %v3969_v18 = vld [vmem:[#allocation7 + $0x588] sm:$0xff]  ;;  %v4274_v45 = vld [vmem:[#allocation7 + $0xf10] sm:$0xff] }
 0x3aa   :  { %4425 = vmatpush.msrb.mxu1 %v4017_v59  ;;  %4445 = vmatpush.msrb.mxu2 %v4145_v25  ;;  %v7256_v8 = vmax.f32 %v3771_v62, %v3779_v38  ;;  %v4097_v26 = vld [vmem:[#allocation7 + $0x988] sm:$0xff]  ;;  %v4002_v38 = vld [vmem:[#allocation7 + $0x690] sm:$0xff] }
 0x3ab   :  { %4465 = vmatpush.msrb.mxu3 %v4273_v12  ;;  %4406 = vmatpush.msrb.mxu0 %v3881_v35  ;;  %v4225_v32 = vld [vmem:[#allocation7 + $0xd88] sm:$0xff]  ;;  %v3906_v35 = vld [vmem:[#allocation7 + $0x390] sm:$0xff] }
 0x3ac   :  { %4426 = vmatpush.msrb.mxu1 %v4009_v3  ;;  %4446 = vmatpush.msrb.mxu2 %v4137_v34  ;;  %v3833_v31 = vld [vmem:[#allocation7 + $0x148] sm:$0xff]  ;;  %v4034_v3 = vld [vmem:[#allocation7 + $0x790] sm:$0xff] }
 0x3ad   :  { %4466 = vmatpush.msrb.mxu3 %v4265_v36  ;;  %4378 = vmatmul.f32.vlgmr.msra.gmra.mxu2 %v7252_v54  ;;  %v3961_v23 = vld [vmem:[#allocation7 + $0x548] sm:$0xff]  ;;  %v4162_v34 = vld [vmem:[#allocation7 + $0xb90] sm:$0xff] }
 0x3ae   :  { %4407 = vmatpush.msrb.mxu0 %v3873_v16  ;;  %4427 = vmatpush.msrb.mxu1 %v4001_v19  ;;  %v4089_v52 = vld [vmem:[#allocation7 + $0x948] sm:$0xff]  ;;  %v4290_v36 = vld [vmem:[#allocation7 + $0xf90] sm:$0xff] }
 0x3af   :  { %4447 = vmatpush.msrb.mxu2 %v4129_v6  ;;  %4467 = vmatpush.msrb.mxu3 %v4257_v43  ;;  %v4217_v37 = vld [vmem:[#allocation7 + $0xd48] sm:$0xff]  ;;  %v4282_v16 = vld [vmem:[#allocation7 + $0xf50] sm:$0xff] }
 0x3b0   :  { %4408 = vmatpush.msrb.mxu0 %v3865_v10  ;;  %4428 = vmatpush.msrb.mxu1 %v3993_v1  ;;  %v3825_v13 = vld [vmem:[#allocation7 + $0x108] sm:$0xff]  ;;  %v3890_v19 = vld [vmem:[#allocation7 + $0x310] sm:$0xff] }
 0x3b1   :  { %4448 = vmatpush.msrb.mxu2 %v4121_v11  ;;  %4468 = vmatpush.msrb.mxu3 %v4249_v33  ;;  %v3953_v49 = vld [vmem:[#allocation7 + $0x508] sm:$0xff]  ;;  %v4018_v6 = vld [vmem:[#allocation7 + $0x710] sm:$0xff] }
 0x3b2   :  { %4409 = vmatpush.msrb.mxu0 %v3857_v50  ;;  %4429 = vmatpush.msrb.mxu1 %v3985_v63  ;;  %v4081_v30 = vld [vmem:[#allocation7 + $0x908] sm:$0xff]  ;;  %v3882_v43 = vld [vmem:[#allocation7 + $0x2d0] sm:$0xff] }
 0x3b3   :  { %4449 = vmatpush.msrb.mxu2 %v4113_v40  ;;  %4469 = vmatpush.msrb.mxu3 %v4241_v58  ;;  %v4209_v48 = vld [vmem:[#allocation7 + $0xd08] sm:$0xff]  ;;  %v4010_v10 = vld [vmem:[#allocation7 + $0x6d0] sm:$0xff] }
 0x3b4   :  { %4410 = vmatpush.msrb.mxu0 %v3849_v53  ;;  %4430 = vmatpush.msrb.mxu1 %v3977_v20  ;;  %v3817_v5 = vld [vmem:[#allocation7 + $0xc8] sm:$0xff]  ;;  %v4138_v1 = vld [vmem:[#allocation7 + $0xad0] sm:$0xff] }
 0x3b5   :  { %4450 = vmatpush.msrb.mxu2 %v4105_v60  ;;  %4470 = vmatpush.msrb.mxu3 %v4233_v27  ;;  %v3945_v4 = vld [vmem:[#allocation7 + $0x4c8] sm:$0xff]  ;;  %v4266_v11 = vld [vmem:[#allocation7 + $0xed0] sm:$0xff] }
 0x3b6   :  { %4411 = vmatpush.msrb.mxu0 %v3841_v61  ;;  %4398 = vmatmul.f32.vlgmr.msra.gmra.mxu3 %v7256_v8  ;;  %v4073_v17 = vld [vmem:[#allocation7 + $0x8c8] sm:$0xff]  ;;  %v4130_v33 = vld [vmem:[#allocation7 + $0xa90] sm:$0xff] }
 0x3b7   :  { %4431 = vmatpush.msrb.mxu1 %v3969_v18  ;;  %4451 = vmatpush.msrb.mxu2 %v4097_v26  ;;  %v4201_v2 = vld [vmem:[#allocation7 + $0xcc8] sm:$0xff]  ;;  %v4258_v50 = vld [vmem:[#allocation7 + $0xe90] sm:$0xff] }
 0x3b8   :  { %4471 = vmatpush.msrb.mxu3 %v4225_v32  ;;  %4412 = vmatpush.msrb.mxu0 %v3833_v31  ;;  %v3809_v15 = vld [vmem:[#allocation7 + $0x88] sm:$0xff]  ;;  %v3866_v63 = vld [vmem:[#allocation7 + $0x250] sm:$0xff] }
 0x3b9   :  { %4432 = vmatpush.msrb.mxu1 %v3961_v23  ;;  %4452 = vmatpush.msrb.mxu2 %v4089_v52  ;;  %v3937_v9 = vld [vmem:[#allocation7 + $0x488] sm:$0xff]  ;;  %v3994_v40 = vld [vmem:[#allocation7 + $0x650] sm:$0xff] }
 0x3ba   :  { %4472 = vmatpush.msrb.mxu3 %v4217_v37  ;;  %4413 = vmatpush.msrb.mxu0 %v3825_v13  ;;  %v4065_v24 = vld [vmem:[#allocation7 + $0x888] sm:$0xff]  ;;  %v4122_v62 = vld [vmem:[#allocation7 + $0xa50] sm:$0xff] }
 0x3bb   :  { %4433 = vmatpush.msrb.mxu1 %v3953_v49  ;;  %4453 = vmatpush.msrb.mxu2 %v4081_v30  ;;  %v4193_v51 = vld [vmem:[#allocation7 + $0xc88] sm:$0xff]  ;;  %v4250_v58 = vld [vmem:[#allocation7 + $0xe50] sm:$0xff] }
 0x3bc   :  { %4473 = vmatpush.msrb.mxu3 %v4209_v48  ;;  %4414 = vmatpush.msrb.mxu0 %v3817_v5  ;;  %v3801_v39 = vld [vmem:[#allocation7 + $0x48] sm:$0xff]  ;;  %v3858_v53 = vld [vmem:[#allocation7 + $0x210] sm:$0xff] }
 0x3bd   :  { %4434 = vmatpush.msrb.mxu1 %v3945_v4  ;;  %4454 = vmatpush.msrb.mxu2 %v4073_v17  ;;  %v3929_v57 = vld [vmem:[#allocation7 + $0x448] sm:$0xff]  ;;  %v3986_v20 = vld [vmem:[#allocation7 + $0x610] sm:$0xff] }
 0x3be   :  { %4474 = vmatpush.msrb.mxu3 %v4201_v2  ;;  %4415 = vmatpush.msrb.mxu0 %v3809_v15  ;;  %v4057_v29 = vld [vmem:[#allocation7 + $0x848] sm:$0xff]  ;;  %v4114_v60 = vld [vmem:[#allocation7 + $0xa10] sm:$0xff] }
 0x3bf   :  { %4435 = vmatpush.msrb.mxu1 %v3937_v9  ;;  %v4185_v59 = vld [vmem:[#allocation7 + $0xc48] sm:$0xff]  ;;  %4455 = vmatpush.msrb.mxu2 %v4065_v24  ;;  %v4242_v27 = vld [vmem:[#allocation7 + $0xe10] sm:$0xff] }
 0x3c0   :  { %4475 = vmatpush.msrb.mxu3 %v4193_v51  ;;  %v3793_v41 = vld [vmem:[#allocation7 + $0x8] sm:$0xff]  ;;  %4416 = vmatpush.msrb.mxu0 %v3801_v39  ;;  %v3850_v61 = vld [vmem:[#allocation7 + $0x1d0] sm:$0xff] }
 0x3c1   :  { %v3921_v22 = vld [vmem:[#allocation7 + $0x408] sm:$0xff]  ;;  %4436 = vmatpush.msrb.mxu1 %v3929_v57  ;;  %4456 = vmatpush.msrb.mxu2 %v4057_v29  ;;  %v3978_v18 = vld [vmem:[#allocation7 + $0x5d0] sm:$0xff] }
 0x3c2   :  { %v4049_v25 = vld [vmem:[#allocation7 + $0x808] sm:$0xff]  ;;  %4476 = vmatpush.msrb.mxu3 %v4185_v59  ;;  %4417 = vmatpush.msrb.mxu0 %v3793_v41  ;;  %v4106_v26 = vld [vmem:[#allocation7 + $0x9d0] sm:$0xff] }
 0x3c3   :  { %v4177_v12 = vld [vmem:[#allocation7 + $0xc08] sm:$0xff]  ;;  %4437 = vmatpush.msrb.mxu1 %v3921_v22  ;;  %4457 = vmatpush.msrb.mxu2 %v4049_v25  ;;  %v4234_v32 = vld [vmem:[#allocation7 + $0xdd0] sm:$0xff] }
 0x3c4   :  { %4477 = vmatpush.msrb.mxu3 %v4177_v12  ;;  %4418 = vmatmul.f32.vlgmr.msrb.gmra.mxu0 %v7239_v46  ;;  %v3842_v31 = vld [vmem:[#allocation7 + $0x190] sm:$0xff] }
 0x3c5   :  { %4438 = vmatmul.f32.vlgmr.msrb.gmra.mxu1 %v7241_v56  ;;  %4458 = vmatmul.f32.vlgmr.msrb.gmra.mxu2 %v7252_v54  ;;  %v3970_v23 = vld [vmem:[#allocation7 + $0x590] sm:$0xff] }
 0x3c6   :  { %4478 = vmatmul.f32.vlgmr.msrb.gmra.mxu3 %v7256_v8  ;;  %4482 = vmatpush.msra.mxu0 %v3914_v47  ;;  %v4098_v52 = vld [vmem:[#allocation7 + $0x990] sm:$0xff] }
 0x3c7   :  { %4502 = vmatpush.msra.mxu1 %v4042_v55  ;;  %4522 = vmatpush.msra.mxu2 %v4170_v21  ;;  %v4226_v37 = vld [vmem:[#allocation7 + $0xd90] sm:$0xff] }
 0x3c8   :  { %4542 = vmatpush.msra.mxu3 %v4298_v44  ;;  %4483 = vmatpush.msra.mxu0 %v3906_v35  ;;  %v3834_v13 = vld [vmem:[#allocation7 + $0x150] sm:$0xff]  ;;  %v3915_v35 = vld [vmem:[#allocation7 + $0x3d8] sm:$0xff] }
 0x3c9   :  { %4503 = vmatpush.msra.mxu1 %v4034_v3  ;;  %4523 = vmatpush.msra.mxu2 %v4162_v34  ;;  %v3962_v49 = vld [vmem:[#allocation7 + $0x550] sm:$0xff]  ;;  %v4043_v3 = vld [vmem:[#allocation7 + $0x7d8] sm:$0xff] }
 0x3ca   :  { %4543 = vmatpush.msra.mxu3 %v4290_v36  ;;  %4484 = vmatpush.msra.mxu0 %v3898_v7  ;;  %v4090_v30 = vld [vmem:[#allocation7 + $0x950] sm:$0xff]  ;;  %v4171_v34 = vld [vmem:[#allocation7 + $0xbd8] sm:$0xff] }
 0x3cb   :  { %4504 = vmatpush.msra.mxu1 %v4026_v14  ;;  %4524 = vmatpush.msra.mxu2 %v4154_v0  ;;  %v4218_v48 = vld [vmem:[#allocation7 + $0xd50] sm:$0xff]  ;;  %v4299_v36 = vld [vmem:[#allocation7 + $0xfd8] sm:$0xff] }
 0x3cc   :  { %4544 = vmatpush.msra.mxu3 %v4282_v16  ;;  %4485 = vmatpush.msra.mxu0 %v3890_v19  ;;  %v3826_v5 = vld [vmem:[#allocation7 + $0x110] sm:$0xff]  ;;  %v3907_v7 = vld [vmem:[#allocation7 + $0x398] sm:$0xff] }
 0x3cd   :  { %4505 = vmatpush.msra.mxu1 %v4018_v6  ;;  %4525 = vmatpush.msra.mxu2 %v4146_v28  ;;  %v3954_v4 = vld [vmem:[#allocation7 + $0x510] sm:$0xff]  ;;  %v4035_v14 = vld [vmem:[#allocation7 + $0x798] sm:$0xff] }
 0x3ce   :  { %4545 = vmatpush.msra.mxu3 %v4274_v45  ;;  %4486 = vmatpush.msra.mxu0 %v3882_v43  ;;  %v4082_v17 = vld [vmem:[#allocation7 + $0x910] sm:$0xff]  ;;  %v4163_v0 = vld [vmem:[#allocation7 + $0xb98] sm:$0xff] }
 0x3cf   :  { %4506 = vmatpush.msra.mxu1 %v4010_v10  ;;  %4526 = vmatpush.msra.mxu2 %v4138_v1  ;;  %v4210_v2 = vld [vmem:[#allocation7 + $0xd10] sm:$0xff]  ;;  %v4291_v16 = vld [vmem:[#allocation7 + $0xf98] sm:$0xff] }
 0x3d0   :  { %4546 = vmatpush.msra.mxu3 %v4266_v11  ;;  %4487 = vmatpush.msra.mxu0 %v3874_v42  ;;  %v3818_v15 = vld [vmem:[#allocation7 + $0xd0] sm:$0xff]  ;;  %v3899_v19 = vld [vmem:[#allocation7 + $0x358] sm:$0xff] }
 0x3d1   :  { %4507 = vmatpush.msra.mxu1 %v4002_v38  ;;  %4527 = vmatpush.msra.mxu2 %v4130_v33  ;;  %v3946_v9 = vld [vmem:[#allocation7 + $0x4d0] sm:$0xff]  ;;  %v4027_v6 = vld [vmem:[#allocation7 + $0x758] sm:$0xff] }
 0x3d2   :  { %4547 = vmatpush.msra.mxu3 %v4258_v50  ;;  %4488 = vmatpush.msra.mxu0 %v3866_v63  ;;  %v4074_v24 = vld [vmem:[#allocation7 + $0x8d0] sm:$0xff]  ;;  %v4155_v28 = vld [vmem:[#allocation7 + $0xb58] sm:$0xff] }
 0x3d3   :  { %4508 = vmatpush.msra.mxu1 %v3994_v40  ;;  %4528 = vmatpush.msra.mxu2 %v4122_v62  ;;  %v4202_v51 = vld [vmem:[#allocation7 + $0xcd0] sm:$0xff]  ;;  %v4283_v45 = vld [vmem:[#allocation7 + $0xf58] sm:$0xff] }
 0x3d4   :  { %4548 = vmatpush.msra.mxu3 %v4250_v58  ;;  %4489 = vmatpush.msra.mxu0 %v3858_v53  ;;  %v3810_v39 = vld [vmem:[#allocation7 + $0x90] sm:$0xff]  ;;  %v3891_v43 = vld [vmem:[#allocation7 + $0x318] sm:$0xff] }
 0x3d5   :  { %4509 = vmatpush.msra.mxu1 %v3986_v20  ;;  %4529 = vmatpush.msra.mxu2 %v4114_v60  ;;  %v3938_v57 = vld [vmem:[#allocation7 + $0x490] sm:$0xff]  ;;  %v4019_v10 = vld [vmem:[#allocation7 + $0x718] sm:$0xff] }
 0x3d6   :  { %4549 = vmatpush.msra.mxu3 %v4242_v27  ;;  %4490 = vmatpush.msra.mxu0 %v3850_v61  ;;  %v4066_v29 = vld [vmem:[#allocation7 + $0x890] sm:$0xff]  ;;  %v4147_v1 = vld [vmem:[#allocation7 + $0xb18] sm:$0xff] }
 0x3d7   :  { %4510 = vmatpush.msra.mxu1 %v3978_v18  ;;  %4530 = vmatpush.msra.mxu2 %v4106_v26  ;;  %v4194_v59 = vld [vmem:[#allocation7 + $0xc90] sm:$0xff]  ;;  %v4275_v11 = vld [vmem:[#allocation7 + $0xf18] sm:$0xff] }
 0x3d8   :  { %4550 = vmatpush.msra.mxu3 %v4234_v32  ;;  %4491 = vmatpush.msra.mxu0 %v3842_v31  ;;  %v3802_v41 = vld [vmem:[#allocation7 + $0x50] sm:$0xff]  ;;  %v3883_v42 = vld [vmem:[#allocation7 + $0x2d8] sm:$0xff] }
 0x3d9   :  { %4511 = vmatpush.msra.mxu1 %v3970_v23  ;;  %4531 = vmatpush.msra.mxu2 %v4098_v52  ;;  %v3930_v22 = vld [vmem:[#allocation7 + $0x450] sm:$0xff]  ;;  %v4011_v38 = vld [vmem:[#allocation7 + $0x6d8] sm:$0xff] }
 0x3da   :  { %4551 = vmatpush.msra.mxu3 %v4226_v37  ;;  %4492 = vmatpush.msra.mxu0 %v3834_v13  ;;  %v4058_v25 = vld [vmem:[#allocation7 + $0x850] sm:$0xff]  ;;  %v4139_v33 = vld [vmem:[#allocation7 + $0xad8] sm:$0xff] }
 0x3db   :  { %4512 = vmatpush.msra.mxu1 %v3962_v49  ;;  %4532 = vmatpush.msra.mxu2 %v4090_v30  ;;  %v4186_v12 = vld [vmem:[#allocation7 + $0xc50] sm:$0xff]  ;;  %v4267_v50 = vld [vmem:[#allocation7 + $0xed8] sm:$0xff] }
 0x3dc   :  { %4552 = vmatpush.msra.mxu3 %v4218_v48  ;;  %4493 = vmatpush.msra.mxu0 %v3826_v5  ;;  %v3794_v47 = vld [vmem:[#allocation7 + $0x10] sm:$0xff]  ;;  %v3875_v63 = vld [vmem:[#allocation7 + $0x298] sm:$0xff] }
 0x3dd   :  { %4513 = vmatpush.msra.mxu1 %v3954_v4  ;;  %4533 = vmatpush.msra.mxu2 %v4082_v17  ;;  %v3922_v55 = vld [vmem:[#allocation7 + $0x410] sm:$0xff]  ;;  %v4003_v40 = vld [vmem:[#allocation7 + $0x698] sm:$0xff] }
 0x3de   :  { %4553 = vmatpush.msra.mxu3 %v4210_v2  ;;  %4494 = vmatpush.msra.mxu0 %v3818_v15  ;;  %v4050_v21 = vld [vmem:[#allocation7 + $0x810] sm:$0xff]  ;;  %v4131_v62 = vld [vmem:[#allocation7 + $0xa98] sm:$0xff] }
 0x3df   :  { %4514 = vmatpush.msra.mxu1 %v3946_v9  ;;  %4534 = vmatpush.msra.mxu2 %v4074_v24  ;;  %v4178_v44 = vld [vmem:[#allocation7 + $0xc10] sm:$0xff]  ;;  %v4259_v58 = vld [vmem:[#allocation7 + $0xe98] sm:$0xff] }
 0x3e0   :  { %4554 = vmatpush.msra.mxu3 %v4202_v51  ;;  %4495 = vmatpush.msra.mxu0 %v3810_v39  ;;  %v3867_v53 = vld [vmem:[#allocation7 + $0x258] sm:$0xff] }
 0x3e1   :  { %4515 = vmatpush.msra.mxu1 %v3938_v57  ;;  %4535 = vmatpush.msra.mxu2 %v4066_v29  ;;  %v3995_v20 = vld [vmem:[#allocation7 + $0x658] sm:$0xff] }
 0x3e2   :  { %4555 = vmatpush.msra.mxu3 %v4194_v59  ;;  %4496 = vmatpush.msra.mxu0 %v3802_v41  ;;  %v4123_v60 = vld [vmem:[#allocation7 + $0xa58] sm:$0xff] }
 0x3e3   :  { %4516 = vmatpush.msra.mxu1 %v3930_v22  ;;  %4536 = vmatpush.msra.mxu2 %v4058_v25  ;;  %v4251_v27 = vld [vmem:[#allocation7 + $0xe58] sm:$0xff] }
 0x3e4   :  { %4556 = vmatpush.msra.mxu3 %v4186_v12  ;;  %4497 = vmatpush.msra.mxu0 %v3794_v47  ;;  %v3859_v61 = vld [vmem:[#allocation7 + $0x218] sm:$0xff] }
 0x3e5   :  { %4517 = vmatpush.msra.mxu1 %v3922_v55  ;;  %4537 = vmatpush.msra.mxu2 %v4050_v21  ;;  %v3987_v18 = vld [vmem:[#allocation7 + $0x618] sm:$0xff] }
 0x3e6   :  { %4557 = vmatpush.msra.mxu3 %v4178_v44  ;;  %4498 = vmatmul.f32.vlgmr.msra.gmra.mxu0 %v7239_v46  ;;  %v4115_v26 = vld [vmem:[#allocation7 + $0xa18] sm:$0xff] }
 0x3e7   :  { %4518 = vmatmul.f32.vlgmr.msra.gmra.mxu1 %v7241_v56  ;;  %4538 = vmatmul.f32.vlgmr.msra.gmra.mxu2 %v7252_v54  ;;  %v4243_v32 = vld [vmem:[#allocation7 + $0xe18] sm:$0xff] }
 0x3e8   :  { %4558 = vmatmul.f32.vlgmr.msra.gmra.mxu3 %v7256_v8  ;;  %4562 = vmatpush.msrb.mxu0 %v3915_v35  ;;  %v3851_v31 = vld [vmem:[#allocation7 + $0x1d8] sm:$0xff] }
 0x3e9   :  { %4582 = vmatpush.msrb.mxu1 %v4043_v3  ;;  %4602 = vmatpush.msrb.mxu2 %v4171_v34  ;;  %v3979_v23 = vld [vmem:[#allocation7 + $0x5d8] sm:$0xff] }
 0x3ea   :  { %4622 = vmatpush.msrb.mxu3 %v4299_v36  ;;  %4563 = vmatpush.msrb.mxu0 %v3907_v7  ;;  %v4107_v52 = vld [vmem:[#allocation7 + $0x9d8] sm:$0xff]  ;;  %v3916_v7 = vld [vmem:[#allocation7 + $0x3e0] sm:$0xff] }
 0x3eb   :  { %4583 = vmatpush.msrb.mxu1 %v4035_v14  ;;  %4603 = vmatpush.msrb.mxu2 %v4163_v0  ;;  %v4235_v37 = vld [vmem:[#allocation7 + $0xdd8] sm:$0xff]  ;;  %v4044_v14 = vld [vmem:[#allocation7 + $0x7e0] sm:$0xff] }
 0x3ec   :  { %4623 = vmatpush.msrb.mxu3 %v4291_v16  ;;  %4564 = vmatpush.msrb.mxu0 %v3899_v19  ;;  %v3843_v13 = vld [vmem:[#allocation7 + $0x198] sm:$0xff]  ;;  %v4172_v0 = vld [vmem:[#allocation7 + $0xbe0] sm:$0xff] }
 0x3ed   :  { %4584 = vmatpush.msrb.mxu1 %v4027_v6  ;;  %4604 = vmatpush.msrb.mxu2 %v4155_v28  ;;  %v3971_v49 = vld [vmem:[#allocation7 + $0x598] sm:$0xff]  ;;  %v4300_v16 = vld [vmem:[#allocation7 + $0xfe0] sm:$0xff] }
 0x3ee   :  { %4624 = vmatpush.msrb.mxu3 %v4283_v45  ;;  %4565 = vmatpush.msrb.mxu0 %v3891_v43  ;;  %v4099_v30 = vld [vmem:[#allocation7 + $0x998] sm:$0xff]  ;;  %v3908_v19 = vld [vmem:[#allocation7 + $0x3a0] sm:$0xff] }
 0x3ef   :  { %4585 = vmatpush.msrb.mxu1 %v4019_v10  ;;  %4605 = vmatpush.msrb.mxu2 %v4147_v1  ;;  %v4227_v48 = vld [vmem:[#allocation7 + $0xd98] sm:$0xff]  ;;  %v4036_v6 = vld [vmem:[#allocation7 + $0x7a0] sm:$0xff] }
 0x3f0   :  { %4625 = vmatpush.msrb.mxu3 %v4275_v11  ;;  %4566 = vmatpush.msrb.mxu0 %v3883_v42  ;;  %v3835_v5 = vld [vmem:[#allocation7 + $0x158] sm:$0xff]  ;;  %v4164_v28 = vld [vmem:[#allocation7 + $0xba0] sm:$0xff] }
 0x3f1   :  { %4586 = vmatpush.msrb.mxu1 %v4011_v38  ;;  %4606 = vmatpush.msrb.mxu2 %v4139_v33  ;;  %v3963_v4 = vld [vmem:[#allocation7 + $0x558] sm:$0xff]  ;;  %v4292_v45 = vld [vmem:[#allocation7 + $0xfa0] sm:$0xff] }
 0x3f2   :  { %4626 = vmatpush.msrb.mxu3 %v4267_v50  ;;  %4567 = vmatpush.msrb.mxu0 %v3875_v63  ;;  %v4091_v17 = vld [vmem:[#allocation7 + $0x958] sm:$0xff]  ;;  %v3900_v43 = vld [vmem:[#allocation7 + $0x360] sm:$0xff] }
 0x3f3   :  { %4587 = vmatpush.msrb.mxu1 %v4003_v40  ;;  %4607 = vmatpush.msrb.mxu2 %v4131_v62  ;;  %v4219_v2 = vld [vmem:[#allocation7 + $0xd58] sm:$0xff]  ;;  %v4028_v10 = vld [vmem:[#allocation7 + $0x760] sm:$0xff] }
 0x3f4   :  { %4627 = vmatpush.msrb.mxu3 %v4259_v58  ;;  %4568 = vmatpush.msrb.mxu0 %v3867_v53  ;;  %v3827_v15 = vld [vmem:[#allocation7 + $0x118] sm:$0xff]  ;;  %v4156_v1 = vld [vmem:[#allocation7 + $0xb60] sm:$0xff] }
 0x3f5   :  { %4588 = vmatpush.msrb.mxu1 %v3995_v20  ;;  %4608 = vmatpush.msrb.mxu2 %v4123_v60  ;;  %v3955_v9 = vld [vmem:[#allocation7 + $0x518] sm:$0xff]  ;;  %v4284_v11 = vld [vmem:[#allocation7 + $0xf60] sm:$0xff] }
 0x3f6   :  { %4628 = vmatpush.msrb.mxu3 %v4251_v27  ;;  %4569 = vmatpush.msrb.mxu0 %v3859_v61  ;;  %v4083_v24 = vld [vmem:[#allocation7 + $0x918] sm:$0xff]  ;;  %v3892_v42 = vld [vmem:[#allocation7 + $0x320] sm:$0xff] }
 0x3f7   :  { %4589 = vmatpush.msrb.mxu1 %v3987_v18  ;;  %4609 = vmatpush.msrb.mxu2 %v4115_v26  ;;  %v4211_v51 = vld [vmem:[#allocation7 + $0xd18] sm:$0xff]  ;;  %v4020_v38 = vld [vmem:[#allocation7 + $0x720] sm:$0xff] }
 0x3f8   :  { %4629 = vmatpush.msrb.mxu3 %v4243_v32  ;;  %4570 = vmatpush.msrb.mxu0 %v3851_v31  ;;  %v3819_v39 = vld [vmem:[#allocation7 + $0xd8] sm:$0xff]  ;;  %v4148_v33 = vld [vmem:[#allocation7 + $0xb20] sm:$0xff] }
 0x3f9   :  { %4590 = vmatpush.msrb.mxu1 %v3979_v23  ;;  %4610 = vmatpush.msrb.mxu2 %v4107_v52  ;;  %v3947_v57 = vld [vmem:[#allocation7 + $0x4d8] sm:$0xff]  ;;  %v4276_v50 = vld [vmem:[#allocation7 + $0xf20] sm:$0xff] }
 0x3fa   :  { %4630 = vmatpush.msrb.mxu3 %v4235_v37  ;;  %4571 = vmatpush.msrb.mxu0 %v3843_v13  ;;  %v4075_v29 = vld [vmem:[#allocation7 + $0x8d8] sm:$0xff]  ;;  %v3884_v63 = vld [vmem:[#allocation7 + $0x2e0] sm:$0xff] }
 0x3fb   :  { %4591 = vmatpush.msrb.mxu1 %v3971_v49  ;;  %4611 = vmatpush.msrb.mxu2 %v4099_v30  ;;  %v4203_v59 = vld [vmem:[#allocation7 + $0xcd8] sm:$0xff]  ;;  %v4012_v40 = vld [vmem:[#allocation7 + $0x6e0] sm:$0xff] }
 0x3fc   :  { %4631 = vmatpush.msrb.mxu3 %v4227_v48  ;;  %4572 = vmatpush.msrb.mxu0 %v3835_v5  ;;  %v3811_v41 = vld [vmem:[#allocation7 + $0x98] sm:$0xff]  ;;  %v4140_v62 = vld [vmem:[#allocation7 + $0xae0] sm:$0xff] }
 0x3fd   :  { %4592 = vmatpush.msrb.mxu1 %v3963_v4  ;;  %4612 = vmatpush.msrb.mxu2 %v4091_v17  ;;  %v3939_v22 = vld [vmem:[#allocation7 + $0x498] sm:$0xff]  ;;  %v4268_v58 = vld [vmem:[#allocation7 + $0xee0] sm:$0xff] }
 0x3fe   :  { %4632 = vmatpush.msrb.mxu3 %v4219_v2  ;;  %4573 = vmatpush.msrb.mxu0 %v3827_v15  ;;  %v4067_v25 = vld [vmem:[#allocation7 + $0x898] sm:$0xff]  ;;  %v3876_v53 = vld [vmem:[#allocation7 + $0x2a0] sm:$0xff] }
 0x3ff   :  { %4593 = vmatpush.msrb.mxu1 %v3955_v9  ;;  %4613 = vmatpush.msrb.mxu2 %v4083_v24  ;;  %v4195_v12 = vld [vmem:[#allocation7 + $0xc98] sm:$0xff]  ;;  %v4004_v20 = vld [vmem:[#allocation7 + $0x6a0] sm:$0xff] }
 0x400   :  { %4633 = vmatpush.msrb.mxu3 %v4211_v51  ;;  %4574 = vmatpush.msrb.mxu0 %v3819_v39  ;;  %v3803_v47 = vld [vmem:[#allocation7 + $0x58] sm:$0xff]  ;;  %v4132_v60 = vld [vmem:[#allocation7 + $0xaa0] sm:$0xff] }
 0x401   :  { %4594 = vmatpush.msrb.mxu1 %v3947_v57  ;;  %4614 = vmatpush.msrb.mxu2 %v4075_v29  ;;  %v3931_v55 = vld [vmem:[#allocation7 + $0x458] sm:$0xff]  ;;  %v4260_v27 = vld [vmem:[#allocation7 + $0xea0] sm:$0xff] }
 0x402   :  { %4634 = vmatpush.msrb.mxu3 %v4203_v59  ;;  %4575 = vmatpush.msrb.mxu0 %v3811_v41  ;;  %v4059_v21 = vld [vmem:[#allocation7 + $0x858] sm:$0xff]  ;;  %v3868_v61 = vld [vmem:[#allocation7 + $0x260] sm:$0xff] }
 0x403   :  { %4595 = vmatpush.msrb.mxu1 %v3939_v22  ;;  %v4187_v44 = vld [vmem:[#allocation7 + $0xc58] sm:$0xff]  ;;  %4615 = vmatpush.msrb.mxu2 %v4067_v25  ;;  %v3996_v18 = vld [vmem:[#allocation7 + $0x660] sm:$0xff] }
 0x404   :  { %4635 = vmatpush.msrb.mxu3 %v4195_v12  ;;  %v3795_v35 = vld [vmem:[#allocation7 + $0x18] sm:$0xff]  ;;  %4576 = vmatpush.msrb.mxu0 %v3803_v47  ;;  %v4124_v26 = vld [vmem:[#allocation7 + $0xa60] sm:$0xff] }
 0x405   :  { %v3923_v3 = vld [vmem:[#allocation7 + $0x418] sm:$0xff]  ;;  %4596 = vmatpush.msrb.mxu1 %v3931_v55  ;;  %4616 = vmatpush.msrb.mxu2 %v4059_v21  ;;  %v4252_v32 = vld [vmem:[#allocation7 + $0xe60] sm:$0xff] }
 0x406   :  { %v4051_v34 = vld [vmem:[#allocation7 + $0x818] sm:$0xff]  ;;  %4636 = vmatpush.msrb.mxu3 %v4187_v44  ;;  %4577 = vmatpush.msrb.mxu0 %v3795_v35  ;;  %v3860_v31 = vld [vmem:[#allocation7 + $0x220] sm:$0xff] }
 0x407   :  { %v4179_v36 = vld [vmem:[#allocation7 + $0xc18] sm:$0xff]  ;;  %4597 = vmatpush.msrb.mxu1 %v3923_v3  ;;  %4617 = vmatpush.msrb.mxu2 %v4051_v34  ;;  %v3988_v23 = vld [vmem:[#allocation7 + $0x620] sm:$0xff] }
 0x408   :  { %4637 = vmatpush.msrb.mxu3 %v4179_v36  ;;  %4578 = vmatmul.f32.vlgmr.msrb.gmra.mxu0 %v7239_v46  ;;  %v4116_v52 = vld [vmem:[#allocation7 + $0xa20] sm:$0xff] }
 0x409   :  { %4598 = vmatmul.f32.vlgmr.msrb.gmra.mxu1 %v7241_v56  ;;  %4618 = vmatmul.f32.vlgmr.msrb.gmra.mxu2 %v7252_v54  ;;  %v4244_v37 = vld [vmem:[#allocation7 + $0xe20] sm:$0xff] }
 0x40a   :  { %4638 = vmatmul.f32.vlgmr.msrb.gmra.mxu3 %v7256_v8  ;;  %4642 = vmatpush.msra.mxu0 %v3916_v7  ;;  %v3852_v13 = vld [vmem:[#allocation7 + $0x1e0] sm:$0xff] }
 0x40b   :  { %4662 = vmatpush.msra.mxu1 %v4044_v14  ;;  %4682 = vmatpush.msra.mxu2 %v4172_v0  ;;  %v3980_v49 = vld [vmem:[#allocation7 + $0x5e0] sm:$0xff] }
 0x40c   :  { %4702 = vmatpush.msra.mxu3 %v4300_v16  ;;  %4643 = vmatpush.msra.mxu0 %v3908_v19  ;;  %v4108_v30 = vld [vmem:[#allocation7 + $0x9e0] sm:$0xff]  ;;  %v3917_v19 = vld [vmem:[#allocation7 + $0x3e8] sm:$0xff] }
 0x40d   :  { %4663 = vmatpush.msra.mxu1 %v4036_v6  ;;  %4683 = vmatpush.msra.mxu2 %v4164_v28  ;;  %v4236_v48 = vld [vmem:[#allocation7 + $0xde0] sm:$0xff]  ;;  %v4045_v6 = vld [vmem:[#allocation7 + $0x7e8] sm:$0xff] }
 0x40e   :  { %4703 = vmatpush.msra.mxu3 %v4292_v45  ;;  %4644 = vmatpush.msra.mxu0 %v3900_v43  ;;  %v3844_v5 = vld [vmem:[#allocation7 + $0x1a0] sm:$0xff]  ;;  %v4173_v28 = vld [vmem:[#allocation7 + $0xbe8] sm:$0xff] }
 0x40f   :  { %4664 = vmatpush.msra.mxu1 %v4028_v10  ;;  %4684 = vmatpush.msra.mxu2 %v4156_v1  ;;  %v3972_v4 = vld [vmem:[#allocation7 + $0x5a0] sm:$0xff]  ;;  %v4301_v45 = vld [vmem:[#allocation7 + $0xfe8] sm:$0xff] }
 0x410   :  { %4704 = vmatpush.msra.mxu3 %v4284_v11  ;;  %4645 = vmatpush.msra.mxu0 %v3892_v42  ;;  %v4100_v17 = vld [vmem:[#allocation7 + $0x9a0] sm:$0xff]  ;;  %v3909_v43 = vld [vmem:[#allocation7 + $0x3a8] sm:$0xff] }
 0x411   :  { %4665 = vmatpush.msra.mxu1 %v4020_v38  ;;  %4685 = vmatpush.msra.mxu2 %v4148_v33  ;;  %v4228_v2 = vld [vmem:[#allocation7 + $0xda0] sm:$0xff]  ;;  %v4037_v10 = vld [vmem:[#allocation7 + $0x7a8] sm:$0xff] }
 0x412   :  { %4705 = vmatpush.msra.mxu3 %v4276_v50  ;;  %4646 = vmatpush.msra.mxu0 %v3884_v63  ;;  %v3836_v15 = vld [vmem:[#allocation7 + $0x160] sm:$0xff]  ;;  %v4165_v1 = vld [vmem:[#allocation7 + $0xba8] sm:$0xff] }
 0x413   :  { %4666 = vmatpush.msra.mxu1 %v4012_v40  ;;  %4686 = vmatpush.msra.mxu2 %v4140_v62  ;;  %v3964_v9 = vld [vmem:[#allocation7 + $0x560] sm:$0xff]  ;;  %v4293_v11 = vld [vmem:[#allocation7 + $0xfa8] sm:$0xff] }
 0x414   :  { %4706 = vmatpush.msra.mxu3 %v4268_v58  ;;  %4647 = vmatpush.msra.mxu0 %v3876_v53  ;;  %v4092_v24 = vld [vmem:[#allocation7 + $0x960] sm:$0xff]  ;;  %v3901_v42 = vld [vmem:[#allocation7 + $0x368] sm:$0xff] }
 0x415   :  { %4667 = vmatpush.msra.mxu1 %v4004_v20  ;;  %4687 = vmatpush.msra.mxu2 %v4132_v60  ;;  %v4220_v51 = vld [vmem:[#allocation7 + $0xd60] sm:$0xff]  ;;  %v4029_v38 = vld [vmem:[#allocation7 + $0x768] sm:$0xff] }
 0x416   :  { %4707 = vmatpush.msra.mxu3 %v4260_v27  ;;  %4648 = vmatpush.msra.mxu0 %v3868_v61  ;;  %v3828_v39 = vld [vmem:[#allocation7 + $0x120] sm:$0xff]  ;;  %v4157_v33 = vld [vmem:[#allocation7 + $0xb68] sm:$0xff] }
 0x417   :  { %4668 = vmatpush.msra.mxu1 %v3996_v18  ;;  %4688 = vmatpush.msra.mxu2 %v4124_v26  ;;  %v3956_v57 = vld [vmem:[#allocation7 + $0x520] sm:$0xff]  ;;  %v4285_v50 = vld [vmem:[#allocation7 + $0xf68] sm:$0xff] }
 0x418   :  { %4708 = vmatpush.msra.mxu3 %v4252_v32  ;;  %4649 = vmatpush.msra.mxu0 %v3860_v31  ;;  %v4084_v29 = vld [vmem:[#allocation7 + $0x920] sm:$0xff]  ;;  %v3893_v63 = vld [vmem:[#allocation7 + $0x328] sm:$0xff] }
 0x419   :  { %4669 = vmatpush.msra.mxu1 %v3988_v23  ;;  %4689 = vmatpush.msra.mxu2 %v4116_v52  ;;  %v4212_v59 = vld [vmem:[#allocation7 + $0xd20] sm:$0xff]  ;;  %v4021_v40 = vld [vmem:[#allocation7 + $0x728] sm:$0xff] }
 0x41a   :  { %4709 = vmatpush.msra.mxu3 %v4244_v37  ;;  %4650 = vmatpush.msra.mxu0 %v3852_v13  ;;  %v3820_v41 = vld [vmem:[#allocation7 + $0xe0] sm:$0xff]  ;;  %v4149_v62 = vld [vmem:[#allocation7 + $0xb28] sm:$0xff] }
 0x41b   :  { %4670 = vmatpush.msra.mxu1 %v3980_v49  ;;  %4690 = vmatpush.msra.mxu2 %v4108_v30  ;;  %v3948_v22 = vld [vmem:[#allocation7 + $0x4e0] sm:$0xff]  ;;  %v4277_v58 = vld [vmem:[#allocation7 + $0xf28] sm:$0xff] }
 0x41c   :  { %4710 = vmatpush.msra.mxu3 %v4236_v48  ;;  %4651 = vmatpush.msra.mxu0 %v3844_v5  ;;  %v4076_v25 = vld [vmem:[#allocation7 + $0x8e0] sm:$0xff]  ;;  %v3885_v53 = vld [vmem:[#allocation7 + $0x2e8] sm:$0xff] }
 0x41d   :  { %4671 = vmatpush.msra.mxu1 %v3972_v4  ;;  %4691 = vmatpush.msra.mxu2 %v4100_v17  ;;  %v4204_v12 = vld [vmem:[#allocation7 + $0xce0] sm:$0xff]  ;;  %v4013_v20 = vld [vmem:[#allocation7 + $0x6e8] sm:$0xff] }
 0x41e   :  { %4711 = vmatpush.msra.mxu3 %v4228_v2  ;;  %4652 = vmatpush.msra.mxu0 %v3836_v15  ;;  %v3812_v47 = vld [vmem:[#allocation7 + $0xa0] sm:$0xff]  ;;  %v4141_v60 = vld [vmem:[#allocation7 + $0xae8] sm:$0xff] }
 0x41f   :  { %4672 = vmatpush.msra.mxu1 %v3964_v9  ;;  %4692 = vmatpush.msra.mxu2 %v4092_v24  ;;  %v3940_v55 = vld [vmem:[#allocation7 + $0x4a0] sm:$0xff]  ;;  %v4269_v27 = vld [vmem:[#allocation7 + $0xee8] sm:$0xff] }
 0x420   :  { %4712 = vmatpush.msra.mxu3 %v4220_v51  ;;  %4653 = vmatpush.msra.mxu0 %v3828_v39  ;;  %v4068_v21 = vld [vmem:[#allocation7 + $0x8a0] sm:$0xff]  ;;  %v3877_v61 = vld [vmem:[#allocation7 + $0x2a8] sm:$0xff] }
 0x421   :  { %4673 = vmatpush.msra.mxu1 %v3956_v57  ;;  %4693 = vmatpush.msra.mxu2 %v4084_v29  ;;  %v4196_v44 = vld [vmem:[#allocation7 + $0xca0] sm:$0xff]  ;;  %v4005_v18 = vld [vmem:[#allocation7 + $0x6a8] sm:$0xff] }
 0x422   :  { %4713 = vmatpush.msra.mxu3 %v4212_v59  ;;  %4654 = vmatpush.msra.mxu0 %v3820_v41  ;;  %v3804_v35 = vld [vmem:[#allocation7 + $0x60] sm:$0xff]  ;;  %v4133_v26 = vld [vmem:[#allocation7 + $0xaa8] sm:$0xff] }
 0x423   :  { %4674 = vmatpush.msra.mxu1 %v3948_v22  ;;  %4694 = vmatpush.msra.mxu2 %v4076_v25  ;;  %v3932_v3 = vld [vmem:[#allocation7 + $0x460] sm:$0xff]  ;;  %v4261_v32 = vld [vmem:[#allocation7 + $0xea8] sm:$0xff] }
 0x424   :  { %4714 = vmatpush.msra.mxu3 %v4204_v12  ;;  %4655 = vmatpush.msra.mxu0 %v3812_v47  ;;  %v4060_v34 = vld [vmem:[#allocation7 + $0x860] sm:$0xff]  ;;  %v3869_v31 = vld [vmem:[#allocation7 + $0x268] sm:$0xff] }
 0x425   :  { %4675 = vmatpush.msra.mxu1 %v3940_v55  ;;  %v4188_v36 = vld [vmem:[#allocation7 + $0xc60] sm:$0xff]  ;;  %4695 = vmatpush.msra.mxu2 %v4068_v21  ;;  %v3997_v23 = vld [vmem:[#allocation7 + $0x668] sm:$0xff] }
 0x426   :  { %4715 = vmatpush.msra.mxu3 %v4196_v44  ;;  %v3796_v7 = vld [vmem:[#allocation7 + $0x20] sm:$0xff]  ;;  %4656 = vmatpush.msra.mxu0 %v3804_v35  ;;  %v4125_v52 = vld [vmem:[#allocation7 + $0xa68] sm:$0xff] }
 0x427   :  { %v3924_v14 = vld [vmem:[#allocation7 + $0x420] sm:$0xff]  ;;  %4676 = vmatpush.msra.mxu1 %v3932_v3  ;;  %4696 = vmatpush.msra.mxu2 %v4060_v34  ;;  %v4253_v37 = vld [vmem:[#allocation7 + $0xe68] sm:$0xff] }
 0x428   :  { %v4052_v0 = vld [vmem:[#allocation7 + $0x820] sm:$0xff]  ;;  %4716 = vmatpush.msra.mxu3 %v4188_v36  ;;  %4657 = vmatpush.msra.mxu0 %v3796_v7  ;;  %v3861_v13 = vld [vmem:[#allocation7 + $0x228] sm:$0xff] }
 0x429   :  { %v4180_v16 = vld [vmem:[#allocation7 + $0xc20] sm:$0xff]  ;;  %4677 = vmatpush.msra.mxu1 %v3924_v14  ;;  %4697 = vmatpush.msra.mxu2 %v4052_v0  ;;  %v3989_v49 = vld [vmem:[#allocation7 + $0x628] sm:$0xff] }
 0x42a   :  { %4717 = vmatpush.msra.mxu3 %v4180_v16  ;;  %4658 = vmatmul.f32.vlgmr.msra.gmra.mxu0 %v7239_v46  ;;  %v4117_v30 = vld [vmem:[#allocation7 + $0xa28] sm:$0xff] }
 0x42b   :  { %4678 = vmatmul.f32.vlgmr.msra.gmra.mxu1 %v7241_v56  ;;  %4698 = vmatmul.f32.vlgmr.msra.gmra.mxu2 %v7252_v54  ;;  %v4245_v48 = vld [vmem:[#allocation7 + $0xe28] sm:$0xff] }
 0x42c   :  { %4718 = vmatmul.f32.vlgmr.msra.gmra.mxu3 %v7256_v8  ;;  %4722 = vmatpush.msrb.mxu0 %v3917_v19  ;;  %v3853_v5 = vld [vmem:[#allocation7 + $0x1e8] sm:$0xff] }
 0x42d   :  { %4742 = vmatpush.msrb.mxu1 %v4045_v6  ;;  %4762 = vmatpush.msrb.mxu2 %v4173_v28  ;;  %v3981_v4 = vld [vmem:[#allocation7 + $0x5e8] sm:$0xff] }
 0x42e   :  { %4782 = vmatpush.msrb.mxu3 %v4301_v45  ;;  %4723 = vmatpush.msrb.mxu0 %v3909_v43  ;;  %v4109_v17 = vld [vmem:[#allocation7 + $0x9e8] sm:$0xff]  ;;  %v3918_v43 = vld [vmem:[#allocation7 + $0x3f0] sm:$0xff] }
 0x42f   :  { %4743 = vmatpush.msrb.mxu1 %v4037_v10  ;;  %4763 = vmatpush.msrb.mxu2 %v4165_v1  ;;  %v4237_v2 = vld [vmem:[#allocation7 + $0xde8] sm:$0xff]  ;;  %v4046_v10 = vld [vmem:[#allocation7 + $0x7f0] sm:$0xff] }
 0x430   :  { %4783 = vmatpush.msrb.mxu3 %v4293_v11  ;;  %4724 = vmatpush.msrb.mxu0 %v3901_v42  ;;  %v3845_v15 = vld [vmem:[#allocation7 + $0x1a8] sm:$0xff]  ;;  %v4174_v1 = vld [vmem:[#allocation7 + $0xbf0] sm:$0xff] }
 0x431   :  { %4744 = vmatpush.msrb.mxu1 %v4029_v38  ;;  %4764 = vmatpush.msrb.mxu2 %v4157_v33  ;;  %v3973_v9 = vld [vmem:[#allocation7 + $0x5a8] sm:$0xff]  ;;  %v4302_v11 = vld [vmem:[#allocation7 + $0xff0] sm:$0xff] }
 0x432   :  { %4784 = vmatpush.msrb.mxu3 %v4285_v50  ;;  %4725 = vmatpush.msrb.mxu0 %v3893_v63  ;;  %v4101_v24 = vld [vmem:[#allocation7 + $0x9a8] sm:$0xff]  ;;  %v3910_v42 = vld [vmem:[#allocation7 + $0x3b0] sm:$0xff] }
 0x433   :  { %4745 = vmatpush.msrb.mxu1 %v4021_v40  ;;  %4765 = vmatpush.msrb.mxu2 %v4149_v62  ;;  %v4229_v51 = vld [vmem:[#allocation7 + $0xda8] sm:$0xff]  ;;  %v4038_v38 = vld [vmem:[#allocation7 + $0x7b0] sm:$0xff] }
 0x434   :  { %4785 = vmatpush.msrb.mxu3 %v4277_v58  ;;  %4726 = vmatpush.msrb.mxu0 %v3885_v53  ;;  %v3837_v39 = vld [vmem:[#allocation7 + $0x168] sm:$0xff]  ;;  %v4166_v33 = vld [vmem:[#allocation7 + $0xbb0] sm:$0xff] }
 0x435   :  { %4746 = vmatpush.msrb.mxu1 %v4013_v20  ;;  %4766 = vmatpush.msrb.mxu2 %v4141_v60  ;;  %v3965_v57 = vld [vmem:[#allocation7 + $0x568] sm:$0xff]  ;;  %v4294_v50 = vld [vmem:[#allocation7 + $0xfb0] sm:$0xff] }
 0x436   :  { %4786 = vmatpush.msrb.mxu3 %v4269_v27  ;;  %4727 = vmatpush.msrb.mxu0 %v3877_v61  ;;  %v4093_v29 = vld [vmem:[#allocation7 + $0x968] sm:$0xff]  ;;  %v3902_v63 = vld [vmem:[#allocation7 + $0x370] sm:$0xff] }
 0x437   :  { %4747 = vmatpush.msrb.mxu1 %v4005_v18  ;;  %4767 = vmatpush.msrb.mxu2 %v4133_v26  ;;  %v4221_v59 = vld [vmem:[#allocation7 + $0xd68] sm:$0xff]  ;;  %v4030_v40 = vld [vmem:[#allocation7 + $0x770] sm:$0xff] }
 0x438   :  { %4787 = vmatpush.msrb.mxu3 %v4261_v32  ;;  %4728 = vmatpush.msrb.mxu0 %v3869_v31  ;;  %v3829_v41 = vld [vmem:[#allocation7 + $0x128] sm:$0xff]  ;;  %v4158_v62 = vld [vmem:[#allocation7 + $0xb70] sm:$0xff] }
 0x439   :  { %4748 = vmatpush.msrb.mxu1 %v3997_v23  ;;  %4768 = vmatpush.msrb.mxu2 %v4125_v52  ;;  %v3957_v22 = vld [vmem:[#allocation7 + $0x528] sm:$0xff]  ;;  %v4286_v58 = vld [vmem:[#allocation7 + $0xf70] sm:$0xff] }
 0x43a   :  { %4788 = vmatpush.msrb.mxu3 %v4253_v37  ;;  %4729 = vmatpush.msrb.mxu0 %v3861_v13  ;;  %v4085_v25 = vld [vmem:[#allocation7 + $0x928] sm:$0xff]  ;;  %v3894_v53 = vld [vmem:[#allocation7 + $0x330] sm:$0xff] }
 0x43b   :  { %4749 = vmatpush.msrb.mxu1 %v3989_v49  ;;  %4769 = vmatpush.msrb.mxu2 %v4117_v30  ;;  %v4213_v12 = vld [vmem:[#allocation7 + $0xd28] sm:$0xff]  ;;  %v4022_v20 = vld [vmem:[#allocation7 + $0x730] sm:$0xff] }
 0x43c   :  { %4789 = vmatpush.msrb.mxu3 %v4245_v48  ;;  %4730 = vmatpush.msrb.mxu0 %v3853_v5  ;;  %v3821_v47 = vld [vmem:[#allocation7 + $0xe8] sm:$0xff]  ;;  %v4150_v60 = vld [vmem:[#allocation7 + $0xb30] sm:$0xff] }
 0x43d   :  { %4750 = vmatpush.msrb.mxu1 %v3981_v4  ;;  %4770 = vmatpush.msrb.mxu2 %v4109_v17  ;;  %v3949_v55 = vld [vmem:[#allocation7 + $0x4e8] sm:$0xff]  ;;  %v4278_v27 = vld [vmem:[#allocation7 + $0xf30] sm:$0xff] }
 0x43e   :  { %4790 = vmatpush.msrb.mxu3 %v4237_v2  ;;  %4731 = vmatpush.msrb.mxu0 %v3845_v15  ;;  %v4077_v21 = vld [vmem:[#allocation7 + $0x8e8] sm:$0xff]  ;;  %v3886_v61 = vld [vmem:[#allocation7 + $0x2f0] sm:$0xff] }
 0x43f   :  { %4751 = vmatpush.msrb.mxu1 %v3973_v9  ;;  %4771 = vmatpush.msrb.mxu2 %v4101_v24  ;;  %v4205_v44 = vld [vmem:[#allocation7 + $0xce8] sm:$0xff]  ;;  %v4014_v18 = vld [vmem:[#allocation7 + $0x6f0] sm:$0xff] }
 0x440   :  { %4791 = vmatpush.msrb.mxu3 %v4229_v51  ;;  %4732 = vmatpush.msrb.mxu0 %v3837_v39  ;;  %v3813_v35 = vld [vmem:[#allocation7 + $0xa8] sm:$0xff]  ;;  %v4142_v26 = vld [vmem:[#allocation7 + $0xaf0] sm:$0xff] }
 0x441   :  { %4752 = vmatpush.msrb.mxu1 %v3965_v57  ;;  %4772 = vmatpush.msrb.mxu2 %v4093_v29  ;;  %v3941_v3 = vld [vmem:[#allocation7 + $0x4a8] sm:$0xff]  ;;  %v4270_v32 = vld [vmem:[#allocation7 + $0xef0] sm:$0xff] }
 0x442   :  { %4792 = vmatpush.msrb.mxu3 %v4221_v59  ;;  %4733 = vmatpush.msrb.mxu0 %v3829_v41  ;;  %v4069_v34 = vld [vmem:[#allocation7 + $0x8a8] sm:$0xff]  ;;  %v3878_v31 = vld [vmem:[#allocation7 + $0x2b0] sm:$0xff] }
 0x443   :  { %4753 = vmatpush.msrb.mxu1 %v3957_v22  ;;  %4773 = vmatpush.msrb.mxu2 %v4085_v25  ;;  %v4197_v36 = vld [vmem:[#allocation7 + $0xca8] sm:$0xff]  ;;  %v4006_v23 = vld [vmem:[#allocation7 + $0x6b0] sm:$0xff] }
 0x444   :  { %4793 = vmatpush.msrb.mxu3 %v4213_v12  ;;  %4734 = vmatpush.msrb.mxu0 %v3821_v47  ;;  %v3805_v7 = vld [vmem:[#allocation7 + $0x68] sm:$0xff]  ;;  %v4134_v52 = vld [vmem:[#allocation7 + $0xab0] sm:$0xff] }
 0x445   :  { %4754 = vmatpush.msrb.mxu1 %v3949_v55  ;;  %4774 = vmatpush.msrb.mxu2 %v4077_v21  ;;  %v3933_v14 = vld [vmem:[#allocation7 + $0x468] sm:$0xff]  ;;  %v4262_v37 = vld [vmem:[#allocation7 + $0xeb0] sm:$0xff] }
 0x446   :  { %4794 = vmatpush.msrb.mxu3 %v4205_v44  ;;  %4735 = vmatpush.msrb.mxu0 %v3813_v35  ;;  %v4061_v0 = vld [vmem:[#allocation7 + $0x868] sm:$0xff]  ;;  %v3870_v13 = vld [vmem:[#allocation7 + $0x270] sm:$0xff] }
 0x447   :  { %4755 = vmatpush.msrb.mxu1 %v3941_v3  ;;  %v4189_v16 = vld [vmem:[#allocation7 + $0xc68] sm:$0xff]  ;;  %4775 = vmatpush.msrb.mxu2 %v4069_v34  ;;  %v3998_v49 = vld [vmem:[#allocation7 + $0x670] sm:$0xff] }
 0x448   :  { %4795 = vmatpush.msrb.mxu3 %v4197_v36  ;;  %v3797_v19 = vld [vmem:[#allocation7 + $0x28] sm:$0xff]  ;;  %4736 = vmatpush.msrb.mxu0 %v3805_v7  ;;  %v4126_v30 = vld [vmem:[#allocation7 + $0xa70] sm:$0xff] }
 0x449   :  { %v3925_v6 = vld [vmem:[#allocation7 + $0x428] sm:$0xff]  ;;  %4756 = vmatpush.msrb.mxu1 %v3933_v14  ;;  %4776 = vmatpush.msrb.mxu2 %v4061_v0  ;;  %v4254_v48 = vld [vmem:[#allocation7 + $0xe70] sm:$0xff] }
 0x44a   :  { %v4053_v28 = vld [vmem:[#allocation7 + $0x828] sm:$0xff]  ;;  %4796 = vmatpush.msrb.mxu3 %v4189_v16  ;;  %4737 = vmatpush.msrb.mxu0 %v3797_v19  ;;  %v3862_v5 = vld [vmem:[#allocation7 + $0x230] sm:$0xff] }
 0x44b   :  { %v4181_v45 = vld [vmem:[#allocation7 + $0xc28] sm:$0xff]  ;;  %4757 = vmatpush.msrb.mxu1 %v3925_v6  ;;  %4777 = vmatpush.msrb.mxu2 %v4053_v28  ;;  %v3990_v4 = vld [vmem:[#allocation7 + $0x630] sm:$0xff] }
 0x44c   :  { %4797 = vmatpush.msrb.mxu3 %v4181_v45  ;;  %4738 = vmatmul.f32.vlgmr.msrb.gmra.mxu0 %v7239_v46  ;;  %v4118_v17 = vld [vmem:[#allocation7 + $0xa30] sm:$0xff] }
 0x44d   :  { %4758 = vmatmul.f32.vlgmr.msrb.gmra.mxu1 %v7241_v56  ;;  %4778 = vmatmul.f32.vlgmr.msrb.gmra.mxu2 %v7252_v54  ;;  %v4246_v2 = vld [vmem:[#allocation7 + $0xe30] sm:$0xff] }
 0x44e   :  { %4798 = vmatmul.f32.vlgmr.msrb.gmra.mxu3 %v7256_v8  ;;  %4802 = vmatpush.msra.mxu0 %v3918_v43  ;;  %v3854_v15 = vld [vmem:[#allocation7 + $0x1f0] sm:$0xff] }
 0x44f   :  { %4822 = vmatpush.msra.mxu1 %v4046_v10  ;;  %4842 = vmatpush.msra.mxu2 %v4174_v1  ;;  %v3982_v9 = vld [vmem:[#allocation7 + $0x5f0] sm:$0xff] }
 0x450   :  { %4862 = vmatpush.msra.mxu3 %v4302_v11  ;;  %4803 = vmatpush.msra.mxu0 %v3910_v42  ;;  %v4110_v24 = vld [vmem:[#allocation7 + $0x9f0] sm:$0xff]  ;;  %v3919_v42 = vld [vmem:[#allocation7 + $0x3f8] sm:$0xff] }
 0x451   :  { %4823 = vmatpush.msra.mxu1 %v4038_v38  ;;  %4843 = vmatpush.msra.mxu2 %v4166_v33  ;;  %v4238_v51 = vld [vmem:[#allocation7 + $0xdf0] sm:$0xff]  ;;  %v4047_v38 = vld [vmem:[#allocation7 + $0x7f8] sm:$0xff] }
 0x452   :  { %4863 = vmatpush.msra.mxu3 %v4294_v50  ;;  %4804 = vmatpush.msra.mxu0 %v3902_v63  ;;  %v3846_v39 = vld [vmem:[#allocation7 + $0x1b0] sm:$0xff]  ;;  %v4175_v33 = vld [vmem:[#allocation7 + $0xbf8] sm:$0xff] }
 0x453   :  { %4824 = vmatpush.msra.mxu1 %v4030_v40  ;;  %4844 = vmatpush.msra.mxu2 %v4158_v62  ;;  %v3974_v57 = vld [vmem:[#allocation7 + $0x5b0] sm:$0xff]  ;;  %v4303_v50 = vld [vmem:[#allocation7 + $0xff8] sm:$0xff] }
 0x454   :  { %4864 = vmatpush.msra.mxu3 %v4286_v58  ;;  %4805 = vmatpush.msra.mxu0 %v3894_v53  ;;  %v4102_v29 = vld [vmem:[#allocation7 + $0x9b0] sm:$0xff]  ;;  %v3911_v63 = vld [vmem:[#allocation7 + $0x3b8] sm:$0xff] }
 0x455   :  { %4825 = vmatpush.msra.mxu1 %v4022_v20  ;;  %4845 = vmatpush.msra.mxu2 %v4150_v60  ;;  %v4230_v59 = vld [vmem:[#allocation7 + $0xdb0] sm:$0xff]  ;;  %v4039_v40 = vld [vmem:[#allocation7 + $0x7b8] sm:$0xff] }
 0x456   :  { %4865 = vmatpush.msra.mxu3 %v4278_v27  ;;  %4806 = vmatpush.msra.mxu0 %v3886_v61  ;;  %v3838_v41 = vld [vmem:[#allocation7 + $0x170] sm:$0xff]  ;;  %v4167_v62 = vld [vmem:[#allocation7 + $0xbb8] sm:$0xff] }
 0x457   :  { %4826 = vmatpush.msra.mxu1 %v4014_v18  ;;  %4846 = vmatpush.msra.mxu2 %v4142_v26  ;;  %v3966_v22 = vld [vmem:[#allocation7 + $0x570] sm:$0xff]  ;;  %v4295_v58 = vld [vmem:[#allocation7 + $0xfb8] sm:$0xff] }
 0x458   :  { %4866 = vmatpush.msra.mxu3 %v4270_v32  ;;  %4807 = vmatpush.msra.mxu0 %v3878_v31  ;;  %v4094_v25 = vld [vmem:[#allocation7 + $0x970] sm:$0xff]  ;;  %v3903_v53 = vld [vmem:[#allocation7 + $0x378] sm:$0xff] }
 0x459   :  { %4827 = vmatpush.msra.mxu1 %v4006_v23  ;;  %4847 = vmatpush.msra.mxu2 %v4134_v52  ;;  %v4222_v12 = vld [vmem:[#allocation7 + $0xd70] sm:$0xff]  ;;  %v4031_v20 = vld [vmem:[#allocation7 + $0x778] sm:$0xff] }
 0x45a   :  { %4867 = vmatpush.msra.mxu3 %v4262_v37  ;;  %4808 = vmatpush.msra.mxu0 %v3870_v13  ;;  %v3830_v47 = vld [vmem:[#allocation7 + $0x130] sm:$0xff]  ;;  %v4159_v60 = vld [vmem:[#allocation7 + $0xb78] sm:$0xff] }
 0x45b   :  { %4828 = vmatpush.msra.mxu1 %v3998_v49  ;;  %4848 = vmatpush.msra.mxu2 %v4126_v30  ;;  %v3958_v55 = vld [vmem:[#allocation7 + $0x530] sm:$0xff]  ;;  %v4287_v27 = vld [vmem:[#allocation7 + $0xf78] sm:$0xff] }
 0x45c   :  { %4868 = vmatpush.msra.mxu3 %v4254_v48  ;;  %4809 = vmatpush.msra.mxu0 %v3862_v5  ;;  %v4086_v21 = vld [vmem:[#allocation7 + $0x930] sm:$0xff]  ;;  %v3895_v61 = vld [vmem:[#allocation7 + $0x338] sm:$0xff] }
 0x45d   :  { %4829 = vmatpush.msra.mxu1 %v3990_v4  ;;  %4849 = vmatpush.msra.mxu2 %v4118_v17  ;;  %v4214_v44 = vld [vmem:[#allocation7 + $0xd30] sm:$0xff]  ;;  %v4023_v18 = vld [vmem:[#allocation7 + $0x738] sm:$0xff] }
 0x45e   :  { %4869 = vmatpush.msra.mxu3 %v4246_v2  ;;  %4810 = vmatpush.msra.mxu0 %v3854_v15  ;;  %v3822_v35 = vld [vmem:[#allocation7 + $0xf0] sm:$0xff]  ;;  %v4151_v26 = vld [vmem:[#allocation7 + $0xb38] sm:$0xff] }
 0x45f   :  { %4830 = vmatpush.msra.mxu1 %v3982_v9  ;;  %4850 = vmatpush.msra.mxu2 %v4110_v24  ;;  %v3950_v3 = vld [vmem:[#allocation7 + $0x4f0] sm:$0xff]  ;;  %v4279_v32 = vld [vmem:[#allocation7 + $0xf38] sm:$0xff] }
 0x460   :  { %4870 = vmatpush.msra.mxu3 %v4238_v51  ;;  %4811 = vmatpush.msra.mxu0 %v3846_v39  ;;  %v4078_v34 = vld [vmem:[#allocation7 + $0x8f0] sm:$0xff]  ;;  %v3887_v31 = vld [vmem:[#allocation7 + $0x2f8] sm:$0xff] }
 0x461   :  { %4831 = vmatpush.msra.mxu1 %v3974_v57  ;;  %4851 = vmatpush.msra.mxu2 %v4102_v29  ;;  %v4206_v36 = vld [vmem:[#allocation7 + $0xcf0] sm:$0xff]  ;;  %v4015_v23 = vld [vmem:[#allocation7 + $0x6f8] sm:$0xff] }
 0x462   :  { %4871 = vmatpush.msra.mxu3 %v4230_v59  ;;  %4812 = vmatpush.msra.mxu0 %v3838_v41  ;;  %v3814_v7 = vld [vmem:[#allocation7 + $0xb0] sm:$0xff]  ;;  %v4143_v52 = vld [vmem:[#allocation7 + $0xaf8] sm:$0xff] }
 0x463   :  { %4832 = vmatpush.msra.mxu1 %v3966_v22  ;;  %4852 = vmatpush.msra.mxu2 %v4094_v25  ;;  %v3942_v14 = vld [vmem:[#allocation7 + $0x4b0] sm:$0xff]  ;;  %v4271_v37 = vld [vmem:[#allocation7 + $0xef8] sm:$0xff] }
 0x464   :  { %4872 = vmatpush.msra.mxu3 %v4222_v12  ;;  %4813 = vmatpush.msra.mxu0 %v3830_v47  ;;  %v4070_v0 = vld [vmem:[#allocation7 + $0x8b0] sm:$0xff]  ;;  %v3879_v13 = vld [vmem:[#allocation7 + $0x2b8] sm:$0xff] }
 0x465   :  { %4833 = vmatpush.msra.mxu1 %v3958_v55  ;;  %4853 = vmatpush.msra.mxu2 %v4086_v21  ;;  %v4198_v16 = vld [vmem:[#allocation7 + $0xcb0] sm:$0xff]  ;;  %v4007_v49 = vld [vmem:[#allocation7 + $0x6b8] sm:$0xff] }
 0x466   :  { %4873 = vmatpush.msra.mxu3 %v4214_v44  ;;  %4814 = vmatpush.msra.mxu0 %v3822_v35  ;;  %v3806_v19 = vld [vmem:[#allocation7 + $0x70] sm:$0xff]  ;;  %v4135_v30 = vld [vmem:[#allocation7 + $0xab8] sm:$0xff] }
 0x467   :  { %4834 = vmatpush.msra.mxu1 %v3950_v3  ;;  %4854 = vmatpush.msra.mxu2 %v4078_v34  ;;  %v3934_v6 = vld [vmem:[#allocation7 + $0x470] sm:$0xff]  ;;  %v4263_v48 = vld [vmem:[#allocation7 + $0xeb8] sm:$0xff] }
 0x468   :  { %4874 = vmatpush.msra.mxu3 %v4206_v36  ;;  %4815 = vmatpush.msra.mxu0 %v3814_v7  ;;  %v4062_v28 = vld [vmem:[#allocation7 + $0x870] sm:$0xff]  ;;  %v3871_v5 = vld [vmem:[#allocation7 + $0x278] sm:$0xff] }
 0x469   :  { %4835 = vmatpush.msra.mxu1 %v3942_v14  ;;  %v4190_v45 = vld [vmem:[#allocation7 + $0xc70] sm:$0xff]  ;;  %4855 = vmatpush.msra.mxu2 %v4070_v0  ;;  %v3999_v4 = vld [vmem:[#allocation7 + $0x678] sm:$0xff] }
 0x46a   :  { %4875 = vmatpush.msra.mxu3 %v4198_v16  ;;  %v3798_v43 = vld [vmem:[#allocation7 + $0x30] sm:$0xff]  ;;  %4816 = vmatpush.msra.mxu0 %v3806_v19  ;;  %v4127_v17 = vld [vmem:[#allocation7 + $0xa78] sm:$0xff] }
 0x46b   :  { %v3926_v10 = vld [vmem:[#allocation7 + $0x430] sm:$0xff]  ;;  %4836 = vmatpush.msra.mxu1 %v3934_v6  ;;  %4856 = vmatpush.msra.mxu2 %v4062_v28  ;;  %v4255_v2 = vld [vmem:[#allocation7 + $0xe78] sm:$0xff] }
 0x46c   :  { %v4054_v1 = vld [vmem:[#allocation7 + $0x830] sm:$0xff]  ;;  %4876 = vmatpush.msra.mxu3 %v4190_v45  ;;  %4817 = vmatpush.msra.mxu0 %v3798_v43  ;;  %v3863_v15 = vld [vmem:[#allocation7 + $0x238] sm:$0xff] }
 0x46d   :  { %v4182_v11 = vld [vmem:[#allocation7 + $0xc30] sm:$0xff]  ;;  %4837 = vmatpush.msra.mxu1 %v3926_v10  ;;  %4857 = vmatpush.msra.mxu2 %v4054_v1  ;;  %v3991_v9 = vld [vmem:[#allocation7 + $0x638] sm:$0xff]  ;;  %v7283_v1 = vpop.f32.mrf.mxu1 }
 0x46e   :  { %4877 = vmatpush.msra.mxu3 %v4182_v11  ;;  %4818 = vmatmul.f32.vlgmr.msra.gmra.mxu0 %v7239_v46  ;;  %v4119_v24 = vld [vmem:[#allocation7 + $0xa38] sm:$0xff] }
 0x46f   :  { %4838 = vmatmul.f32.vlgmr.msra.gmra.mxu1 %v7241_v56  ;;  %4858 = vmatmul.f32.vlgmr.msra.gmra.mxu2 %v7252_v54  ;;  %v4247_v51 = vld [vmem:[#allocation7 + $0xe38] sm:$0xff] }
 0x470   :  { %4878 = vmatmul.f32.vlgmr.msra.gmra.mxu3 %v7256_v8  ;;  %4882 = vmatpush.msrb.mxu0 %v3919_v42  ;;  %v3855_v39 = vld [vmem:[#allocation7 + $0x1f8] sm:$0xff] }
 0x471   :  { %4902 = vmatpush.msrb.mxu1 %v4047_v38  ;;  %4922 = vmatpush.msrb.mxu2 %v4175_v33  ;;  %v3983_v57 = vld [vmem:[#allocation7 + $0x5f8] sm:$0xff] }
 0x472   :  { %4942 = vmatpush.msrb.mxu3 %v4303_v50  ;;  %4883 = vmatpush.msrb.mxu0 %v3911_v63  ;;  %v4111_v29 = vld [vmem:[#allocation7 + $0x9f8] sm:$0xff] }
 0x473   :  { %4903 = vmatpush.msrb.mxu1 %v4039_v40  ;;  %4923 = vmatpush.msrb.mxu2 %v4167_v62  ;;  %v4239_v59 = vld [vmem:[#allocation7 + $0xdf8] sm:$0xff]  ;;  %v7285_v40 = vpop.f32.mrf.mxu2  ;;  %v5090_v62 = vld [vmem:[#allocation10 + $0x3c0] sm:$0xff] }
 0x474   :  { %4943 = vmatpush.msrb.mxu3 %v4295_v58  ;;  %4884 = vmatpush.msrb.mxu0 %v3903_v53  ;;  %v3847_v41 = vld [vmem:[#allocation7 + $0x1b8] sm:$0xff]  ;;  %v5218_v58 = vld [vmem:[#allocation10 + $0x7c0] sm:$0xff] }
 0x475   :  { %4904 = vmatpush.msrb.mxu1 %v4031_v20  ;;  %4924 = vmatpush.msrb.mxu2 %v4159_v60  ;;  %v3975_v22 = vld [vmem:[#allocation7 + $0x5b8] sm:$0xff]  ;;  %v5346_v53 = vld [vmem:[#allocation10 + $0xbc0] sm:$0xff]  ;;  %v7289_v60 = vpop.f32.mrf.mxu0 }
 0x476   :  { %4944 = vmatpush.msrb.mxu3 %v4287_v27  ;;  %4885 = vmatpush.msrb.mxu0 %v3895_v61  ;;  %v4103_v25 = vld [vmem:[#allocation7 + $0x9b8] sm:$0xff]  ;;  %v5474_v20 = vld [vmem:[#allocation10 + $0xfc0] sm:$0xff] }
 0x477   :  { %4905 = vmatpush.msrb.mxu1 %v4023_v18  ;;  %4925 = vmatpush.msrb.mxu2 %v4151_v26  ;;  %v4231_v12 = vld [vmem:[#allocation7 + $0xdb8] sm:$0xff]  ;;  %v5082_v27 = vld [vmem:[#allocation10 + $0x380] sm:$0xff]  ;;  %v7293_v18 = vld [vmem:[#allocation5] sm:$0xff] }
 0x478   :  { %4945 = vmatpush.msrb.mxu3 %v4279_v32  ;;  %4886 = vmatpush.msrb.mxu0 %v3887_v31  ;;  %v3839_v47 = vld [vmem:[#allocation7 + $0x178] sm:$0xff]  ;;  %v5210_v61 = vld [vmem:[#allocation10 + $0x780] sm:$0xff]  ;;  %v1756_v26 = vperm.slane %v7293_v18, 4  ;;  %v7296_v32 = vpop.f32.mrf.mxu3  ;;  %v7298_v31 = vpop.f32.mrf.mxu1 }
 0x479   :  { %4906 = vmatpush.msrb.mxu1 %v4015_v23  ;;  %4926 = vmatpush.msrb.mxu2 %v4143_v52  ;;  %v3967_v55 = vld [vmem:[#allocation7 + $0x578] sm:$0xff]  ;;  %v1757_v23 = vperm.slane %v7293_v18, 5  ;;  %v1758_v52 = vperm.slane %v7293_v18, 6 }
 0x47a   :  { %4946 = vmatpush.msrb.mxu3 %v4271_v37  ;;  %4887 = vmatpush.msrb.mxu0 %v3879_v13  ;;  %v4095_v21 = vld [vmem:[#allocation7 + $0x978] sm:$0xff]  ;;  %v5330_v37 = vld [vmem:[#allocation10 + $0xb40] sm:$0xff] }
 0x47b   :  { %4907 = vmatpush.msrb.mxu1 %v4007_v49  ;;  %4927 = vmatpush.msrb.mxu2 %v4135_v30  ;;  %v4223_v44 = vld [vmem:[#allocation7 + $0xd78] sm:$0xff]  ;;  %v5458_v13 = vld [vmem:[#allocation10 + $0xf40] sm:$0xff] }
 0x47c   :  { %4947 = vmatpush.msrb.mxu3 %v4263_v48  ;;  %4888 = vmatpush.msrb.mxu0 %v3871_v5  ;;  %v3831_v35 = vld [vmem:[#allocation7 + $0x138] sm:$0xff]  ;;  %v5066_v49 = vld [vmem:[#allocation10 + $0x300] sm:$0xff] }
 0x47d   :  { %4908 = vmatpush.msrb.mxu1 %v3999_v4  ;;  %4928 = vmatpush.msrb.mxu2 %v4127_v17  ;;  %v3959_v3 = vld [vmem:[#allocation7 + $0x538] sm:$0xff]  ;;  %v5194_v30 = vld [vmem:[#allocation10 + $0x700] sm:$0xff]  ;;  %v3633_v4 = vpop.f32.mrf.mxu2 }
 0x47e   :  { %4948 = vmatpush.msrb.mxu3 %v4255_v2  ;;  %4889 = vmatpush.msrb.mxu0 %v3863_v15  ;;  %v4087_v34 = vld [vmem:[#allocation7 + $0x938] sm:$0xff]  ;;  %v7596_v48 = vld [vmem:[#allocation37_spill] sm:$0xff] }
 0x47f   :  { %4909 = vmatpush.msrb.mxu1 %v3991_v9  ;;  %4929 = vmatpush.msrb.mxu2 %v4119_v24  ;;  %v4215_v36 = vld [vmem:[#allocation7 + $0xd38] sm:$0xff]  ;;  %v2074_v5 = vadd.f32 %v7596_v48, %v1756_v26  ;;  %v5322_v17 = vld [vmem:[#allocation10 + $0xb00] sm:$0xff] }
 0x480   :  { %4949 = vmatpush.msrb.mxu3 %v4247_v51  ;;  %4890 = vmatpush.msrb.mxu0 %v3855_v39  ;;  %v3823_v7 = vld [vmem:[#allocation7 + $0xf8] sm:$0xff]  ;;  %v5450_v2 = vld [vmem:[#allocation10 + $0xf00] sm:$0xff] }
 0x481   :  { %4910 = vmatpush.msrb.mxu1 %v3983_v57  ;;  %4930 = vmatpush.msrb.mxu2 %v4111_v29  ;;  %v3951_v14 = vld [vmem:[#allocation7 + $0x4f8] sm:$0xff]  ;;  %v7597_v15 = vld [vmem:[#allocation33_spill] sm:$0xff] }
 0x482   :  { %4950 = vmatpush.msrb.mxu3 %v4239_v59  ;;  %4891 = vmatpush.msrb.mxu0 %v3847_v41  ;;  %v4079_v0 = vld [vmem:[#allocation7 + $0x8f8] sm:$0xff]  ;;  %v2134_v9 = vadd.f32 %v7597_v15, %v1757_v23  ;;  %v5058_v24 = vld [vmem:[#allocation10 + $0x2c0] sm:$0xff] }
 0x483   :  { %4911 = vmatpush.msrb.mxu1 %v3975_v22  ;;  %4931 = vmatpush.msrb.mxu2 %v4103_v25  ;;  %v4207_v16 = vld [vmem:[#allocation7 + $0xcf8] sm:$0xff]  ;;  %v5186_v51 = vld [vmem:[#allocation10 + $0x6c0] sm:$0xff] }
 0x484   :  { %4951 = vmatpush.msrb.mxu3 %v4231_v12  ;;  %4892 = vmatpush.msrb.mxu0 %v3839_v47  ;;  %v3815_v19 = vld [vmem:[#allocation7 + $0xb8] sm:$0xff]  ;;  %v5314_v22 = vld [vmem:[#allocation10 + $0xac0] sm:$0xff] }
 0x485   :  { %4912 = vmatpush.msrb.mxu1 %v3967_v55  ;;  %4932 = vmatpush.msrb.mxu2 %v4095_v21  ;;  %v3943_v6 = vld [vmem:[#allocation7 + $0x4b8] sm:$0xff]  ;;  %v5442_v25 = vld [vmem:[#allocation10 + $0xec0] sm:$0xff]  ;;  %v3593_v55 = vpop.f32.mrf.mxu0 }
 0x486   :  { %4952 = vmatpush.msrb.mxu3 %v4223_v44  ;;  %4893 = vmatpush.msrb.mxu0 %v3831_v35  ;;  %v4071_v28 = vld [vmem:[#allocation7 + $0x8b8] sm:$0xff]  ;;  %v6452_v12 = vld [vmem:[#allocation5 + $0x8] sm:$0xff] }
 0x487   :  { %4913 = vmatpush.msrb.mxu1 %v3959_v3  ;;  %4933 = vmatpush.msrb.mxu2 %v4087_v34  ;;  %v4199_v45 = vld [vmem:[#allocation7 + $0xcb8] sm:$0xff]  ;;  %v1764_v47 = vperm.slane %v6452_v12, 4  ;;  %v5050_v35 = vld [vmem:[#allocation10 + $0x280] sm:$0xff] }
 0x488   :  { %4953 = vmatpush.msrb.mxu3 %v4215_v36  ;;  %4894 = vmatpush.msrb.mxu0 %v3823_v7  ;;  %v3807_v43 = vld [vmem:[#allocation7 + $0x78] sm:$0xff]  ;;  %v5178_v3 = vld [vmem:[#allocation10 + $0x680] sm:$0xff]  ;;  %v1765_v7 = vperm.slane %v6452_v12, 5 }
 0x489   :  { %4914 = vmatpush.msrb.mxu1 %v3951_v14  ;;  %4934 = vmatpush.msrb.mxu2 %v4079_v0  ;;  %v3935_v10 = vld [vmem:[#allocation7 + $0x478] sm:$0xff]  ;;  %v6453_v14 = vld [vmem:[#allocation5 + $0x10] sm:$0xff]  ;;  %v5418_v48 = vld [vmem:[#allocation10 + $0xe00] sm:$0xff] }
 0x48a   :  { %4954 = vmatpush.msrb.mxu3 %v4207_v16  ;;  %4895 = vmatpush.msrb.mxu0 %v3815_v19  ;;  %v4063_v11 = vld [vmem:[#allocation7 + $0x878] sm:$0xff]  ;;  %v1772_v0 = vperm.slane %v6453_v14, 4  ;;  %v1773_v16 = vperm.slane %v6453_v14, 5  ;;  %v3653_v19 = vpop.f32.mrf.mxu3  ;;  %v7608_v15 = vld [vmem:[#allocation57_spill] sm:$0xff] }
 0x48b   :  { %4915 = vmatpush.msrb.mxu1 %v3943_v6  ;;  %v4191_v42 = vld [vmem:[#allocation7 + $0xc78] sm:$0xff]  ;;  %4935 = vmatpush.msrb.mxu2 %v4071_v28  ;;  %v3693_v6 = vpop.f32.mrf.mxu1  ;;  %v5306_v28 = vld [vmem:[#allocation10 + $0xa80] sm:$0xff] }
 0x48c   :  { %4955 = vmatpush.msrb.mxu3 %v4199_v45  ;;  %v3799_v38 = vld [vmem:[#allocation7 + $0x38] sm:$0xff]  ;;  %4896 = vmatpush.msrb.mxu0 %v3807_v43  ;;  %v5434_v45 = vld [vmem:[#allocation10 + $0xe80] sm:$0xff] }
 0x48d   :  { %v3927_v33 = vld [vmem:[#allocation7 + $0x438] sm:$0xff]  ;;  %4916 = vmatpush.msrb.mxu1 %v3935_v10  ;;  %4936 = vmatpush.msrb.mxu2 %v4063_v11  ;;  %v7600_v43 = vld [vmem:[#allocation40_spill] sm:$0xff]  ;;  %v1766_v11 = vperm.slane %v6452_v12, 6 }
 0x48e   :  { %v4055_v50 = vld [vmem:[#allocation7 + $0x838] sm:$0xff]  ;;  %4956 = vmatpush.msrb.mxu3 %v4191_v42  ;;  %4897 = vmatpush.msrb.mxu0 %v3799_v38  ;;  %v7309_v10 = vadd.f32 %v7600_v43, %v2134_v9  ;;  %v1767_v42 = vperm.slane %v6452_v12, 7  ;;  %v1774_v38 = vperm.slane %v6453_v14, 6 }
 0x48f   :  { %v4183_v63 = vld [vmem:[#allocation7 + $0xc38] sm:$0xff]  ;;  %4917 = vmatpush.msrb.mxu1 %v3927_v33  ;;  %4937 = vmatpush.msrb.mxu2 %v4055_v50  ;;  %v5042_v33 = vld [vmem:[#allocation10 + $0x240] sm:$0xff] }
 0x490   :  { %4957 = vmatpush.msrb.mxu3 %v4183_v63  ;;  %4898 = vmatmul.f32.vlgmr.msrb.gmra.mxu0 %v7239_v46  ;;  %v5338_v46 = vld [vmem:[#allocation10 + $0xb80] sm:$0xff]  ;;  %v7598_v39 = vld [vmem:[#allocation31_spill] sm:$0xff]  ;;  %v3154_v9 = vadd.f32 %v7608_v15, %v1774_v38 }
 0x491   :  { %4918 = vmatmul.f32.vlgmr.msrb.gmra.mxu1 %v7241_v56  ;;  %4938 = vmatmul.f32.vlgmr.msrb.gmra.mxu2 %v7252_v54  ;;  %v5466_v56 = vld [vmem:[#allocation10 + $0xf80] sm:$0xff]  ;;  %v2194_v57 = vadd.f32 %v7598_v39, %v1758_v52  ;;  %v6451_v29 = vld [vmem:[#allocation5 + $0x18] sm:$0xff] }
 0x492   :  { %4958 = vmatmul.f32.vlgmr.msrb.gmra.mxu3 %v7256_v8  ;;  %5500 = vmatpush.msra.mxu0 %v5090_v62  ;;  %v5074_v54 = vld [vmem:[#allocation10 + $0x340] sm:$0xff]  ;;  %v1780_v59 = vperm.slane %v6451_v29, 4  ;;  %v1781_v41 = vperm.slane %v6451_v29, 5  ;;  %v1782_v21 = vperm.slane %v6451_v29, 6  ;;  %v1783_v44 = vperm.slane %v6451_v29, 7  ;;  %v7599_v34 = vld [vmem:[#allocation27_spill] sm:$0xff] }
 0x493   :  { %5520 = vmatpush.msra.mxu1 %v5218_v58  ;;  %5540 = vmatpush.msra.mxu2 %v5346_v53  ;;  %v5202_v8 = vld [vmem:[#allocation10 + $0x740] sm:$0xff]  ;;  %v7306_v36 = vadd.f32 %v7599_v34, %v2074_v5  ;;  %v7601_v63 = vld [vmem:[#allocation35_spill] sm:$0xff]  ;;  %v1759_v58 = vperm.slane %v7293_v18, 7 }
 0x494   :  { %5560 = vmatpush.msra.mxu3 %v5474_v20  ;;  %5501 = vmatpush.msra.mxu0 %v5082_v27  ;;  %v5170_v50 = vld [vmem:[#allocation10 + $0x640] sm:$0xff]  ;;  %v7312_v62 = vadd.f32 %v7601_v63, %v2194_v57  ;;  %v3514_v53 = vadd.f32 %v7289_v60, %v1780_v59  ;;  %v3574_v20 = vadd.f32 %v7296_v32, %v1781_v41  ;;  %v7602_v26 = vld [vmem:[#allocation51_spill] sm:$0xff]  ;;  %v7617_v63 = vld [vmem:[#allocation34_spill] sm:$0xff] }
 0x495   :  { %5521 = vmatpush.msra.mxu1 %v5210_v61  ;;  %5541 = vmatpush.msra.mxu2 %v5338_v46  ;;  %v5298_v27 = vld [vmem:[#allocation10 + $0xa40] sm:$0xff]  ;;  %v2554_v46 = vadd.f32 %v7602_v26, %v1764_v47  ;;  %v3694_v23 = vadd.f32 %v3693_v6, %v1783_v44  ;;  %v7606_v5 = vld [vmem:[#allocation43_spill] sm:$0xff] }
 0x496   :  { %5561 = vmatpush.msra.mxu3 %v5466_v56  ;;  %5502 = vmatpush.msra.mxu0 %v5074_v54  ;;  %v5426_v61 = vld [vmem:[#allocation10 + $0xe40] sm:$0xff]  ;;  %v3634_v56 = vadd.f32 %v3633_v4, %v1782_v21  ;;  %v3534_v29 = vadd.f32 %v7283_v1, %v3514_v53  ;;  %v3594_v59 = vadd.f32 %v3593_v55, %v3574_v20  ;;  %v3673_v1 = vpop.f32.mrf.mxu0  ;;  %v3733_v55 = vpop.f32.mrf.mxu3  ;;  %v7618_v26 = vld [vmem:[#allocation39_spill] sm:$0xff] }
 0x497   :  { %5522 = vmatpush.msra.mxu1 %v5202_v8  ;;  %5542 = vmatpush.msra.mxu2 %v5330_v37  ;;  %v5034_v54 = vld [vmem:[#allocation10 + $0x200] sm:$0xff] }
 0x498   :  { %5562 = vmatpush.msra.mxu3 %v5458_v13  ;;  %5503 = vmatpush.msra.mxu0 %v5066_v49  ;;  %v5162_v8 = vld [vmem:[#allocation10 + $0x600] sm:$0xff]  ;;  %v7604_v13 = vld [vmem:[#allocation62_spill] sm:$0xff]  ;;  %v7605_v49 = vld [vmem:[#allocation59_spill] sm:$0xff]  ;;  %v3654_v47 = vadd.f32 %v3653_v19, %v3634_v56  ;;  %v3554_v53 = vadd.f32 %v7285_v40, %v3534_v29  ;;  %v3614_v20 = vadd.f32 %v7298_v31, %v3594_v59 }
 0x499   :  { %5523 = vmatpush.msra.mxu1 %v5194_v30  ;;  %5543 = vmatpush.msra.mxu2 %v5322_v17  ;;  %v7603_v52 = vld [vmem:[#allocation45_spill] sm:$0xff]  ;;  %v3034_v18 = vadd.f32 %v7604_v13, %v1772_v0  ;;  %v3094_v60 = vadd.f32 %v7605_v49, %v1773_v16  ;;  %v3713_v30 = vpop.f32.mrf.mxu2  ;;  %v2674_v17 = vadd.f32 %v7606_v5, %v1766_v11  ;;  %v7609_v39 = vld [vmem:[#allocation32_spill] sm:$0xff]  ;;  %v7613_v0 = vld [vmem:[#allocation63_spill] sm:$0xff] }
 0x49a   :  { %5563 = vmatpush.msra.mxu3 %v5450_v2  ;;  %5504 = vmatpush.msra.mxu0 %v5058_v24  ;;  %v2614_v37 = vadd.f32 %v7603_v52, %v1765_v7  ;;  %v5290_v32 = vld [vmem:[#allocation10 + $0xa00] sm:$0xff]  ;;  %v7607_v2 = vld [vmem:[#allocation46_spill] sm:$0xff]  ;;  %v2254_v57 = vadd.f32 %v7609_v39, %v1759_v58  ;;  %v3714_v21 = vadd.f32 %v3713_v30, %v3694_v23  ;;  %v7615_v19 = vld [vmem:[#allocation47_spill] sm:$0xff]  ;;  %v3765_v29 = vmax.f32 %v3614_v20, 0.0 }
 0x49b   :  { %5524 = vmatpush.msra.mxu1 %v5186_v51  ;;  %5544 = vmatpush.msra.mxu2 %v5314_v22  ;;  %v2734_v4 = vadd.f32 %v7607_v2, %v1767_v42  ;;  %v5026_v24 = vld [vmem:[#allocation10 + $0x1c0] sm:$0xff]  ;;  %v3114_v16 = vadd.f32 %v7613_v0, %v3094_v60  ;;  %v7339_v56 = vadd.f32 %v3673_v1, %v3654_v47  ;;  %v7619_v52 = vld [vmem:[#allocation42_spill] sm:$0xff] }
 0x49c   :  { %5564 = vmatpush.msra.mxu3 %v5442_v25  ;;  %5505 = vmatpush.msra.mxu0 %v5050_v35  ;;  %v5154_v51 = vld [vmem:[#allocation10 + $0x5c0] sm:$0xff]  ;;  %v7610_v25 = vld [vmem:[#allocation38_spill] sm:$0xff]  ;;  %v2274_v58 = vadd.f32 %v7617_v63, %v2254_v57  ;;  %v7341_v23 = vadd.f32 %v3733_v55, %v3714_v21  ;;  %v3764_v57 = vmax.f32 %v3554_v53, 0.0 }
 0x49d   :  { %5525 = vmatpush.msra.mxu1 %v5178_v3  ;;  %5545 = vmatpush.msra.mxu2 %v5306_v28  ;;  %v5282_v41 = vld [vmem:[#allocation10 + $0x9c0] sm:$0xff]  ;;  %v2574_v12 = vadd.f32 %v7610_v25, %v2554_v46  ;;  %v7611_v3 = vld [vmem:[#allocation54_spill] sm:$0xff]  ;;  %v2754_v11 = vadd.f32 %v7615_v19, %v2734_v4  ;;  %v3766_v21 = vmax.f32 %v7339_v56, 0.0 }
 0x49e   :  { %5565 = vmatpush.msra.mxu3 %v5434_v45  ;;  %5506 = vmatpush.msra.mxu0 %v5042_v33  ;;  %v5410_v22 = vld [vmem:[#allocation10 + $0xdc0] sm:$0xff]  ;;  %v2634_v34 = vadd.f32 %v7611_v3, %v2614_v37  ;;  %v7622_v30 = vld [vmem:[#allocation58_spill] sm:$0xff] }
 0x49f   :  { %5526 = vmatpush.msra.mxu1 %v5170_v50  ;;  %5546 = vmatpush.msra.mxu2 %v5298_v27  ;;  %v5018_v44 = vld [vmem:[#allocation10 + $0x180] sm:$0xff]  ;;  %v7337_v46 = vadd.f32 %v7618_v26, %v2574_v12 }
 0x4a0   :  { %5566 = vmatpush.msra.mxu3 %v5426_v61  ;;  %5507 = vmatpush.msra.mxu0 %v5034_v54  ;;  %v5146_v35 = vld [vmem:[#allocation10 + $0x580] sm:$0xff]  ;;  %v7344_v37 = vadd.f32 %v7619_v52, %v2634_v34 }
 0x4a1   :  { %5527 = vmatpush.msra.mxu1 %v5162_v8  ;;  %5547 = vmatpush.msra.mxu2 %v5290_v32  ;;  %v7612_v7 = vld [vmem:[#allocation52_spill] sm:$0xff]  ;;  %v7620_v40 = vld [vmem:[#allocation53_spill] sm:$0xff] }
 0x4a2   :  { %5567 = vmatpush.msra.mxu3 %v5418_v48  ;;  %v3054_v14 = vadd.f32 %v7612_v7, %v3034_v18  ;;  %5508 = vmatpush.msra.mxu0 %v5026_v24  ;;  %v5274_v6 = vld [vmem:[#allocation10 + $0x980] sm:$0xff]  ;;  %v3749_v3 = vmax.f32 %v7344_v37, 0.0 }
 0x4a3   :  { %5528 = vmatpush.msra.mxu1 %v5154_v51  ;;  %v5402_v28 = vld [vmem:[#allocation10 + $0xd80] sm:$0xff]  ;;  %5548 = vmatpush.msra.mxu2 %v5282_v41 }
 0x4a4   :  { %v7614_v45 = vld [vmem:[#allocation48_spill] sm:$0xff]  ;;  %5568 = vmatpush.msra.mxu3 %v5410_v22  ;;  %5509 = vmatpush.msra.mxu0 %v5018_v44  ;;  %v3074_v31 = vadd.f32 %v7620_v40, %v3054_v14  ;;  %v7623_v48 = vld [vmem:[#allocation49_spill] sm:$0xff]  ;;  %v3767_v44 = vmax.f32 %v7341_v23, 0.0 }
 0x4a5   :  { %v2694_v43 = vadd.f32 %v7614_v45, %v2674_v17  ;;  %v7616_v42 = vld [vmem:[#allocation60_spill] sm:$0xff]  ;;  %5529 = vmatpush.msra.mxu1 %v5146_v35  ;;  %5549 = vmatpush.msra.mxu2 %v5274_v6  ;;  %v2774_v5 = vadd.f32 %v7623_v48, %v2754_v11  ;;  %v7626_v51 = vld [vmem:[#allocation29_spill] sm:$0xff] }
 0x4a6   :  { %v3174_v38 = vadd.f32 %v7616_v42, %v3154_v9  ;;  %v5010_v33 = vld [vmem:[#allocation10 + $0x140] sm:$0xff]  ;;  %5569 = vmatpush.msra.mxu3 %v5402_v28  ;;  %v2174_v39 = vadd.f32 %v7626_v51, %v7309_v10  ;;  %v3748_v10 = vmax.f32 %v7337_v46, 0.0  ;;  %v3756_v34 = vmax.f32 %v3074_v31, 0.0  ;;  %v5091_v31 = vld [vmem:[#allocation10 + $0x3c8] sm:$0xff] }
 0x4a7   :  { %v5138_v50 = vld [vmem:[#allocation10 + $0x540] sm:$0xff]  ;;  %5510 = vmatpush.msra.mxu0 %v5010_v33  ;;  %v2714_v32 = vadd.f32 %v7622_v30, %v2694_v43  ;;  %v5211_v30 = vld [vmem:[#allocation10 + $0x788] sm:$0xff] }
 0x4a8   :  { %v5266_v27 = vld [vmem:[#allocation10 + $0x940] sm:$0xff]  ;;  %5530 = vmatpush.msra.mxu1 %v5138_v50  ;;  %v3741_v19 = vmax.f32 %v2174_v39, 0.0  ;;  %v3780_v11 = vmax.f32 %v3756_v34, %v3764_v57  ;;  %v5467_v48 = vld [vmem:[#allocation10 + $0xf88] sm:$0xff] }
 0x4a9   :  { %v5394_v61 = vld [vmem:[#allocation10 + $0xd40] sm:$0xff]  ;;  %5550 = vmatpush.msra.mxu2 %v5266_v27  ;;  %v3750_v0 = vmax.f32 %v2714_v32, 0.0  ;;  %v5339_v32 = vld [vmem:[#allocation10 + $0xb88] sm:$0xff] }
 0x4aa   :  { %v5002_v54 = vld [vmem:[#allocation10 + $0x100] sm:$0xff]  ;;  %5570 = vmatpush.msra.mxu3 %v5394_v61  ;;  %v3773_v26 = vmax.f32 %v3741_v19, %v3749_v3  ;;  %v5451_v51 = vld [vmem:[#allocation10 + $0xf08] sm:$0xff] }
 0x4ab   :  { %v5130_v8 = vld [vmem:[#allocation10 + $0x500] sm:$0xff]  ;;  %5511 = vmatpush.msra.mxu0 %v5002_v54  ;;  %v5059_v39 = vld [vmem:[#allocation10 + $0x2c8] sm:$0xff] }
 0x4ac   :  { %v7621_v13 = vld [vmem:[#allocation56_spill] sm:$0xff]  ;;  %5531 = vmatpush.msra.mxu1 %v5130_v8  ;;  %v7629_v55 = vld [vmem:[#allocation61_spill] sm:$0xff] }
 0x4ad   :  { %v3134_v18 = vadd.f32 %v7621_v13, %v3114_v16  ;;  %v5258_v49 = vld [vmem:[#allocation10 + $0x900] sm:$0xff]  ;;  %v3751_v16 = vmax.f32 %v2774_v5, 0.0  ;;  %v3759_v6 = vmax.f32 %v7629_v55, 0.0  ;;  %v5219_v13 = vld [vmem:[#allocation10 + $0x7c8] sm:$0xff] }
 0x4ae   :  { %v5386_v60 = vld [vmem:[#allocation10 + $0xd00] sm:$0xff]  ;;  %5551 = vmatpush.msra.mxu2 %v5258_v49  ;;  %v5475_v49 = vld [vmem:[#allocation10 + $0xfc8] sm:$0xff] }
 0x4af   :  { %v7624_v17 = vld [vmem:[#allocation64_spill] sm:$0xff]  ;;  %5571 = vmatpush.msra.mxu3 %v5386_v60  ;;  %v3757_v7 = vmax.f32 %v3134_v18, 0.0  ;;  %v3783_v53 = vmax.f32 %v3759_v6, %v3767_v44  ;;  %v5347_v18 = vld [vmem:[#allocation10 + $0xbc8] sm:$0xff] }
 0x4b0   :  { %v3194_v2 = vadd.f32 %v7624_v17, %v3174_v38  ;;  %v4994_v4 = vld [vmem:[#allocation10 + $0xc0] sm:$0xff]  ;;  %v5083_v60 = vld [vmem:[#allocation10 + $0x388] sm:$0xff] }
 0x4b1   :  { %v5122_v15 = vld [vmem:[#allocation10 + $0x4c0] sm:$0xff]  ;;  %5512 = vmatpush.msra.mxu0 %v4994_v4  ;;  %v3781_v42 = vmax.f32 %v3757_v7, %v3765_v29  ;;  %v5075_v5 = vld [vmem:[#allocation10 + $0x348] sm:$0xff] }
 0x4b2   :  { %v7625_v9 = vld [vmem:[#allocation28_spill] sm:$0xff]  ;;  %5532 = vmatpush.msra.mxu1 %v5122_v15  ;;  %v3758_v1 = vmax.f32 %v3194_v2, 0.0  ;;  %v5203_v17 = vld [vmem:[#allocation10 + $0x748] sm:$0xff] }
 0x4b3   :  { %v2114_v24 = vadd.f32 %v7625_v9, %v7306_v36  ;;  %v5250_v59 = vld [vmem:[#allocation10 + $0x8c0] sm:$0xff]  ;;  %v7365_v52 = vmax.f32 %v3773_v26, %v3781_v42  ;;  %v5331_v2 = vld [vmem:[#allocation10 + $0xb48] sm:$0xff] }
 0x4b4   :  { %v5378_v41 = vld [vmem:[#allocation10 + $0xcc0] sm:$0xff]  ;;  %5552 = vmatpush.msra.mxu2 %v5250_v59  ;;  %v5459_v4 = vld [vmem:[#allocation10 + $0xf48] sm:$0xff] }
 0x4b5   :  { %v7627_v22 = vld [vmem:[#allocation44_spill] sm:$0xff]  ;;  %5572 = vmatpush.msra.mxu3 %v5378_v41  ;;  %v3740_v43 = vmax.f32 %v2114_v24, 0.0  ;;  %v5067_v15 = vld [vmem:[#allocation10 + $0x308] sm:$0xff] }
 0x4b6   :  { %v2234_v25 = vadd.f32 %v7627_v22, %v7312_v62  ;;  %v7628_v12 = vld [vmem:[#allocation36_spill] sm:$0xff]  ;;  %v5195_v9 = vld [vmem:[#allocation10 + $0x708] sm:$0xff] }
 0x4b7   :  { %v2294_v47 = vadd.f32 %v7628_v12, %v2274_v58  ;;  %v4986_v36 = vld [vmem:[#allocation10 + $0x80] sm:$0xff]  ;;  %v3782_v58 = vmax.f32 %v3758_v1, %v3766_v21  ;;  %v3772_v61 = vmax.f32 %v3740_v43, %v3748_v10  ;;  %v5323_v24 = vld [vmem:[#allocation10 + $0xb08] sm:$0xff] }
 0x4b8   :  { %v5114_v35 = vld [vmem:[#allocation10 + $0x480] sm:$0xff]  ;;  %5513 = vmatpush.msra.mxu0 %v4986_v36  ;;  %v3742_v50 = vmax.f32 %v2234_v25, 0.0  ;;  %v5187_v57 = vld [vmem:[#allocation10 + $0x6c8] sm:$0xff] }
 0x4b9   :  { %v5242_v14 = vld [vmem:[#allocation10 + $0x880] sm:$0xff]  ;;  %5533 = vmatpush.msra.mxu1 %v5114_v35  ;;  %v3743_v63 = vmax.f32 %v2294_v47, 0.0  ;;  %v7363_v8 = vmax.f32 %v3772_v61, %v3780_v11  ;;  %v5315_v29 = vld [vmem:[#allocation10 + $0xac8] sm:$0xff] }
 0x4ba   :  { %v5370_v62 = vld [vmem:[#allocation10 + $0xc80] sm:$0xff]  ;;  %5553 = vmatpush.msra.mxu2 %v5242_v14  ;;  %v3774_v23 = vmax.f32 %v3742_v50, %v3750_v0  ;;  %v5443_v59 = vld [vmem:[#allocation10 + $0xec8] sm:$0xff] }
 0x4bb   :  { %v4978_v28 = vld [vmem:[#allocation10 + $0x40] sm:$0xff]  ;;  %5573 = vmatpush.msra.mxu3 %v5370_v62  ;;  %v3775_v54 = vmax.f32 %v3743_v63, %v3751_v16  ;;  %v5051_v41 = vld [vmem:[#allocation10 + $0x288] sm:$0xff] }
 0x4bc   :  { %v5106_v45 = vld [vmem:[#allocation10 + $0x440] sm:$0xff]  ;;  %5514 = vmatpush.msra.mxu0 %v4978_v28  ;;  %v7367_v37 = vmax.f32 %v3774_v23, %v3782_v58  ;;  %v5179_v22 = vld [vmem:[#allocation10 + $0x688] sm:$0xff] }
 0x4bd   :  { %v5234_v38 = vld [vmem:[#allocation10 + $0x840] sm:$0xff]  ;;  %5534 = vmatpush.msra.mxu1 %v5106_v45  ;;  %v7369_v40 = vmax.f32 %v3775_v54, %v3783_v53  ;;  %v5307_v25 = vld [vmem:[#allocation10 + $0xa88] sm:$0xff] }
 0x4be   :  { %v5362_v33 = vld [vmem:[#allocation10 + $0xc40] sm:$0xff]  ;;  %5554 = vmatpush.msra.mxu2 %v5234_v38  ;;  %v5435_v12 = vld [vmem:[#allocation10 + $0xe88] sm:$0xff] }
 0x4bf   :  { %v4970_v20 = vld [vmem:[#allocation10] sm:$0xff]  ;;  %5574 = vmatpush.msra.mxu3 %v5362_v33  ;;  %v5043_v47 = vld [vmem:[#allocation10 + $0x248] sm:$0xff] }
 0x4c0   :  { %v5098_v27 = vld [vmem:[#allocation10 + $0x400] sm:$0xff]  ;;  %5515 = vmatpush.msra.mxu0 %v4970_v20  ;;  %v5171_v21 = vld [vmem:[#allocation10 + $0x648] sm:$0xff] }
 0x4c1   :  { %v5226_v46 = vld [vmem:[#allocation10 + $0x800] sm:$0xff]  ;;  %5535 = vmatpush.msra.mxu1 %v5098_v27  ;;  %5516 = vmatmul.f32.vlgmr.msra.gmra.mxu0 %v7363_v8  ;;  %v5299_v44 = vld [vmem:[#allocation10 + $0xa48] sm:$0xff] }
 0x4c2   :  { %v5354_v56 = vld [vmem:[#allocation10 + $0xc00] sm:$0xff]  ;;  %5555 = vmatpush.msra.mxu2 %v5226_v46  ;;  %5536 = vmatmul.f32.vlgmr.msra.gmra.mxu1 %v7365_v52  ;;  %v5427_v36 = vld [vmem:[#allocation10 + $0xe48] sm:$0xff] }
 0x4c3   :  { %5575 = vmatpush.msra.mxu3 %v5354_v56  ;;  %5556 = vmatmul.f32.vlgmr.msra.gmra.mxu2 %v7367_v37  ;;  %v5035_v35 = vld [vmem:[#allocation10 + $0x208] sm:$0xff] }
 0x4c4   :  { %5576 = vmatmul.f32.vlgmr.msra.gmra.mxu3 %v7369_v40  ;;  %5580 = vmatpush.msrb.mxu0 %v5091_v31  ;;  %v5163_v10 = vld [vmem:[#allocation10 + $0x608] sm:$0xff] }
 0x4c5   :  { %5600 = vmatpush.msrb.mxu1 %v5219_v13  ;;  %5620 = vmatpush.msrb.mxu2 %v5347_v18  ;;  %v5291_v3 = vld [vmem:[#allocation10 + $0xa08] sm:$0xff] }
 0x4c6   :  { %5640 = vmatpush.msrb.mxu3 %v5475_v49  ;;  %5581 = vmatpush.msrb.mxu0 %v5083_v60  ;;  %v5419_v34 = vld [vmem:[#allocation10 + $0xe08] sm:$0xff]  ;;  %v5092_v60 = vld [vmem:[#allocation10 + $0x3d0] sm:$0xff] }
 0x4c7   :  { %5601 = vmatpush.msrb.mxu1 %v5211_v30  ;;  %5621 = vmatpush.msrb.mxu2 %v5339_v32  ;;  %v5027_v7 = vld [vmem:[#allocation10 + $0x1c8] sm:$0xff]  ;;  %v5220_v30 = vld [vmem:[#allocation10 + $0x7d0] sm:$0xff] }
 0x4c8   :  { %5641 = vmatpush.msrb.mxu3 %v5467_v48  ;;  %5582 = vmatpush.msrb.mxu0 %v5075_v5  ;;  %v5155_v14 = vld [vmem:[#allocation10 + $0x5c8] sm:$0xff]  ;;  %v5348_v32 = vld [vmem:[#allocation10 + $0xbd0] sm:$0xff] }
 0x4c9   :  { %5602 = vmatpush.msrb.mxu1 %v5203_v17  ;;  %5622 = vmatpush.msrb.mxu2 %v5331_v2  ;;  %v5283_v62 = vld [vmem:[#allocation10 + $0x9c8] sm:$0xff]  ;;  %v5476_v48 = vld [vmem:[#allocation10 + $0xfd0] sm:$0xff] }
 0x4ca   :  { %5642 = vmatpush.msrb.mxu3 %v5459_v4  ;;  %5583 = vmatpush.msrb.mxu0 %v5067_v15  ;;  %v5411_v0 = vld [vmem:[#allocation10 + $0xdc8] sm:$0xff]  ;;  %v5084_v5 = vld [vmem:[#allocation10 + $0x390] sm:$0xff] }
 0x4cb   :  { %5603 = vmatpush.msrb.mxu1 %v5195_v9  ;;  %5623 = vmatpush.msrb.mxu2 %v5323_v24  ;;  %v5019_v16 = vld [vmem:[#allocation10 + $0x188] sm:$0xff]  ;;  %v5212_v17 = vld [vmem:[#allocation10 + $0x790] sm:$0xff] }
 0x4cc   :  { %5643 = vmatpush.msrb.mxu3 %v5451_v51  ;;  %5584 = vmatpush.msrb.mxu0 %v5059_v39  ;;  %v5147_v1 = vld [vmem:[#allocation10 + $0x588] sm:$0xff]  ;;  %v5340_v2 = vld [vmem:[#allocation10 + $0xb90] sm:$0xff] }
 0x4cd   :  { %5604 = vmatpush.msrb.mxu1 %v5187_v57  ;;  %5624 = vmatpush.msrb.mxu2 %v5315_v29  ;;  %v5275_v55 = vld [vmem:[#allocation10 + $0x988] sm:$0xff]  ;;  %v5468_v4 = vld [vmem:[#allocation10 + $0xf90] sm:$0xff] }
 0x4ce   :  { %5644 = vmatpush.msrb.mxu3 %v5443_v59  ;;  %5585 = vmatpush.msrb.mxu0 %v5051_v41  ;;  %v5403_v6 = vld [vmem:[#allocation10 + $0xd88] sm:$0xff]  ;;  %v5076_v15 = vld [vmem:[#allocation10 + $0x350] sm:$0xff] }
 0x4cf   :  { %5605 = vmatpush.msrb.mxu1 %v5179_v22  ;;  %5625 = vmatpush.msrb.mxu2 %v5307_v25  ;;  %v5011_v28 = vld [vmem:[#allocation10 + $0x148] sm:$0xff]  ;;  %v5204_v9 = vld [vmem:[#allocation10 + $0x750] sm:$0xff] }
 0x4d0   :  { %5645 = vmatpush.msrb.mxu3 %v5435_v12  ;;  %5586 = vmatpush.msrb.mxu0 %v5043_v47  ;;  %v5139_v45 = vld [vmem:[#allocation10 + $0x548] sm:$0xff]  ;;  %v5332_v24 = vld [vmem:[#allocation10 + $0xb50] sm:$0xff] }
 0x4d1   :  { %5606 = vmatpush.msrb.mxu1 %v5171_v21  ;;  %5626 = vmatpush.msrb.mxu2 %v5299_v44  ;;  %v5267_v43 = vld [vmem:[#allocation10 + $0x948] sm:$0xff]  ;;  %v5460_v51 = vld [vmem:[#allocation10 + $0xf50] sm:$0xff] }
 0x4d2   :  { %5646 = vmatpush.msrb.mxu3 %v5427_v36  ;;  %5587 = vmatpush.msrb.mxu0 %v5035_v35  ;;  %v5395_v19 = vld [vmem:[#allocation10 + $0xd48] sm:$0xff]  ;;  %v5068_v39 = vld [vmem:[#allocation10 + $0x310] sm:$0xff] }
 0x4d3   :  { %5607 = vmatpush.msrb.mxu1 %v5163_v10  ;;  %5627 = vmatpush.msrb.mxu2 %v5291_v3  ;;  %v5003_v11 = vld [vmem:[#allocation10 + $0x108] sm:$0xff]  ;;  %v5196_v57 = vld [vmem:[#allocation10 + $0x710] sm:$0xff] }
 0x4d4   :  { %5647 = vmatpush.msrb.mxu3 %v5419_v34  ;;  %5588 = vmatpush.msrb.mxu0 %v5027_v7  ;;  %v5131_v42 = vld [vmem:[#allocation10 + $0x508] sm:$0xff]  ;;  %v5324_v29 = vld [vmem:[#allocation10 + $0xb10] sm:$0xff] }
 0x4d5   :  { %5608 = vmatpush.msrb.mxu1 %v5155_v14  ;;  %5628 = vmatpush.msrb.mxu2 %v5283_v62  ;;  %v5259_v38 = vld [vmem:[#allocation10 + $0x908] sm:$0xff]  ;;  %v5452_v59 = vld [vmem:[#allocation10 + $0xf10] sm:$0xff] }
 0x4d6   :  { %5648 = vmatpush.msrb.mxu3 %v5411_v0  ;;  %5589 = vmatpush.msrb.mxu0 %v5019_v16  ;;  %v5387_v33 = vld [vmem:[#allocation10 + $0xd08] sm:$0xff]  ;;  %v5060_v41 = vld [vmem:[#allocation10 + $0x2d0] sm:$0xff] }
 0x4d7   :  { %5609 = vmatpush.msrb.mxu1 %v5147_v1  ;;  %5629 = vmatpush.msrb.mxu2 %v5275_v55  ;;  %v4995_v50 = vld [vmem:[#allocation10 + $0xc8] sm:$0xff]  ;;  %v5188_v22 = vld [vmem:[#allocation10 + $0x6d0] sm:$0xff] }
 0x4d8   :  { %5649 = vmatpush.msrb.mxu3 %v5403_v6  ;;  %5590 = vmatpush.msrb.mxu0 %v5011_v28  ;;  %v5123_v63 = vld [vmem:[#allocation10 + $0x4c8] sm:$0xff]  ;;  %v5316_v25 = vld [vmem:[#allocation10 + $0xad0] sm:$0xff] }
 0x4d9   :  { %5610 = vmatpush.msrb.mxu1 %v5139_v45  ;;  %5630 = vmatpush.msrb.mxu2 %v5267_v43  ;;  %v5251_v58 = vld [vmem:[#allocation10 + $0x8c8] sm:$0xff]  ;;  %v5444_v12 = vld [vmem:[#allocation10 + $0xed0] sm:$0xff] }
 0x4da   :  { %5650 = vmatpush.msrb.mxu3 %v5395_v19  ;;  %5591 = vmatpush.msrb.mxu0 %v5003_v11  ;;  %v5379_v53 = vld [vmem:[#allocation10 + $0xcc8] sm:$0xff]  ;;  %v5052_v47 = vld [vmem:[#allocation10 + $0x290] sm:$0xff] }
 0x4db   :  { %5611 = vmatpush.msrb.mxu1 %v5131_v42  ;;  %5631 = vmatpush.msrb.mxu2 %v5259_v38  ;;  %v4987_v20 = vld [vmem:[#allocation10 + $0x88] sm:$0xff]  ;;  %v5180_v21 = vld [vmem:[#allocation10 + $0x690] sm:$0xff] }
 0x4dc   :  { %5651 = vmatpush.msrb.mxu3 %v5387_v33  ;;  %v5115_v27 = vld [vmem:[#allocation10 + $0x488] sm:$0xff]  ;;  %5592 = vmatpush.msrb.mxu0 %v4995_v50  ;;  %v5308_v44 = vld [vmem:[#allocation10 + $0xa90] sm:$0xff] }
 0x4dd   :  { %5612 = vmatpush.msrb.mxu1 %v5123_v63  ;;  %v5243_v61 = vld [vmem:[#allocation10 + $0x888] sm:$0xff]  ;;  %5632 = vmatpush.msrb.mxu2 %v5251_v58  ;;  %v5436_v36 = vld [vmem:[#allocation10 + $0xe90] sm:$0xff] }
 0x4de   :  { %v5371_v26 = vld [vmem:[#allocation10 + $0xc88] sm:$0xff]  ;;  %5652 = vmatpush.msrb.mxu3 %v5379_v53  ;;  %5593 = vmatpush.msrb.mxu0 %v4987_v20  ;;  %v5044_v35 = vld [vmem:[#allocation10 + $0x250] sm:$0xff] }
 0x4df   :  { %v4979_v46 = vld [vmem:[#allocation10 + $0x48] sm:$0xff]  ;;  %5613 = vmatpush.msrb.mxu1 %v5115_v27  ;;  %5633 = vmatpush.msrb.mxu2 %v5243_v61  ;;  %v5172_v10 = vld [vmem:[#allocation10 + $0x650] sm:$0xff] }
 0x4e0   :  { %v5107_v56 = vld [vmem:[#allocation10 + $0x448] sm:$0xff]  ;;  %5653 = vmatpush.msrb.mxu3 %v5371_v26  ;;  %5594 = vmatpush.msrb.mxu0 %v4979_v46  ;;  %v5300_v3 = vld [vmem:[#allocation10 + $0xa50] sm:$0xff] }
 0x4e1   :  { %v5235_v23 = vld [vmem:[#allocation10 + $0x848] sm:$0xff]  ;;  %5614 = vmatpush.msrb.mxu1 %v5107_v56  ;;  %v5428_v34 = vld [vmem:[#allocation10 + $0xe50] sm:$0xff] }
 0x4e2   :  { %v5363_v54 = vld [vmem:[#allocation10 + $0xc48] sm:$0xff]  ;;  %5634 = vmatpush.msrb.mxu2 %v5235_v23  ;;  %v5036_v7 = vld [vmem:[#allocation10 + $0x210] sm:$0xff] }
 0x4e3   :  { %v4971_v31 = vld [vmem:[#allocation10 + $0x8] sm:$0xff]  ;;  %5654 = vmatpush.msrb.mxu3 %v5363_v54  ;;  %v5164_v14 = vld [vmem:[#allocation10 + $0x610] sm:$0xff] }
 0x4e4   :  { %v5099_v13 = vld [vmem:[#allocation10 + $0x408] sm:$0xff]  ;;  %5595 = vmatpush.msrb.mxu0 %v4971_v31  ;;  %v5292_v62 = vld [vmem:[#allocation10 + $0xa10] sm:$0xff] }
 0x4e5   :  { %v5227_v18 = vld [vmem:[#allocation10 + $0x808] sm:$0xff]  ;;  %5615 = vmatpush.msrb.mxu1 %v5099_v13  ;;  %5596 = vmatmul.f32.vlgmr.msrb.gmra.mxu0 %v7363_v8  ;;  %v5420_v0 = vld [vmem:[#allocation10 + $0xe10] sm:$0xff] }
 0x4e6   :  { %v5355_v49 = vld [vmem:[#allocation10 + $0xc08] sm:$0xff]  ;;  %5635 = vmatpush.msrb.mxu2 %v5227_v18  ;;  %5616 = vmatmul.f32.vlgmr.msrb.gmra.mxu1 %v7365_v52  ;;  %v5028_v16 = vld [vmem:[#allocation10 + $0x1d0] sm:$0xff] }
 0x4e7   :  { %5655 = vmatpush.msrb.mxu3 %v5355_v49  ;;  %5636 = vmatmul.f32.vlgmr.msrb.gmra.mxu2 %v7367_v37  ;;  %v5156_v1 = vld [vmem:[#allocation10 + $0x5d0] sm:$0xff] }
 0x4e8   :  { %5656 = vmatmul.f32.vlgmr.msrb.gmra.mxu3 %v7369_v40  ;;  %5660 = vmatpush.msra.mxu0 %v5092_v60  ;;  %v5284_v55 = vld [vmem:[#allocation10 + $0x9d0] sm:$0xff] }
 0x4e9   :  { %5680 = vmatpush.msra.mxu1 %v5220_v30  ;;  %5700 = vmatpush.msra.mxu2 %v5348_v32  ;;  %v5412_v6 = vld [vmem:[#allocation10 + $0xdd0] sm:$0xff] }
 0x4ea   :  { %5720 = vmatpush.msra.mxu3 %v5476_v48  ;;  %5661 = vmatpush.msra.mxu0 %v5084_v5  ;;  %v5020_v28 = vld [vmem:[#allocation10 + $0x190] sm:$0xff]  ;;  %v5093_v5 = vld [vmem:[#allocation10 + $0x3d8] sm:$0xff] }
 0x4eb   :  { %5681 = vmatpush.msra.mxu1 %v5212_v17  ;;  %5701 = vmatpush.msra.mxu2 %v5340_v2  ;;  %v5148_v45 = vld [vmem:[#allocation10 + $0x590] sm:$0xff]  ;;  %v5221_v17 = vld [vmem:[#allocation10 + $0x7d8] sm:$0xff] }
 0x4ec   :  { %5721 = vmatpush.msra.mxu3 %v5468_v4  ;;  %5662 = vmatpush.msra.mxu0 %v5076_v15  ;;  %v5276_v43 = vld [vmem:[#allocation10 + $0x990] sm:$0xff]  ;;  %v5349_v2 = vld [vmem:[#allocation10 + $0xbd8] sm:$0xff] }
 0x4ed   :  { %5682 = vmatpush.msra.mxu1 %v5204_v9  ;;  %5702 = vmatpush.msra.mxu2 %v5332_v24  ;;  %v5404_v19 = vld [vmem:[#allocation10 + $0xd90] sm:$0xff]  ;;  %v5477_v4 = vld [vmem:[#allocation10 + $0xfd8] sm:$0xff] }
 0x4ee   :  { %5722 = vmatpush.msra.mxu3 %v5460_v51  ;;  %5663 = vmatpush.msra.mxu0 %v5068_v39  ;;  %v5012_v11 = vld [vmem:[#allocation10 + $0x150] sm:$0xff]  ;;  %v5085_v15 = vld [vmem:[#allocation10 + $0x398] sm:$0xff] }
 0x4ef   :  { %5683 = vmatpush.msra.mxu1 %v5196_v57  ;;  %5703 = vmatpush.msra.mxu2 %v5324_v29  ;;  %v5140_v42 = vld [vmem:[#allocation10 + $0x550] sm:$0xff]  ;;  %v5213_v9 = vld [vmem:[#allocation10 + $0x798] sm:$0xff] }
 0x4f0   :  { %5723 = vmatpush.msra.mxu3 %v5452_v59  ;;  %5664 = vmatpush.msra.mxu0 %v5060_v41  ;;  %v5268_v38 = vld [vmem:[#allocation10 + $0x950] sm:$0xff]  ;;  %v5341_v24 = vld [vmem:[#allocation10 + $0xb98] sm:$0xff] }
 0x4f1   :  { %5684 = vmatpush.msra.mxu1 %v5188_v22  ;;  %5704 = vmatpush.msra.mxu2 %v5316_v25  ;;  %v5396_v33 = vld [vmem:[#allocation10 + $0xd50] sm:$0xff]  ;;  %v5469_v51 = vld [vmem:[#allocation10 + $0xf98] sm:$0xff] }
 0x4f2   :  { %5724 = vmatpush.msra.mxu3 %v5444_v12  ;;  %5665 = vmatpush.msra.mxu0 %v5052_v47  ;;  %v5004_v50 = vld [vmem:[#allocation10 + $0x110] sm:$0xff]  ;;  %v5077_v39 = vld [vmem:[#allocation10 + $0x358] sm:$0xff] }
 0x4f3   :  { %5685 = vmatpush.msra.mxu1 %v5180_v21  ;;  %5705 = vmatpush.msra.mxu2 %v5308_v44  ;;  %v5132_v63 = vld [vmem:[#allocation10 + $0x510] sm:$0xff]  ;;  %v5205_v57 = vld [vmem:[#allocation10 + $0x758] sm:$0xff] }
 0x4f4   :  { %5725 = vmatpush.msra.mxu3 %v5436_v36  ;;  %5666 = vmatpush.msra.mxu0 %v5044_v35  ;;  %v5260_v58 = vld [vmem:[#allocation10 + $0x910] sm:$0xff]  ;;  %v5333_v29 = vld [vmem:[#allocation10 + $0xb58] sm:$0xff] }
 0x4f5   :  { %5686 = vmatpush.msra.mxu1 %v5172_v10  ;;  %5706 = vmatpush.msra.mxu2 %v5300_v3  ;;  %v5388_v53 = vld [vmem:[#allocation10 + $0xd10] sm:$0xff]  ;;  %v5461_v59 = vld [vmem:[#allocation10 + $0xf58] sm:$0xff] }
 0x4f6   :  { %5726 = vmatpush.msra.mxu3 %v5428_v34  ;;  %5667 = vmatpush.msra.mxu0 %v5036_v7  ;;  %v4996_v20 = vld [vmem:[#allocation10 + $0xd0] sm:$0xff]  ;;  %v5069_v41 = vld [vmem:[#allocation10 + $0x318] sm:$0xff] }
 0x4f7   :  { %5687 = vmatpush.msra.mxu1 %v5164_v14  ;;  %5707 = vmatpush.msra.mxu2 %v5292_v62  ;;  %v5124_v27 = vld [vmem:[#allocation10 + $0x4d0] sm:$0xff]  ;;  %v5197_v22 = vld [vmem:[#allocation10 + $0x718] sm:$0xff] }
 0x4f8   :  { %5727 = vmatpush.msra.mxu3 %v5420_v0  ;;  %5668 = vmatpush.msra.mxu0 %v5028_v16  ;;  %v5252_v61 = vld [vmem:[#allocation10 + $0x8d0] sm:$0xff]  ;;  %v5325_v25 = vld [vmem:[#allocation10 + $0xb18] sm:$0xff] }
 0x4f9   :  { %5688 = vmatpush.msra.mxu1 %v5156_v1  ;;  %5708 = vmatpush.msra.mxu2 %v5284_v55  ;;  %v5380_v26 = vld [vmem:[#allocation10 + $0xcd0] sm:$0xff]  ;;  %v5453_v12 = vld [vmem:[#allocation10 + $0xf18] sm:$0xff] }
 0x4fa   :  { %5728 = vmatpush.msra.mxu3 %v5412_v6  ;;  %5669 = vmatpush.msra.mxu0 %v5020_v28  ;;  %v4988_v46 = vld [vmem:[#allocation10 + $0x90] sm:$0xff]  ;;  %v5061_v47 = vld [vmem:[#allocation10 + $0x2d8] sm:$0xff] }
 0x4fb   :  { %5689 = vmatpush.msra.mxu1 %v5148_v45  ;;  %5709 = vmatpush.msra.mxu2 %v5276_v43  ;;  %v5116_v56 = vld [vmem:[#allocation10 + $0x490] sm:$0xff]  ;;  %v5189_v21 = vld [vmem:[#allocation10 + $0x6d8] sm:$0xff] }
 0x4fc   :  { %5729 = vmatpush.msra.mxu3 %v5404_v19  ;;  %5670 = vmatpush.msra.mxu0 %v5012_v11  ;;  %v5244_v23 = vld [vmem:[#allocation10 + $0x890] sm:$0xff]  ;;  %v5317_v44 = vld [vmem:[#allocation10 + $0xad8] sm:$0xff] }
 0x4fd   :  { %5690 = vmatpush.msra.mxu1 %v5140_v42  ;;  %5710 = vmatpush.msra.mxu2 %v5268_v38  ;;  %v5372_v54 = vld [vmem:[#allocation10 + $0xc90] sm:$0xff]  ;;  %v5445_v36 = vld [vmem:[#allocation10 + $0xed8] sm:$0xff] }
 0x4fe   :  { %5730 = vmatpush.msra.mxu3 %v5396_v33  ;;  %5671 = vmatpush.msra.mxu0 %v5004_v50  ;;  %v4980_v31 = vld [vmem:[#allocation10 + $0x50] sm:$0xff]  ;;  %v5053_v35 = vld [vmem:[#allocation10 + $0x298] sm:$0xff]  ;;  %v7383_v50 = vpop.f32.mrf.mxu0 }
 0x4ff   :  { %5691 = vmatpush.msra.mxu1 %v5132_v63  ;;  %5711 = vmatpush.msra.mxu2 %v5260_v58  ;;  %v5108_v13 = vld [vmem:[#allocation10 + $0x450] sm:$0xff]  ;;  %v5181_v10 = vld [vmem:[#allocation10 + $0x698] sm:$0xff] }
 0x500   :  { %5731 = vmatpush.msra.mxu3 %v5388_v53  ;;  %5672 = vmatpush.msra.mxu0 %v4996_v20  ;;  %v5236_v18 = vld [vmem:[#allocation10 + $0x850] sm:$0xff]  ;;  %v5309_v3 = vld [vmem:[#allocation10 + $0xa98] sm:$0xff] }
 0x501   :  { %5692 = vmatpush.msra.mxu1 %v5124_v27  ;;  %5712 = vmatpush.msra.mxu2 %v5252_v61  ;;  %v5364_v49 = vld [vmem:[#allocation10 + $0xc50] sm:$0xff]  ;;  %v5437_v34 = vld [vmem:[#allocation10 + $0xe98] sm:$0xff]  ;;  %v7385_v27 = vpop.f32.mrf.mxu1 }
 0x502   :  { %5732 = vmatpush.msra.mxu3 %v5380_v26  ;;  %5673 = vmatpush.msra.mxu0 %v4988_v46  ;;  %v4972_v60 = vld [vmem:[#allocation10 + $0x10] sm:$0xff]  ;;  %v5045_v7 = vld [vmem:[#allocation10 + $0x258] sm:$0xff] }
 0x503   :  { %5693 = vmatpush.msra.mxu1 %v5116_v56  ;;  %5713 = vmatpush.msra.mxu2 %v5244_v23  ;;  %v5100_v30 = vld [vmem:[#allocation10 + $0x410] sm:$0xff]  ;;  %v5173_v14 = vld [vmem:[#allocation10 + $0x658] sm:$0xff] }
 0x504   :  { %5733 = vmatpush.msra.mxu3 %v5372_v54  ;;  %5674 = vmatpush.msra.mxu0 %v4980_v31  ;;  %v5228_v32 = vld [vmem:[#allocation10 + $0x810] sm:$0xff]  ;;  %v5301_v62 = vld [vmem:[#allocation10 + $0xa58] sm:$0xff] }
 0x505   :  { %5694 = vmatpush.msra.mxu1 %v5108_v13  ;;  %v5356_v48 = vld [vmem:[#allocation10 + $0xc10] sm:$0xff]  ;;  %5714 = vmatpush.msra.mxu2 %v5236_v18  ;;  %v5429_v0 = vld [vmem:[#allocation10 + $0xe58] sm:$0xff] }
 0x506   :  { %5734 = vmatpush.msra.mxu3 %v5364_v49  ;;  %5675 = vmatpush.msra.mxu0 %v4972_v60  ;;  %v5037_v16 = vld [vmem:[#allocation10 + $0x218] sm:$0xff]  ;;  %v7387_v60 = vpop.f32.mrf.mxu2 }
 0x507   :  { %5695 = vmatpush.msra.mxu1 %v5100_v30  ;;  %5715 = vmatpush.msra.mxu2 %v5228_v32  ;;  %v5165_v1 = vld [vmem:[#allocation10 + $0x618] sm:$0xff] }
 0x508   :  { %5735 = vmatpush.msra.mxu3 %v5356_v48  ;;  %5676 = vmatmul.f32.vlgmr.msra.gmra.mxu0 %v7363_v8  ;;  %v5293_v55 = vld [vmem:[#allocation10 + $0xa18] sm:$0xff]  ;;  %v7389_v48 = vpop.f32.mrf.mxu0 }
 0x509   :  { %5696 = vmatmul.f32.vlgmr.msra.gmra.mxu1 %v7365_v52  ;;  %5716 = vmatmul.f32.vlgmr.msra.gmra.mxu2 %v7367_v37  ;;  %v5421_v6 = vld [vmem:[#allocation10 + $0xe18] sm:$0xff] }
 0x50a   :  { %5736 = vmatmul.f32.vlgmr.msra.gmra.mxu3 %v7369_v40  ;;  %5740 = vmatpush.msrb.mxu0 %v5093_v5  ;;  %v5029_v28 = vld [vmem:[#allocation10 + $0x1d8] sm:$0xff] }
 0x50b   :  { %5760 = vmatpush.msrb.mxu1 %v5221_v17  ;;  %5780 = vmatpush.msrb.mxu2 %v5349_v2  ;;  %v5157_v45 = vld [vmem:[#allocation10 + $0x5d8] sm:$0xff]  ;;  %v7391_v2 = vpop.f32.mrf.mxu3 }
 0x50c   :  { %5800 = vmatpush.msrb.mxu3 %v5477_v4  ;;  %5741 = vmatpush.msrb.mxu0 %v5085_v15  ;;  %v5285_v43 = vld [vmem:[#allocation10 + $0x9d8] sm:$0xff] }
 0x50d   :  { %5761 = vmatpush.msrb.mxu1 %v5213_v9  ;;  %5781 = vmatpush.msrb.mxu2 %v5341_v24  ;;  %v5413_v19 = vld [vmem:[#allocation10 + $0xdd8] sm:$0xff]  ;;  %v7393_v9 = vpop.f32.mrf.mxu1 }
 0x50e   :  { %5801 = vmatpush.msrb.mxu3 %v5469_v51  ;;  %5742 = vmatpush.msrb.mxu0 %v5077_v39  ;;  %v5021_v11 = vld [vmem:[#allocation10 + $0x198] sm:$0xff] }
 0x50f   :  { %5762 = vmatpush.msrb.mxu1 %v5205_v57  ;;  %5782 = vmatpush.msrb.mxu2 %v5333_v29  ;;  %v5149_v42 = vld [vmem:[#allocation10 + $0x598] sm:$0xff]  ;;  %v5094_v29 = vld [vmem:[#allocation10 + $0x3e0] sm:$0xff] }
 0x510   :  { %5802 = vmatpush.msrb.mxu3 %v5461_v59  ;;  %5743 = vmatpush.msrb.mxu0 %v5069_v41  ;;  %v5277_v38 = vld [vmem:[#allocation10 + $0x998] sm:$0xff]  ;;  %v5222_v59 = vld [vmem:[#allocation10 + $0x7e0] sm:$0xff]  ;;  %v7395_v41 = vpop.f32.mrf.mxu2 }
 0x511   :  { %5763 = vmatpush.msrb.mxu1 %v5197_v22  ;;  %5783 = vmatpush.msrb.mxu2 %v5325_v25  ;;  %v5405_v33 = vld [vmem:[#allocation10 + $0xd98] sm:$0xff]  ;;  %v5350_v22 = vld [vmem:[#allocation10 + $0xbe0] sm:$0xff] }
 0x512   :  { %5803 = vmatpush.msrb.mxu3 %v5453_v12  ;;  %5744 = vmatpush.msrb.mxu0 %v5061_v47  ;;  %v5013_v63 = vld [vmem:[#allocation10 + $0x158] sm:$0xff]  ;;  %v5478_v25 = vld [vmem:[#allocation10 + $0xfe0] sm:$0xff]  ;;  %v7399_v12 = vpop.f32.mrf.mxu0 }
 0x513   :  { %5764 = vmatpush.msrb.mxu1 %v5189_v21  ;;  %5784 = vmatpush.msrb.mxu2 %v5317_v44  ;;  %v5141_v58 = vld [vmem:[#allocation10 + $0x558] sm:$0xff]  ;;  %v5086_v47 = vld [vmem:[#allocation10 + $0x3a0] sm:$0xff]  ;;  %v7403_v44 = vpop.f32.mrf.mxu3 }
 0x514   :  { %5804 = vmatpush.msrb.mxu3 %v5445_v36  ;;  %5745 = vmatpush.msrb.mxu0 %v5053_v35  ;;  %v5269_v53 = vld [vmem:[#allocation10 + $0x958] sm:$0xff]  ;;  %v5214_v21 = vld [vmem:[#allocation10 + $0x7a0] sm:$0xff] }
 0x515   :  { %5765 = vmatpush.msrb.mxu1 %v5181_v10  ;;  %5785 = vmatpush.msrb.mxu2 %v5309_v3  ;;  %v5397_v20 = vld [vmem:[#allocation10 + $0xd58] sm:$0xff]  ;;  %v5342_v36 = vld [vmem:[#allocation10 + $0xba0] sm:$0xff]  ;;  %v7405_v10 = vpop.f32.mrf.mxu1 }
 0x516   :  { %5805 = vmatpush.msrb.mxu3 %v5437_v34  ;;  %5746 = vmatpush.msrb.mxu0 %v5045_v7  ;;  %v5005_v61 = vld [vmem:[#allocation10 + $0x118] sm:$0xff]  ;;  %v5470_v35 = vld [vmem:[#allocation10 + $0xfa0] sm:$0xff] }
 0x517   :  { %5766 = vmatpush.msrb.mxu1 %v5173_v14  ;;  %5786 = vmatpush.msrb.mxu2 %v5301_v62  ;;  %v5133_v26 = vld [vmem:[#allocation10 + $0x518] sm:$0xff]  ;;  %v5078_v3 = vld [vmem:[#allocation10 + $0x360] sm:$0xff] }
 0x518   :  { %5806 = vmatpush.msrb.mxu3 %v5429_v0  ;;  %5747 = vmatpush.msrb.mxu0 %v5037_v16  ;;  %v5261_v46 = vld [vmem:[#allocation10 + $0x918] sm:$0xff]  ;;  %v5206_v34 = vld [vmem:[#allocation10 + $0x760] sm:$0xff] }
 0x519   :  { %5767 = vmatpush.msrb.mxu1 %v5165_v1  ;;  %5787 = vmatpush.msrb.mxu2 %v5293_v55  ;;  %v5389_v56 = vld [vmem:[#allocation10 + $0xd18] sm:$0xff]  ;;  %v5334_v7 = vld [vmem:[#allocation10 + $0xb60] sm:$0xff] }
 0x51a   :  { %5807 = vmatpush.msrb.mxu3 %v5421_v6  ;;  %5748 = vmatpush.msrb.mxu0 %v5029_v28  ;;  %v4997_v23 = vld [vmem:[#allocation10 + $0xd8] sm:$0xff]  ;;  %v5462_v14 = vld [vmem:[#allocation10 + $0xf60] sm:$0xff]  ;;  %v7407_v28 = vpop.f32.mrf.mxu2 }
 0x51b   :  { %5768 = vmatpush.msrb.mxu1 %v5157_v45  ;;  %5788 = vmatpush.msrb.mxu2 %v5285_v43  ;;  %v5125_v54 = vld [vmem:[#allocation10 + $0x4d8] sm:$0xff]  ;;  %v5070_v62 = vld [vmem:[#allocation10 + $0x320] sm:$0xff] }
 0x51c   :  { %5808 = vmatpush.msrb.mxu3 %v5413_v19  ;;  %5749 = vmatpush.msrb.mxu0 %v5021_v11  ;;  %v5253_v31 = vld [vmem:[#allocation10 + $0x8d8] sm:$0xff]  ;;  %v5198_v0 = vld [vmem:[#allocation10 + $0x720] sm:$0xff]  ;;  %v7409_v19 = vpop.f32.mrf.mxu0 }
 0x51d   :  { %5769 = vmatpush.msrb.mxu1 %v5149_v42  ;;  %5789 = vmatpush.msrb.mxu2 %v5277_v38  ;;  %v5381_v13 = vld [vmem:[#allocation10 + $0xcd8] sm:$0xff]  ;;  %v5326_v16 = vld [vmem:[#allocation10 + $0xb20] sm:$0xff]  ;;  %v7411_v38 = vpop.f32.mrf.mxu3 }
 0x51e   :  { %5809 = vmatpush.msrb.mxu3 %v5405_v33  ;;  %5750 = vmatpush.msrb.mxu0 %v5013_v63  ;;  %v4989_v18 = vld [vmem:[#allocation10 + $0x98] sm:$0xff]  ;;  %v5454_v1 = vld [vmem:[#allocation10 + $0xf20] sm:$0xff] }
 0x51f   :  { %5770 = vmatpush.msrb.mxu1 %v5141_v58  ;;  %5790 = vmatpush.msrb.mxu2 %v5269_v53  ;;  %v5117_v49 = vld [vmem:[#allocation10 + $0x498] sm:$0xff]  ;;  %v5062_v55 = vld [vmem:[#allocation10 + $0x2e0] sm:$0xff]  ;;  %v7413_v58 = vpop.f32.mrf.mxu1 }
 0x520   :  { %5810 = vmatpush.msrb.mxu3 %v5397_v20  ;;  %5751 = vmatpush.msrb.mxu0 %v5005_v61  ;;  %v5245_v30 = vld [vmem:[#allocation10 + $0x898] sm:$0xff]  ;;  %v5190_v6 = vld [vmem:[#allocation10 + $0x6e0] sm:$0xff] }
 0x521   :  { %5771 = vmatpush.msrb.mxu1 %v5133_v26  ;;  %5791 = vmatpush.msrb.mxu2 %v5261_v46  ;;  %v5373_v32 = vld [vmem:[#allocation10 + $0xc98] sm:$0xff]  ;;  %v5318_v45 = vld [vmem:[#allocation10 + $0xae0] sm:$0xff] }
 0x522   :  { %5811 = vmatpush.msrb.mxu3 %v5389_v56  ;;  %5752 = vmatpush.msrb.mxu0 %v4997_v23  ;;  %v4981_v5 = vld [vmem:[#allocation10 + $0x58] sm:$0xff]  ;;  %v5446_v43 = vld [vmem:[#allocation10 + $0xee0] sm:$0xff] }
 0x523   :  { %5772 = vmatpush.msrb.mxu1 %v5125_v54  ;;  %5792 = vmatpush.msrb.mxu2 %v5253_v31  ;;  %v5109_v17 = vld [vmem:[#allocation10 + $0x458] sm:$0xff]  ;;  %v5054_v11 = vld [vmem:[#allocation10 + $0x2a0] sm:$0xff] }
 0x524   :  { %5812 = vmatpush.msrb.mxu3 %v5381_v13  ;;  %5753 = vmatpush.msrb.mxu0 %v4989_v18  ;;  %v5237_v4 = vld [vmem:[#allocation10 + $0x858] sm:$0xff]  ;;  %v5182_v42 = vld [vmem:[#allocation10 + $0x6a0] sm:$0xff]  ;;  %v7415_v18 = vpop.f32.mrf.mxu2 }
 0x525   :  { %5773 = vmatpush.msrb.mxu1 %v5117_v49  ;;  %v5365_v15 = vld [vmem:[#allocation10 + $0xc58] sm:$0xff]  ;;  %5793 = vmatpush.msrb.mxu2 %v5245_v30  ;;  %v5310_v33 = vld [vmem:[#allocation10 + $0xaa0] sm:$0xff] }
 0x526   :  { %5813 = vmatpush.msrb.mxu3 %v5373_v32  ;;  %v4973_v24 = vld [vmem:[#allocation10 + $0x18] sm:$0xff]  ;;  %5754 = vmatpush.msrb.mxu0 %v4981_v5  ;;  %v5438_v63 = vld [vmem:[#allocation10 + $0xea0] sm:$0xff]  ;;  %v7417_v32 = vpop.f32.mrf.mxu0 }
 0x527   :  { %v5101_v51 = vld [vmem:[#allocation10 + $0x418] sm:$0xff]  ;;  %5774 = vmatpush.msrb.mxu1 %v5109_v17  ;;  %5794 = vmatpush.msrb.mxu2 %v5237_v4  ;;  %v5046_v53 = vld [vmem:[#allocation10 + $0x260] sm:$0xff]  ;;  %v7419_v4 = vpop.f32.mrf.mxu3 }
 0x528   :  { %v5229_v39 = vld [vmem:[#allocation10 + $0x818] sm:$0xff]  ;;  %5814 = vmatpush.msrb.mxu3 %v5365_v15  ;;  %5755 = vmatpush.msrb.mxu0 %v4973_v24  ;;  %v5174_v20 = vld [vmem:[#allocation10 + $0x660] sm:$0xff] }
 0x529   :  { %v5357_v57 = vld [vmem:[#allocation10 + $0xc18] sm:$0xff]  ;;  %5775 = vmatpush.msrb.mxu1 %v5101_v51  ;;  %5795 = vmatpush.msrb.mxu2 %v5229_v39  ;;  %v5302_v61 = vld [vmem:[#allocation10 + $0xa60] sm:$0xff]  ;;  %v7421_v51 = vpop.f32.mrf.mxu1 }
 0x52a   :  { %5815 = vmatpush.msrb.mxu3 %v5357_v57  ;;  %5756 = vmatmul.f32.vlgmr.msrb.gmra.mxu0 %v7363_v8  ;;  %v5430_v26 = vld [vmem:[#allocation10 + $0xe60] sm:$0xff] }
 0x52b   :  { %5776 = vmatmul.f32.vlgmr.msrb.gmra.mxu1 %v7365_v52  ;;  %5796 = vmatmul.f32.vlgmr.msrb.gmra.mxu2 %v7367_v37  ;;  %v5038_v46 = vld [vmem:[#allocation10 + $0x220] sm:$0xff] }
 0x52c   :  { %5816 = vmatmul.f32.vlgmr.msrb.gmra.mxu3 %v7369_v40  ;;  %5820 = vmatpush.msra.mxu0 %v5094_v29  ;;  %v5166_v56 = vld [vmem:[#allocation10 + $0x620] sm:$0xff] }
 0x52d   :  { %5840 = vmatpush.msra.mxu1 %v5222_v59  ;;  %5860 = vmatpush.msra.mxu2 %v5350_v22  ;;  %v5294_v23 = vld [vmem:[#allocation10 + $0xa20] sm:$0xff] }
 0x52e   :  { %5880 = vmatpush.msra.mxu3 %v5478_v25  ;;  %5821 = vmatpush.msra.mxu0 %v5086_v47  ;;  %v5422_v54 = vld [vmem:[#allocation10 + $0xe20] sm:$0xff] }
 0x52f   :  { %5841 = vmatpush.msra.mxu1 %v5214_v21  ;;  %5861 = vmatpush.msra.mxu2 %v5342_v36  ;;  %v5030_v31 = vld [vmem:[#allocation10 + $0x1e0] sm:$0xff] }
 0x530   :  { %5881 = vmatpush.msra.mxu3 %v5470_v35  ;;  %5822 = vmatpush.msra.mxu0 %v5078_v3  ;;  %v5158_v13 = vld [vmem:[#allocation10 + $0x5e0] sm:$0xff]  ;;  %v7423_v3 = vpop.f32.mrf.mxu2 }
 0x531   :  { %5842 = vmatpush.msra.mxu1 %v5206_v34  ;;  %5862 = vmatpush.msra.mxu2 %v5334_v7  ;;  %v5286_v49 = vld [vmem:[#allocation10 + $0x9e0] sm:$0xff] }
 0x532   :  { %5882 = vmatpush.msra.mxu3 %v5462_v14  ;;  %5823 = vmatpush.msra.mxu0 %v5070_v62  ;;  %v5414_v30 = vld [vmem:[#allocation10 + $0xde0] sm:$0xff]  ;;  %v7425_v14 = vpop.f32.mrf.mxu0 }
 0x533   :  { %5843 = vmatpush.msra.mxu1 %v5198_v0  ;;  %5863 = vmatpush.msra.mxu2 %v5326_v16  ;;  %v5022_v5 = vld [vmem:[#allocation10 + $0x1a0] sm:$0xff]  ;;  %v7427_v16 = vpop.f32.mrf.mxu3 }
 0x534   :  { %5883 = vmatpush.msra.mxu3 %v5454_v1  ;;  %5824 = vmatpush.msra.mxu0 %v5062_v55  ;;  %v5150_v17 = vld [vmem:[#allocation10 + $0x5a0] sm:$0xff] }
 0x535   :  { %5844 = vmatpush.msra.mxu1 %v5190_v6  ;;  %5864 = vmatpush.msra.mxu2 %v5318_v45  ;;  %v5278_v15 = vld [vmem:[#allocation10 + $0x9a0] sm:$0xff]  ;;  %v7429_v6 = vpop.f32.mrf.mxu1 }
 0x536   :  { %5884 = vmatpush.msra.mxu3 %v5446_v43  ;;  %5825 = vmatpush.msra.mxu0 %v5054_v11  ;;  %v5406_v24 = vld [vmem:[#allocation10 + $0xda0] sm:$0xff] }
 0x537   :  { %5845 = vmatpush.msra.mxu1 %v5182_v42  ;;  %5865 = vmatpush.msra.mxu2 %v5310_v33  ;;  %v5014_v39 = vld [vmem:[#allocation10 + $0x160] sm:$0xff] }
 0x538   :  { %5885 = vmatpush.msra.mxu3 %v5438_v63  ;;  %5826 = vmatpush.msra.mxu0 %v5046_v53  ;;  %v5142_v57 = vld [vmem:[#allocation10 + $0x560] sm:$0xff] }
 0x539   :  { %5846 = vmatpush.msra.mxu1 %v5174_v20  ;;  %5866 = vmatpush.msra.mxu2 %v5302_v61  ;;  %v5270_v29 = vld [vmem:[#allocation10 + $0x960] sm:$0xff]  ;;  %v7431_v61 = vpop.f32.mrf.mxu2 }
 0x53a   :  { %5886 = vmatpush.msra.mxu3 %v5430_v26  ;;  %5827 = vmatpush.msra.mxu0 %v5038_v46  ;;  %v5398_v59 = vld [vmem:[#allocation10 + $0xd60] sm:$0xff]  ;;  %v7433_v26 = vpop.f32.mrf.mxu0  ;;  %v5095_v46 = vld [vmem:[#allocation10 + $0x3e8] sm:$0xff] }
 0x53b   :  { %5847 = vmatpush.msra.mxu1 %v5166_v56  ;;  %5867 = vmatpush.msra.mxu2 %v5294_v23  ;;  %v5006_v22 = vld [vmem:[#allocation10 + $0x120] sm:$0xff]  ;;  %v5223_v56 = vld [vmem:[#allocation10 + $0x7e8] sm:$0xff]  ;;  %v7435_v23 = vpop.f32.mrf.mxu3 }
 0x53c   :  { %5887 = vmatpush.msra.mxu3 %v5422_v54  ;;  %5828 = vmatpush.msra.mxu0 %v5030_v31  ;;  %v5134_v25 = vld [vmem:[#allocation10 + $0x520] sm:$0xff]  ;;  %v5351_v54 = vld [vmem:[#allocation10 + $0xbe8] sm:$0xff] }
 0x53d   :  { %5848 = vmatpush.msra.mxu1 %v5158_v13  ;;  %5868 = vmatpush.msra.mxu2 %v5286_v49  ;;  %v5262_v47 = vld [vmem:[#allocation10 + $0x920] sm:$0xff]  ;;  %v5479_v31 = vld [vmem:[#allocation10 + $0xfe8] sm:$0xff]  ;;  %v7439_v13 = vpop.f32.mrf.mxu1 }
 0x53e   :  { %5888 = vmatpush.msra.mxu3 %v5414_v30  ;;  %5829 = vmatpush.msra.mxu0 %v5022_v5  ;;  %v5390_v21 = vld [vmem:[#allocation10 + $0xd20] sm:$0xff]  ;;  %v5087_v49 = vld [vmem:[#allocation10 + $0x3a8] sm:$0xff] }
 0x53f   :  { %5849 = vmatpush.msra.mxu1 %v5150_v17  ;;  %5869 = vmatpush.msra.mxu2 %v5278_v15  ;;  %v4998_v36 = vld [vmem:[#allocation10 + $0xe0] sm:$0xff]  ;;  %v5215_v30 = vld [vmem:[#allocation10 + $0x7a8] sm:$0xff] }
 0x540   :  { %5889 = vmatpush.msra.mxu3 %v5406_v24  ;;  %5830 = vmatpush.msra.mxu0 %v5014_v39  ;;  %v5126_v35 = vld [vmem:[#allocation10 + $0x4e0] sm:$0xff]  ;;  %v5343_v5 = vld [vmem:[#allocation10 + $0xba8] sm:$0xff] }
 0x541   :  { %5850 = vmatpush.msra.mxu1 %v5142_v57  ;;  %5870 = vmatpush.msra.mxu2 %v5270_v29  ;;  %v5254_v34 = vld [vmem:[#allocation10 + $0x8e0] sm:$0xff]  ;;  %v5471_v17 = vld [vmem:[#allocation10 + $0xfa8] sm:$0xff] }
 0x542   :  { %5890 = vmatpush.msra.mxu3 %v5398_v59  ;;  %5831 = vmatpush.msra.mxu0 %v5006_v22  ;;  %v5382_v7 = vld [vmem:[#allocation10 + $0xce0] sm:$0xff]  ;;  %v5079_v15 = vld [vmem:[#allocation10 + $0x368] sm:$0xff]  ;;  %v7443_v22 = vpop.f32.mrf.mxu2 }
 0x543   :  { %5851 = vmatpush.msra.mxu1 %v5134_v25  ;;  %5871 = vmatpush.msra.mxu2 %v5262_v47  ;;  %v4990_v62 = vld [vmem:[#allocation10 + $0xa0] sm:$0xff]  ;;  %v5207_v24 = vld [vmem:[#allocation10 + $0x768] sm:$0xff] }
 0x544   :  { %5891 = vmatpush.msra.mxu3 %v5390_v21  ;;  %v5118_v0 = vld [vmem:[#allocation10 + $0x4a0] sm:$0xff]  ;;  %5832 = vmatpush.msra.mxu0 %v4998_v36  ;;  %v5335_v39 = vld [vmem:[#allocation10 + $0xb68] sm:$0xff]  ;;  %v7445_v21 = vpop.f32.mrf.mxu0 }
 0x545   :  { %5852 = vmatpush.msra.mxu1 %v5126_v35  ;;  %v5246_v1 = vld [vmem:[#allocation10 + $0x8a0] sm:$0xff]  ;;  %5872 = vmatpush.msra.mxu2 %v5254_v34  ;;  %v5463_v57 = vld [vmem:[#allocation10 + $0xf68] sm:$0xff]  ;;  %v7447_v34 = vpop.f32.mrf.mxu3 }
 0x546   :  { %v5374_v55 = vld [vmem:[#allocation10 + $0xca0] sm:$0xff]  ;;  %5892 = vmatpush.msra.mxu3 %v5382_v7  ;;  %5833 = vmatpush.msra.mxu0 %v4990_v62  ;;  %v5071_v29 = vld [vmem:[#allocation10 + $0x328] sm:$0xff] }
 0x547   :  { %v4982_v45 = vld [vmem:[#allocation10 + $0x60] sm:$0xff]  ;;  %5853 = vmatpush.msra.mxu1 %v5118_v0  ;;  %5873 = vmatpush.msra.mxu2 %v5246_v1  ;;  %v5199_v59 = vld [vmem:[#allocation10 + $0x728] sm:$0xff]  ;;  %v7449_v0 = vpop.f32.mrf.mxu1 }
 0x548   :  { %v5110_v43 = vld [vmem:[#allocation10 + $0x460] sm:$0xff]  ;;  %5893 = vmatpush.msra.mxu3 %v5374_v55  ;;  %5834 = vmatpush.msra.mxu0 %v4982_v45  ;;  %v5327_v25 = vld [vmem:[#allocation10 + $0xb28] sm:$0xff] }
 0x549   :  { %v5238_v11 = vld [vmem:[#allocation10 + $0x860] sm:$0xff]  ;;  %5854 = vmatpush.msra.mxu1 %v5110_v43  ;;  %v5455_v47 = vld [vmem:[#allocation10 + $0xf28] sm:$0xff] }
 0x54a   :  { %v5366_v42 = vld [vmem:[#allocation10 + $0xc60] sm:$0xff]  ;;  %5874 = vmatpush.msra.mxu2 %v5238_v11  ;;  %v5063_v36 = vld [vmem:[#allocation10 + $0x2e8] sm:$0xff] }
 0x54b   :  { %v4974_v33 = vld [vmem:[#allocation10 + $0x20] sm:$0xff]  ;;  %5894 = vmatpush.msra.mxu3 %v5366_v42  ;;  %v5191_v35 = vld [vmem:[#allocation10 + $0x6e8] sm:$0xff] }
 0x54c   :  { %v5102_v63 = vld [vmem:[#allocation10 + $0x420] sm:$0xff]  ;;  %5835 = vmatpush.msra.mxu0 %v4974_v33  ;;  %v5319_v7 = vld [vmem:[#allocation10 + $0xae8] sm:$0xff] }
 0x54d   :  { %v5230_v53 = vld [vmem:[#allocation10 + $0x820] sm:$0xff]  ;;  %5855 = vmatpush.msra.mxu1 %v5102_v63  ;;  %5836 = vmatmul.f32.vlgmr.msra.gmra.mxu0 %v7363_v8  ;;  %v5447_v62 = vld [vmem:[#allocation10 + $0xee8] sm:$0xff] }
 0x54e   :  { %v5358_v20 = vld [vmem:[#allocation10 + $0xc20] sm:$0xff]  ;;  %5875 = vmatpush.msra.mxu2 %v5230_v53  ;;  %5856 = vmatmul.f32.vlgmr.msra.gmra.mxu1 %v7365_v52  ;;  %v5055_v1 = vld [vmem:[#allocation10 + $0x2a8] sm:$0xff] }
 0x54f   :  { %5895 = vmatpush.msra.mxu3 %v5358_v20  ;;  %5876 = vmatmul.f32.vlgmr.msra.gmra.mxu2 %v7367_v37  ;;  %v5183_v55 = vld [vmem:[#allocation10 + $0x6a8] sm:$0xff] }
 0x550   :  { %5896 = vmatmul.f32.vlgmr.msra.gmra.mxu3 %v7369_v40  ;;  %5900 = vmatpush.msrb.mxu0 %v5095_v46  ;;  %v5311_v45 = vld [vmem:[#allocation10 + $0xaa8] sm:$0xff]  ;;  %v7451_v46 = vpop.f32.mrf.mxu2 }
 0x551   :  { %5920 = vmatpush.msrb.mxu1 %v5223_v56  ;;  %5940 = vmatpush.msrb.mxu2 %v5351_v54  ;;  %v5439_v43 = vld [vmem:[#allocation10 + $0xea8] sm:$0xff] }
 0x552   :  { %5960 = vmatpush.msrb.mxu3 %v5479_v31  ;;  %5901 = vmatpush.msrb.mxu0 %v5087_v49  ;;  %v5047_v11 = vld [vmem:[#allocation10 + $0x268] sm:$0xff]  ;;  %v7453_v31 = vpop.f32.mrf.mxu0 }
 0x553   :  { %5921 = vmatpush.msrb.mxu1 %v5215_v30  ;;  %5941 = vmatpush.msrb.mxu2 %v5343_v5  ;;  %v5175_v42 = vld [vmem:[#allocation10 + $0x668] sm:$0xff]  ;;  %v7455_v5 = vpop.f32.mrf.mxu3 }
 0x554   :  { %5961 = vmatpush.msrb.mxu3 %v5471_v17  ;;  %5902 = vmatpush.msrb.mxu0 %v5079_v15  ;;  %v5303_v33 = vld [vmem:[#allocation10 + $0xa68] sm:$0xff] }
 0x555   :  { %5922 = vmatpush.msrb.mxu1 %v5207_v24  ;;  %5942 = vmatpush.msrb.mxu2 %v5335_v39  ;;  %v5431_v63 = vld [vmem:[#allocation10 + $0xe68] sm:$0xff]  ;;  %v7457_v24 = vpop.f32.mrf.mxu1 }
 0x556   :  { %5962 = vmatpush.msrb.mxu3 %v5463_v57  ;;  %5903 = vmatpush.msrb.mxu0 %v5071_v29  ;;  %v5039_v53 = vld [vmem:[#allocation10 + $0x228] sm:$0xff] }
 0x557   :  { %5923 = vmatpush.msrb.mxu1 %v5199_v59  ;;  %5943 = vmatpush.msrb.mxu2 %v5327_v25  ;;  %v5167_v20 = vld [vmem:[#allocation10 + $0x628] sm:$0xff]  ;;  %v7459_v25 = vld [vmem:[#allocation11] sm:$0xff] }
 0x558   :  { %5963 = vmatpush.msrb.mxu3 %v5455_v47  ;;  %5904 = vmatpush.msrb.mxu0 %v5063_v36  ;;  %v5295_v56 = vld [vmem:[#allocation10 + $0xa28] sm:$0xff] }
 0x559   :  { %5924 = vmatpush.msrb.mxu1 %v5191_v35  ;;  %5944 = vmatpush.msrb.mxu2 %v5319_v7  ;;  %v5423_v54 = vld [vmem:[#allocation10 + $0xe28] sm:$0xff] }
 0x55a   :  { %5964 = vmatpush.msrb.mxu3 %v5447_v62  ;;  %5905 = vmatpush.msrb.mxu0 %v5055_v1  ;;  %v5031_v49 = vld [vmem:[#allocation10 + $0x1e8] sm:$0xff]  ;;  %v5485_v62 = vperm.slane %v7459_v25, 1 }
 0x55b   :  { %5925 = vmatpush.msrb.mxu1 %v5183_v55  ;;  %5945 = vmatpush.msrb.mxu2 %v5311_v45  ;;  %v5159_v30 = vld [vmem:[#allocation10 + $0x5e8] sm:$0xff]  ;;  %v7462_v45 = vpop.f32.mrf.mxu2 }
 0x55c   :  { %5965 = vmatpush.msrb.mxu3 %v5439_v43  ;;  %5906 = vmatpush.msrb.mxu0 %v5047_v11  ;;  %v5287_v17 = vld [vmem:[#allocation10 + $0x9e8] sm:$0xff] }
 0x55d   :  { %5926 = vmatpush.msrb.mxu1 %v5175_v42  ;;  %5946 = vmatpush.msrb.mxu2 %v5303_v33  ;;  %v5415_v15 = vld [vmem:[#allocation10 + $0xde8] sm:$0xff] }
 0x55e   :  { %5966 = vmatpush.msrb.mxu3 %v5431_v63  ;;  %5907 = vmatpush.msrb.mxu0 %v5039_v53  ;;  %v5023_v39 = vld [vmem:[#allocation10 + $0x1a8] sm:$0xff]  ;;  %v7464_v53 = vpop.f32.mrf.mxu3 }
 0x55f   :  { %5927 = vmatpush.msrb.mxu1 %v5167_v20  ;;  %5947 = vmatpush.msrb.mxu2 %v5295_v56  ;;  %v5151_v57 = vld [vmem:[#allocation10 + $0x5a8] sm:$0xff] }
 0x560   :  { %5967 = vmatpush.msrb.mxu3 %v5423_v54  ;;  %5908 = vmatpush.msrb.mxu0 %v5031_v49  ;;  %v5279_v29 = vld [vmem:[#allocation10 + $0x9a8] sm:$0xff] }
 0x561   :  { %5928 = vmatpush.msrb.mxu1 %v5159_v30  ;;  %v5407_v59 = vld [vmem:[#allocation10 + $0xda8] sm:$0xff]  ;;  %5948 = vmatpush.msrb.mxu2 %v5287_v17 }
 0x562   :  { %5968 = vmatpush.msrb.mxu3 %v5415_v15  ;;  %v5015_v47 = vld [vmem:[#allocation10 + $0x168] sm:$0xff]  ;;  %5909 = vmatpush.msrb.mxu0 %v5023_v39  ;;  %v5597_v63 = vpop.f32.mrf.mxu0 }
 0x563   :  { %v5143_v36 = vld [vmem:[#allocation10 + $0x568] sm:$0xff]  ;;  %5929 = vmatpush.msrb.mxu1 %v5151_v57  ;;  %5949 = vmatpush.msrb.mxu2 %v5279_v29  ;;  %v5598_v54 = vadd.f32 %v5597_v63, %v5485_v62  ;;  %v5617_v17 = vpop.f32.mrf.mxu1 }
 0x564   :  { %v5271_v35 = vld [vmem:[#allocation10 + $0x968] sm:$0xff]  ;;  %5969 = vmatpush.msrb.mxu3 %v5407_v59  ;;  %5910 = vmatpush.msrb.mxu0 %v5015_v47 }
 0x565   :  { %v5399_v7 = vld [vmem:[#allocation10 + $0xd68] sm:$0xff]  ;;  %5930 = vmatpush.msrb.mxu1 %v5143_v36  ;;  %5950 = vmatpush.msrb.mxu2 %v5271_v35  ;;  %v5618_v57 = vadd.f32 %v5617_v17, %v5598_v54  ;;  %v5088_v54 = vld [vmem:[#allocation10 + $0x3b0] sm:$0xff] }
 0x566   :  { %v5007_v1 = vld [vmem:[#allocation10 + $0x128] sm:$0xff]  ;;  %5970 = vmatpush.msrb.mxu3 %v5399_v7  ;;  %v5472_v17 = vld [vmem:[#allocation10 + $0xfb0] sm:$0xff] }
 0x567   :  { %v5135_v55 = vld [vmem:[#allocation10 + $0x528] sm:$0xff]  ;;  %5911 = vmatpush.msrb.mxu0 %v5007_v1 }
 0x568   :  { %v5263_v43 = vld [vmem:[#allocation10 + $0x928] sm:$0xff]  ;;  %5931 = vmatpush.msrb.mxu1 %v5135_v55 }
 0x569   :  { %v5391_v11 = vld [vmem:[#allocation10 + $0xd28] sm:$0xff]  ;;  %5951 = vmatpush.msrb.mxu2 %v5263_v43 }
 0x56a   :  { %v4999_v42 = vld [vmem:[#allocation10 + $0xe8] sm:$0xff]  ;;  %5971 = vmatpush.msrb.mxu3 %v5391_v11  ;;  %v5637_v55 = vpop.f32.mrf.mxu2 }
 0x56b   :  { %v5127_v33 = vld [vmem:[#allocation10 + $0x4e8] sm:$0xff]  ;;  %5912 = vmatpush.msrb.mxu0 %v4999_v42  ;;  %v5638_v43 = vadd.f32 %v5637_v55, %v5618_v57  ;;  %v5657_v11 = vpop.f32.mrf.mxu3  ;;  %v5096_v42 = vld [vmem:[#allocation10 + $0x3f0] sm:$0xff] }
 0x56c   :  { %v5255_v20 = vld [vmem:[#allocation10 + $0x8e8] sm:$0xff]  ;;  %5932 = vmatpush.msrb.mxu1 %v5127_v33  ;;  %v5224_v33 = vld [vmem:[#allocation10 + $0x7f0] sm:$0xff] }
 0x56d   :  { %v5383_v56 = vld [vmem:[#allocation10 + $0xce8] sm:$0xff]  ;;  %5952 = vmatpush.msrb.mxu2 %v5255_v20  ;;  %v7466_v63 = vadd.f32 %v5657_v11, %v5638_v43  ;;  %v5352_v20 = vld [vmem:[#allocation10 + $0xbf0] sm:$0xff] }
 0x56e   :  { %v4991_v49 = vld [vmem:[#allocation10 + $0xa8] sm:$0xff]  ;;  %5972 = vmatpush.msrb.mxu3 %v5383_v56  ;;  %v5480_v56 = vld [vmem:[#allocation10 + $0xff0] sm:$0xff] }
 0x56f   :  { %v5119_v30 = vld [vmem:[#allocation10 + $0x4a8] sm:$0xff]  ;;  %5913 = vmatpush.msrb.mxu0 %v4991_v49  ;;  %v5216_v49 = vld [vmem:[#allocation10 + $0x7b0] sm:$0xff] }
 0x570   :  { %v5247_v15 = vld [vmem:[#allocation10 + $0x8a8] sm:$0xff]  ;;  %5933 = vmatpush.msrb.mxu1 %v5119_v30  ;;  %v5344_v30 = vld [vmem:[#allocation10 + $0xbb0] sm:$0xff] }
 0x571   :  { %v5375_v39 = vld [vmem:[#allocation10 + $0xca8] sm:$0xff]  ;;  %5953 = vmatpush.msrb.mxu2 %v5247_v15  ;;  %v5080_v15 = vld [vmem:[#allocation10 + $0x370] sm:$0xff] }
 0x572   :  { %v4983_v29 = vld [vmem:[#allocation10 + $0x68] sm:$0xff]  ;;  %5973 = vmatpush.msrb.mxu3 %v5375_v39  ;;  %v5208_v39 = vld [vmem:[#allocation10 + $0x770] sm:$0xff] }
 0x573   :  { %v5111_v59 = vld [vmem:[#allocation10 + $0x468] sm:$0xff]  ;;  %5914 = vmatpush.msrb.mxu0 %v4983_v29  ;;  %v5336_v57 = vld [vmem:[#allocation10 + $0xb70] sm:$0xff] }
 0x574   :  { %v5239_v47 = vld [vmem:[#allocation10 + $0x868] sm:$0xff]  ;;  %5934 = vmatpush.msrb.mxu1 %v5111_v59  ;;  %v5464_v29 = vld [vmem:[#allocation10 + $0xf70] sm:$0xff] }
 0x575   :  { %v5367_v36 = vld [vmem:[#allocation10 + $0xc68] sm:$0xff]  ;;  %5954 = vmatpush.msrb.mxu2 %v5239_v47  ;;  %v5072_v59 = vld [vmem:[#allocation10 + $0x330] sm:$0xff] }
 0x576   :  { %v4975_v35 = vld [vmem:[#allocation10 + $0x28] sm:$0xff]  ;;  %5974 = vmatpush.msrb.mxu3 %v5367_v36  ;;  %v5200_v47 = vld [vmem:[#allocation10 + $0x730] sm:$0xff] }
 0x577   :  { %v5103_v7 = vld [vmem:[#allocation10 + $0x428] sm:$0xff]  ;;  %5915 = vmatpush.msrb.mxu0 %v4975_v35  ;;  %v5328_v36 = vld [vmem:[#allocation10 + $0xb30] sm:$0xff] }
 0x578   :  { %v5231_v62 = vld [vmem:[#allocation10 + $0x828] sm:$0xff]  ;;  %5935 = vmatpush.msrb.mxu1 %v5103_v7  ;;  %5916 = vmatmul.f32.vlgmr.msrb.gmra.mxu0 %v7363_v8  ;;  %v5456_v35 = vld [vmem:[#allocation10 + $0xf30] sm:$0xff] }
 0x579   :  { %v5359_v1 = vld [vmem:[#allocation10 + $0xc28] sm:$0xff]  ;;  %5955 = vmatpush.msrb.mxu2 %v5231_v62  ;;  %5936 = vmatmul.f32.vlgmr.msrb.gmra.mxu1 %v7365_v52  ;;  %v5064_v7 = vld [vmem:[#allocation10 + $0x2f0] sm:$0xff] }
 0x57a   :  { %5975 = vmatpush.msrb.mxu3 %v5359_v1  ;;  %5956 = vmatmul.f32.vlgmr.msrb.gmra.mxu2 %v7367_v37  ;;  %v5192_v62 = vld [vmem:[#allocation10 + $0x6f0] sm:$0xff] }
 0x57b   :  { %5976 = vmatmul.f32.vlgmr.msrb.gmra.mxu3 %v7369_v40  ;;  %5980 = vmatpush.msra.mxu0 %v5096_v42  ;;  %v5320_v1 = vld [vmem:[#allocation10 + $0xaf0] sm:$0xff] }
 0x57c   :  { %6000 = vmatpush.msra.mxu1 %v5224_v33  ;;  %6020 = vmatpush.msra.mxu2 %v5352_v20  ;;  %v5448_v55 = vld [vmem:[#allocation10 + $0xef0] sm:$0xff] }
 0x57d   :  { %6040 = vmatpush.msra.mxu3 %v5480_v56  ;;  %5981 = vmatpush.msra.mxu0 %v5088_v54  ;;  %v5056_v43 = vld [vmem:[#allocation10 + $0x2b0] sm:$0xff] }
 0x57e   :  { %6001 = vmatpush.msra.mxu1 %v5216_v49  ;;  %6021 = vmatpush.msra.mxu2 %v5344_v30  ;;  %v5184_v11 = vld [vmem:[#allocation10 + $0x6b0] sm:$0xff] }
 0x57f   :  { %6041 = vmatpush.msra.mxu3 %v5472_v17  ;;  %5982 = vmatpush.msra.mxu0 %v5080_v15  ;;  %v5312_v42 = vld [vmem:[#allocation10 + $0xab0] sm:$0xff] }
 0x580   :  { %6002 = vmatpush.msra.mxu1 %v5208_v39  ;;  %6022 = vmatpush.msra.mxu2 %v5336_v57  ;;  %v5440_v33 = vld [vmem:[#allocation10 + $0xeb0] sm:$0xff] }
 0x581   :  { %6042 = vmatpush.msra.mxu3 %v5464_v29  ;;  %5983 = vmatpush.msra.mxu0 %v5072_v59  ;;  %v5048_v20 = vld [vmem:[#allocation10 + $0x270] sm:$0xff] }
 0x582   :  { %6003 = vmatpush.msra.mxu1 %v5200_v47  ;;  %6023 = vmatpush.msra.mxu2 %v5328_v36  ;;  %v5176_v56 = vld [vmem:[#allocation10 + $0x670] sm:$0xff] }
 0x583   :  { %6043 = vmatpush.msra.mxu3 %v5456_v35  ;;  %5984 = vmatpush.msra.mxu0 %v5064_v7  ;;  %v5304_v54 = vld [vmem:[#allocation10 + $0xa70] sm:$0xff] }
 0x584   :  { %6004 = vmatpush.msra.mxu1 %v5192_v62  ;;  %6024 = vmatpush.msra.mxu2 %v5320_v1  ;;  %v5432_v49 = vld [vmem:[#allocation10 + $0xe70] sm:$0xff] }
 0x585   :  { %6044 = vmatpush.msra.mxu3 %v5448_v55  ;;  %5985 = vmatpush.msra.mxu0 %v5056_v43  ;;  %v5040_v30 = vld [vmem:[#allocation10 + $0x230] sm:$0xff] }
 0x586   :  { %6005 = vmatpush.msra.mxu1 %v5184_v11  ;;  %6025 = vmatpush.msra.mxu2 %v5312_v42  ;;  %v5168_v17 = vld [vmem:[#allocation10 + $0x630] sm:$0xff] }
 0x587   :  { %6045 = vmatpush.msra.mxu3 %v5440_v33  ;;  %5986 = vmatpush.msra.mxu0 %v5048_v20  ;;  %v5296_v15 = vld [vmem:[#allocation10 + $0xa30] sm:$0xff] }
 0x588   :  { %6006 = vmatpush.msra.mxu1 %v5176_v56  ;;  %v5424_v39 = vld [vmem:[#allocation10 + $0xe30] sm:$0xff]  ;;  %6026 = vmatpush.msra.mxu2 %v5304_v54 }
 0x589   :  { %6046 = vmatpush.msra.mxu3 %v5432_v49  ;;  %v5032_v57 = vld [vmem:[#allocation10 + $0x1f0] sm:$0xff]  ;;  %5987 = vmatpush.msra.mxu0 %v5040_v30 }
 0x58a   :  { %v5160_v29 = vld [vmem:[#allocation10 + $0x5f0] sm:$0xff]  ;;  %6007 = vmatpush.msra.mxu1 %v5168_v17  ;;  %6027 = vmatpush.msra.mxu2 %v5296_v15 }
 0x58b   :  { %v5288_v59 = vld [vmem:[#allocation10 + $0x9f0] sm:$0xff]  ;;  %6047 = vmatpush.msra.mxu3 %v5424_v39  ;;  %5988 = vmatpush.msra.mxu0 %v5032_v57 }
 0x58c   :  { %v5416_v47 = vld [vmem:[#allocation10 + $0xdf0] sm:$0xff]  ;;  %6008 = vmatpush.msra.mxu1 %v5160_v29  ;;  %6028 = vmatpush.msra.mxu2 %v5288_v59 }
 0x58d   :  { %v5024_v36 = vld [vmem:[#allocation10 + $0x1b0] sm:$0xff]  ;;  %6048 = vmatpush.msra.mxu3 %v5416_v47 }
 0x58e   :  { %v5152_v35 = vld [vmem:[#allocation10 + $0x5b0] sm:$0xff]  ;;  %5989 = vmatpush.msra.mxu0 %v5024_v36 }
 0x58f   :  { %v5280_v7 = vld [vmem:[#allocation10 + $0x9b0] sm:$0xff]  ;;  %6009 = vmatpush.msra.mxu1 %v5152_v35 }
 0x590   :  { %v5408_v62 = vld [vmem:[#allocation10 + $0xdb0] sm:$0xff]  ;;  %6029 = vmatpush.msra.mxu2 %v5280_v7 }
 0x591   :  { %v5016_v1 = vld [vmem:[#allocation10 + $0x170] sm:$0xff]  ;;  %6049 = vmatpush.msra.mxu3 %v5408_v62 }
 0x592   :  { %v5144_v55 = vld [vmem:[#allocation10 + $0x570] sm:$0xff]  ;;  %5990 = vmatpush.msra.mxu0 %v5016_v1 }
 0x593   :  { %v5272_v43 = vld [vmem:[#allocation10 + $0x970] sm:$0xff]  ;;  %6010 = vmatpush.msra.mxu1 %v5144_v55 }
 0x594   :  { %v5400_v11 = vld [vmem:[#allocation10 + $0xd70] sm:$0xff]  ;;  %6030 = vmatpush.msra.mxu2 %v5272_v43  ;;  %v5097_v43 = vld [vmem:[#allocation10 + $0x3f8] sm:$0xff] }
 0x595   :  { %v5008_v42 = vld [vmem:[#allocation10 + $0x130] sm:$0xff]  ;;  %6050 = vmatpush.msra.mxu3 %v5400_v11  ;;  %v5225_v11 = vld [vmem:[#allocation10 + $0x7f8] sm:$0xff] }
 0x596   :  { %v5136_v33 = vld [vmem:[#allocation10 + $0x530] sm:$0xff]  ;;  %5991 = vmatpush.msra.mxu0 %v5008_v42  ;;  %v5353_v42 = vld [vmem:[#allocation10 + $0xbf8] sm:$0xff] }
 0x597   :  { %v5264_v20 = vld [vmem:[#allocation10 + $0x930] sm:$0xff]  ;;  %6011 = vmatpush.msra.mxu1 %v5136_v33  ;;  %v5481_v33 = vld [vmem:[#allocation10 + $0xff8] sm:$0xff] }
 0x598   :  { %v5392_v56 = vld [vmem:[#allocation10 + $0xd30] sm:$0xff]  ;;  %6031 = vmatpush.msra.mxu2 %v5264_v20  ;;  %v5089_v20 = vld [vmem:[#allocation10 + $0x3b8] sm:$0xff] }
 0x599   :  { %v5000_v54 = vld [vmem:[#allocation10 + $0xf0] sm:$0xff]  ;;  %6051 = vmatpush.msra.mxu3 %v5392_v56  ;;  %v5217_v56 = vld [vmem:[#allocation10 + $0x7b8] sm:$0xff] }
 0x59a   :  { %v5128_v49 = vld [vmem:[#allocation10 + $0x4f0] sm:$0xff]  ;;  %5992 = vmatpush.msra.mxu0 %v5000_v54  ;;  %v5345_v54 = vld [vmem:[#allocation10 + $0xbb8] sm:$0xff] }
 0x59b   :  { %v5256_v30 = vld [vmem:[#allocation10 + $0x8f0] sm:$0xff]  ;;  %6012 = vmatpush.msra.mxu1 %v5128_v49  ;;  %v5473_v49 = vld [vmem:[#allocation10 + $0xfb8] sm:$0xff] }
 0x59c   :  { %v5384_v17 = vld [vmem:[#allocation10 + $0xcf0] sm:$0xff]  ;;  %6032 = vmatpush.msra.mxu2 %v5256_v30  ;;  %v5081_v30 = vld [vmem:[#allocation10 + $0x378] sm:$0xff] }
 0x59d   :  { %v4992_v15 = vld [vmem:[#allocation10 + $0xb0] sm:$0xff]  ;;  %6052 = vmatpush.msra.mxu3 %v5384_v17  ;;  %v5209_v17 = vld [vmem:[#allocation10 + $0x778] sm:$0xff] }
 0x59e   :  { %v5120_v39 = vld [vmem:[#allocation10 + $0x4b0] sm:$0xff]  ;;  %5993 = vmatpush.msra.mxu0 %v4992_v15  ;;  %v5337_v15 = vld [vmem:[#allocation10 + $0xb78] sm:$0xff] }
 0x59f   :  { %v5248_v57 = vld [vmem:[#allocation10 + $0x8b0] sm:$0xff]  ;;  %6013 = vmatpush.msra.mxu1 %v5120_v39  ;;  %v5465_v39 = vld [vmem:[#allocation10 + $0xf78] sm:$0xff] }
 0x5a0   :  { %v5376_v29 = vld [vmem:[#allocation10 + $0xcb0] sm:$0xff]  ;;  %6033 = vmatpush.msra.mxu2 %v5248_v57  ;;  %v5073_v57 = vld [vmem:[#allocation10 + $0x338] sm:$0xff] }
 0x5a1   :  { %v4984_v59 = vld [vmem:[#allocation10 + $0x70] sm:$0xff]  ;;  %6053 = vmatpush.msra.mxu3 %v5376_v29  ;;  %v5201_v29 = vld [vmem:[#allocation10 + $0x738] sm:$0xff] }
 0x5a2   :  { %v5112_v47 = vld [vmem:[#allocation10 + $0x470] sm:$0xff]  ;;  %5994 = vmatpush.msra.mxu0 %v4984_v59  ;;  %v5329_v59 = vld [vmem:[#allocation10 + $0xb38] sm:$0xff] }
 0x5a3   :  { %v5240_v36 = vld [vmem:[#allocation10 + $0x870] sm:$0xff]  ;;  %6014 = vmatpush.msra.mxu1 %v5112_v47  ;;  %v5457_v47 = vld [vmem:[#allocation10 + $0xf38] sm:$0xff] }
 0x5a4   :  { %v5368_v35 = vld [vmem:[#allocation10 + $0xc70] sm:$0xff]  ;;  %6034 = vmatpush.msra.mxu2 %v5240_v36  ;;  %v5065_v36 = vld [vmem:[#allocation10 + $0x2f8] sm:$0xff] }
 0x5a5   :  { %v4976_v7 = vld [vmem:[#allocation10 + $0x30] sm:$0xff]  ;;  %6054 = vmatpush.msra.mxu3 %v5368_v35  ;;  %v5193_v35 = vld [vmem:[#allocation10 + $0x6f8] sm:$0xff] }
 0x5a6   :  { %v5104_v62 = vld [vmem:[#allocation10 + $0x430] sm:$0xff]  ;;  %5995 = vmatpush.msra.mxu0 %v4976_v7  ;;  %v5321_v7 = vld [vmem:[#allocation10 + $0xaf8] sm:$0xff] }
 0x5a7   :  { %v5232_v1 = vld [vmem:[#allocation10 + $0x830] sm:$0xff]  ;;  %6015 = vmatpush.msra.mxu1 %v5104_v62  ;;  %5996 = vmatmul.f32.vlgmr.msra.gmra.mxu0 %v7363_v8  ;;  %v5449_v62 = vld [vmem:[#allocation10 + $0xef8] sm:$0xff] }
 0x5a8   :  { %v5360_v55 = vld [vmem:[#allocation10 + $0xc30] sm:$0xff]  ;;  %6035 = vmatpush.msra.mxu2 %v5232_v1  ;;  %6016 = vmatmul.f32.vlgmr.msra.gmra.mxu1 %v7365_v52  ;;  %v5057_v1 = vld [vmem:[#allocation10 + $0x2b8] sm:$0xff] }
 0x5a9   :  { %6055 = vmatpush.msra.mxu3 %v5360_v55  ;;  %6036 = vmatmul.f32.vlgmr.msra.gmra.mxu2 %v7367_v37  ;;  %v5185_v55 = vld [vmem:[#allocation10 + $0x6b8] sm:$0xff] }
 0x5aa   :  { %6056 = vmatmul.f32.vlgmr.msra.gmra.mxu3 %v7369_v40  ;;  %6060 = vmatpush.msrb.mxu0 %v5097_v43  ;;  %v5313_v43 = vld [vmem:[#allocation10 + $0xab8] sm:$0xff] }
 0x5ab   :  { %6080 = vmatpush.msrb.mxu1 %v5225_v11  ;;  %6100 = vmatpush.msrb.mxu2 %v5353_v42  ;;  %v5441_v11 = vld [vmem:[#allocation10 + $0xeb8] sm:$0xff] }
 0x5ac   :  { %6120 = vmatpush.msrb.mxu3 %v5481_v33  ;;  %6061 = vmatpush.msrb.mxu0 %v5089_v20  ;;  %v5049_v42 = vld [vmem:[#allocation10 + $0x278] sm:$0xff] }
 0x5ad   :  { %6081 = vmatpush.msrb.mxu1 %v5217_v56  ;;  %6101 = vmatpush.msrb.mxu2 %v5345_v54  ;;  %v5177_v33 = vld [vmem:[#allocation10 + $0x678] sm:$0xff] }
 0x5ae   :  { %6121 = vmatpush.msrb.mxu3 %v5473_v49  ;;  %6062 = vmatpush.msrb.mxu0 %v5081_v30  ;;  %v5305_v20 = vld [vmem:[#allocation10 + $0xa78] sm:$0xff] }
 0x5af   :  { %6082 = vmatpush.msrb.mxu1 %v5209_v17  ;;  %6102 = vmatpush.msrb.mxu2 %v5337_v15  ;;  %v5433_v56 = vld [vmem:[#allocation10 + $0xe78] sm:$0xff] }
 0x5b0   :  { %6122 = vmatpush.msrb.mxu3 %v5465_v39  ;;  %6063 = vmatpush.msrb.mxu0 %v5073_v57  ;;  %v5041_v54 = vld [vmem:[#allocation10 + $0x238] sm:$0xff] }
 0x5b1   :  { %6083 = vmatpush.msrb.mxu1 %v5201_v29  ;;  %6103 = vmatpush.msrb.mxu2 %v5329_v59  ;;  %v5169_v49 = vld [vmem:[#allocation10 + $0x638] sm:$0xff] }
 0x5b2   :  { %6123 = vmatpush.msrb.mxu3 %v5457_v47  ;;  %6064 = vmatpush.msrb.mxu0 %v5065_v36  ;;  %v5297_v30 = vld [vmem:[#allocation10 + $0xa38] sm:$0xff] }
 0x5b3   :  { %6084 = vmatpush.msrb.mxu1 %v5193_v35  ;;  %6104 = vmatpush.msrb.mxu2 %v5321_v7  ;;  %v5425_v17 = vld [vmem:[#allocation10 + $0xe38] sm:$0xff] }
 0x5b4   :  { %6124 = vmatpush.msrb.mxu3 %v5449_v62  ;;  %6065 = vmatpush.msrb.mxu0 %v5057_v1  ;;  %v5033_v15 = vld [vmem:[#allocation10 + $0x1f8] sm:$0xff] }
 0x5b5   :  { %6085 = vmatpush.msrb.mxu1 %v5185_v55  ;;  %6105 = vmatpush.msrb.mxu2 %v5313_v43  ;;  %v5161_v39 = vld [vmem:[#allocation10 + $0x5f8] sm:$0xff] }
 0x5b6   :  { %6125 = vmatpush.msrb.mxu3 %v5441_v11  ;;  %6066 = vmatpush.msrb.mxu0 %v5049_v42  ;;  %v5289_v57 = vld [vmem:[#allocation10 + $0x9f8] sm:$0xff] }
 0x5b7   :  { %6086 = vmatpush.msrb.mxu1 %v5177_v33  ;;  %6106 = vmatpush.msrb.mxu2 %v5305_v20  ;;  %v5417_v29 = vld [vmem:[#allocation10 + $0xdf8] sm:$0xff] }
 0x5b8   :  { %6126 = vmatpush.msrb.mxu3 %v5433_v56  ;;  %6067 = vmatpush.msrb.mxu0 %v5041_v54  ;;  %v5025_v59 = vld [vmem:[#allocation10 + $0x1b8] sm:$0xff] }
 0x5b9   :  { %6087 = vmatpush.msrb.mxu1 %v5169_v49  ;;  %6107 = vmatpush.msrb.mxu2 %v5297_v30  ;;  %v5153_v47 = vld [vmem:[#allocation10 + $0x5b8] sm:$0xff] }
 0x5ba   :  { %6127 = vmatpush.msrb.mxu3 %v5425_v17  ;;  %6068 = vmatpush.msrb.mxu0 %v5033_v15  ;;  %v5281_v36 = vld [vmem:[#allocation10 + $0x9b8] sm:$0xff] }
 0x5bb   :  { %6088 = vmatpush.msrb.mxu1 %v5161_v39  ;;  %v5409_v35 = vld [vmem:[#allocation10 + $0xdb8] sm:$0xff]  ;;  %6108 = vmatpush.msrb.mxu2 %v5289_v57 }
 0x5bc   :  { %6128 = vmatpush.msrb.mxu3 %v5417_v29  ;;  %v5017_v7 = vld [vmem:[#allocation10 + $0x178] sm:$0xff]  ;;  %6069 = vmatpush.msrb.mxu0 %v5025_v59 }
 0x5bd   :  { %v5145_v62 = vld [vmem:[#allocation10 + $0x578] sm:$0xff]  ;;  %6089 = vmatpush.msrb.mxu1 %v5153_v47  ;;  %6109 = vmatpush.msrb.mxu2 %v5281_v36 }
 0x5be   :  { %v5273_v1 = vld [vmem:[#allocation10 + $0x978] sm:$0xff]  ;;  %6129 = vmatpush.msrb.mxu3 %v5409_v35  ;;  %6070 = vmatpush.msrb.mxu0 %v5017_v7 }
 0x5bf   :  { %v5401_v55 = vld [vmem:[#allocation10 + $0xd78] sm:$0xff]  ;;  %6090 = vmatpush.msrb.mxu1 %v5145_v62  ;;  %6110 = vmatpush.msrb.mxu2 %v5273_v1  ;;  %v6175_v1 = vld [vmem:[#allocation13 + $0x78] sm:$0xff] }
 0x5c0   :  { %v5009_v43 = vld [vmem:[#allocation10 + $0x138] sm:$0xff]  ;;  %6130 = vmatpush.msrb.mxu3 %v5401_v55  ;;  %v6191_v55 = vld [vmem:[#allocation13 + $0xf8] sm:$0xff] }
 0x5c1   :  { %v5137_v11 = vld [vmem:[#allocation10 + $0x538] sm:$0xff]  ;;  %6071 = vmatpush.msrb.mxu0 %v5009_v43 }
 0x5c2   :  { %v5265_v42 = vld [vmem:[#allocation10 + $0x938] sm:$0xff]  ;;  %6091 = vmatpush.msrb.mxu1 %v5137_v11 }
 0x5c3   :  { %v5393_v33 = vld [vmem:[#allocation10 + $0xd38] sm:$0xff]  ;;  %6111 = vmatpush.msrb.mxu2 %v5265_v42  ;;  %v6173_v42 = vld [vmem:[#allocation13 + $0x68] sm:$0xff] }
 0x5c4   :  { %v5001_v20 = vld [vmem:[#allocation10 + $0xf8] sm:$0xff]  ;;  %6131 = vmatpush.msrb.mxu3 %v5393_v33  ;;  %v6189_v33 = vld [vmem:[#allocation13 + $0xe8] sm:$0xff] }
 0x5c5   :  { %v5129_v56 = vld [vmem:[#allocation10 + $0x4f8] sm:$0xff]  ;;  %6072 = vmatpush.msrb.mxu0 %v5001_v20 }
 0x5c6   :  { %v5257_v54 = vld [vmem:[#allocation10 + $0x8f8] sm:$0xff]  ;;  %6092 = vmatpush.msrb.mxu1 %v5129_v56 }
 0x5c7   :  { %v5385_v49 = vld [vmem:[#allocation10 + $0xcf8] sm:$0xff]  ;;  %6112 = vmatpush.msrb.mxu2 %v5257_v54 }
 0x5c8   :  { %v4993_v30 = vld [vmem:[#allocation10 + $0xb8] sm:$0xff]  ;;  %6132 = vmatpush.msrb.mxu3 %v5385_v49  ;;  %v6172_v49 = vld [vmem:[#allocation13 + $0x60] sm:$0xff] }
 0x5c9   :  { %v5121_v17 = vld [vmem:[#allocation10 + $0x4b8] sm:$0xff]  ;;  %6073 = vmatpush.msrb.mxu0 %v4993_v30  ;;  %v6188_v30 = vld [vmem:[#allocation13 + $0xe0] sm:$0xff] }
 0x5ca   :  { %v5249_v15 = vld [vmem:[#allocation10 + $0x8b8] sm:$0xff]  ;;  %6093 = vmatpush.msrb.mxu1 %v5121_v17 }
 0x5cb   :  { %v5377_v39 = vld [vmem:[#allocation10 + $0xcb8] sm:$0xff]  ;;  %6113 = vmatpush.msrb.mxu2 %v5249_v15  ;;  %v6187_v15 = vld [vmem:[#allocation13 + $0xd8] sm:$0xff] }
 0x5cc   :  { %v4985_v57 = vld [vmem:[#allocation10 + $0x78] sm:$0xff]  ;;  %6133 = vmatpush.msrb.mxu3 %v5377_v39 }
 0x5cd   :  { %v5113_v29 = vld [vmem:[#allocation10 + $0x478] sm:$0xff]  ;;  %6074 = vmatpush.msrb.mxu0 %v4985_v57 }
 0x5ce   :  { %v5241_v59 = vld [vmem:[#allocation10 + $0x878] sm:$0xff]  ;;  %6094 = vmatpush.msrb.mxu1 %v5113_v29 }
 0x5cf   :  { %v5369_v47 = vld [vmem:[#allocation10 + $0xc78] sm:$0xff]  ;;  %6114 = vmatpush.msrb.mxu2 %v5241_v59 }
 0x5d0   :  { %v4977_v36 = vld [vmem:[#allocation10 + $0x38] sm:$0xff]  ;;  %6134 = vmatpush.msrb.mxu3 %v5369_v47 }
 0x5d1   :  { %v5105_v35 = vld [vmem:[#allocation10 + $0x438] sm:$0xff]  ;;  %6075 = vmatpush.msrb.mxu0 %v4977_v36 }
 0x5d2   :  { %v5233_v7 = vld [vmem:[#allocation10 + $0x838] sm:$0xff]  ;;  %6095 = vmatpush.msrb.mxu1 %v5105_v35  ;;  %6076 = vmatmul.f32.vlgmr.msrb.gmra.mxu0 %v7363_v8 }
 0x5d3   :  { %v5361_v62 = vld [vmem:[#allocation10 + $0xc38] sm:$0xff]  ;;  %6115 = vmatpush.msrb.mxu2 %v5233_v7  ;;  %6096 = vmatmul.f32.vlgmr.msrb.gmra.mxu1 %v7365_v52 }
 0x5d4   :  { %6135 = vmatpush.msrb.mxu3 %v5361_v62  ;;  %6116 = vmatmul.f32.vlgmr.msrb.gmra.mxu2 %v7367_v37  ;;  %v6174_v43 = vld [vmem:[#allocation13 + $0x70] sm:$0xff] }
 0x5d5   :  { %6136 = vmatmul.f32.vlgmr.msrb.gmra.mxu3 %v7369_v40  ;;  %v6190_v11 = vld [vmem:[#allocation13 + $0xf0] sm:$0xff]  ;;  %6228 = vmatpush.msra.mxu0 %v6175_v1  ;;  %v6171_v40 = vld [vmem:[#allocation13 + $0x58] sm:$0xff] }
 0x5d6   :  { %6248 = vmatpush.msra.mxu1 %v6191_v55  ;;  %v4304_v20 = vld [vmem:[#allocation8] sm:$0xff]  ;;  %v6169_v55 = vld [vmem:[#allocation13 + $0x48] sm:$0xff] }
 0x5d7   :  { %6229 = vmatpush.msra.mxu0 %v6174_v43  ;;  %v4312_v56 = vperm.slane %v4304_v20, 6  ;;  %v4313_v54 = vperm.slane %v4304_v20, 7  ;;  %v4308_v8 = vperm.slane %v4304_v20, 2  ;;  %v4309_v17 = vperm.slane %v4304_v20, 3  ;;  %v6170_v59 = vld [vmem:[#allocation13 + $0x50] sm:$0xff]  ;;  %v6185_v43 = vld [vmem:[#allocation13 + $0xc8] sm:$0xff] }
 0x5d8   :  { %6249 = vmatpush.msra.mxu1 %v6190_v11  ;;  %v4310_v52 = vperm.slane %v4304_v20, 4  ;;  %v4311_v37 = vperm.slane %v4304_v20, 5  ;;  %v4307_v39 = vperm.slane %v4304_v20, 1  ;;  %v6186_v47 = vld [vmem:[#allocation13 + $0xd0] sm:$0xff]  ;;  %v4306_v36 = vperm.slane %v4304_v20, 0 }
 0x5d9   :  { %6230 = vmatpush.msra.mxu0 %v6173_v42  ;;  %v4820_v57 = vadd.f32 %v7433_v26, %v4312_v56  ;;  %v4900_v29 = vadd.f32 %v7445_v21, %v4313_v54  ;;  %v4500_v35 = vadd.f32 %v7399_v12, %v4308_v8  ;;  %v4580_v7 = vadd.f32 %v7409_v19, %v4309_v17  ;;  %v6168_v42 = vld [vmem:[#allocation13 + $0x40] sm:$0xff]  ;;  %v6167_v56 = vld [vmem:[#allocation13 + $0x38] sm:$0xff]  ;;  %v6165_v8 = vld [vmem:[#allocation13 + $0x28] sm:$0xff] }
 0x5da   :  { %6250 = vmatpush.msra.mxu1 %v6189_v33  ;;  %v4660_v62 = vadd.f32 %v7417_v32, %v4310_v52  ;;  %v4740_v1 = vadd.f32 %v7425_v14, %v4311_v37  ;;  %v4420_v11 = vadd.f32 %v7389_v48, %v4307_v39  ;;  %v6184_v12 = vld [vmem:[#allocation13 + $0xc0] sm:$0xff]  ;;  %v4340_v19 = vadd.f32 %v7383_v50, %v4306_v36  ;;  %v6161_v36 = vld [vmem:[#allocation13 + $0x8] sm:$0xff] }
 0x5db   :  { %6231 = vmatpush.msra.mxu0 %v6172_v49  ;;  %v4840_v26 = vadd.f32 %v7439_v13, %v4820_v57  ;;  %v4920_v21 = vadd.f32 %v7449_v0, %v4900_v29  ;;  %v4520_v33 = vadd.f32 %v7405_v10, %v4500_v35  ;;  %v4600_v32 = vadd.f32 %v7413_v58, %v4580_v7  ;;  %v6183_v0 = vld [vmem:[#allocation13 + $0xb8] sm:$0xff]  ;;  %v6166_v49 = vld [vmem:[#allocation13 + $0x30] sm:$0xff]  ;;  %v6164_v52 = vld [vmem:[#allocation13 + $0x20] sm:$0xff] }
 0x5dc   :  { %6251 = vmatpush.msra.mxu1 %v6188_v30  ;;  %v4680_v14 = vadd.f32 %v7421_v51, %v4660_v62  ;;  %v4760_v48 = vadd.f32 %v7429_v6, %v4740_v1  ;;  %v4440_v54 = vadd.f32 %v7393_v9, %v4420_v11  ;;  %v6182_v6 = vld [vmem:[#allocation13 + $0xb0] sm:$0xff]  ;;  %v6160_v62 = vld [vmem:[#allocation13] sm:$0xff]  ;;  %v6207_v11 = vld [vmem:[#allocation13 + $0x178] sm:$0xff] }
 0x5dd   :  { %6232 = vmatpush.msra.mxu0 %v6171_v40  ;;  %v4860_v20 = vadd.f32 %v7443_v22, %v4840_v26  ;;  %v4940_v13 = vadd.f32 %v7451_v46, %v4920_v21  ;;  %v4540_v50 = vadd.f32 %v7407_v28, %v4520_v33  ;;  %v4620_v10 = vadd.f32 %v7415_v18, %v4600_v32  ;;  %v6181_v28 = vld [vmem:[#allocation13 + $0xa8] sm:$0xff]  ;;  %v6163_v40 = vld [vmem:[#allocation13 + $0x18] sm:$0xff]  ;;  %v6162_v57 = vld [vmem:[#allocation13 + $0x10] sm:$0xff]  ;;  %v5677_v32 = vpop.f32.mrf.mxu0 }
 0x5de   :  { %6252 = vmatpush.msra.mxu1 %v6187_v15  ;;  %v4700_v58 = vadd.f32 %v7423_v3, %v4680_v14  ;;  %v4780_v51 = vadd.f32 %v7431_v61, %v4760_v48  ;;  %v4360_v22 = vadd.f32 %v7385_v27, %v4340_v19  ;;  %v4460_v46 = vadd.f32 %v7395_v41, %v4440_v54  ;;  %v6180_v41 = vld [vmem:[#allocation13 + $0xa0] sm:$0xff]  ;;  %v6179_v15 = vld [vmem:[#allocation13 + $0x98] sm:$0xff]  ;;  %v6206_v26 = vld [vmem:[#allocation13 + $0x170] sm:$0xff]  ;;  %v5737_v54 = vpop.f32.mrf.mxu3 }
 0x5df   :  { %6233 = vmatpush.msra.mxu0 %v6170_v59  ;;  %v4880_v9 = vadd.f32 %v7447_v34, %v4860_v20  ;;  %v4960_v30 = vadd.f32 %v7455_v5, %v4940_v13  ;;  %v4560_v3 = vadd.f32 %v7411_v38, %v4540_v50  ;;  %v4640_v61 = vadd.f32 %v7419_v4, %v4620_v10  ;;  %v6176_v1 = vld [vmem:[#allocation13 + $0x80] sm:$0xff]  ;;  %v6205_v21 = vld [vmem:[#allocation13 + $0x168] sm:$0xff]  ;;  %v6202_v19 = vld [vmem:[#allocation13 + $0x150] sm:$0xff]  ;;  %v5697_v20 = vpop.f32.mrf.mxu1 }
 0x5e0   :  { %6253 = vmatpush.msra.mxu1 %v6186_v47  ;;  %v4380_v18 = vadd.f32 %v7387_v60, %v4360_v22  ;;  %v4720_v27 = vadd.f32 %v7427_v16, %v4700_v58  ;;  %v4800_v17 = vadd.f32 %v7435_v23, %v4780_v51  ;;  %v4480_v5 = vadd.f32 %v7403_v44, %v4460_v46  ;;  %v6178_v23 = vld [vmem:[#allocation13 + $0x90] sm:$0xff]  ;;  %v6177_v44 = vld [vmem:[#allocation13 + $0x88] sm:$0xff]  ;;  %v6200_v14 = vld [vmem:[#allocation13 + $0x140] sm:$0xff] }
 0x5e1   :  { %6234 = vmatpush.msra.mxu0 %v6169_v55  ;;  %v4968_v37 = vmax.f32 %v4880_v9, 0.0  ;;  %v4969_v60 = vmax.f32 %v4960_v30, 0.0  ;;  %v4964_v38 = vmax.f32 %v4560_v3, 0.0  ;;  %v4965_v4 = vmax.f32 %v4640_v61, 0.0  ;;  %6268 = vmatpush.msra.mxu2 %v6207_v11  ;;  %v6201_v33 = vld [vmem:[#allocation13 + $0x148] sm:$0xff]  ;;  %v6199_v48 = vld [vmem:[#allocation13 + $0x138] sm:$0xff] }
 0x5e2   :  { %6254 = vmatpush.msra.mxu1 %v6185_v43  ;;  %v4400_v34 = vadd.f32 %v7391_v2, %v4380_v18  ;;  %v4966_v39 = vmax.f32 %v4720_v27, 0.0  ;;  %v4967_v16 = vmax.f32 %v4800_v17, 0.0  ;;  %v4963_v59 = vmax.f32 %v4480_v5, 0.0  ;;  %v6198_v13 = vld [vmem:[#allocation13 + $0x130] sm:$0xff]  ;;  %v6197_v50 = vld [vmem:[#allocation13 + $0x128] sm:$0xff]  ;;  %v6196_v10 = vld [vmem:[#allocation13 + $0x120] sm:$0xff] }
 0x5e3   :  { %6235 = vmatpush.msra.mxu0 %v6168_v42  ;;  %6269 = vmatpush.msra.mxu2 %v6206_v26  ;;  %v6204_v42 = vld [vmem:[#allocation13 + $0x160] sm:$0xff]  ;;  %v6195_v51 = vld [vmem:[#allocation13 + $0x118] sm:$0xff]  ;;  %v6194_v22 = vld [vmem:[#allocation13 + $0x110] sm:$0xff]  ;;  %v5486_v17 = vperm.slane %v7459_v25, 2  ;;  %v5484_v5 = vperm.slane %v7459_v25, 0 }
 0x5e4   :  { %6255 = vmatpush.msra.mxu1 %v6184_v12  ;;  %v4962_v29 = vmax.f32 %v4400_v34, 0.0  ;;  %v6150_v47 = vmax.f32 %v4966_v39, %v4968_v37  ;;  %v6151_v2 = vmax.f32 %v4967_v16, %v4969_v60  ;;  %v6149_v7 = vmax.f32 %v4963_v59, %v4965_v4  ;;  %v6203_v12 = vld [vmem:[#allocation13 + $0x158] sm:$0xff]  ;;  %v6193_v46 = vld [vmem:[#allocation13 + $0x108] sm:$0xff]  ;;  %v6192_v30 = vld [vmem:[#allocation13 + $0x100] sm:$0xff] }
 0x5e5   :  { %6236 = vmatpush.msra.mxu0 %v6167_v56  ;;  %6270 = vmatpush.msra.mxu2 %v6205_v21  ;;  %v5717_v56 = vpop.f32.mrf.mxu2  ;;  %v6221_v18 = vld [vmem:[#allocation13 + $0x1e8] sm:$0xff]  ;;  %v6220_v61 = vld [vmem:[#allocation13 + $0x1e0] sm:$0xff]  ;;  %v5488_v37 = vperm.slane %v7459_v25, 4  ;;  %v6218_v60 = vld [vmem:[#allocation13 + $0x1d0] sm:$0xff]  ;;  %v5518_v4 = vadd.f32 %v7453_v31, %v5484_v5 }
 0x5e6   :  { %6256 = vmatpush.msra.mxu1 %v6183_v0  ;;  %v6148_v35 = vmax.f32 %v4962_v29, %v4964_v38  ;;  %v6153_v43 = vmax.f32 %v6149_v7, %v6151_v2  ;;  %v7512_v0 = vpop.f32.mrf.mxu0  ;;  %v7518_v9 = vpop.f32.mrf.mxu3  ;;  %v6454_v16 = vld [vmem:[#allocation11] sm:$0xff] }
 0x5e7   :  { %6237 = vmatpush.msra.mxu0 %v6166_v49  ;;  %6271 = vmatpush.msra.mxu2 %v6204_v42  ;;  %v7514_v58 = vpop.f32.mrf.mxu1  ;;  %v5538_v2 = vadd.f32 %v7457_v24, %v5518_v4  ;;  %v6215_v31 = vld [vmem:[#allocation13 + $0x1b8] sm:$0xff] }
 0x5e8   :  { %6257 = vmatpush.msra.mxu1 %v6182_v6  ;;  %v6152_v55 = vmax.f32 %v6148_v35, %v6150_v47  ;;  %v6216_v35 = vld [vmem:[#allocation13 + $0x1c0] sm:$0xff] }
 0x5e9   :  { %6238 = vmatpush.msra.mxu0 %v6165_v8  ;;  %6272 = vmatpush.msra.mxu2 %v6203_v12  ;;  %v6223_v8 = vld [vmem:[#allocation13 + $0x1f8] sm:$0xff]  ;;  %v5558_v7 = vadd.f32 %v7462_v45, %v5538_v2  ;;  %v6212_v45 = vld [vmem:[#allocation13 + $0x1a0] sm:$0xff]  ;;  %v6318_v2 = vld [vmem:[#allocation16 + $0x48] sm:$0xff] }
 0x5ea   :  { %6258 = vmatpush.msra.mxu1 %v6181_v28  ;;  %v6222_v28 = vld [vmem:[#allocation13 + $0x1f0] sm:$0xff]  ;;  %6288 = vmatpush.msra.mxu3 %v6223_v8  ;;  %v5491_v8 = vperm.slane %v6454_v16, 7 }
 0x5eb   :  { %6239 = vmatpush.msra.mxu0 %v6164_v52  ;;  %6273 = vmatpush.msra.mxu2 %v6202_v19  ;;  %v5578_v21 = vadd.f32 %v7464_v53, %v5558_v7  ;;  %v6213_v19 = vld [vmem:[#allocation13 + $0x1a8] sm:$0xff]  ;;  %v6312_v7 = vld [vmem:[#allocation16 + $0x18] sm:$0xff] }
 0x5ec   :  { %6259 = vmatpush.msra.mxu1 %v6180_v41  ;;  %6289 = vmatpush.msra.mxu3 %v6222_v28  ;;  %v6219_v41 = vld [vmem:[#allocation13 + $0x1d8] sm:$0xff]  ;;  %v6209_v53 = vld [vmem:[#allocation13 + $0x188] sm:$0xff] }
 0x5ed   :  { %6240 = vmatpush.msra.mxu0 %v6163_v40  ;;  %6274 = vmatpush.msra.mxu2 %v6201_v33  ;;  %v7516_v49 = vpop.f32.mrf.mxu2  ;;  %v5678_v40 = vadd.f32 %v5677_v32, %v5486_v17 }
 0x5ee   :  { %6260 = vmatpush.msra.mxu1 %v6179_v15  ;;  %v5837_v6 = vpop.f32.mrf.mxu0  ;;  %6290 = vmatpush.msra.mxu3 %v6221_v18  ;;  %v5897_v34 = vpop.f32.mrf.mxu3  ;;  %v6217_v15 = vld [vmem:[#allocation13 + $0x1c8] sm:$0xff] }
 0x5ef   :  { %6241 = vmatpush.msra.mxu0 %v6162_v57  ;;  %6275 = vmatpush.msra.mxu2 %v6200_v14  ;;  %v5857_v3 = vpop.f32.mrf.mxu1  ;;  %v5838_v39 = vadd.f32 %v5837_v6, %v5488_v37  ;;  %v5490_v57 = vperm.slane %v6454_v16, 6  ;;  %v5698_v29 = vadd.f32 %v5697_v20, %v5678_v40  ;;  %v6140_v14 = vmax.f32 %v5578_v21, 0.0 }
 0x5f0   :  { %6261 = vmatpush.msra.mxu1 %v6178_v23  ;;  %6291 = vmatpush.msra.mxu3 %v6220_v61  ;;  %v5487_v6 = vperm.slane %v6454_v16, 3 }
 0x5f1   :  { %6242 = vmatpush.msra.mxu0 %v6161_v36  ;;  %6276 = vmatpush.msra.mxu2 %v6199_v48  ;;  %v5718_v36 = vadd.f32 %v5717_v56, %v5698_v29  ;;  %v5858_v25 = vadd.f32 %v5857_v3, %v5838_v39  ;;  %v6322_v29 = vld [vmem:[#allocation16 + $0x68] sm:$0xff] }
 0x5f2   :  { %6262 = vmatpush.msra.mxu1 %v6177_v44  ;;  %6292 = vmatpush.msra.mxu3 %v6219_v41 }
 0x5f3   :  { %6243 = vmatpush.msra.mxu0 %v6160_v62  ;;  %6277 = vmatpush.msra.mxu2 %v6198_v13  ;;  %v6211_v13 = vld [vmem:[#allocation13 + $0x198] sm:$0xff] }
 0x5f4   :  { %6263 = vmatpush.msra.mxu1 %v6176_v1  ;;  %6244 = vmatmul.f32.vlgmr.msra.gmra.mxu0 %v6152_v55  ;;  %v6214_v55 = vld [vmem:[#allocation13 + $0x1b0] sm:$0xff] }
 0x5f5   :  { %6264 = vmatmul.f32.vlgmr.msra.gmra.mxu1 %v6153_v43  ;;  %6278 = vmatpush.msra.mxu2 %v6197_v50  ;;  %v5877_v27 = vpop.f32.mrf.mxu2  ;;  %v5738_v43 = vadd.f32 %v5737_v54, %v5718_v36  ;;  %v6210_v50 = vld [vmem:[#allocation13 + $0x190] sm:$0xff]  ;;  %v6316_v36 = vld [vmem:[#allocation16 + $0x38] sm:$0xff] }
 0x5f6   :  { %v7521_v52 = vpop.f32.mrf.mxu0  ;;  %6293 = vmatpush.msra.mxu3 %v6218_v60  ;;  %v5878_v62 = vadd.f32 %v5877_v27, %v5858_v25  ;;  %v6315_v25 = vld [vmem:[#allocation16 + $0x30] sm:$0xff] }
 0x5f7   :  { %6279 = vmatpush.msra.mxu2 %v6196_v10  ;;  %v5937_v38 = vpop.f32.mrf.mxu1  ;;  %v6142_v33 = vmax.f32 %v5738_v43, 0.0 }
 0x5f8   :  { %6294 = vmatpush.msra.mxu3 %v6217_v15  ;;  %v5898_v42 = vadd.f32 %v5897_v34, %v5878_v62  ;;  %v6311_v62 = vld [vmem:[#allocation16 + $0x10] sm:$0xff] }
 0x5f9   :  { %6280 = vmatpush.msra.mxu2 %v6195_v51  ;;  %v6154_v56 = vmax.f32 %v6140_v14, %v6142_v33  ;;  %v6208_v51 = vld [vmem:[#allocation13 + $0x180] sm:$0xff] }
 0x5fa   :  { %6295 = vmatpush.msra.mxu3 %v6216_v35  ;;  %v6144_v48 = vmax.f32 %v5898_v42, 0.0  ;;  %v6313_v35 = vld [vmem:[#allocation16 + $0x20] sm:$0xff] }
 0x5fb   :  { %6281 = vmatpush.msra.mxu2 %v6194_v22  ;;  %v5489_v22 = vperm.slane %v6454_v16, 5 }
 0x5fc   :  { %6296 = vmatpush.msra.mxu3 %v6215_v31  ;;  %v6309_v31 = vld [vmem:[#allocation16] sm:$0xff] }
 0x5fd   :  { %6282 = vmatpush.msra.mxu2 %v6193_v46  ;;  %v5957_v23 = vpop.f32.mrf.mxu2  ;;  %v5758_v46 = vadd.f32 %v7512_v0, %v5487_v6 }
 0x5fe   :  { %v5977_v47 = vpop.f32.mrf.mxu3  ;;  %6297 = vmatpush.msra.mxu3 %v6214_v55  ;;  %v6427_v55 = vld [vmem:[#allocation14] ss:$0 sm:$0xff] }
 0x5ff   :  { %6283 = vmatpush.msra.mxu2 %v6192_v30  ;;  %v5918_v30 = vadd.f32 %v7521_v52, %v5489_v22  ;;  %v5778_v28 = vadd.f32 %v7514_v58, %v5758_v46  ;;  %v6141_v52 = vmax.f32 %v7466_v63, 0.0  ;;  %v6317_v63 = vld [vmem:[#allocation16 + $0x40] sm:$0xff]  ;;  %v6430_v46 = vld [vmem:[#allocation2] ss:$0 sm:$0xff] }
 0x600   :  { %6298 = vmatpush.msra.mxu3 %v6213_v19 }
 0x601   :  { %v5798_v3 = vadd.f32 %v7516_v49, %v5778_v28  ;;  %v5938_v61 = vadd.f32 %v5937_v38, %v5918_v30  ;;  %v6324_v38 = vld [vmem:[#allocation16 + $0x78] sm:$0xff] }
 0x602   :  { %6299 = vmatpush.msra.mxu3 %v6212_v45  ;;  %6329 = vmatpush.msrb.mxu0 %v6324_v38  ;;  %v6428_v45 = vld [vmem:[#allocation17] ss:$0 sm:$0xff] }
 0x603   :  { %v5958_v17 = vadd.f32 %v5957_v23, %v5938_v61  ;;  %v5818_v34 = vadd.f32 %v7518_v9, %v5798_v3  ;;  %v6323_v23 = vld [vmem:[#allocation16 + $0x70] sm:$0xff]  ;;  %v6321_v9 = vld [vmem:[#allocation16 + $0x60] sm:$0xff] }
 0x604   :  { %6300 = vmatpush.msra.mxu3 %v6211_v13  ;;  %6330 = vmatpush.msrb.mxu0 %v6323_v23 }
 0x605   :  { %v5978_v60 = vadd.f32 %v5977_v47, %v5958_v17  ;;  %v6143_v0 = vmax.f32 %v5818_v34, 0.0  ;;  %v6319_v47 = vld [vmem:[#allocation16 + $0x50] sm:$0xff] }
 0x606   :  { %6301 = vmatpush.msra.mxu3 %v6210_v50  ;;  %6331 = vmatpush.msrb.mxu0 %v6322_v29 }
 0x607   :  { %v6145_v39 = vmax.f32 %v5978_v60, 0.0  ;;  %v6155_v16 = vmax.f32 %v6141_v52, %v6143_v0 }
 0x608   :  { %6302 = vmatpush.msra.mxu3 %v6209_v53  ;;  %6332 = vmatpush.msrb.mxu0 %v6321_v9 }
 0x60a   :  { %6303 = vmatpush.msra.mxu3 %v6208_v51 }
 0x624   :  { %v5997_v59 = vpop.f32.mrf.mxu0 }
 0x625   :  { %v5998_v44 = vadd.f32 %v5997_v59, %v5490_v57  ;;  %v6017_v1 = vpop.f32.mrf.mxu1  ;;  %v6320_v59 = vld [vmem:[#allocation16 + $0x58] sm:$0xff] }
 0x626   :  { %6333 = vmatpush.msrb.mxu0 %v6320_v59 }
 0x627   :  { %v6018_v11 = vadd.f32 %v6017_v1, %v5998_v44  ;;  %v6314_v44 = vld [vmem:[#allocation16 + $0x28] sm:$0xff] }
 0x628   :  { %6334 = vmatpush.msrb.mxu0 %v6319_v47  ;;  %v6310_v1 = vld [vmem:[#allocation16 + $0x8] sm:$0xff] }
 0x62a   :  { %6335 = vmatpush.msrb.mxu0 %v6318_v2 }
 0x62c   :  { %v6037_v26 = vpop.f32.mrf.mxu2  ;;  %6336 = vmatpush.msrb.mxu0 %v6317_v63 }
 0x62d   :  { %v6038_v12 = vadd.f32 %v6037_v26, %v6018_v11  ;;  %v6057_v24 = vpop.f32.mrf.mxu3 }
 0x62e   :  { %6337 = vmatpush.msrb.mxu0 %v6316_v36 }
 0x62f   :  { %v6058_v32 = vadd.f32 %v6057_v24, %v6038_v12 }
 0x630   :  { %6338 = vmatpush.msrb.mxu0 %v6315_v25 }
 0x631   :  { %v6146_v20 = vmax.f32 %v6058_v32, 0.0  ;;  %v6350_v32 = vlaneseq }
 0x632   :  { %6339 = vmatpush.msrb.mxu0 %v6314_v44 }
 0x633   :  { %v6156_v54 = vmax.f32 %v6144_v48, %v6146_v20  ;;  %v6351_v14 = vand.u32 127, %v6350_v32 }
 0x634   :  { %6340 = vmatpush.msrb.mxu0 %v6313_v35 }
 0x635   :  { %v6158_v10 = vmax.f32 %v6154_v56, %v6156_v54  ;;  %vm6352_vm0 = vcmp.lt.s32.totalorder %v6351_v14, 3  ;;  %v6429_v54 = vld [vmem:[#allocation19] ss:$0 sm:$0xff]  ;;  %vm6389_vm5 = vcmp.eq.s32.totalorder %v6351_v14, 3 }
 0x636   :  { %6341 = vmatpush.msrb.mxu0 %v6312_v7 }
 0x637   :  { %6284 = vmatmul.f32.vlgmr.msra.gmra.mxu2 %v6158_v10  ;;  %v6748_v10 = vmov 0  }
 0x638   :  { %6342 = vmatpush.msrb.mxu0 %v6311_v62  ;;  %6425 = vset.pattern.permute.xlu1 %v6748_v10 }
 0x639   :  { %6426 = vset.pattern.permute.xlu0 %v6748_v10 }
 0x63a   :  { %6343 = vmatpush.msrb.mxu0 %v6310_v1 }
 0x63c   :  { %6344 = vmatpush.msrb.mxu0 %v6309_v31 }
 0x64f   :  { %v6077_v18 = vpop.f32.mrf.mxu0 }
 0x650   :  { %v6078_v27 = vadd.f32 %v6077_v18, %v5491_v8  ;;  %v6097_v41 = vpop.f32.mrf.mxu1 }
 0x652   :  { %v6098_v5 = vadd.f32 %v6097_v41, %v6078_v27 }
 0x657   :  { %v6117_v37 = vpop.f32.mrf.mxu2 }
 0x658   :  { %v6118_v40 = vadd.f32 %v6117_v37, %v6098_v5  ;;  %v6137_v15 = vpop.f32.mrf.mxu3 }
 0x65a   :  { %v6138_v4 = vadd.f32 %v6137_v15, %v6118_v40 }
 0x65c   :  { %v6147_v58 = vmax.f32 %v6138_v4, 0.0 }
 0x65e   :  { %v6157_v57 = vmax.f32 %v6145_v39, %v6147_v58 }
 0x660   :  { %v6159_v49 = vmax.f32 %v6155_v16, %v6157_v57 }
 0x662   :  { %6304 = vmatmul.f32.vlgmr.msra.gmra.mxu3 %v6159_v49 }
 0x671   :  { %v6245_v43 = vpop.f32.mrf.mxu0 }
 0x672   :  { %v6246_v11 = vadd.f32 %v6427_v55, %v6245_v43  ;;  %v6265_v26 = vpop.f32.mrf.mxu1 }
 0x674   :  { %v6266_v42 = vadd.f32 %v6265_v26, %v6246_v11 }
 0x6ba   :  { %v6285_v21 = vpop.f32.mrf.mxu2 }
 0x6bb   :  { %v6286_v12 = vadd.f32 %v6285_v21, %v6266_v42 }
 0x6e5   :  { %v6305_v24 = vpop.f32.mrf.mxu3 }
 0x6e6   :  { %v6306_v19 = vadd.f32 %v6305_v24, %v6286_v12 }
 0x6e8   :  { %v6308_v33 = vmax.f32 %v6306_v19, 0.0 }
 0x6ea   :  { %6345 = vmatmul.f32.vlgmr.msrb.gmra.mxu0 %v6308_v33 }
 0x767   :  { %v6346_v48 = vpop.f32.mrf.mxu0 }
 0x768   :  { %v6347_v20 = vadd.f32 %v6428_v45, %v6346_v48 }
 0x76a   :  { %v6349_v13 = vmax.f32 %v6347_v20, 0.0 }
 0x76c   :  { %v6353_v56 = vsel %vm6352_vm0, %v6349_v13, -inf  ;;  %v6380_v50 = vmul.f32 %v6429_v54, %v6349_v13 }
 0x76d   :  { %6354 = vmax.xlane.f32.xlu0 %v6353_v56 }
 0x775   :  { %6381 = vadd.xlane.f32.xlu0 %v6380_v50 }
 0x7e0   :  { %v6355_v53 = vpop.xlane.xlu0 %6354 }
 0x7e1   :  { %v6356_v51 = vsub.f32 %v6353_v56, %v6355_v53 }
 0x7e3   :  { %v6357_v6 = vmul.f32 1.442695, %v6356_v51 }
 0x7e5   :  { %6431 = vpow2.f32 %v6357_v6 }
 0x7e8   :  { %v6382_v30 = vpop.xlane.xlu0 %6381 }
 0x7e9   :  { %v6387_v8 = vadd.f32 %v6430_v46, %v6382_v30 }
 0x7eb   :  { %v6432_v22 = vpop.eup %6431  ;;  %v6388_v28 = vmax.f32 %v6387_v8, 0.0 }
 0x7ec   :  { %6359 = vadd.xlane.f32.xlu1 %v6432_v22 }
 0x805   :  { %6392 = vperm.xlu1 %6425, %v6388_v28  }
 0x85f   :  { %v6360_v18 = vpop.xlane.xlu1 %6359 }
 0x860   :  { %6433 = vrcp.f32 %v6360_v18  ;;  %v6372_v34 = vand.u32 2147483648, %v6360_v18  ;;  %vm6366_vm2 = vweird.f32 %v6360_v18  ;;  %v6370_v5 = vand.u32 2147483647, %v6360_v18 }
 0x862   :  { %v6373_v60 = vor.u32 1.1754944e-38, %v6372_v34  ;;  %vm6371_vm4 = vcmp.eq.f32.partialorder %v6370_v5, 8.507059e+37 }
 0x866   :  { %v6434_v3 = vpop.eup %6433 }
 0x867   :  { %v6362_v61 = vmul.f32 %v6434_v3, %v6360_v18  ;;  %vm6367_vm1 = vweird.f32 %v6434_v3 }
 0x868   :  { %vm6368_vm3 = vmor %vm6366_vm2, %vm6367_vm1 }
 0x869   :  { %v6363_v27 = vsub.f32 1.0, %v6362_v61 }
 0x86b   :  { %v6364_v17 = vmul.f32 %v6434_v3, %v6363_v27 }
 0x86d   :  { %v6365_v41 = vadd.f32 %v6434_v3, %v6364_v17 }
 0x86f   :  { %v6369_v37 = vsel %vm6368_vm3, %v6434_v3, %v6365_v41 }
 0x870   :  { %v6374_v40 = vsel %vm6371_vm4, %v6373_v60, %v6369_v37 }
 0x871   :  { %v6375_v15 = vmul.f32 %v6432_v22, %v6374_v40 }
 0x877   :  { %v6393_v0 = vpop.permute.xlu1 %6392 }
 0x878   :  { %v6395_v4 = vsel %vm6389_vm5, %v6393_v0, %v6375_v15 }
 0x879   :  { %6396 = vst [vmem:[%s7551_s13] sm:$0xff] %v6395_v4 }
 0x87a   :  { %6401 = vsyncpa [#allocation4], 1 }
 0x87b   :  { %6402 = vsyncpa [#allocation6], 1 }
 0x87c   :  { %6403 = vsyncpa [#allocation9], 1 }
 0x87d   :  { %6404 = vsyncpa [#allocation12], 1 }
 0x87e   :  { %6405 = vsyncpa [#allocation15], 1 }
 0x87f   :  { %6406 = vsyncpa [#allocation18], 1 }

</bundles_post_ra>
